<compile_context>
chip_gen: v6e
topology: v6e:2x2x1
jax: 0.10.0
libtpu: 0.0.40
codegen_flags: <defaults>
</compile_context>

<pallas_src>
import jax
import jax.numpy as jnp
from jax.experimental import pallas as pl
from jax.experimental.pallas import tpu as pltpu

HIDDEN_DIM = 32
HEADS = 8
FINAL_HEADS = 4
LAYER_HEADS = (HEADS, HEADS, FINAL_HEADS)   # the 3 GATv2Conv layers per branch
NEG_SLOPE = 0.2                             # GATv2Conv leaky_relu default
MASK_VALUE = -1e30


def _fused_kernel(na_ref, xcat_ref, mask8_ref, mask4_ref,
                  w0_ref, b0_ref, a0_ref, o0_ref,
                  w1_ref, b1_ref, a1_ref, o1_ref,
                  w2_ref, b2_ref, a2_ref, o2_ref,
                  r8_ref, s8_ref, r4_ref, s4_ref,
                  gw_ref, gb_ref, out_ref):
    """All 3 gated dual-graph GAT layers, both graphs lane-fused, one launch."""
    x_cat = xcat_ref[...]                     # (N, 2F) = [x1 | x2]
    n = x_cat.shape[0]
    f = x_cat.shape[1] // 2

    num_actual = na_ref[0]                    # SMEM scalar
    row = jax.lax.broadcasted_iota(jnp.int32, (n, 1), 0)
    is_actual = row < num_actual

    gw = gw_ref[...]                          # (2F, 1)   gate weight (cat order)
    gb = gb_ref[...]                          # (1, 1)
    mask8 = mask8_ref[...]                    # (N*N, 2*HEADS)
    mask4 = mask4_ref[...]                    # (N*N, 2*FINAL_HEADS)
    r8 = r8_ref[...]; s8 = s8_ref[...]        # expansion / head-mean constants
    r4 = r4_ref[...]; s4 = s4_ref[...]

    layer_cfg = (
        (HEADS,       w0_ref, b0_ref, a0_ref, o0_ref, mask8, r8, s8),
        (HEADS,       w1_ref, b1_ref, a1_ref, o1_ref, mask8, r8, s8),
        (FINAL_HEADS, w2_ref, b2_ref, a2_ref, o2_ref, mask4, r4, s4),
    )

    for heads, w_ref, b_ref, a_ref, o_ref, mask2h, r2, s2 in layer_cfg:
        hf2 = 2 * heads * f                   # both graphs' head-lanes

        # --- fused dual-graph projection: x_cat @ blockdiag([lin_l|lin_r]) ---
        xlr = jnp.dot(x_cat, w_ref[...],
                      preferred_element_type=jnp.float32) + b_ref[...]   # (N, 4HF)
        xl = xlr[:, :hf2]                     # [xl1 | xl2]  (sources)
        xr = xlr[:, hf2:]                     # [xr1 | xr2]  (targets)
        xl_b = xl.astype(jnp.bfloat16)
        xr_b = xr.astype(jnp.bfloat16)

        # e[i, j, :] = leaky_relu(xl[j, :] + xr[i, :])  -- both graphs at once
        e = xr_b[:, None, :] + xl_b[None, :, :]                          # (N, N, 2HF)
        e = jnp.maximum(e, NEG_SLOPE * e)

        # One bf16 MXU matmul for ALL heads of BOTH graphs; additive mask
        # (pre-broadcast host-side to (N*N, 2H)) kills missing edges.
        scores = jnp.dot(e.reshape(n * n, hf2), a_ref[...],
                         preferred_element_type=jnp.float32) + mask2h    # (N*N, 2H)
        scores = scores.reshape(n, n, 2 * heads)                         # [i, j, gh]

        # Softmax over sources j (self loops guarantee a nonzero denominator).
        m = jnp.max(scores, axis=1, keepdims=True)                       # (N, 1, 2H)
        p = jnp.exp(scores - m)
        denom = jnp.sum(p, axis=1, keepdims=True)
        alpha = p / denom                                                # exact

        # alpha expanded across each head's F lanes on the MXU, multiply with
        # sources, reduce over j, fold the mean-over-heads into s2.
        alpha_exp = jnp.dot(alpha.reshape(n * n, 2 * heads), r2,
                            preferred_element_type=jnp.float32).reshape(n, n, hf2)
        out_heads = jnp.sum(alpha_exp * xl[None, :, :],
                            axis=1, keepdims=True).reshape(n, hf2)       # (N, 2HF)
        g_cat = jnp.dot(out_heads, s2,
                        preferred_element_type=jnp.float32) + o_ref[...]  # (N, 2F)

        # ReLU -> dropout (eval: identity) -> residual (residual == layer input)
        x_new = jnp.maximum(g_cat, 0.0) + x_cat                          # [x1n | x2n]

        # gate = sigmoid([x1n ; x2n] @ Wg + bg) -- one K=2F matmul.
        z = jnp.dot(x_new, gw, preferred_element_type=jnp.float32) + gb
        gate = jax.nn.sigmoid(z)                                         # (N, 1)

        x1n = x_new[:, :f]
        x2n = x_new[:, f:]
        mixed = jnp.maximum(gate * x1n + (1.0 - gate) * x2n, 0.0)        # relu(mix)

        # Paragraph rows of BOTH branches take the mixed value; auxiliary rows
        # keep x_new (= relu(conv) + residual), matching
        # torch.cat([mixed_actual, x_new[num_actual:]], dim=0).
        mixed_cat = jnp.concatenate([mixed, mixed], axis=1)              # (N, 2F)
        x_cat = jnp.where(is_actual, mixed_cat, x_new)

    # Rows [:num_actual] of the first-graph half are exactly mixed_actual.
    out_ref[...] = x_cat[:, :f]


def build_additive_mask(edge_index, num_nodes):
    """(N*N, 1) additive mask: 0 where edge j->i (self loops forced), else -1e30."""
    src = edge_index[0]
    dst = edge_index[1]
    adj = jnp.zeros((num_nodes, num_nodes), jnp.float32).at[dst, src].set(1.0)
    adj = jnp.maximum(adj, jnp.eye(num_nodes, dtype=jnp.float32))
    mask = jnp.where(adj > 0.0, 0.0, MASK_VALUE).astype(jnp.float32)
    return mask.reshape(num_nodes * num_nodes, 1)


def paragraph_gat_all_gating(x1, x2, edge_index1, edge_index2, num_actual, params):
    """Runs the 3-layer gated dual-graph GAT; returns mixed_actual (P, F)."""
    # TODO(synk): the reference module skips a GAT conv entirely when its
    # edge_index is empty; that Python-level check stays host-side and this
    # synthetic example always has edges.
    n, f = x1.shape
    assert x2.shape == (n, f), "kernel assumes both graphs have the same node count"

    x_cat = jnp.concatenate([x1, x2], axis=1)                       # (N, 2F)

    m1 = build_additive_mask(edge_index1, n)                        # (N*N, 1)
    m2 = build_additive_mask(edge_index2, n)
    # Pre-broadcast to the exact score layouts (N*N, 2H): cols [:H]=graph1.
    mask_h8 = jnp.concatenate([jnp.broadcast_to(m1, (n * n, HEADS)),
                               jnp.broadcast_to(m2, (n * n, HEADS))], axis=1)
    mask_h4 = jnp.concatenate([jnp.broadcast_to(m1, (n * n, FINAL_HEADS)),
                               jnp.broadcast_to(m2, (n * n, FINAL_HEADS))], axis=1)

    vmem = pl.BlockSpec(memory_space=pltpu.MemorySpace.VMEM)
    smem = pl.BlockSpec(memory_space=pltpu.MemorySpace.SMEM)

    inputs = [jnp.asarray([num_actual], jnp.int32), x_cat, mask_h8, mask_h4]
    in_specs = [smem, vmem, vmem, vmem]
    for layer in params["layers"]:
        inputs += [layer["w_blk"], layer["b_blk"], layer["att_blk"], layer["bo_cat"]]
        in_specs += [vmem] * 4
    inputs += [params["r8"], params["s8"], params["r4"], params["s4"],
               params["gate_w"], params["gate_b"]]
    in_specs += [vmem] * 6

    out = pl.pallas_call(
        _fused_kernel,
        out_shape=jax.ShapeDtypeStruct((n, f), jnp.float32),
        in_specs=in_specs,
        out_specs=pl.BlockSpec(memory_space=pltpu.MemorySpace.VMEM),
    )(*inputs)
    return out[:num_actual]


def init_raw_params(key, hidden_dim=HIDDEN_DIM):
    """Per-conv parameters in PyTorch GATv2Conv layout (lin_l, lin_r, att, bias)."""
    def gat_params(k, heads):
        ks = jax.random.split(k, 6)
        hf = heads * hidden_dim
        s = 1.0 / jnp.sqrt(jnp.float32(hidden_dim))
        return dict(
            wl=jax.random.normal(ks[0], (hidden_dim, hf), jnp.float32) * s,
            bl=jax.random.normal(ks[1], (1, hf), jnp.float32) * 0.01,
            wr=jax.random.normal(ks[2], (hidden_dim, hf), jnp.float32) * s,
            br=jax.random.normal(ks[3], (1, hf), jnp.float32) * 0.01,
            att=jax.random.normal(ks[4], (heads, hidden_dim), jnp.float32) * s,
            bo=jax.random.normal(ks[5], (1, hidden_dim), jnp.float32) * 0.01,
        )

    keys = jax.random.split(key, 8)
    return {
        "first": [gat_params(keys[i], LAYER_HEADS[i]) for i in range(3)],
        "second": [gat_params(keys[3 + i], LAYER_HEADS[i]) for i in range(3)],
        # gate Linear(2F, 1): rows [:F] act on x1, rows [F:] on x2 (cat order).
        "gate_w": jax.random.normal(keys[6], (2 * hidden_dim, 1), jnp.float32)
        * (1.0 / jnp.sqrt(jnp.float32(2 * hidden_dim))),
        "gate_b": jax.random.normal(keys[7], (1, 1), jnp.float32) * 0.01,
    }


def pack_params(raw, hidden_dim=HIDDEN_DIM):
    """Host-side repack into the kernel-friendly dual-graph block layouts."""
    f = hidden_dim
    layers = []
    for layer in range(3):
        h = LAYER_HEADS[layer]
        hf = h * f
        p1 = raw["first"][layer]
        p2 = raw["second"][layer]

        # Block-diagonal projection: x_cat @ w_blk -> [xl1 | xl2 | xr1 | xr2].
        w_blk = jnp.zeros((2 * f, 4 * hf), jnp.float32)
        w_blk = w_blk.at[:f, 0:hf].set(p1["wl"])
        w_blk = w_blk.at[f:, hf:2 * hf].set(p2["wl"])
        w_blk = w_blk.at[:f, 2 * hf:3 * hf].set(p1["wr"])
        w_blk = w_blk.at[f:, 3 * hf:].set(p2["wr"])
        b_blk = jnp.concatenate([p1["bl"], p2["bl"], p1["br"], p2["br"]], axis=1)

        def att_block(att):                   # (H, F) -> (HF, H) block diagonal
            return (jnp.eye(h, dtype=jnp.float32)[:, None, :]
                    * att[:, :, None]).reshape(hf, h)

        att_blk = jnp.zeros((2 * hf, 2 * h), jnp.float32)
        att_blk = att_blk.at[:hf, :h].set(att_block(p1["att"]))
        att_blk = att_blk.at[hf:, h:].set(att_block(p2["att"]))

        bo_cat = jnp.concatenate([p1["bo"], p2["bo"]], axis=1)           # (1, 2F)

        layers.append(dict(
            w_blk=w_blk,                                                 # (2F, 4HF)
            b_blk=b_blk,                                                 # (1, 4HF)
            att_blk=att_blk.astype(jnp.bfloat16),                        # (2HF, 2H)
            bo_cat=bo_cat,                                               # (1, 2F)
        ))

    def expansion_constants(h):
        hf = h * f
        # head -> per-head F-lane block expansion for both graphs (2H, 2HF)
        r2 = jnp.repeat(jnp.eye(2 * h, dtype=jnp.float32), f, axis=1)
        # per-graph mean over heads, block diagonal over graphs (2HF, 2F)
        s_one = jnp.tile(jnp.eye(f, dtype=jnp.float32), (h, 1)) / h
        s2 = jnp.zeros((2 * hf, 2 * f), jnp.float32)
        s2 = s2.at[:hf, :f].set(s_one).at[hf:, f:].set(s_one)
        return r2, s2

    r8, s8 = expansion_constants(HEADS)          # shared by layers 0 and 1
    r4, s4 = expansion_constants(FINAL_HEADS)    # layer 2

    return dict(layers=layers, r8=r8, s8=s8, r4=r4, s4=s4,
                gate_w=raw["gate_w"], gate_b=raw["gate_b"])


if __name__ == "__main__":
    key = jax.random.PRNGKey(0)
    k_params, k_x1, k_x2 = jax.random.split(key, 3)

    N = 16    # total nodes per graph (paragraph + auxiliary nodes)
    P = 12    # num_paragraphs ("actual" nodes), equal for both graphs

    x1 = jax.random.normal(k_x1, (N, HIDDEN_DIM), jnp.float32)
    x2 = jax.random.normal(k_x2, (N, HIDDEN_DIM), jnp.float32)

    # Deterministic edge lists (2, E): row 0 = source, row 1 = target.
    idx = jnp.arange(N, dtype=jnp.int32)
    e1_src = jnp.concatenate([idx, (idx + 1) % N])
    e1_dst = jnp.concatenate([(idx + 1) % N, idx])
    edge_index1 = jnp.stack([e1_src, e1_dst])
    e2_src = jnp.concatenate([idx, (idx + 3) % N])
    e2_dst = jnp.concatenate([(idx + 3) % N, idx])
    edge_index2 = jnp.stack([e2_src, e2_dst])

    params = pack_params(init_raw_params(k_params))

    out = paragraph_gat_all_gating(x1, x2, edge_index1, edge_index2, P, params)
    out = jax.block_until_ready(out)
    assert out.shape == (P, HIDDEN_DIM), out.shape
    assert bool(jnp.all(jnp.isfinite(out)))
    print("KERNEL_OK")
</pallas_src>

<mosaic_0001>
module attributes {stable_mosaic.version = 11 : i64} {
  func.func @_fused_kernel(%arg0: memref<1xi32, #tpu.memory_space<smem>>, %arg1: memref<16x64xf32, #tpu.memory_space<vmem>>, %arg2: memref<256x16xf32, #tpu.memory_space<vmem>>, %arg3: memref<256x8xf32, #tpu.memory_space<vmem>>, %arg4: memref<64x1024xf32, #tpu.memory_space<vmem>>, %arg5: memref<1x1024xf32, #tpu.memory_space<vmem>>, %arg6: memref<512x16xbf16, #tpu.memory_space<vmem>>, %arg7: memref<1x64xf32, #tpu.memory_space<vmem>>, %arg8: memref<64x1024xf32, #tpu.memory_space<vmem>>, %arg9: memref<1x1024xf32, #tpu.memory_space<vmem>>, %arg10: memref<512x16xbf16, #tpu.memory_space<vmem>>, %arg11: memref<1x64xf32, #tpu.memory_space<vmem>>, %arg12: memref<64x512xf32, #tpu.memory_space<vmem>>, %arg13: memref<1x512xf32, #tpu.memory_space<vmem>>, %arg14: memref<256x8xbf16, #tpu.memory_space<vmem>>, %arg15: memref<1x64xf32, #tpu.memory_space<vmem>>, %arg16: memref<16x512xf32, #tpu.memory_space<vmem>>, %arg17: memref<512x64xf32, #tpu.memory_space<vmem>>, %arg18: memref<8x256xf32, #tpu.memory_space<vmem>>, %arg19: memref<256x64xf32, #tpu.memory_space<vmem>>, %arg20: memref<64x1xf32, #tpu.memory_space<vmem>>, %arg21: memref<1x1xf32, #tpu.memory_space<vmem>>, %arg22: memref<16x32xf32, #tpu.memory_space<vmem>>) attributes {dimension_semantics = [], scalar_prefetch = 0 : i64, scratch_operands = 0 : i64, tpu.core_type = #tpu.core_type<tc>} {
    %c0 = arith.constant 0 : index
    %c0_0 = arith.constant 0 : index
    %0 = vector.load %arg1[%c0, %c0_0] : memref<16x64xf32, #tpu.memory_space<vmem>>, vector<16x64xf32>
    %c0_1 = arith.constant 0 : index
    %1 = memref.load %arg0[%c0_1] : memref<1xi32, #tpu.memory_space<smem>>
    %2 = tpu.iota {dimensions = array<i32: 0>} : vector<16x1xi32>
    %3 = vector.broadcast %1 : i32 to vector<16x1xi32>
    %4 = arith.cmpi slt, %2, %3 : vector<16x1xi32>
    %c0_2 = arith.constant 0 : index
    %c0_3 = arith.constant 0 : index
    %5 = vector.load %arg20[%c0_2, %c0_3] : memref<64x1xf32, #tpu.memory_space<vmem>>, vector<64x1xf32>
    %c0_4 = arith.constant 0 : index
    %c0_5 = arith.constant 0 : index
    %6 = vector.load %arg21[%c0_4, %c0_5] : memref<1x1xf32, #tpu.memory_space<vmem>>, vector<1x1xf32>
    %c0_6 = arith.constant 0 : index
    %c0_7 = arith.constant 0 : index
    %7 = vector.load %arg2[%c0_6, %c0_7] : memref<256x16xf32, #tpu.memory_space<vmem>>, vector<256x16xf32>
    %c0_8 = arith.constant 0 : index
    %c0_9 = arith.constant 0 : index
    %8 = vector.load %arg3[%c0_8, %c0_9] : memref<256x8xf32, #tpu.memory_space<vmem>>, vector<256x8xf32>
    %c0_10 = arith.constant 0 : index
    %c0_11 = arith.constant 0 : index
    %9 = vector.load %arg16[%c0_10, %c0_11] : memref<16x512xf32, #tpu.memory_space<vmem>>, vector<16x512xf32>
    %c0_12 = arith.constant 0 : index
    %c0_13 = arith.constant 0 : index
    %10 = vector.load %arg17[%c0_12, %c0_13] : memref<512x64xf32, #tpu.memory_space<vmem>>, vector<512x64xf32>
    %c0_14 = arith.constant 0 : index
    %c0_15 = arith.constant 0 : index
    %11 = vector.load %arg18[%c0_14, %c0_15] : memref<8x256xf32, #tpu.memory_space<vmem>>, vector<8x256xf32>
    %c0_16 = arith.constant 0 : index
    %c0_17 = arith.constant 0 : index
    %12 = vector.load %arg19[%c0_16, %c0_17] : memref<256x64xf32, #tpu.memory_space<vmem>>, vector<256x64xf32>
    %c0_18 = arith.constant 0 : index
    %c0_19 = arith.constant 0 : index
    %13 = vector.load %arg4[%c0_18, %c0_19] : memref<64x1024xf32, #tpu.memory_space<vmem>>, vector<64x1024xf32>
    %cst = arith.constant dense<0.000000e+00> : vector<16x1024xf32>
    %14 = tpu.matmul %0, %13, %cst {dimension_numbers = #tpu.dot_dimension_numbers<[1], [0], [0], [1], [0, 0, 1, 1], [], []>} : vector<16x64xf32>, vector<64x1024xf32>, vector<16x1024xf32> -> vector<16x1024xf32>
    %c0_20 = arith.constant 0 : index
    %c0_21 = arith.constant 0 : index
    %15 = vector.load %arg5[%c0_20, %c0_21] : memref<1x1024xf32, #tpu.memory_space<vmem>>, vector<1x1024xf32>
    %16 = vector.broadcast %15 : vector<1x1024xf32> to vector<16x1024xf32>
    %17 = arith.addf %14, %16 : vector<16x1024xf32>
    %18 = vector.extract_strided_slice %17 {offsets = [0, 0], sizes = [16, 512], strides = [1, 1]} : vector<16x1024xf32> to vector<16x512xf32>
    %19 = vector.extract_strided_slice %17 {offsets = [0, 512], sizes = [16, 512], strides = [1, 1]} : vector<16x1024xf32> to vector<16x512xf32>
    %20 = arith.truncf %18 : vector<16x512xf32> to vector<16x512xbf16>
    %21 = arith.truncf %19 : vector<16x512xf32> to vector<16x512xbf16>
    %22 = vector.shape_cast %21 : vector<16x512xbf16> to vector<16x1x512xbf16>
    %23 = vector.shape_cast %20 : vector<16x512xbf16> to vector<1x16x512xbf16>
    %24 = vector.broadcast %22 : vector<16x1x512xbf16> to vector<16x16x512xbf16>
    %25 = vector.broadcast %23 : vector<1x16x512xbf16> to vector<16x16x512xbf16>
    %26 = arith.addf %24, %25 : vector<16x16x512xbf16>
    %cst_22 = arith.constant 2.001950e-01 : bf16
    %27 = vector.broadcast %cst_22 : bf16 to vector<16x16x512xbf16>
    %28 = arith.mulf %27, %26 : vector<16x16x512xbf16>
    %29 = arith.maximumf %26, %28 : vector<16x16x512xbf16>
    %30 = vector.shape_cast %29 : vector<16x16x512xbf16> to vector<256x512xbf16>
    %c0_23 = arith.constant 0 : index
    %c0_24 = arith.constant 0 : index
    %31 = vector.load %arg6[%c0_23, %c0_24] : memref<512x16xbf16, #tpu.memory_space<vmem>>, vector<512x16xbf16>
    %cst_25 = arith.constant dense<0.000000e+00> : vector<256x16xf32>
    %32 = tpu.matmul %30, %31, %cst_25 {dimension_numbers = #tpu.dot_dimension_numbers<[1], [0], [0], [1], [0, 0, 1, 1], [], []>} : vector<256x512xbf16>, vector<512x16xbf16>, vector<256x16xf32> -> vector<256x16xf32>
    %33 = arith.addf %32, %7 : vector<256x16xf32>
    %34 = vector.shape_cast %33 : vector<256x16xf32> to vector<16x16x16xf32>
    %cst_26 = arith.constant dense<0xFF800000> : vector<16x16xf32>
    %35 = vector.multi_reduction <maximumf>, %34, %cst_26 [1] : vector<16x16x16xf32> to vector<16x16xf32>
    %36 = vector.shape_cast %35 : vector<16x16xf32> to vector<16x1x16xf32>
    %37 = vector.broadcast %36 : vector<16x1x16xf32> to vector<16x16x16xf32>
    %38 = arith.subf %34, %37 : vector<16x16x16xf32>
    %39 = math.exp %38 : vector<16x16x16xf32>
    %cst_27 = arith.constant dense<0.000000e+00> : vector<16x16xf32>
    %40 = vector.multi_reduction <add>, %39, %cst_27 [1] : vector<16x16x16xf32> to vector<16x16xf32>
    %41 = vector.shape_cast %40 : vector<16x16xf32> to vector<16x1x16xf32>
    %42 = vector.broadcast %41 : vector<16x1x16xf32> to vector<16x16x16xf32>
    %43 = arith.divf %39, %42 : vector<16x16x16xf32>
    %44 = vector.shape_cast %43 : vector<16x16x16xf32> to vector<256x16xf32>
    %cst_28 = arith.constant dense<0.000000e+00> : vector<256x512xf32>
    %45 = tpu.matmul %44, %9, %cst_28 {dimension_numbers = #tpu.dot_dimension_numbers<[1], [0], [0], [1], [0, 0, 1, 1], [], []>} : vector<256x16xf32>, vector<16x512xf32>, vector<256x512xf32> -> vector<256x512xf32>
    %46 = vector.shape_cast %45 : vector<256x512xf32> to vector<16x16x512xf32>
    %47 = vector.shape_cast %18 : vector<16x512xf32> to vector<1x16x512xf32>
    %48 = vector.broadcast %47 : vector<1x16x512xf32> to vector<16x16x512xf32>
    %49 = arith.mulf %46, %48 : vector<16x16x512xf32>
    %cst_29 = arith.constant dense<0.000000e+00> : vector<16x512xf32>
    %50 = vector.multi_reduction <add>, %49, %cst_29 [1] : vector<16x16x512xf32> to vector<16x512xf32>
    %51 = vector.shape_cast %50 : vector<16x512xf32> to vector<16x1x512xf32>
    %52 = vector.shape_cast %51 : vector<16x1x512xf32> to vector<16x512xf32>
    %cst_30 = arith.constant dense<0.000000e+00> : vector<16x64xf32>
    %53 = tpu.matmul %52, %10, %cst_30 {dimension_numbers = #tpu.dot_dimension_numbers<[1], [0], [0], [1], [0, 0, 1, 1], [], []>} : vector<16x512xf32>, vector<512x64xf32>, vector<16x64xf32> -> vector<16x64xf32>
    %c0_31 = arith.constant 0 : index
    %c0_32 = arith.constant 0 : index
    %54 = vector.load %arg7[%c0_31, %c0_32] : memref<1x64xf32, #tpu.memory_space<vmem>>, vector<1x64xf32>
    %55 = vector.broadcast %54 : vector<1x64xf32> to vector<16x64xf32>
    %56 = arith.addf %53, %55 : vector<16x64xf32>
    %cst_33 = arith.constant 0.000000e+00 : f32
    %57 = vector.broadcast %cst_33 : f32 to vector<16x64xf32>
    %58 = arith.maximumf %56, %57 : vector<16x64xf32>
    %59 = arith.addf %58, %0 : vector<16x64xf32>
    %cst_34 = arith.constant dense<0.000000e+00> : vector<16x1xf32>
    %60 = tpu.matmul %59, %5, %cst_34 {dimension_numbers = #tpu.dot_dimension_numbers<[1], [0], [0], [1], [0, 0, 1, 1], [], []>} : vector<16x64xf32>, vector<64x1xf32>, vector<16x1xf32> -> vector<16x1xf32>
    %61 = vector.broadcast %6 : vector<1x1xf32> to vector<16x1xf32>
    %62 = arith.addf %60, %61 : vector<16x1xf32>
    %63 = arith.negf %62 : vector<16x1xf32>
    %64 = math.exp %63 : vector<16x1xf32>
    %cst_35 = arith.constant 1.000000e+00 : f32
    %65 = vector.broadcast %cst_35 : f32 to vector<16x1xf32>
    %66 = arith.addf %65, %64 : vector<16x1xf32>
    %67 = arith.divf %65, %66 : vector<16x1xf32>
    %68 = vector.extract_strided_slice %59 {offsets = [0, 0], sizes = [16, 32], strides = [1, 1]} : vector<16x64xf32> to vector<16x32xf32>
    %69 = vector.extract_strided_slice %59 {offsets = [0, 32], sizes = [16, 32], strides = [1, 1]} : vector<16x64xf32> to vector<16x32xf32>
    %70 = vector.broadcast %67 : vector<16x1xf32> to vector<16x32xf32>
    %71 = arith.mulf %70, %68 : vector<16x32xf32>
    %cst_36 = arith.constant 1.000000e+00 : f32
    %72 = vector.broadcast %cst_36 : f32 to vector<16x1xf32>
    %73 = arith.subf %72, %67 : vector<16x1xf32>
    %74 = vector.broadcast %73 : vector<16x1xf32> to vector<16x32xf32>
    %75 = arith.mulf %74, %69 : vector<16x32xf32>
    %76 = arith.addf %71, %75 : vector<16x32xf32>
    %cst_37 = arith.constant 0.000000e+00 : f32
    %77 = vector.broadcast %cst_37 : f32 to vector<16x32xf32>
    %78 = arith.maximumf %76, %77 : vector<16x32xf32>
    %79 = tpu.concatenate %78, %78 in 1 : vector<16x32xf32>, vector<16x32xf32> -> vector<16x64xf32>
    %80 = vector.shape_cast %4 : vector<16x1xi1> to vector<16x1xi1>
    %81 = vector.broadcast %80 : vector<16x1xi1> to vector<16x64xi1>
    %82 = arith.select %81, %79, %59 : vector<16x64xi1>, vector<16x64xf32>
    %c0_38 = arith.constant 0 : index
    %c0_39 = arith.constant 0 : index
    %83 = vector.load %arg8[%c0_38, %c0_39] : memref<64x1024xf32, #tpu.memory_space<vmem>>, vector<64x1024xf32>
    %cst_40 = arith.constant dense<0.000000e+00> : vector<16x1024xf32>
    %84 = tpu.matmul %82, %83, %cst_40 {dimension_numbers = #tpu.dot_dimension_numbers<[1], [0], [0], [1], [0, 0, 1, 1], [], []>} : vector<16x64xf32>, vector<64x1024xf32>, vector<16x1024xf32> -> vector<16x1024xf32>
    %c0_41 = arith.constant 0 : index
    %c0_42 = arith.constant 0 : index
    %85 = vector.load %arg9[%c0_41, %c0_42] : memref<1x1024xf32, #tpu.memory_space<vmem>>, vector<1x1024xf32>
    %86 = vector.broadcast %85 : vector<1x1024xf32> to vector<16x1024xf32>
    %87 = arith.addf %84, %86 : vector<16x1024xf32>
    %88 = vector.extract_strided_slice %87 {offsets = [0, 0], sizes = [16, 512], strides = [1, 1]} : vector<16x1024xf32> to vector<16x512xf32>
    %89 = vector.extract_strided_slice %87 {offsets = [0, 512], sizes = [16, 512], strides = [1, 1]} : vector<16x1024xf32> to vector<16x512xf32>
    %90 = arith.truncf %88 : vector<16x512xf32> to vector<16x512xbf16>
    %91 = arith.truncf %89 : vector<16x512xf32> to vector<16x512xbf16>
    %92 = vector.shape_cast %91 : vector<16x512xbf16> to vector<16x1x512xbf16>
    %93 = vector.shape_cast %90 : vector<16x512xbf16> to vector<1x16x512xbf16>
    %94 = vector.broadcast %92 : vector<16x1x512xbf16> to vector<16x16x512xbf16>
    %95 = vector.broadcast %93 : vector<1x16x512xbf16> to vector<16x16x512xbf16>
    %96 = arith.addf %94, %95 : vector<16x16x512xbf16>
    %cst_43 = arith.constant 2.001950e-01 : bf16
    %97 = vector.broadcast %cst_43 : bf16 to vector<16x16x512xbf16>
    %98 = arith.mulf %97, %96 : vector<16x16x512xbf16>
    %99 = arith.maximumf %96, %98 : vector<16x16x512xbf16>
    %100 = vector.shape_cast %99 : vector<16x16x512xbf16> to vector<256x512xbf16>
    %c0_44 = arith.constant 0 : index
    %c0_45 = arith.constant 0 : index
    %101 = vector.load %arg10[%c0_44, %c0_45] : memref<512x16xbf16, #tpu.memory_space<vmem>>, vector<512x16xbf16>
    %cst_46 = arith.constant dense<0.000000e+00> : vector<256x16xf32>
    %102 = tpu.matmul %100, %101, %cst_46 {dimension_numbers = #tpu.dot_dimension_numbers<[1], [0], [0], [1], [0, 0, 1, 1], [], []>} : vector<256x512xbf16>, vector<512x16xbf16>, vector<256x16xf32> -> vector<256x16xf32>
    %103 = arith.addf %102, %7 : vector<256x16xf32>
    %104 = vector.shape_cast %103 : vector<256x16xf32> to vector<16x16x16xf32>
    %cst_47 = arith.constant dense<0xFF800000> : vector<16x16xf32>
    %105 = vector.multi_reduction <maximumf>, %104, %cst_47 [1] : vector<16x16x16xf32> to vector<16x16xf32>
    %106 = vector.shape_cast %105 : vector<16x16xf32> to vector<16x1x16xf32>
    %107 = vector.broadcast %106 : vector<16x1x16xf32> to vector<16x16x16xf32>
    %108 = arith.subf %104, %107 : vector<16x16x16xf32>
    %109 = math.exp %108 : vector<16x16x16xf32>
    %cst_48 = arith.constant dense<0.000000e+00> : vector<16x16xf32>
    %110 = vector.multi_reduction <add>, %109, %cst_48 [1] : vector<16x16x16xf32> to vector<16x16xf32>
    %111 = vector.shape_cast %110 : vector<16x16xf32> to vector<16x1x16xf32>
    %112 = vector.broadcast %111 : vector<16x1x16xf32> to vector<16x16x16xf32>
    %113 = arith.divf %109, %112 : vector<16x16x16xf32>
    %114 = vector.shape_cast %113 : vector<16x16x16xf32> to vector<256x16xf32>
    %cst_49 = arith.constant dense<0.000000e+00> : vector<256x512xf32>
    %115 = tpu.matmul %114, %9, %cst_49 {dimension_numbers = #tpu.dot_dimension_numbers<[1], [0], [0], [1], [0, 0, 1, 1], [], []>} : vector<256x16xf32>, vector<16x512xf32>, vector<256x512xf32> -> vector<256x512xf32>
    %116 = vector.shape_cast %115 : vector<256x512xf32> to vector<16x16x512xf32>
    %117 = vector.shape_cast %88 : vector<16x512xf32> to vector<1x16x512xf32>
    %118 = vector.broadcast %117 : vector<1x16x512xf32> to vector<16x16x512xf32>
    %119 = arith.mulf %116, %118 : vector<16x16x512xf32>
    %cst_50 = arith.constant dense<0.000000e+00> : vector<16x512xf32>
    %120 = vector.multi_reduction <add>, %119, %cst_50 [1] : vector<16x16x512xf32> to vector<16x512xf32>
    %121 = vector.shape_cast %120 : vector<16x512xf32> to vector<16x1x512xf32>
    %122 = vector.shape_cast %121 : vector<16x1x512xf32> to vector<16x512xf32>
    %cst_51 = arith.constant dense<0.000000e+00> : vector<16x64xf32>
    %123 = tpu.matmul %122, %10, %cst_51 {dimension_numbers = #tpu.dot_dimension_numbers<[1], [0], [0], [1], [0, 0, 1, 1], [], []>} : vector<16x512xf32>, vector<512x64xf32>, vector<16x64xf32> -> vector<16x64xf32>
    %c0_52 = arith.constant 0 : index
    %c0_53 = arith.constant 0 : index
    %124 = vector.load %arg11[%c0_52, %c0_53] : memref<1x64xf32, #tpu.memory_space<vmem>>, vector<1x64xf32>
    %125 = vector.broadcast %124 : vector<1x64xf32> to vector<16x64xf32>
    %126 = arith.addf %123, %125 : vector<16x64xf32>
    %cst_54 = arith.constant 0.000000e+00 : f32
    %127 = vector.broadcast %cst_54 : f32 to vector<16x64xf32>
    %128 = arith.maximumf %126, %127 : vector<16x64xf32>
    %129 = arith.addf %128, %82 : vector<16x64xf32>
    %cst_55 = arith.constant dense<0.000000e+00> : vector<16x1xf32>
    %130 = tpu.matmul %129, %5, %cst_55 {dimension_numbers = #tpu.dot_dimension_numbers<[1], [0], [0], [1], [0, 0, 1, 1], [], []>} : vector<16x64xf32>, vector<64x1xf32>, vector<16x1xf32> -> vector<16x1xf32>
    %131 = vector.broadcast %6 : vector<1x1xf32> to vector<16x1xf32>
    %132 = arith.addf %130, %131 : vector<16x1xf32>
    %133 = arith.negf %132 : vector<16x1xf32>
    %134 = math.exp %133 : vector<16x1xf32>
    %cst_56 = arith.constant 1.000000e+00 : f32
    %135 = vector.broadcast %cst_56 : f32 to vector<16x1xf32>
    %136 = arith.addf %135, %134 : vector<16x1xf32>
    %137 = arith.divf %135, %136 : vector<16x1xf32>
    %138 = vector.extract_strided_slice %129 {offsets = [0, 0], sizes = [16, 32], strides = [1, 1]} : vector<16x64xf32> to vector<16x32xf32>
    %139 = vector.extract_strided_slice %129 {offsets = [0, 32], sizes = [16, 32], strides = [1, 1]} : vector<16x64xf32> to vector<16x32xf32>
    %140 = vector.broadcast %137 : vector<16x1xf32> to vector<16x32xf32>
    %141 = arith.mulf %140, %138 : vector<16x32xf32>
    %cst_57 = arith.constant 1.000000e+00 : f32
    %142 = vector.broadcast %cst_57 : f32 to vector<16x1xf32>
    %143 = arith.subf %142, %137 : vector<16x1xf32>
    %144 = vector.broadcast %143 : vector<16x1xf32> to vector<16x32xf32>
    %145 = arith.mulf %144, %139 : vector<16x32xf32>
    %146 = arith.addf %141, %145 : vector<16x32xf32>
    %cst_58 = arith.constant 0.000000e+00 : f32
    %147 = vector.broadcast %cst_58 : f32 to vector<16x32xf32>
    %148 = arith.maximumf %146, %147 : vector<16x32xf32>
    %149 = tpu.concatenate %148, %148 in 1 : vector<16x32xf32>, vector<16x32xf32> -> vector<16x64xf32>
    %150 = vector.shape_cast %4 : vector<16x1xi1> to vector<16x1xi1>
    %151 = vector.broadcast %150 : vector<16x1xi1> to vector<16x64xi1>
    %152 = arith.select %151, %149, %129 : vector<16x64xi1>, vector<16x64xf32>
    %c0_59 = arith.constant 0 : index
    %c0_60 = arith.constant 0 : index
    %153 = vector.load %arg12[%c0_59, %c0_60] : memref<64x512xf32, #tpu.memory_space<vmem>>, vector<64x512xf32>
    %cst_61 = arith.constant dense<0.000000e+00> : vector<16x512xf32>
    %154 = tpu.matmul %152, %153, %cst_61 {dimension_numbers = #tpu.dot_dimension_numbers<[1], [0], [0], [1], [0, 0, 1, 1], [], []>} : vector<16x64xf32>, vector<64x512xf32>, vector<16x512xf32> -> vector<16x512xf32>
    %c0_62 = arith.constant 0 : index
    %c0_63 = arith.constant 0 : index
    %155 = vector.load %arg13[%c0_62, %c0_63] : memref<1x512xf32, #tpu.memory_space<vmem>>, vector<1x512xf32>
    %156 = vector.broadcast %155 : vector<1x512xf32> to vector<16x512xf32>
    %157 = arith.addf %154, %156 : vector<16x512xf32>
    %158 = vector.extract_strided_slice %157 {offsets = [0, 0], sizes = [16, 256], strides = [1, 1]} : vector<16x512xf32> to vector<16x256xf32>
    %159 = vector.extract_strided_slice %157 {offsets = [0, 256], sizes = [16, 256], strides = [1, 1]} : vector<16x512xf32> to vector<16x256xf32>
    %160 = arith.truncf %158 : vector<16x256xf32> to vector<16x256xbf16>
    %161 = arith.truncf %159 : vector<16x256xf32> to vector<16x256xbf16>
    %162 = vector.shape_cast %161 : vector<16x256xbf16> to vector<16x1x256xbf16>
    %163 = vector.shape_cast %160 : vector<16x256xbf16> to vector<1x16x256xbf16>
    %164 = vector.broadcast %162 : vector<16x1x256xbf16> to vector<16x16x256xbf16>
    %165 = vector.broadcast %163 : vector<1x16x256xbf16> to vector<16x16x256xbf16>
    %166 = arith.addf %164, %165 : vector<16x16x256xbf16>
    %cst_64 = arith.constant 2.001950e-01 : bf16
    %167 = vector.broadcast %cst_64 : bf16 to vector<16x16x256xbf16>
    %168 = arith.mulf %167, %166 : vector<16x16x256xbf16>
    %169 = arith.maximumf %166, %168 : vector<16x16x256xbf16>
    %170 = vector.shape_cast %169 : vector<16x16x256xbf16> to vector<256x256xbf16>
    %c0_65 = arith.constant 0 : index
    %c0_66 = arith.constant 0 : index
    %171 = vector.load %arg14[%c0_65, %c0_66] : memref<256x8xbf16, #tpu.memory_space<vmem>>, vector<256x8xbf16>
    %cst_67 = arith.constant dense<0.000000e+00> : vector<256x8xf32>
    %172 = tpu.matmul %170, %171, %cst_67 {dimension_numbers = #tpu.dot_dimension_numbers<[1], [0], [0], [1], [0, 0, 1, 1], [], []>} : vector<256x256xbf16>, vector<256x8xbf16>, vector<256x8xf32> -> vector<256x8xf32>
    %173 = arith.addf %172, %8 : vector<256x8xf32>
    %174 = vector.shape_cast %173 : vector<256x8xf32> to vector<16x16x8xf32>
    %cst_68 = arith.constant dense<0xFF800000> : vector<16x8xf32>
    %175 = vector.multi_reduction <maximumf>, %174, %cst_68 [1] : vector<16x16x8xf32> to vector<16x8xf32>
    %176 = vector.shape_cast %175 : vector<16x8xf32> to vector<16x1x8xf32>
    %177 = vector.broadcast %176 : vector<16x1x8xf32> to vector<16x16x8xf32>
    %178 = arith.subf %174, %177 : vector<16x16x8xf32>
    %179 = math.exp %178 : vector<16x16x8xf32>
    %cst_69 = arith.constant dense<0.000000e+00> : vector<16x8xf32>
    %180 = vector.multi_reduction <add>, %179, %cst_69 [1] : vector<16x16x8xf32> to vector<16x8xf32>
    %181 = vector.shape_cast %180 : vector<16x8xf32> to vector<16x1x8xf32>
    %182 = vector.broadcast %181 : vector<16x1x8xf32> to vector<16x16x8xf32>
    %183 = arith.divf %179, %182 : vector<16x16x8xf32>
    %184 = vector.shape_cast %183 : vector<16x16x8xf32> to vector<256x8xf32>
    %cst_70 = arith.constant dense<0.000000e+00> : vector<256x256xf32>
    %185 = tpu.matmul %184, %11, %cst_70 {dimension_numbers = #tpu.dot_dimension_numbers<[1], [0], [0], [1], [0, 0, 1, 1], [], []>} : vector<256x8xf32>, vector<8x256xf32>, vector<256x256xf32> -> vector<256x256xf32>
    %186 = vector.shape_cast %185 : vector<256x256xf32> to vector<16x16x256xf32>
    %187 = vector.shape_cast %158 : vector<16x256xf32> to vector<1x16x256xf32>
    %188 = vector.broadcast %187 : vector<1x16x256xf32> to vector<16x16x256xf32>
    %189 = arith.mulf %186, %188 : vector<16x16x256xf32>
    %cst_71 = arith.constant dense<0.000000e+00> : vector<16x256xf32>
    %190 = vector.multi_reduction <add>, %189, %cst_71 [1] : vector<16x16x256xf32> to vector<16x256xf32>
    %191 = vector.shape_cast %190 : vector<16x256xf32> to vector<16x1x256xf32>
    %192 = vector.shape_cast %191 : vector<16x1x256xf32> to vector<16x256xf32>
    %cst_72 = arith.constant dense<0.000000e+00> : vector<16x64xf32>
    %193 = tpu.matmul %192, %12, %cst_72 {dimension_numbers = #tpu.dot_dimension_numbers<[1], [0], [0], [1], [0, 0, 1, 1], [], []>} : vector<16x256xf32>, vector<256x64xf32>, vector<16x64xf32> -> vector<16x64xf32>
    %c0_73 = arith.constant 0 : index
    %c0_74 = arith.constant 0 : index
    %194 = vector.load %arg15[%c0_73, %c0_74] : memref<1x64xf32, #tpu.memory_space<vmem>>, vector<1x64xf32>
    %195 = vector.broadcast %194 : vector<1x64xf32> to vector<16x64xf32>
    %196 = arith.addf %193, %195 : vector<16x64xf32>
    %cst_75 = arith.constant 0.000000e+00 : f32
    %197 = vector.broadcast %cst_75 : f32 to vector<16x64xf32>
    %198 = arith.maximumf %196, %197 : vector<16x64xf32>
    %199 = arith.addf %198, %152 : vector<16x64xf32>
    %cst_76 = arith.constant dense<0.000000e+00> : vector<16x1xf32>
    %200 = tpu.matmul %199, %5, %cst_76 {dimension_numbers = #tpu.dot_dimension_numbers<[1], [0], [0], [1], [0, 0, 1, 1], [], []>} : vector<16x64xf32>, vector<64x1xf32>, vector<16x1xf32> -> vector<16x1xf32>
    %201 = vector.broadcast %6 : vector<1x1xf32> to vector<16x1xf32>
    %202 = arith.addf %200, %201 : vector<16x1xf32>
    %203 = arith.negf %202 : vector<16x1xf32>
    %204 = math.exp %203 : vector<16x1xf32>
    %cst_77 = arith.constant 1.000000e+00 : f32
    %205 = vector.broadcast %cst_77 : f32 to vector<16x1xf32>
    %206 = arith.addf %205, %204 : vector<16x1xf32>
    %207 = arith.divf %205, %206 : vector<16x1xf32>
    %208 = vector.extract_strided_slice %199 {offsets = [0, 0], sizes = [16, 32], strides = [1, 1]} : vector<16x64xf32> to vector<16x32xf32>
    %209 = vector.extract_strided_slice %199 {offsets = [0, 32], sizes = [16, 32], strides = [1, 1]} : vector<16x64xf32> to vector<16x32xf32>
    %210 = vector.broadcast %207 : vector<16x1xf32> to vector<16x32xf32>
    %211 = arith.mulf %210, %208 : vector<16x32xf32>
    %cst_78 = arith.constant 1.000000e+00 : f32
    %212 = vector.broadcast %cst_78 : f32 to vector<16x1xf32>
    %213 = arith.subf %212, %207 : vector<16x1xf32>
    %214 = vector.broadcast %213 : vector<16x1xf32> to vector<16x32xf32>
    %215 = arith.mulf %214, %209 : vector<16x32xf32>
    %216 = arith.addf %211, %215 : vector<16x32xf32>
    %cst_79 = arith.constant 0.000000e+00 : f32
    %217 = vector.broadcast %cst_79 : f32 to vector<16x32xf32>
    %218 = arith.maximumf %216, %217 : vector<16x32xf32>
    %219 = tpu.concatenate %218, %218 in 1 : vector<16x32xf32>, vector<16x32xf32> -> vector<16x64xf32>
    %220 = vector.shape_cast %4 : vector<16x1xi1> to vector<16x1xi1>
    %221 = vector.broadcast %220 : vector<16x1xi1> to vector<16x64xi1>
    %222 = arith.select %221, %219, %199 : vector<16x64xi1>, vector<16x64xf32>
    %223 = vector.extract_strided_slice %222 {offsets = [0, 0], sizes = [16, 32], strides = [1, 1]} : vector<16x64xf32> to vector<16x32xf32>
    %c0_80 = arith.constant 0 : index
    %c0_81 = arith.constant 0 : index
    %224 = vector.load %arg22[%c0_80, %c0_81] : memref<16x32xf32, #tpu.memory_space<vmem>>, vector<16x32xf32>
    tpu.vector_store %arg22[%c0_80, %c0_81], %223 {strides = array<i32>} : memref<16x32xf32, #tpu.memory_space<vmem>>, vector<16x32xf32>,
    return
  }
}

</mosaic_0001>

<bundles_post_ra>
// kernel: tpu_custom_call.1
= control target key start
LH: loop header
LB: loop body
LE: loop exit
PB: predicated region body
PF: predicated region fallthrough
CT: control target
= control target key end

     0   :  { %s17503_s0 = inlined_call_operand.<no memory space> [shape: s32[1], index: 0, kind: input, shape index: {}]   ;;  %s17504_s1 = inlined_call_operand.vmem [shape: f32[16,64], index: 1, kind: input, shape index: {}]   ;;  %s17505_s2 = inlined_call_operand.vmem [shape: f32[256,16], index: 2, kind: input, shape index: {}]   ;;  %s17506_s3 = inlined_call_operand.vmem [shape: f32[256,8], index: 3, kind: input, shape index: {}]   ;;  %s17507_s4 = inlined_call_operand.vmem [shape: f32[64,1024], index: 4, kind: input, shape index: {}]   ;;  %s17508_s5 = inlined_call_operand.vmem [shape: f32[1,1024], index: 5, kind: input, shape index: {}]   ;;  %s17509_s6 = inlined_call_operand.vmem [shape: bf16[512,16], index: 6, kind: input, shape index: {}]   ;;  %s17510_s7 = inlined_call_operand.vmem [shape: f32[1,64], index: 7, kind: input, shape index: {}]   ;;  %s17511_s8 = inlined_call_operand.vmem [shape: f32[64,1024], index: 8, kind: input, shape index: {}]   ;;  %s17512_s9 = inlined_call_operand.vmem [shape: f32[1,1024], index: 9, kind: input, shape index: {}]   ;;  %s17513_s10 = inlined_call_operand.vmem [shape: bf16[512,16], index: 10, kind: input, shape index: {}]   ;;  %s17514_s11 = inlined_call_operand.vmem [shape: f32[1,64], index: 11, kind: input, shape index: {}]   ;;  %s17515_s12 = inlined_call_operand.vmem [shape: f32[64,512], index: 12, kind: input, shape index: {}]   ;;  %s17516_s13 = inlined_call_operand.vmem [shape: f32[1,512], index: 13, kind: input, shape index: {}]   ;;  %s17517_s14 = inlined_call_operand.vmem [shape: bf16[256,8], index: 14, kind: input, shape index: {}]   ;;  %s17518_s15 = inlined_call_operand.vmem [shape: f32[1,64], index: 15, kind: input, shape index: {}]   ;;  %s17519_s16 = inlined_call_operand.vmem [shape: f32[16,512], index: 16, kind: input, shape index: {}]   ;;  %s17520_s17 = inlined_call_operand.vmem [shape: f32[512,64], index: 17, kind: input, shape index: {}]   ;;  %s17521_s18 = inlined_call_operand.vmem [shape: f32[8,256], index: 18, kind: input, shape index: {}]   ;;  %s17522_s19 = inlined_call_operand.vmem [shape: f32[256,64], index: 19, kind: input, shape index: {}]   ;;  %s17523_s20 = inlined_call_operand.vmem [shape: f32[64,1], index: 20, kind: input, shape index: {}]   ;;  %s17524_s21 = inlined_call_operand.<no memory space> [shape: f32[1,1], index: 21, kind: input, shape index: {}]   ;;  %s17525_s22 = inlined_call_operand.hbm [shape: f32[16,32], index: 22, kind: output, shape index: {}]  }
   0x1   :  { %17558 = sst [smem:[#allocation16_spill]] %s17503_s0  ;;  %v28_v0 = vstv %s17524_s21 }
   0x2   :  { %17559 = sst [smem:[#allocation17_spill]] %s17504_s1  ;;  %29 = vst [vmem:[#allocation3] sm:$0x1] %v28_v0 }
   0x3   :  { %17560 = sst [smem:[#allocation18_spill]] %s17505_s2 }
   0x4   :  { %17561 = sst [smem:[#allocation19_spill]] %s17506_s3 }
   0x5   :  { %17562 = sst [smem:[#allocation20_spill]] %s17507_s4 }
   0x6   :  { %17563 = sst [smem:[#allocation21_spill]] %s17508_s5 }
   0x7   :  { %17564 = sst [smem:[#allocation22_spill]] %s17509_s6 }
   0x8   :  { %s17565_s4 = sld [smem:[#allocation20_spill]]  ;;  %vm371_vm0 = vcmask 523264   ;;  %v17539_v34 = vmov 0.0  }
   0x9   :  { %s17566_s24 = sld [smem:[#allocation17_spill]]  ;;  %442 = vmatprep.mubr.f32.mxu0 %v17539_v34  ;;  %519 = vmatprep.mubr.f32.mxu1 %v17539_v34 }
   0xe   :  { %v322_v1 = vld [vmem:[%s17565_s4 + $0x1c8] sm:$0xff]  ;;  %v324_v2 = vld [vmem:[%s17565_s4 + $0x1d8] sm:$0xff]  ;;  %v321_v3 = vld [vmem:[%s17565_s4 + $0x1c0] sm:$0xff] }
   0xf   :  { %394 = vmatprep.subr.mxu0 %v322_v1  ;;  %471 = vmatprep.subr.mxu1 %v324_v2  ;;  %v323_v4 = vld [vmem:[%s17565_s4 + $0x1d0] sm:$0xff]  ;;  %v314_v5 = vld [vmem:[%s17565_s4 + $0x188] sm:$0xff]  ;;  %v316_v6 = vld [vmem:[%s17565_s4 + $0x198] sm:$0xff] }
  0x10   :  { %395 = vmatpush1.msra.mxu0 %v321_v3  ;;  %472 = vmatpush1.msra.mxu1 %v323_v4  ;;  %v313_v7 = vld [vmem:[%s17565_s4 + $0x180] sm:$0xff]  ;;  %v315_v8 = vld [vmem:[%s17565_s4 + $0x190] sm:$0xff]  ;;  %v306_v9 = vld [vmem:[%s17565_s4 + $0x148] sm:$0xff] }
  0x11   :  { %396 = vmatprep.subr.mxu0 %v314_v5  ;;  %473 = vmatprep.subr.mxu1 %v316_v6  ;;  %v308_v10 = vld [vmem:[%s17565_s4 + $0x158] sm:$0xff]  ;;  %v305_v11 = vld [vmem:[%s17565_s4 + $0x140] sm:$0xff]  ;;  %v307_v12 = vld [vmem:[%s17565_s4 + $0x150] sm:$0xff] }
  0x12   :  { %397 = vmatpush1.msra.mxu0 %v313_v7  ;;  %474 = vmatpush1.msra.mxu1 %v315_v8  ;;  %v298_v13 = vld [vmem:[%s17565_s4 + $0x108] sm:$0xff]  ;;  %v300_v14 = vld [vmem:[%s17565_s4 + $0x118] sm:$0xff]  ;;  %v297_v15 = vld [vmem:[%s17565_s4 + $0x100] sm:$0xff] }
  0x13   :  { %398 = vmatprep.subr.mxu0 %v306_v9  ;;  %475 = vmatprep.subr.mxu1 %v308_v10  ;;  %v299_v16 = vld [vmem:[%s17565_s4 + $0x110] sm:$0xff]  ;;  %v290_v17 = vld [vmem:[%s17565_s4 + $0xc8] sm:$0xff]  ;;  %v292_v18 = vld [vmem:[%s17565_s4 + $0xd8] sm:$0xff] }
  0x14   :  { %399 = vmatpush1.msra.mxu0 %v305_v11  ;;  %476 = vmatpush1.msra.mxu1 %v307_v12  ;;  %v289_v19 = vld [vmem:[%s17565_s4 + $0xc0] sm:$0xff]  ;;  %v291_v20 = vld [vmem:[%s17565_s4 + $0xd0] sm:$0xff]  ;;  %v282_v21 = vld [vmem:[%s17565_s4 + $0x88] sm:$0xff] }
  0x15   :  { %400 = vmatprep.subr.mxu0 %v298_v13  ;;  %477 = vmatprep.subr.mxu1 %v300_v14  ;;  %v284_v22 = vld [vmem:[%s17565_s4 + $0x98] sm:$0xff]  ;;  %v281_v23 = vld [vmem:[%s17565_s4 + $0x80] sm:$0xff]  ;;  %v283_v24 = vld [vmem:[%s17565_s4 + $0x90] sm:$0xff] }
  0x16   :  { %401 = vmatpush1.msra.mxu0 %v297_v15  ;;  %478 = vmatpush1.msra.mxu1 %v299_v16  ;;  %v274_v25 = vld [vmem:[%s17565_s4 + $0x48] sm:$0xff]  ;;  %v276_v26 = vld [vmem:[%s17565_s4 + $0x58] sm:$0xff]  ;;  %v273_v27 = vld [vmem:[%s17565_s4 + $0x40] sm:$0xff] }
  0x17   :  { %402 = vmatprep.subr.mxu0 %v290_v17  ;;  %479 = vmatprep.subr.mxu1 %v292_v18  ;;  %v275_v28 = vld [vmem:[%s17565_s4 + $0x50] sm:$0xff]  ;;  %v266_v29 = vld [vmem:[%s17565_s4 + $0x8] sm:$0xff]  ;;  %v268_v30 = vld [vmem:[%s17565_s4 + $0x18] sm:$0xff] }
  0x18   :  { %403 = vmatpush1.msra.mxu0 %v289_v19  ;;  %480 = vmatpush1.msra.mxu1 %v291_v20  ;;  %v265_v31 = vld [vmem:[%s17565_s4] sm:$0xff]  ;;  %v267_v32 = vld [vmem:[%s17565_s4 + $0x10] sm:$0xff]  ;;  %v326_v35 = vld [vmem:[%s17565_s4 + $0x1e8] sm:$0xff] }
  0x19   :  { %404 = vmatprep.subr.mxu0 %v282_v21  ;;  %481 = vmatprep.subr.mxu1 %v284_v22  ;;  %v12742_v33 = vld [vmem:[%s17566_s24] sm:$0xff]  ;;  %v328_v36 = vld [vmem:[%s17565_s4 + $0x1f8] sm:$0xff]  ;;  %v327_v38 = vld [vmem:[%s17565_s4 + $0x1f0] sm:$0xff] }
  0x1a   :  { %405 = vmatpush1.msra.mxu0 %v281_v23  ;;  %482 = vmatpush1.msra.mxu1 %v283_v24  ;;  %v325_v37 = vld [vmem:[%s17565_s4 + $0x1e0] sm:$0xff]  ;;  %v318_v39 = vld [vmem:[%s17565_s4 + $0x1a8] sm:$0xff]  ;;  %v320_v40 = vld [vmem:[%s17565_s4 + $0x1b8] sm:$0xff] }
  0x1b   :  { %406 = vmatprep.subr.mxu0 %v274_v25  ;;  %483 = vmatprep.subr.mxu1 %v276_v26  ;;  %v317_v41 = vld [vmem:[%s17565_s4 + $0x1a0] sm:$0xff]  ;;  %v319_v42 = vld [vmem:[%s17565_s4 + $0x1b0] sm:$0xff]  ;;  %v12777_v43 = vld [vmem:[%s17566_s24 + $0x8] sm:$0xff] }
  0x1c   :  { %407 = vmatpush1.msra.mxu0 %v273_v27  ;;  %484 = vmatpush1.msra.mxu1 %v275_v28  ;;  %v310_v44 = vld [vmem:[%s17565_s4 + $0x168] sm:$0xff]  ;;  %v312_v45 = vld [vmem:[%s17565_s4 + $0x178] sm:$0xff]  ;;  %v309_v46 = vld [vmem:[%s17565_s4 + $0x160] sm:$0xff] }
  0x1d   :  { %408 = vmatprep.subr.mxu0 %v266_v29  ;;  %485 = vmatprep.subr.mxu1 %v268_v30  ;;  %v311_v47 = vld [vmem:[%s17565_s4 + $0x170] sm:$0xff]  ;;  %v302_v48 = vld [vmem:[%s17565_s4 + $0x128] sm:$0xff]  ;;  %v304_v49 = vld [vmem:[%s17565_s4 + $0x138] sm:$0xff] }
  0x1e   :  { %409 = vmatpush1.msra.mxu0 %v265_v31  ;;  %486 = vmatpush1.msra.mxu1 %v267_v32  ;;  %v301_v50 = vld [vmem:[%s17565_s4 + $0x120] sm:$0xff]  ;;  %v303_v51 = vld [vmem:[%s17565_s4 + $0x130] sm:$0xff]  ;;  %v294_v52 = vld [vmem:[%s17565_s4 + $0xe8] sm:$0xff] }
  0x1f   :  { %10821 = vmatmul.mubr.msk.f32.vlgmr.msra.gmra.mxu0 %vm371_vm0, %v12742_v33  ;;  %10823 = vmatmul.mubr.msk.f32.vlgmr.msra.gmra.mxu1 %vm371_vm0, %v12742_v33  ;;  %v296_v53 = vld [vmem:[%s17565_s4 + $0xf8] sm:$0xff]  ;;  %v293_v54 = vld [vmem:[%s17565_s4 + $0xe0] sm:$0xff]  ;;  %v295_v55 = vld [vmem:[%s17565_s4 + $0xf0] sm:$0xff] }
  0x20   :  { %548 = vmatprep.subr.mxu0 %v326_v35  ;;  %625 = vmatprep.subr.mxu1 %v328_v36  ;;  %v286_v56 = vld [vmem:[%s17565_s4 + $0xa8] sm:$0xff]  ;;  %v288_v57 = vld [vmem:[%s17565_s4 + $0xb8] sm:$0xff]  ;;  %v285_v58 = vld [vmem:[%s17565_s4 + $0xa0] sm:$0xff] }
  0x21   :  { %549 = vmatpush1.msra.mxu0 %v325_v37  ;;  %626 = vmatpush1.msra.mxu1 %v327_v38  ;;  %v287_v59 = vld [vmem:[%s17565_s4 + $0xb0] sm:$0xff]  ;;  %v278_v60 = vld [vmem:[%s17565_s4 + $0x68] sm:$0xff]  ;;  %v280_v61 = vld [vmem:[%s17565_s4 + $0x78] sm:$0xff] }
  0x22   :  { %550 = vmatprep.subr.mxu0 %v318_v39  ;;  %627 = vmatprep.subr.mxu1 %v320_v40  ;;  %v277_v62 = vld [vmem:[%s17565_s4 + $0x60] sm:$0xff]  ;;  %v279_v63 = vld [vmem:[%s17565_s4 + $0x70] sm:$0xff]  ;;  %v270_v0 = vld [vmem:[%s17565_s4 + $0x28] sm:$0xff] }
  0x23   :  { %448 = vmatprep.mubr.f32.mxu0 %v17539_v34  ;;  %525 = vmatprep.mubr.f32.mxu1 %v17539_v34  ;;  %v272_v1 = vld [vmem:[%s17565_s4 + $0x38] sm:$0xff]  ;;  %v269_v2 = vld [vmem:[%s17565_s4 + $0x20] sm:$0xff]  ;;  %v271_v3 = vld [vmem:[%s17565_s4 + $0x30] sm:$0xff] }
  0x24   :  { %551 = vmatpush1.msra.mxu0 %v317_v41  ;;  %628 = vmatpush1.msra.mxu1 %v319_v42 }
  0x25   :  { %10822 = vmatmul.mubr.msk.f32.gmra.mxu0 %vm371_vm0, %v12777_v43  ;;  %10824 = vmatmul.mubr.msk.f32.gmra.mxu1 %vm371_vm0, %v12777_v43 }
  0x26   :  { %552 = vmatprep.subr.mxu0 %v310_v44  ;;  %629 = vmatprep.subr.mxu1 %v312_v45 }
  0x27   :  { %553 = vmatpush1.msra.mxu0 %v309_v46  ;;  %630 = vmatpush1.msra.mxu1 %v311_v47 }
  0x28   :  { %554 = vmatprep.subr.mxu0 %v302_v48  ;;  %631 = vmatprep.subr.mxu1 %v304_v49 }
  0x29   :  { %555 = vmatpush1.msra.mxu0 %v301_v50  ;;  %632 = vmatpush1.msra.mxu1 %v303_v51 }
  0x2a   :  { %556 = vmatprep.subr.mxu0 %v294_v52  ;;  %633 = vmatprep.subr.mxu1 %v296_v53 }
  0x2b   :  { %557 = vmatpush1.msra.mxu0 %v293_v54  ;;  %634 = vmatpush1.msra.mxu1 %v295_v55 }
  0x2c   :  { %558 = vmatprep.subr.mxu0 %v286_v56  ;;  %635 = vmatprep.subr.mxu1 %v288_v57 }
  0x2d   :  { %559 = vmatpush1.msra.mxu0 %v285_v58  ;;  %636 = vmatpush1.msra.mxu1 %v287_v59 }
  0x2e   :  { %560 = vmatprep.subr.mxu0 %v278_v60  ;;  %637 = vmatprep.subr.mxu1 %v280_v61 }
  0x2f   :  { %561 = vmatpush1.msra.mxu0 %v277_v62  ;;  %638 = vmatpush1.msra.mxu1 %v279_v63 }
  0x30   :  { %562 = vmatprep.subr.mxu0 %v270_v0  ;;  %639 = vmatprep.subr.mxu1 %v272_v1 }
  0x31   :  { %563 = vmatpush1.msra.mxu0 %v269_v2  ;;  %596 = vmatprep.mubr.f32.mxu0 %v17539_v34 }
  0x32   :  { %640 = vmatpush1.msra.mxu1 %v271_v3  ;;  %673 = vmatprep.mubr.f32.mxu1 %v17539_v34 }
  0x33   :  { %10825 = vmatmul.mubr.msk.f32.vlgmr.msra.gmra.mxu0 %vm371_vm0, %v12742_v33  ;;  %10827 = vmatmul.mubr.msk.f32.vlgmr.msra.gmra.mxu1 %vm371_vm0, %v12742_v33 }
  0x34   :  { %602 = vmatprep.mubr.f32.mxu0 %v17539_v34  ;;  %679 = vmatprep.mubr.f32.mxu1 %v17539_v34 }
  0x37   :  { %10826 = vmatmul.mubr.msk.f32.gmra.mxu0 %vm371_vm0, %v12777_v43  ;;  %10828 = vmatmul.mubr.msk.f32.gmra.mxu1 %vm371_vm0, %v12777_v43 }
  0x38   :  { %30 = vsyncpa [#allocation5], 0  ;;  %s17567_s23 = sld [smem:[#allocation22_spill]]  ;;  %v80_v39 = vlaneseq  ;;  %v12518_v45 = vmov 1966171168   ;;  %vm2272_vm1 = vcmask 130048  }
  0x39   :  { %v703_v46 = vunpack.c.l.s4 %v12518_v45  ;;  %s17568_s27 = sld [smem:[#allocation21_spill]]  ;;  %vm3962_vm2 = vcmask 1041409   ;;  %vm3964_vm3 = vcmask 1042434   ;;  %vm3966_vm4 = vcmask 1043459   ;;  %s12521_s26 = smov 32  }
  0x3a   :  { %v12965_v42 = vshrl.u32 %v80_v39, 7  ;;  %s17574_s30 = sld [smem:[#allocation18_spill]]  ;;  %vm3968_vm5 = vcmask 1044484   ;;  %vm3970_vm6 = vcmask 1045509   ;;  %vm3972_vm7 = vcmask 1046534  }
  0x3b   :  { %v704_v54 = vunpack.c.0.s8 %v703_v46  ;;  %vm3974_vm8 = vcmask 1047559   ;;  %s17579_s3 = sld [smem:[#allocation16_spill]]  ;;  %vm4332_vm9 = vcmask 261120   ;;  %vm9436_vm12 = vcmask 64512  }
  0x3c   :  { %v17534_v47 = vsub.s32 4, %v12965_v42  ;;  %v17533_v48 = vsub.s32 6, %v12965_v42  ;;  %v17532_v49 = vsub.s32 5, %v12965_v42  ;;  %v17531_v50 = vsub.s32 7, %v12965_v42  ;;  %s17609_s2 = sld [smem:[#allocation19_spill]] }
  0x3d   :  { %v12983_v61 = vsub.s32 %v704_v54, %v12965_v42 }
  0x3e   :  { %v11978_v4 = vld [vmem:[%s17567_s23 + $0x78] sm:$0xff]   ;;  %v11982_v8 = vld [vmem:[%s17567_s23 + $0x70] sm:$0xff]   ;;  %v11986_v12 = vld [vmem:[%s17567_s23 + $0x68] sm:$0xff]  }
  0x3f   :  { %v11979_v5 = vld [vmem:[%s17567_s23 + $0xf8] sm:$0xff]   ;;  %11131 = vmatprep.subr.bf16.mxu0 %v11978_v4  ;;  %v11983_v9 = vld [vmem:[%s17567_s23 + $0xf0] sm:$0xff]   ;;  %v11987_v13 = vld [vmem:[%s17567_s23 + $0xe8] sm:$0xff]   ;;  %17569 = vst [vmem:[#allocation7_spill] sm:$0xff] %v12983_v61 }
  0x40   :  { %v11980_v6 = vld [vmem:[%s17567_s23 + $0x38] sm:$0xff]   ;;  %11243 = vmatprep.subr.bf16.mxu1 %v11979_v5  ;;  %v11984_v10 = vld [vmem:[%s17567_s23 + $0x30] sm:$0xff]   ;;  %v11988_v14 = vld [vmem:[%s17567_s23 + $0x28] sm:$0xff]  }
  0x41   :  { %v11981_v7 = vld [vmem:[%s17567_s23 + $0xb8] sm:$0xff]   ;;  %11132 = vmatpush3.bf16.msra.mxu0 %v11980_v6  ;;  %v11985_v11 = vld [vmem:[%s17567_s23 + $0xb0] sm:$0xff]   ;;  %v11989_v15 = vld [vmem:[%s17567_s23 + $0xa8] sm:$0xff]   ;;  %v12986_v6 = vsub.s32 0, %v12965_v42 }
  0x42   :  { %11244 = vmatpush3.bf16.msra.mxu1 %v11981_v7  ;;  %11133 = vmatprep.subr.bf16.mxu0 %v11982_v8  ;;  %v11990_v16 = vld [vmem:[%s17567_s23 + $0x60] sm:$0xff]   ;;  %v11994_v20 = vld [vmem:[%s17567_s23 + $0x58] sm:$0xff]   ;;  %v11998_v24 = vld [vmem:[%s17567_s23 + $0x50] sm:$0xff]  }
  0x43   :  { %11245 = vmatprep.subr.bf16.mxu1 %v11983_v9  ;;  %v11991_v17 = vld [vmem:[%s17567_s23 + $0xe0] sm:$0xff]   ;;  %v11995_v21 = vld [vmem:[%s17567_s23 + $0xd8] sm:$0xff]   ;;  %v11999_v25 = vld [vmem:[%s17567_s23 + $0xd0] sm:$0xff]   ;;  %17570 = vst [vmem:[#allocation8_spill] sm:$0xff] %v12986_v6  ;;  %v12991_v9 = vsub.s32 2, %v12965_v42 }
  0x44   :  { %v11992_v18 = vld [vmem:[%s17567_s23 + $0x20] sm:$0xff]   ;;  %v11996_v22 = vld [vmem:[%s17567_s23 + $0x18] sm:$0xff]   ;;  %v12000_v26 = vld [vmem:[%s17567_s23 + $0x10] sm:$0xff]  }
  0x45   :  { %11134 = vmatpush3.bf16.msra.mxu0 %v11984_v10  ;;  %v11993_v19 = vld [vmem:[%s17567_s23 + $0xa0] sm:$0xff]   ;;  %v11997_v23 = vld [vmem:[%s17567_s23 + $0x98] sm:$0xff]   ;;  %v12001_v27 = vld [vmem:[%s17567_s23 + $0x90] sm:$0xff]   ;;  %17571 = vst [vmem:[#allocation9_spill] sm:$0xff] %v12991_v9  ;;  %v12994_v10 = vsub.s32 1, %v12965_v42 }
  0x46   :  { %11246 = vmatpush3.bf16.msra.mxu1 %v11985_v11  ;;  %11135 = vmatprep.subr.bf16.mxu0 %v11986_v12  ;;  %v12002_v28 = vld [vmem:[%s17567_s23 + $0x48] sm:$0xff]   ;;  %v12006_v32 = vld [vmem:[%s17567_s23 + $0x40] sm:$0xff]   ;;  %v12997_v11 = vsub.s32 3, %v12965_v42 }
  0x47   :  { %11247 = vmatprep.subr.bf16.mxu1 %v11987_v13  ;;  %v12003_v29 = vld [vmem:[%s17567_s23 + $0xc8] sm:$0xff]   ;;  %v12007_v33 = vld [vmem:[%s17567_s23 + $0xc0] sm:$0xff]   ;;  %17572 = vst [vmem:[#allocation10_spill] sm:$0xff] %v12994_v10 }
  0x48   :  { %v12004_v30 = vld [vmem:[%s17567_s23 + $0x8] sm:$0xff]   ;;  %v12008_v35 = vld [vmem:[%s17567_s23] sm:$0xff]   ;;  %17573 = vst [vmem:[#allocation11_spill] sm:$0xff] %v12997_v11 }
  0x49   :  { %11136 = vmatpush3.bf16.msra.mxu0 %v11988_v14  ;;  %v12005_v31 = vld [vmem:[%s17567_s23 + $0x88] sm:$0xff]   ;;  %v12009_v36 = vld [vmem:[%s17567_s23 + $0x80] sm:$0xff]  }
  0x4a   :  { %11248 = vmatpush3.bf16.msra.mxu1 %v11989_v15  ;;  %11137 = vmatprep.subr.bf16.mxu0 %v11990_v16  ;;  %v329_v51 = vld [vmem:[%s17568_s27] sm:$0xff]  ;;  %s12520_s27 = smov 96  }
  0x4b   :  { %11249 = vmatprep.subr.bf16.mxu1 %v11991_v17  ;;  %v350_v55 = vrot.slane %v329_v51, %v17534_v47  ;;  %v358_v56 = vrot.slane %v329_v51, %v17533_v48  ;;  %v354_v57 = vrot.slane %v329_v51, %v17532_v49  ;;  %v362_v58 = vrot.slane %v329_v51, %v17531_v50 }
  0x4c   :  { %v334_v15 = vrot.slane %v329_v51, %v12986_v6  ;;  %v342_v17 = vrot.slane %v329_v51, %v12991_v9 }
  0x4d   :  { %11138 = vmatpush3.bf16.msra.mxu0 %v11992_v18  ;;  %v338_v18 = vrot.slane %v329_v51, %v12994_v10 }
  0x4e   :  { %11250 = vmatpush3.bf16.msra.mxu1 %v11993_v19  ;;  %11139 = vmatprep.subr.bf16.mxu0 %v11994_v20  ;;  %v346_v19 = vrot.slane %v329_v51, %v12997_v11 }
  0x4f   :  { %11251 = vmatprep.subr.bf16.mxu1 %v11995_v21 }
  0x51   :  { %11140 = vmatpush3.bf16.msra.mxu0 %v11996_v22 }
  0x52   :  { %11252 = vmatpush3.bf16.msra.mxu1 %v11997_v23  ;;  %11141 = vmatprep.subr.bf16.mxu0 %v11998_v24 }
  0x53   :  { %11253 = vmatprep.subr.bf16.mxu1 %v11999_v25 }
  0x55   :  { %11142 = vmatpush3.bf16.msra.mxu0 %v12000_v26 }
  0x56   :  { %11254 = vmatpush3.bf16.msra.mxu1 %v12001_v27  ;;  %11143 = vmatprep.subr.bf16.mxu0 %v12002_v28 }
  0x57   :  { %11255 = vmatprep.subr.bf16.mxu1 %v12003_v29 }
  0x59   :  { %11144 = vmatpush3.bf16.msra.mxu0 %v12004_v30 }
  0x5a   :  { %11256 = vmatpush3.bf16.msra.mxu1 %v12005_v31  ;;  %11145 = vmatprep.subr.bf16.mxu0 %v12006_v32 }
  0x5b   :  { %11257 = vmatprep.subr.bf16.mxu1 %v12007_v33 }
  0x5d   :  { %11146 = vmatpush3.bf16.msra.mxu0 %v12008_v35 }
  0x5e   :  { %11258 = vmatpush3.bf16.msra.mxu1 %v12009_v36 }
  0xdf   :  { %v444_v37 = vpop.f32.mrf.mxu0  ;;  %v521_v38 = vpop.f32.mrf.mxu1 }
  0xe0   :  { %v13004_v23 = vadd.f32 %v444_v37, %v334_v15  ;;  %v13022_v35 = vadd.f32 %v521_v38, %v342_v17 }
  0xe1   :  { %v446_v40 = vpop.f32.mrf.mxu0  ;;  %v523_v41 = vpop.f32.mrf.mxu1 }
  0xe5   :  { %v450_v43 = vpop.f32.mrf.mxu0  ;;  %v527_v44 = vpop.f32.mrf.mxu1 }
  0xe6   :  { %v13006_v24 = vadd.f32 %v450_v43, %v334_v15  ;;  %v13008_v26 = vadd.f32 %v527_v44, %v342_v17  ;;  %v13029_v43 = vadd.f32 %v446_v40, %v338_v18  ;;  %v13031_v44 = vadd.f32 %v523_v41, %v346_v19 }
  0xe7   :  { %v452_v52 = vpop.f32.mrf.mxu0  ;;  %v529_v53 = vpop.f32.mrf.mxu1 }
  0xe8   :  { %v13010_v27 = vadd.f32 %v452_v52, %v338_v18  ;;  %v13012_v28 = vadd.f32 %v529_v53, %v346_v19  ;;  %v13035_v45 = vpack.c.bf16 %v13006_v24, %v13004_v23  ;;  %v13039_v38 = vpack.c.bf16 %v13008_v26, %v13022_v35 }
  0xea   :  { %v13047_v41 = vpack.c.bf16 %v13010_v27, %v13029_v43  ;;  %v13051_v54 = vpack.c.bf16 %v13012_v28, %v13031_v44 }
  0xf3   :  { %v598_v59 = vpop.f32.mrf.mxu0  ;;  %v675_v60 = vpop.f32.mrf.mxu1 }
  0xf4   :  { %v599_v0 = vadd.f32 %v598_v59, %v350_v55  ;;  %v676_v1 = vadd.f32 %v675_v60, %v358_v56 }
  0xf5   :  { %v600_v62 = vpop.f32.mrf.mxu0  ;;  %v677_v63 = vpop.f32.mrf.mxu1 }
  0xf6   :  { %v601_v2 = vadd.f32 %v600_v62, %v354_v57  ;;  %v678_v3 = vadd.f32 %v677_v63, %v362_v58 }
  0xf7   :  { %v604_v13 = vpop.f32.mrf.mxu0  ;;  %v681_v14 = vpop.f32.mrf.mxu1 }
  0xf8   :  { %v10829_v4 = vpack.c.bf16 %v601_v2, %v599_v0  ;;  %v10831_v5 = vpack.c.bf16 %v678_v3, %v676_v1  ;;  %v13014_v30 = vadd.f32 %v604_v13, %v350_v55  ;;  %v13016_v31 = vadd.f32 %v681_v14, %v358_v56 }
  0xf9   :  { %v606_v21 = vpop.f32.mrf.mxu0  ;;  %v683_v22 = vpop.f32.mrf.mxu1 }
  0xfa   :  { %v708_v7 = vrot.slane %v10829_v4, %v12983_v61  ;;  %v722_v8 = vrot.slane %v10831_v5, %v12983_v61  ;;  %v13018_v32 = vadd.f32 %v606_v21, %v354_v57  ;;  %v13020_v33 = vadd.f32 %v683_v22, %v362_v58  ;;  %v166_v21 = vld [vmem:[%s17519_s16 + $0x38] sm:$0xff] }
  0xfb   :  { %3086 = vmatprep.subr.mxu1 %v166_v21 }
  0xfc   :  { %v730_v12 = vcombine.low %v708_v7, %v722_v8  ;;  %v731_v20 = vcombine.high %v708_v7, %v722_v8  ;;  %v10830_v53 = vpack.c.bf16 %v13018_v32, %v13014_v30  ;;  %v10832_v40 = vpack.c.bf16 %v13020_v33, %v13016_v31 }
  0xfe   :  { %v740_v16 = vrot.slane %v730_v12, %v12983_v61  ;;  %v13025_v36 = vrot.slane %v731_v20, %v12983_v61  ;;  %v164_v20 = vld [vmem:[%s17519_s16 + $0x28] sm:$0xff] }
  0xff   :  { %2829 = vmatprep.subr.mxu0 %v164_v20 }
 0x100   :  { %v10833_v25 = vpack.i.b16 %v740_v16, %v740_v16  ;;  %v767_v29 = vunpack.i.h.s16 %v740_v16  ;;  %v13053_v55 = vcombine.high %v740_v16, %v740_v16  ;;  %v13057_v56 = vcombine.high %v13025_v36, %v13025_v36 }
 0x101   :  { %v769_v59 = vunpack.i.h.s16 %v13025_v36  ;;  %v13064_v60 = vpack.i.b16 %v13025_v36, %v13025_v36 }
 0x102   :  { %v805_v37 = vrot.slane %v10833_v25, %v12994_v10  ;;  %v813_v39 = vrot.slane %v10833_v25, %v12997_v11  ;;  %v783_v46 = vpack.i.b16 %v767_v29, %v767_v29  ;;  %v801_v62 = vrot.slane %v10833_v25, %v12986_v6 }
 0x103   :  { %v809_v63 = vrot.slane %v10833_v25, %v12991_v9  ;;  %v13103_v20 = vpack.i.b16 %v13053_v55, %v13053_v55  ;;  %v833_v21 = vrot.slane %v13064_v60, %v12986_v6 }
 0x104   :  { %v1062_v51 = vpack.i.b16 %v805_v37, %v805_v37  ;;  %v1076_v52 = vpack.i.b16 %v813_v39, %v813_v39  ;;  %v821_v2 = vrot.slane %v783_v46, %v12994_v10  ;;  %v829_v3 = vrot.slane %v783_v46, %v12997_v11 }
 0x105   :  { %v1055_v4 = vpack.i.b16 %v801_v62, %v801_v62  ;;  %v1069_v5 = vpack.i.b16 %v809_v63, %v809_v63  ;;  %v817_v7 = vrot.slane %v783_v46, %v12986_v6  ;;  %v825_v8 = vrot.slane %v783_v46, %v12991_v9 }
 0x106   :  { %v1067_v57 = vrot.slane %v1062_v51, %v12986_v6  ;;  %v1081_v58 = vrot.slane %v1076_v52, %v12986_v6  ;;  %v1090_v14 = vpack.i.b16 %v821_v2, %v821_v2  ;;  %v1104_v15 = vpack.i.b16 %v829_v3, %v829_v3 }
 0x107   :  { %v1060_v16 = vrot.slane %v1055_v4, %v12986_v6  ;;  %v1074_v17 = vrot.slane %v1069_v5, %v12986_v6  ;;  %v1083_v18 = vpack.i.b16 %v817_v7, %v817_v7  ;;  %v1097_v19 = vpack.i.b16 %v825_v8, %v825_v8 }
 0x108   :  { %v1503_v0 = vadd.bf16 %v1067_v57, %v13047_v41  ;;  %v1505_v1 = vadd.bf16 %v1081_v58, %v13051_v54  ;;  %v1095_v29 = vrot.slane %v1090_v14, %v12986_v6  ;;  %v1109_v36 = vrot.slane %v1104_v15, %v12986_v6 }
 0x109   :  { %v1502_v37 = vadd.bf16 %v1060_v16, %v13035_v45  ;;  %v1504_v39 = vadd.bf16 %v1074_v17, %v13039_v38  ;;  %v1088_v46 = vrot.slane %v1083_v18, %v12986_v6  ;;  %v1102_v51 = vrot.slane %v1097_v19, %v12986_v6  ;;  %v163_v18 = vld [vmem:[%s17519_s16 + $0x20] sm:$0xff] }
 0x10a   :  { %v1567_v12 = vmul.bf16 1045249613, %v1503_v0  ;;  %v1569_v13 = vmul.bf16 1045249613, %v1505_v1  ;;  %v1507_v52 = vadd.bf16 %v1095_v29, %v13047_v41  ;;  %v1509_v57 = vadd.bf16 %v1109_v36, %v13051_v54 }
 0x10b   :  { %v837_v58 = vrot.slane %v13064_v60, %v12994_v10  ;;  %v1566_v62 = vmul.bf16 1045249613, %v1502_v37  ;;  %v1568_v63 = vmul.bf16 1045249613, %v1504_v39  ;;  %v845_v5 = vrot.slane %v13064_v60, %v12997_v11 }
 0x10c   :  { %v1631_v22 = vmax.bf16 %v1567_v12, %v1503_v0  ;;  %v1633_v25 = vmax.bf16 %v1569_v13, %v1505_v1  ;;  %v1506_v0 = vadd.bf16 %v1088_v46, %v13035_v45  ;;  %v1508_v1 = vadd.bf16 %v1102_v51, %v13039_v38 }
 0x10d   :  { %v1571_v2 = vmul.bf16 1045249613, %v1507_v52  ;;  %v1573_v3 = vmul.bf16 1045249613, %v1509_v57  ;;  %v1118_v4 = vpack.i.b16 %v837_v58, %v837_v58  ;;  %v785_v7 = vpack.i.b16 %v769_v59, %v769_v59 }
 0x10e   :  { %1982 = vmatprep.mubr.bf16.mxu0 %v1631_v22  ;;  %2143 = vmatprep.mubr.bf16.mxu1 %v1633_v25  ;;  %v1630_v8 = vmax.bf16 %v1566_v62, %v1502_v37  ;;  %v1632_v12 = vmax.bf16 %v1568_v63, %v1504_v39  ;;  %v1570_v13 = vmul.bf16 1045249613, %v1506_v0  ;;  %v1132_v17 = vpack.i.b16 %v845_v5, %v845_v5  ;;  %v165_v22 = vld [vmem:[%s17519_s16 + $0x30] sm:$0xff] }
 0x10f   :  { %v1635_v14 = vmax.bf16 %v1571_v2, %v1507_v52  ;;  %v1637_v15 = vmax.bf16 %v1573_v3, %v1509_v57  ;;  %v1123_v16 = vrot.slane %v1118_v4, %v12986_v6  ;;  %v771_v19 = vunpack.i.h.s16 %v13053_v55 }
 0x110   :  { %1983 = vmatmul.mubr.bf16.vlgmr.msra.gmra.mxu0 %v1630_v8  ;;  %2144 = vmatmul.mubr.bf16.vlgmr.msra.gmra.mxu1 %v1632_v12  ;;  %v1634_v59 = vmax.bf16 %v1570_v13, %v1506_v0  ;;  %v1572_v25 = vmul.bf16 1045249613, %v1508_v1  ;;  %v1137_v36 = vrot.slane %v1132_v17, %v12986_v6  ;;  %v841_v55 = vrot.slane %v13064_v60, %v12991_v9 }
 0x111   :  { %1990 = vmatprep.mubr.bf16.mxu0 %v1635_v14  ;;  %2151 = vmatprep.mubr.bf16.mxu1 %v1637_v15  ;;  %v1511_v29 = vadd.bf16 %v1123_v16, %v13047_v41  ;;  %v1111_v37 = vpack.i.b16 %v833_v21, %v833_v21  ;;  %v853_v39 = vrot.slane %v785_v7, %v12994_v10 }
 0x112   :  { %v861_v46 = vrot.slane %v785_v7, %v12997_v11  ;;  %v849_v51 = vrot.slane %v785_v7, %v12986_v6  ;;  %2830 = vmatpush1.msra.mxu0 %v163_v18  ;;  %v1513_v57 = vadd.bf16 %v1137_v36, %v13051_v54  ;;  %v1125_v58 = vpack.i.b16 %v841_v55, %v841_v55 }
 0x113   :  { %v1575_v52 = vmul.bf16 1045249613, %v1511_v29  ;;  %v857_v62 = vrot.slane %v785_v7, %v12991_v9  ;;  %3087 = vmatpush1.msra.mxu1 %v165_v22  ;;  %v1116_v63 = vrot.slane %v1111_v37, %v12986_v6  ;;  %v1146_v0 = vpack.i.b16 %v853_v39, %v853_v39 }
 0x114   :  { %v1160_v2 = vpack.i.b16 %v861_v46, %v861_v46  ;;  %v1139_v60 = vpack.i.b16 %v849_v51, %v849_v51  ;;  %v1636_v3 = vmax.bf16 %v1572_v25, %v1508_v1  ;;  %v1577_v4 = vmul.bf16 1045249613, %v1513_v57 }
 0x115   :  { %v1130_v5 = vrot.slane %v1125_v58, %v12986_v6  ;;  %v1153_v8 = vpack.i.b16 %v857_v62, %v857_v62  ;;  %v1639_v12 = vmax.bf16 %v1575_v52, %v1511_v29  ;;  %v1510_v13 = vadd.bf16 %v1116_v63, %v13035_v45 }
 0x116   :  { %v1151_v14 = vrot.slane %v1146_v0, %v12986_v6  ;;  %v1165_v15 = vrot.slane %v1160_v2, %v12986_v6  ;;  %v1641_v16 = vmax.bf16 %v1577_v4, %v1513_v57  ;;  %v1144_v17 = vrot.slane %v1139_v60, %v12986_v6 }
 0x117   :  { %v1512_v7 = vadd.bf16 %v1130_v5, %v13039_v38  ;;  %v869_v18 = vrot.slane %v13103_v20, %v12994_v10  ;;  %v1158_v22 = vrot.slane %v1153_v8, %v12986_v6  ;;  %v1574_v25 = vmul.bf16 1045249613, %v1510_v13 }
 0x118   :  { %1991 = vmatmul.mubr.bf16.gmra.mxu0 %v1634_v59  ;;  %2152 = vmatmul.mubr.bf16.gmra.mxu1 %v1636_v3  ;;  %v1515_v1 = vadd.bf16 %v1151_v14, %v13047_v41  ;;  %v1517_v21 = vadd.bf16 %v1165_v15, %v13051_v54  ;;  %v877_v55 = vrot.slane %v13103_v20, %v12997_v11  ;;  %v773_v8 = vunpack.i.h.s16 %v13057_v56 }
 0x119   :  { %1998 = vmatprep.mubr.bf16.mxu0 %v1639_v12  ;;  %2159 = vmatprep.mubr.bf16.mxu1 %v1641_v16  ;;  %v1576_v29 = vmul.bf16 1045249613, %v1512_v7  ;;  %v1174_v36 = vpack.i.b16 %v869_v18, %v869_v18  ;;  %v787_v37 = vpack.i.b16 %v771_v19, %v771_v19  ;;  %v13137_v59 = vrot.slane %v10830_v53, %v12983_v61 }
 0x11a   :  { %v13143_v39 = vrot.slane %v10832_v40, %v12983_v61  ;;  %v1579_v46 = vmul.bf16 1045249613, %v1515_v1  ;;  %v1581_v51 = vmul.bf16 1045249613, %v1517_v21  ;;  %v1188_v57 = vpack.i.b16 %v877_v55, %v877_v55 }
 0x11b   :  { %v1179_v52 = vrot.slane %v1174_v36, %v12986_v6  ;;  %v10836_v19 = vpack.i.b16 %v13057_v56, %v13057_v56  ;;  %v1514_v58 = vadd.bf16 %v1144_v17, %v13035_v45  ;;  %v1516_v30 = vadd.bf16 %v1158_v22, %v13039_v38 }
 0x11c   :  { %v865_v32 = vrot.slane %v13103_v20, %v12986_v6  ;;  %v1638_v53 = vmax.bf16 %v1574_v25, %v1510_v13  ;;  %v1640_v62 = vmax.bf16 %v1576_v29, %v1512_v7  ;;  %v1193_v31 = vrot.slane %v1188_v57, %v12986_v6 }
 0x11d   :  { %v873_v33 = vrot.slane %v13103_v20, %v12991_v9  ;;  %v1519_v40 = vadd.bf16 %v1179_v52, %v13047_v41  ;;  %v885_v0 = vrot.slane %v787_v37, %v12994_v10  ;;  %v893_v2 = vrot.slane %v787_v37, %v12997_v11 }
 0x11e   :  { %v1167_v63 = vpack.i.b16 %v865_v32, %v865_v32  ;;  %v1643_v60 = vmax.bf16 %v1579_v46, %v1515_v1  ;;  %v1645_v3 = vmax.bf16 %v1581_v51, %v1517_v21  ;;  %v1521_v4 = vadd.bf16 %v1193_v31, %v13051_v54 }
 0x11f   :  { %v1181_v5 = vpack.i.b16 %v873_v33, %v873_v33  ;;  %v1578_v12 = vmul.bf16 1045249613, %v1514_v58  ;;  %v1202_v13 = vpack.i.b16 %v885_v0, %v885_v0  ;;  %v1216_v14 = vpack.i.b16 %v893_v2, %v893_v2 }
 0x120   :  { %1999 = vmatmul.mubr.bf16.gmra.mxu0 %v1638_v53  ;;  %2160 = vmatmul.mubr.bf16.gmra.mxu1 %v1640_v62  ;;  %v1172_v20 = vrot.slane %v1167_v63, %v12986_v6  ;;  %v881_v15 = vrot.slane %v787_v37, %v12986_v6  ;;  %v889_v16 = vrot.slane %v787_v37, %v12991_v9  ;;  %v1580_v7 = vmul.bf16 1045249613, %v1516_v30 }
 0x121   :  { %2006 = vmatprep.mubr.bf16.mxu0 %v1643_v60  ;;  %2167 = vmatprep.mubr.bf16.mxu1 %v1645_v3  ;;  %v1583_v17 = vmul.bf16 1045249613, %v1519_v40  ;;  %v1186_v18 = vrot.slane %v1181_v5, %v12986_v6  ;;  %v1207_v1 = vrot.slane %v1202_v13, %v12986_v6  ;;  %v1585_v56 = vmul.bf16 1045249613, %v1521_v4 }
 0x122   :  { %v1221_v21 = vrot.slane %v1216_v14, %v12986_v6  ;;  %v901_v22 = vrot.slane %v10836_v19, %v12994_v10  ;;  %v789_v25 = vpack.i.b16 %v773_v8, %v773_v8  ;;  %v732_v29 = vcombine.low %v13137_v59, %v13143_v39 }
 0x123   :  { %v1642_v36 = vmax.bf16 %v1578_v12, %v1514_v58  ;;  %v1518_v55 = vadd.bf16 %v1172_v20, %v13035_v45  ;;  %v1195_v46 = vpack.i.b16 %v881_v15, %v881_v15  ;;  %v1209_v37 = vpack.i.b16 %v889_v16, %v889_v16 }
 0x124   :  { %v909_v51 = vrot.slane %v10836_v19, %v12997_v11  ;;  %v1644_v52 = vmax.bf16 %v1580_v7, %v1516_v30  ;;  %v1647_v57 = vmax.bf16 %v1583_v17, %v1519_v40  ;;  %v1520_v32 = vadd.bf16 %v1186_v18, %v13039_v38 }
 0x125   :  { %v1523_v53 = vadd.bf16 %v1207_v1, %v13047_v41  ;;  %v1649_v62 = vmax.bf16 %v1585_v56, %v1521_v4  ;;  %v1525_v31 = vadd.bf16 %v1221_v21, %v13051_v54  ;;  %v1230_v33 = vpack.i.b16 %v901_v22, %v901_v22 }
 0x126   :  { %v1244_v63 = vpack.i.b16 %v909_v51, %v909_v51  ;;  %v13175_v0 = vrot.slane %v732_v29, %v12983_v61  ;;  %v1582_v58 = vmul.bf16 1045249613, %v1518_v55  ;;  %v1200_v30 = vrot.slane %v1195_v46, %v12986_v6 }
 0x127   :  { %v1214_v40 = vrot.slane %v1209_v37, %v12986_v6  ;;  %v897_v2 = vrot.slane %v10836_v19, %v12986_v6  ;;  %v1584_v60 = vmul.bf16 1045249613, %v1520_v32  ;;  %v1587_v3 = vmul.bf16 1045249613, %v1523_v53 }
 0x128   :  { %2007 = vmatmul.mubr.bf16.gmra.mxu0 %v1642_v36  ;;  %2168 = vmatmul.mubr.bf16.gmra.mxu1 %v1644_v52  ;;  %v905_v4 = vrot.slane %v10836_v19, %v12991_v9  ;;  %v917_v5 = vrot.slane %v789_v25, %v12994_v10  ;;  %v1589_v8 = vmul.bf16 1045249613, %v1525_v31  ;;  %v1235_v12 = vrot.slane %v1230_v33, %v12986_v6 }
 0x129   :  { %2014 = vmatprep.mubr.bf16.mxu0 %v1647_v57  ;;  %2175 = vmatprep.mubr.bf16.mxu1 %v1649_v62  ;;  %v1249_v13 = vrot.slane %v1244_v63, %v12986_v6  ;;  %v925_v14 = vrot.slane %v789_v25, %v12997_v11  ;;  %v10837_v20 = vpack.i.b16 %v13175_v0, %v13175_v0  ;;  %v775_v46 = vunpack.i.h.s16 %v13175_v0 }
 0x12a   :  { %v1646_v15 = vmax.bf16 %v1582_v58, %v1518_v55  ;;  %v1522_v16 = vadd.bf16 %v1200_v30, %v13035_v45  ;;  %v1524_v7 = vadd.bf16 %v1214_v40, %v13039_v38  ;;  %v1223_v17 = vpack.i.b16 %v897_v2, %v897_v2 }
 0x12b   :  { %v1648_v18 = vmax.bf16 %v1584_v60, %v1520_v32  ;;  %v1651_v19 = vmax.bf16 %v1587_v3, %v1523_v53  ;;  %v1237_v1 = vpack.i.b16 %v905_v4, %v905_v4  ;;  %v1258_v56 = vpack.i.b16 %v917_v5, %v917_v5 }
 0x12c   :  { %v1653_v21 = vmax.bf16 %v1589_v8, %v1525_v31  ;;  %v1527_v22 = vadd.bf16 %v1235_v12, %v13047_v41  ;;  %v1529_v29 = vadd.bf16 %v1249_v13, %v13051_v54  ;;  %v1272_v36 = vpack.i.b16 %v925_v14, %v925_v14 }
 0x12d   :  { %v1586_v55 = vmul.bf16 1045249613, %v1522_v16  ;;  %v1228_v37 = vrot.slane %v1223_v17, %v12986_v6  ;;  %v913_v51 = vrot.slane %v789_v25, %v12986_v6  ;;  %v921_v52 = vrot.slane %v789_v25, %v12991_v9 }
 0x12e   :  { %v1588_v57 = vmul.bf16 1045249613, %v1524_v7  ;;  %v1242_v32 = vrot.slane %v1237_v1, %v12986_v6  ;;  %v1263_v53 = vrot.slane %v1258_v56, %v12986_v6  ;;  %v933_v62 = vrot.slane %v10837_v20, %v12994_v10 }
 0x12f   :  { %v1591_v31 = vmul.bf16 1045249613, %v1527_v22  ;;  %v1593_v33 = vmul.bf16 1045249613, %v1529_v29  ;;  %v1277_v63 = vrot.slane %v1272_v36, %v12986_v6  ;;  %v941_v58 = vrot.slane %v10837_v20, %v12997_v11 }
 0x130   :  { %2015 = vmatmul.mubr.bf16.gmra.mxu0 %v1646_v15  ;;  %2176 = vmatmul.mubr.bf16.gmra.mxu1 %v1648_v18  ;;  %v733_v30 = vcombine.high %v13137_v59, %v13143_v39  ;;  %v791_v40 = vpack.i.b16 %v775_v46, %v775_v46  ;;  %v1650_v2 = vmax.bf16 %v1586_v55, %v1522_v16 }
 0x131   :  { %2022 = vmatprep.mubr.bf16.mxu0 %v1651_v19  ;;  %2183 = vmatprep.mubr.bf16.mxu1 %v1653_v21  ;;  %v1526_v25 = vadd.bf16 %v1228_v37, %v13035_v45  ;;  %v1251_v60 = vpack.i.b16 %v913_v51, %v913_v51  ;;  %v1265_v3 = vpack.i.b16 %v921_v52, %v921_v52 }
 0x132   :  { %v1652_v4 = vmax.bf16 %v1588_v57, %v1524_v7  ;;  %v1528_v5 = vadd.bf16 %v1242_v32, %v13039_v38  ;;  %v1531_v8 = vadd.bf16 %v1263_v53, %v13047_v41  ;;  %v1286_v12 = vpack.i.b16 %v933_v62, %v933_v62 }
 0x133   :  { %v1655_v13 = vmax.bf16 %v1591_v31, %v1527_v22  ;;  %v1657_v14 = vmax.bf16 %v1593_v33, %v1529_v29  ;;  %v1533_v15 = vadd.bf16 %v1277_v63, %v13051_v54  ;;  %v1300_v17 = vpack.i.b16 %v941_v58, %v941_v58 }
 0x134   :  { %v13207_v18 = vrot.slane %v733_v30, %v12983_v61  ;;  %v1590_v59 = vmul.bf16 1045249613, %v1526_v25  ;;  %v1256_v39 = vrot.slane %v1251_v60, %v12986_v6  ;;  %v1270_v16 = vrot.slane %v1265_v3, %v12986_v6 }
 0x135   :  { %v929_v7 = vrot.slane %v10837_v20, %v12986_v6  ;;  %v1592_v19 = vmul.bf16 1045249613, %v1528_v5  ;;  %v1595_v1 = vmul.bf16 1045249613, %v1531_v8  ;;  %v1291_v56 = vrot.slane %v1286_v12, %v12986_v6 }
 0x136   :  { %v937_v21 = vrot.slane %v10837_v20, %v12991_v9  ;;  %v1597_v22 = vmul.bf16 1045249613, %v1533_v15  ;;  %v1305_v29 = vrot.slane %v1300_v17, %v12986_v6  ;;  %v949_v36 = vrot.slane %v791_v40, %v12994_v10 }
 0x137   :  { %v957_v46 = vrot.slane %v791_v40, %v12997_v11  ;;  %v10838_v55 = vpack.i.b16 %v13207_v18, %v13207_v18  ;;  %v1654_v37 = vmax.bf16 %v1590_v59, %v1526_v25  ;;  %v1530_v51 = vadd.bf16 %v1256_v39, %v13035_v45 }
 0x138   :  { %2023 = vmatmul.mubr.bf16.gmra.mxu0 %v1650_v2  ;;  %2184 = vmatmul.mubr.bf16.gmra.mxu1 %v1652_v4  ;;  %v1532_v52 = vadd.bf16 %v1270_v16, %v13039_v38  ;;  %v1279_v57 = vpack.i.b16 %v929_v7, %v929_v7  ;;  %v1656_v32 = vmax.bf16 %v1592_v19, %v1528_v5  ;;  %v777_v30 = vunpack.i.h.s16 %v13207_v18 }
 0x139   :  { %2030 = vmatprep.mubr.bf16.mxu0 %v1655_v13  ;;  %2191 = vmatprep.mubr.bf16.mxu1 %v1657_v14  ;;  %v1659_v53 = vmax.bf16 %v1595_v1, %v1531_v8  ;;  %v1535_v20 = vadd.bf16 %v1291_v56, %v13047_v41  ;;  %v1293_v62 = vpack.i.b16 %v937_v21, %v937_v21  ;;  %v1594_v2 = vmul.bf16 1045249613, %v1530_v51 }
 0x13a   :  { %v1661_v31 = vmax.bf16 %v1597_v22, %v1533_v15  ;;  %v1537_v33 = vadd.bf16 %v1305_v29, %v13051_v54  ;;  %v1314_v63 = vpack.i.b16 %v949_v36, %v949_v36  ;;  %v1328_v58 = vpack.i.b16 %v957_v46, %v957_v46 }
 0x13b   :  { %v1284_v25 = vrot.slane %v1279_v57, %v12986_v6  ;;  %v945_v60 = vrot.slane %v791_v40, %v12986_v6  ;;  %v953_v3 = vrot.slane %v791_v40, %v12991_v9  ;;  %v1596_v4 = vmul.bf16 1045249613, %v1532_v52 }
 0x13c   :  { %v1599_v5 = vmul.bf16 1045249613, %v1535_v20  ;;  %v1298_v8 = vrot.slane %v1293_v62, %v12986_v6  ;;  %v965_v12 = vrot.slane %v10838_v55, %v12994_v10  ;;  %v1601_v13 = vmul.bf16 1045249613, %v1537_v33 }
 0x13d   :  { %v1319_v14 = vrot.slane %v1314_v63, %v12986_v6  ;;  %v1333_v15 = vrot.slane %v1328_v58, %v12986_v6  ;;  %v973_v17 = vrot.slane %v10838_v55, %v12997_v11  ;;  %v793_v59 = vpack.i.b16 %v777_v30, %v777_v30 }
 0x13e   :  { %v1658_v39 = vmax.bf16 %v1594_v2, %v1530_v51  ;;  %v1534_v16 = vadd.bf16 %v1284_v25, %v13035_v45  ;;  %v1307_v7 = vpack.i.b16 %v945_v60, %v945_v60  ;;  %v1321_v19 = vpack.i.b16 %v953_v3, %v953_v3 }
 0x13f   :  { %v1660_v40 = vmax.bf16 %v1596_v4, %v1532_v52  ;;  %v1663_v1 = vmax.bf16 %v1599_v5, %v1535_v20  ;;  %v1536_v56 = vadd.bf16 %v1298_v8, %v13039_v38  ;;  %v1342_v21 = vpack.i.b16 %v965_v12, %v965_v12 }
 0x140   :  { %2031 = vmatmul.mubr.bf16.gmra.mxu0 %v1654_v37  ;;  %2192 = vmatmul.mubr.bf16.gmra.mxu1 %v1656_v32  ;;  %v1665_v22 = vmax.bf16 %v1601_v13, %v1537_v33  ;;  %v1539_v29 = vadd.bf16 %v1319_v14, %v13047_v41  ;;  %v1541_v36 = vadd.bf16 %v1333_v15, %v13051_v54  ;;  %v1598_v51 = vmul.bf16 1045249613, %v1534_v16 }
 0x141   :  { %2038 = vmatprep.mubr.bf16.mxu0 %v1659_v53  ;;  %2199 = vmatprep.mubr.bf16.mxu1 %v1661_v31  ;;  %v1356_v46 = vpack.i.b16 %v973_v17, %v973_v17  ;;  %v763_v37 = vcombine.high %v13175_v0, %v13175_v0  ;;  %v1312_v52 = vrot.slane %v1307_v7, %v12986_v6  ;;  %v1600_v53 = vmul.bf16 1045249613, %v1536_v56 }
 0x142   :  { %v1326_v57 = vrot.slane %v1321_v19, %v12986_v6  ;;  %v961_v32 = vrot.slane %v10838_v55, %v12986_v6  ;;  %v1347_v20 = vrot.slane %v1342_v21, %v12986_v6  ;;  %v969_v62 = vrot.slane %v10838_v55, %v12991_v9 }
 0x143   :  { %v981_v31 = vrot.slane %v793_v59, %v12994_v10  ;;  %v1603_v33 = vmul.bf16 1045249613, %v1539_v29  ;;  %v1605_v0 = vmul.bf16 1045249613, %v1541_v36  ;;  %v1361_v63 = vrot.slane %v1356_v46, %v12986_v6 }
 0x144   :  { %v989_v58 = vrot.slane %v793_v59, %v12997_v11  ;;  %v10839_v30 = vpack.i.b16 %v763_v37, %v763_v37  ;;  %v1662_v2 = vmax.bf16 %v1598_v51, %v1534_v16  ;;  %v1538_v25 = vadd.bf16 %v1312_v52, %v13035_v45 }
 0x145   :  { %v1540_v60 = vadd.bf16 %v1326_v57, %v13039_v38  ;;  %v1335_v3 = vpack.i.b16 %v961_v32, %v961_v32  ;;  %v1664_v4 = vmax.bf16 %v1600_v53, %v1536_v56  ;;  %v1543_v5 = vadd.bf16 %v1347_v20, %v13047_v41 }
 0x146   :  { %v1349_v8 = vpack.i.b16 %v969_v62, %v969_v62  ;;  %v1370_v55 = vpack.i.b16 %v981_v31, %v981_v31  ;;  %v1667_v12 = vmax.bf16 %v1603_v33, %v1539_v29  ;;  %v1669_v13 = vmax.bf16 %v1605_v0, %v1541_v36 }
 0x147   :  { %v1545_v14 = vadd.bf16 %v1361_v63, %v13051_v54  ;;  %v1384_v15 = vpack.i.b16 %v989_v58, %v989_v58  ;;  %v779_v17 = vunpack.i.h.s16 %v763_v37  ;;  %v1604_v16 = vmul.bf16 1045249613, %v1540_v60 }
 0x148   :  { %2039 = vmatmul.mubr.bf16.gmra.mxu0 %v1658_v39  ;;  %2200 = vmatmul.mubr.bf16.gmra.mxu1 %v1660_v40  ;;  %v1602_v39 = vmul.bf16 1045249613, %v1538_v25  ;;  %v1340_v7 = vrot.slane %v1335_v3, %v12986_v6  ;;  %v977_v19 = vrot.slane %v793_v59, %v12986_v6  ;;  %v1607_v40 = vmul.bf16 1045249613, %v1543_v5 }
 0x149   :  { %2046 = vmatprep.mubr.bf16.mxu0 %v1663_v1  ;;  %2207 = vmatprep.mubr.bf16.mxu1 %v1665_v22  ;;  %v1354_v1 = vrot.slane %v1349_v8, %v12986_v6  ;;  %v1375_v56 = vrot.slane %v1370_v55, %v12986_v6  ;;  %v985_v21 = vrot.slane %v793_v59, %v12991_v9  ;;  %v1609_v22 = vmul.bf16 1045249613, %v1545_v14 }
 0x14a   :  { %v1389_v29 = vrot.slane %v1384_v15, %v12986_v6  ;;  %v997_v36 = vrot.slane %v10839_v30, %v12994_v10  ;;  %v1005_v46 = vrot.slane %v10839_v30, %v12997_v11  ;;  %v795_v37 = vpack.i.b16 %v779_v17, %v779_v17 }
 0x14b   :  { %v1666_v51 = vmax.bf16 %v1602_v39, %v1538_v25  ;;  %v1668_v52 = vmax.bf16 %v1604_v16, %v1540_v60  ;;  %v1542_v57 = vadd.bf16 %v1340_v7, %v13035_v45  ;;  %v1363_v32 = vpack.i.b16 %v977_v19, %v977_v19 }
 0x14c   :  { %v1671_v53 = vmax.bf16 %v1607_v40, %v1543_v5  ;;  %v1544_v20 = vadd.bf16 %v1354_v1, %v13039_v38  ;;  %v1547_v62 = vadd.bf16 %v1375_v56, %v13047_v41  ;;  %v1377_v31 = vpack.i.b16 %v985_v21, %v985_v21 }
 0x14d   :  { %v1673_v59 = vmax.bf16 %v1609_v22, %v1545_v14  ;;  %v1549_v33 = vadd.bf16 %v1389_v29, %v13051_v54  ;;  %v1398_v0 = vpack.i.b16 %v997_v36, %v997_v36  ;;  %v1412_v63 = vpack.i.b16 %v1005_v46, %v1005_v46 }
 0x14e   :  { %v993_v58 = vrot.slane %v10839_v30, %v12986_v6  ;;  %v1606_v25 = vmul.bf16 1045249613, %v1542_v57  ;;  %v1368_v60 = vrot.slane %v1363_v32, %v12986_v6  ;;  %v1001_v3 = vrot.slane %v10839_v30, %v12991_v9 }
 0x14f   :  { %v1382_v5 = vrot.slane %v1377_v31, %v12986_v6  ;;  %v1013_v8 = vrot.slane %v795_v37, %v12994_v10  ;;  %v1021_v55 = vrot.slane %v795_v37, %v12997_v11  ;;  %v1403_v14 = vrot.slane %v1398_v0, %v12986_v6 }
 0x150   :  { %2047 = vmatmul.mubr.bf16.gmra.mxu0 %v1662_v2  ;;  %2208 = vmatmul.mubr.bf16.gmra.mxu1 %v1664_v4  ;;  %v765_v2 = vcombine.high %v13207_v18, %v13207_v18  ;;  %v1608_v4 = vmul.bf16 1045249613, %v1544_v20  ;;  %v1417_v18 = vrot.slane %v1412_v63, %v12986_v6  ;;  %v1391_v15 = vpack.i.b16 %v993_v58, %v993_v58 }
 0x151   :  { %2054 = vmatprep.mubr.bf16.mxu0 %v1667_v12  ;;  %2215 = vmatprep.mubr.bf16.mxu1 %v1669_v13  ;;  %v1611_v12 = vmul.bf16 1045249613, %v1547_v62  ;;  %v1613_v13 = vmul.bf16 1045249613, %v1549_v33  ;;  %v1670_v39 = vmax.bf16 %v1606_v25, %v1542_v57  ;;  %v1546_v16 = vadd.bf16 %v1368_v60, %v13035_v45 }
 0x152   :  { %v10840_v17 = vpack.i.b16 %v765_v2, %v765_v2  ;;  %v1405_v7 = vpack.i.b16 %v1001_v3, %v1001_v3  ;;  %v1672_v30 = vmax.bf16 %v1608_v4, %v1544_v20  ;;  %v1548_v19 = vadd.bf16 %v1382_v5, %v13039_v38 }
 0x153   :  { %v1426_v40 = vpack.i.b16 %v1013_v8, %v1013_v8  ;;  %v1440_v1 = vpack.i.b16 %v1021_v55, %v1021_v55  ;;  %v1675_v56 = vmax.bf16 %v1611_v12, %v1547_v62  ;;  %v1677_v21 = vmax.bf16 %v1613_v13, %v1549_v33 }
 0x154   :  { %v1551_v22 = vadd.bf16 %v1403_v14, %v13047_v41  ;;  %v1553_v29 = vadd.bf16 %v1417_v18, %v13051_v54  ;;  %v781_v36 = vunpack.i.h.s16 %v765_v2  ;;  %v1396_v46 = vrot.slane %v1391_v15, %v12986_v6 }
 0x155   :  { %v1017_v57 = vrot.slane %v795_v37, %v12991_v9  ;;  %v1610_v32 = vmul.bf16 1045249613, %v1546_v16  ;;  %v1431_v20 = vrot.slane %v1426_v40, %v12986_v6  ;;  %v1445_v62 = vrot.slane %v1440_v1, %v12986_v6 }
 0x156   :  { %v1615_v31 = vmul.bf16 1045249613, %v1551_v22  ;;  %v1029_v33 = vrot.slane %v10840_v17, %v12994_v10  ;;  %v1037_v0 = vrot.slane %v10840_v17, %v12997_v11  ;;  %v797_v63 = vpack.i.b16 %v781_v36, %v781_v36 }
 0x157   :  { %v1550_v58 = vadd.bf16 %v1396_v46, %v13035_v45  ;;  %v1433_v60 = vpack.i.b16 %v1017_v57, %v1017_v57  ;;  %v1555_v4 = vadd.bf16 %v1431_v20, %v13047_v41  ;;  %v1557_v5 = vadd.bf16 %v1445_v62, %v13051_v54 }
 0x158   :  { %2055 = vmatmul.mubr.bf16.gmra.mxu0 %v1666_v51  ;;  %2216 = vmatmul.mubr.bf16.gmra.mxu1 %v1668_v52  ;;  %v1410_v51 = vrot.slane %v1405_v7, %v12986_v6  ;;  %v1009_v52 = vrot.slane %v795_v37, %v12986_v6  ;;  %v1674_v37 = vmax.bf16 %v1610_v32, %v1546_v16 }
 0x159   :  { %2062 = vmatprep.mubr.bf16.mxu0 %v1671_v53  ;;  %2223 = vmatprep.mubr.bf16.mxu1 %v1673_v59  ;;  %v1612_v53 = vmul.bf16 1045249613, %v1548_v19  ;;  %v1617_v59 = vmul.bf16 1045249613, %v1553_v29  ;;  %v1679_v8 = vmax.bf16 %v1615_v31, %v1551_v22  ;;  %v1454_v12 = vpack.i.b16 %v1029_v33, %v1029_v33 }
 0x15a   :  { %v1552_v2 = vadd.bf16 %v1410_v51, %v13039_v38  ;;  %v1419_v25 = vpack.i.b16 %v1009_v52, %v1009_v52  ;;  %v1468_v13 = vpack.i.b16 %v1037_v0, %v1037_v0  ;;  %v1614_v14 = vmul.bf16 1045249613, %v1550_v58 }
 0x15b   :  { %v1676_v3 = vmax.bf16 %v1612_v53, %v1548_v19  ;;  %v1681_v55 = vmax.bf16 %v1617_v59, %v1553_v29  ;;  %v1619_v16 = vmul.bf16 1045249613, %v1555_v4  ;;  %v1621_v7 = vmul.bf16 1045249613, %v1557_v5 }
 0x15c   :  { %v1616_v18 = vmul.bf16 1045249613, %v1552_v2  ;;  %v1424_v15 = vrot.slane %v1419_v25, %v12986_v6  ;;  %v1033_v19 = vrot.slane %v10840_v17, %v12991_v9  ;;  %v1459_v40 = vrot.slane %v1454_v12, %v12986_v6 }
 0x15d   :  { %v1473_v1 = vrot.slane %v1468_v13, %v12986_v6  ;;  %v1678_v22 = vmax.bf16 %v1614_v14, %v1550_v58  ;;  %v1683_v51 = vmax.bf16 %v1619_v16, %v1555_v4  ;;  %v1685_v52 = vmax.bf16 %v1621_v7, %v1557_v5 }
 0x15e   :  { %v1680_v29 = vmax.bf16 %v1616_v18, %v1552_v2  ;;  %v1554_v36 = vadd.bf16 %v1424_v15, %v13035_v45  ;;  %v1461_v32 = vpack.i.b16 %v1033_v19, %v1033_v19  ;;  %v1041_v58 = vrot.slane %v797_v63, %v12986_v6 }
 0x15f   :  { %v1561_v53 = vadd.bf16 %v1473_v1, %v13051_v54  ;;  %v1049_v2 = vrot.slane %v797_v63, %v12991_v9 }
 0x160   :  { %2063 = vmatmul.mubr.bf16.gmra.mxu0 %v1670_v39  ;;  %2224 = vmatmul.mubr.bf16.gmra.mxu1 %v1672_v30  ;;  %v1438_v39 = vrot.slane %v1433_v60, %v12986_v6  ;;  %v1025_v30 = vrot.slane %v10840_v17, %v12986_v6  ;;  %v1559_v17 = vadd.bf16 %v1459_v40, %v13047_v41  ;;  %v1618_v31 = vmul.bf16 1045249613, %v1554_v36 }
 0x161   :  { %2070 = vmatprep.mubr.bf16.mxu0 %v1675_v56  ;;  %2231 = vmatprep.mubr.bf16.mxu1 %v1677_v21  ;;  %v1045_v56 = vrot.slane %v797_v63, %v12994_v10  ;;  %v1053_v21 = vrot.slane %v797_v63, %v12997_v11  ;;  %v1466_v0 = vrot.slane %v1461_v32, %v12986_v6  ;;  %v1625_v60 = vmul.bf16 1045249613, %v1561_v53 }
 0x162   :  { %v1556_v46 = vadd.bf16 %v1438_v39, %v13039_v38  ;;  %v1447_v57 = vpack.i.b16 %v1025_v30, %v1025_v30  ;;  %v1623_v25 = vmul.bf16 1045249613, %v1559_v17  ;;  %v1682_v4 = vmax.bf16 %v1618_v31, %v1554_v36 }
 0x163   :  { %v1482_v20 = vpack.i.b16 %v1045_v56, %v1045_v56  ;;  %v1496_v62 = vpack.i.b16 %v1053_v21, %v1053_v21  ;;  %v1475_v12 = vpack.i.b16 %v1041_v58, %v1041_v58  ;;  %v1489_v13 = vpack.i.b16 %v1049_v2, %v1049_v2  ;;  %v96_v58 = vld [vmem:[%s17574_s30 + $0x8] sm:$0xff] }
 0x164   :  { %v1620_v59 = vmul.bf16 1045249613, %v1556_v46  ;;  %v1452_v33 = vrot.slane %v1447_v57, %v12986_v6  ;;  %v1687_v14 = vmax.bf16 %v1623_v25, %v1559_v17  ;;  %v1689_v18 = vmax.bf16 %v1625_v60, %v1561_v53  ;;  %v161_v57 = vld [vmem:[%s17519_s16 + $0x10] sm:$0xff]  ;;  %v95_v53 = vld [vmem:[%s17574_s30] sm:$0xff] }
 0x165   :  { %v1480_v7 = vrot.slane %v1475_v12, %v12986_v6  ;;  %v1494_v30 = vrot.slane %v1489_v13, %v12986_v6  ;;  %v97_v12 = vld [vmem:[%s17574_s30 + $0x10] sm:$0xff] }
 0x166   :  { %v1684_v5 = vmax.bf16 %v1620_v59, %v1556_v46 }
 0x167   :  { %v1562_v21 = vadd.bf16 %v1480_v7, %v13035_v45 }
 0x168   :  { %2071 = vmatmul.mubr.bf16.gmra.mxu0 %v1674_v37  ;;  %2232 = vmatmul.mubr.bf16.gmra.mxu1 %v1676_v3  ;;  %v1487_v37 = vrot.slane %v1482_v20, %v12986_v6  ;;  %v1501_v3 = vrot.slane %v1496_v62, %v12986_v6 }
 0x169   :  { %2078 = vmatprep.mubr.bf16.mxu0 %v1679_v8  ;;  %2239 = vmatprep.mubr.bf16.mxu1 %v1681_v55  ;;  %v1558_v8 = vadd.bf16 %v1452_v33, %v13035_v45  ;;  %v1560_v55 = vadd.bf16 %v1466_v0, %v13039_v38  ;;  %v160_v45 = vld [vmem:[%s17519_s16 + $0x8] sm:$0xff] }
 0x16a   :  { %v1563_v15 = vadd.bf16 %v1487_v37, %v13047_v41  ;;  %v1565_v63 = vadd.bf16 %v1501_v3, %v13051_v54  ;;  %v1564_v41 = vadd.bf16 %v1494_v30, %v13039_v38  ;;  %v159_v38 = vld [vmem:[%s17519_s16] sm:$0xff]  ;;  %2831 = vmatprep.subr.mxu0 %v160_v45 }
 0x16b   :  { %v1622_v39 = vmul.bf16 1045249613, %v1558_v8  ;;  %v1624_v16 = vmul.bf16 1045249613, %v1560_v55  ;;  %2832 = vmatpush1.msra.mxu0 %v159_v38  ;;  %v99_v38 = vld [vmem:[%s17574_s30 + $0x20] sm:$0xff] }
 0x16c   :  { %v1627_v19 = vmul.bf16 1045249613, %v1563_v15  ;;  %v1629_v40 = vmul.bf16 1045249613, %v1565_v63  ;;  %v1628_v36 = vmul.bf16 1045249613, %v1564_v41 }
 0x16d   :  { %v1686_v1 = vmax.bf16 %v1622_v39, %v1558_v8  ;;  %v1688_v56 = vmax.bf16 %v1624_v16, %v1560_v55 }
 0x16e   :  { %v1693_v54 = vmax.bf16 %v1629_v40, %v1565_v63  ;;  %v98_v40 = vld [vmem:[%s17574_s30 + $0x18] sm:$0xff] }
 0x170   :  { %2079 = vmatmul.mubr.bf16.gmra.mxu0 %v1678_v22  ;;  %2240 = vmatmul.mubr.bf16.gmra.mxu1 %v1680_v29  ;;  %v1691_v22 = vmax.bf16 %v1627_v19, %v1563_v15  ;;  %v1626_v29 = vmul.bf16 1045249613, %v1562_v21 }
 0x171   :  { %2086 = vmatprep.mubr.bf16.mxu0 %v1683_v51  ;;  %2247 = vmatprep.mubr.bf16.mxu1 %v1685_v52  ;;  %v1692_v51 = vmax.bf16 %v1628_v36, %v1564_v41  ;;  %v162_v52 = vld [vmem:[%s17519_s16 + $0x18] sm:$0xff] }
 0x172   :  { %v1690_v46 = vmax.bf16 %v1626_v29, %v1562_v21  ;;  %3088 = vmatprep.subr.mxu1 %v162_v52 }
 0x173   :  { %3089 = vmatpush1.msra.mxu1 %v161_v57 }
 0x178   :  { %2087 = vmatmul.mubr.bf16.gmra.mxu0 %v1682_v4  ;;  %2248 = vmatmul.mubr.bf16.gmra.mxu1 %v1684_v5 }
 0x179   :  { %2094 = vmatprep.mubr.bf16.mxu0 %v1687_v14  ;;  %2255 = vmatprep.mubr.bf16.mxu1 %v1689_v18 }
 0x180   :  { %2095 = vmatmul.mubr.bf16.gmra.mxu0 %v1686_v1  ;;  %2256 = vmatmul.mubr.bf16.gmra.mxu1 %v1688_v56 }
 0x181   :  { %2102 = vmatprep.mubr.bf16.mxu0 %v1691_v22  ;;  %2263 = vmatprep.mubr.bf16.mxu1 %v1693_v54 }
 0x188   :  { %2103 = vmatmul.mubr.bf16.gmra.mxu0 %v1690_v46  ;;  %2264 = vmatmul.mubr.bf16.gmra.mxu1 %v1692_v51 }
 0x189   :  { %2865 = vmatprep.mubr.f32.mxu0 %v17539_v34  ;;  %3122 = vmatprep.mubr.f32.mxu1 %v17539_v34 }
 0x1d0   :  { %v11147_v32 = vpop.f32.mrf.mxu0  ;;  %v11259_v17 = vpop.f32.mrf.mxu1 }
 0x1d2   :  { %v11148_v20 = vpop.f32.mrf.mxu0  ;;  %v11260_v62 = vpop.f32.mrf.mxu1 }
 0x1d3   :  { %v11149_v31 = vadd.f32 %v11148_v20, %v11147_v32  ;;  %v11261_v60 = vadd.f32 %v11260_v62, %v11259_v17 }
 0x1d4   :  { %v11150_v59 = vpop.f32.mrf.mxu0  ;;  %v11262_v33 = vpop.f32.mrf.mxu1 }
 0x1d5   :  { %v1985_v0 = vadd.f32 %v11149_v31, %v95_v53 }
 0x1d6   :  { %v11151_v2 = vpop.f32.mrf.mxu0  ;;  %v11263_v25 = vpop.f32.mrf.mxu1 }
 0x1d7   :  { %v11152_v37 = vadd.f32 %v11151_v2, %v11150_v59  ;;  %v13334_v5 = vadd.f32 %v11261_v60, %v1985_v0  ;;  %v11264_v55 = vadd.f32 %v11263_v25, %v11262_v33  ;;  %v100_v2 = vld [vmem:[%s17574_s30 + $0x28] sm:$0xff] }
 0x1d8   :  { %v11153_v3 = vpop.f32.mrf.mxu0  ;;  %v11265_v4 = vpop.f32.mrf.mxu1 }
 0x1d9   :  { %v1988_v8 = vadd.f32 %v11152_v37, %v96_v58  ;;  %v2273_v16 = vsel %vm2272_vm1, %v13334_v5, -inf }
 0x1da   :  { %v11154_v13 = vpop.f32.mrf.mxu0  ;;  %v11266_v14 = vpop.f32.mrf.mxu1 }
 0x1db   :  { %v2149_v18 = vadd.f32 %v11264_v55, %v1988_v8  ;;  %v11155_v15 = vadd.f32 %v11154_v13, %v11153_v3  ;;  %v11267_v21 = vadd.f32 %v11266_v14, %v11265_v4 }
 0x1dc   :  { %v11156_v63 = vpop.f32.mrf.mxu0  ;;  %v11268_v39 = vpop.f32.mrf.mxu1 }
 0x1dd   :  { %v2274_v7 = vsel %vm2272_vm1, %v2149_v18, -inf  ;;  %v1993_v30 = vadd.f32 %v11155_v15, %v97_v12 }
 0x1de   :  { %v2275_v19 = vmax.f32 %v2273_v16, %v2274_v7  ;;  %v11157_v1 = vpop.f32.mrf.mxu0  ;;  %v11269_v56 = vpop.f32.mrf.mxu1  ;;  %v101_v16 = vld [vmem:[%s17574_s30 + $0x30] sm:$0xff] }
 0x1df   :  { %v11158_v41 = vadd.f32 %v11157_v1, %v11156_v63  ;;  %v13345_v36 = vadd.f32 %v11267_v21, %v1993_v30  ;;  %v11270_v51 = vadd.f32 %v11269_v56, %v11268_v39 }
 0x1e0   :  { %v2276_v22 = vrot.slane %v2275_v19, 4  ;;  %v11159_v54 = vpop.f32.mrf.mxu0  ;;  %v11271_v29 = vpop.f32.mrf.mxu1 }
 0x1e1   :  { %v1996_v46 = vadd.f32 %v11158_v41, %v98_v40  ;;  %v2282_v31 = vsel %vm2272_vm1, %v13345_v36, -inf }
 0x1e2   :  { %v2277_v45 = vmax.f32 %v2275_v19, %v2276_v22  ;;  %v11160_v52 = vpop.f32.mrf.mxu0  ;;  %v11272_v57 = vpop.f32.mrf.mxu1 }
 0x1e3   :  { %v13350_v32 = vadd.f32 %v11270_v51, %v1996_v46  ;;  %v11161_v17 = vadd.f32 %v11160_v52, %v11159_v54  ;;  %v11273_v37 = vadd.f32 %v11272_v57, %v11271_v29  ;;  %v102_v57 = vld [vmem:[%s17574_s30 + $0x38] sm:$0xff] }
 0x1e4   :  { %v2278_v53 = vrot.slane %v2277_v45, 2  ;;  %v11162_v20 = vpop.f32.mrf.mxu0  ;;  %v11274_v62 = vpop.f32.mrf.mxu1 }
 0x1e5   :  { %v2283_v59 = vsel %vm2272_vm1, %v13350_v32, -inf  ;;  %v2001_v33 = vadd.f32 %v11161_v17, %v99_v38 }
 0x1e6   :  { %v2279_v0 = vmax.f32 %v2277_v45, %v2278_v53  ;;  %v2284_v58 = vmax.f32 %v2282_v31, %v2283_v59  ;;  %v11163_v25 = vpop.f32.mrf.mxu0  ;;  %v11275_v60 = vpop.f32.mrf.mxu1 }
 0x1e7   :  { %v11164_v3 = vadd.f32 %v11163_v25, %v11162_v20  ;;  %v13359_v13 = vadd.f32 %v11273_v37, %v2001_v33  ;;  %v11276_v15 = vadd.f32 %v11275_v60, %v11274_v62  ;;  %v103_v60 = vld [vmem:[%s17574_s30 + $0x40] sm:$0xff] }
 0x1e8   :  { %v2280_v4 = vrot.slane %v2279_v0, 1  ;;  %v2285_v8 = vrot.slane %v2284_v58, 4  ;;  %v11165_v55 = vpop.f32.mrf.mxu0  ;;  %v11277_v12 = vpop.f32.mrf.mxu1 }
 0x1e9   :  { %v2004_v14 = vadd.f32 %v11164_v3, %v100_v2  ;;  %v2291_v54 = vsel %vm2272_vm1, %v13359_v13, -inf }
 0x1ea   :  { %v2281_v63 = vmax.f32 %v2279_v0, %v2280_v4  ;;  %v2286_v39 = vmax.f32 %v2284_v58, %v2285_v8  ;;  %v11166_v7 = vpop.f32.mrf.mxu0  ;;  %v11278_v30 = vpop.f32.mrf.mxu1 }
 0x1eb   :  { %v13364_v19 = vadd.f32 %v11276_v15, %v2004_v14  ;;  %v11167_v40 = vadd.f32 %v11166_v7, %v11165_v55  ;;  %v11279_v17 = vadd.f32 %v11278_v30, %v11277_v12 }
 0x1ec   :  { %v2417_v1 = vsub.f32 %v13334_v5, %v2281_v63  ;;  %v2418_v56 = vsub.f32 %v2149_v18, %v2281_v63  ;;  %v2287_v21 = vrot.slane %v2286_v39, 2  ;;  %v11168_v41 = vpop.f32.mrf.mxu0  ;;  %v11280_v22 = vpop.f32.mrf.mxu1 }
 0x1ed   :  { %v2292_v29 = vsel %vm2272_vm1, %v13364_v19, -inf  ;;  %v2009_v46 = vadd.f32 %v11167_v40, %v101_v16 }
 0x1ee   :  { %v2449_v51 = vmul.f32 1.442695, %v2417_v1  ;;  %v2451_v45 = vmul.f32 1.442695, %v2418_v56  ;;  %v2288_v38 = vmax.f32 %v2286_v39, %v2287_v21  ;;  %v2293_v52 = vmax.f32 %v2291_v54, %v2292_v29  ;;  %v11169_v5 = vpop.f32.mrf.mxu0  ;;  %v11281_v18 = vpop.f32.mrf.mxu1 }
 0x1ef   :  { %v11170_v53 = vadd.f32 %v11169_v5, %v11168_v41  ;;  %v13374_v33 = vadd.f32 %v11279_v17, %v2009_v46  ;;  %v11282_v58 = vadd.f32 %v11281_v18, %v11280_v22  ;;  %v105_v18 = vld [vmem:[%s17574_s30 + $0x50] sm:$0xff] }
 0x1f0   :  { %12058 = vpow2.f32 %v2449_v51  ;;  %v2289_v20 = vrot.slane %v2288_v38, 1  ;;  %v2294_v62 = vrot.slane %v2293_v52, 4  ;;  %v11171_v31 = vpop.f32.mrf.mxu0  ;;  %v11283_v59 = vpop.f32.mrf.mxu1 }
 0x1f1   :  { %12060 = vpow2.f32 %v2451_v45  ;;  %v2012_v0 = vadd.f32 %v11170_v53, %v102_v57  ;;  %v2300_v39 = vsel %vm2272_vm1, %v13374_v33, -inf }
 0x1f2   :  { %v2290_v2 = vmax.f32 %v2288_v38, %v2289_v20  ;;  %v2295_v25 = vmax.f32 %v2293_v52, %v2294_v62  ;;  %v11172_v37 = vpop.f32.mrf.mxu0  ;;  %v11284_v3 = vpop.f32.mrf.mxu1 }
 0x1f3   :  { %v13379_v4 = vadd.f32 %v11282_v58, %v2012_v0  ;;  %v11173_v8 = vadd.f32 %v11172_v37, %v11171_v31  ;;  %v11285_v41 = vadd.f32 %v11284_v3, %v11283_v59 }
 0x1f4   :  { %v2419_v55 = vsub.f32 %v13345_v36, %v2290_v2  ;;  %v2420_v12 = vsub.f32 %v13350_v32, %v2290_v2  ;;  %v2296_v14 = vrot.slane %v2295_v25, 2  ;;  %v11174_v15 = vpop.f32.mrf.mxu0  ;;  %v11286_v63 = vpop.f32.mrf.mxu1  ;;  %v104_v36 = vld [vmem:[%s17574_s30 + $0x48] sm:$0xff] }
 0x1f5   :  { %v2301_v16 = vsel %vm2272_vm1, %v13379_v4, -inf  ;;  %v2017_v7 = vadd.f32 %v11173_v8, %v103_v60 }
 0x1f6   :  { %v2453_v30 = vmul.f32 1.442695, %v2419_v55  ;;  %v2455_v40 = vmul.f32 1.442695, %v2420_v12  ;;  %v2297_v1 = vmax.f32 %v2295_v25, %v2296_v14  ;;  %v2302_v56 = vmax.f32 %v2300_v39, %v2301_v16  ;;  %v11175_v21 = vpop.f32.mrf.mxu0  ;;  %v11287_v32 = vpop.f32.mrf.mxu1 }
 0x1f7   :  { %v11176_v22 = vadd.f32 %v11175_v21, %v11174_v15  ;;  %v13390_v45 = vadd.f32 %v11285_v41, %v2017_v7  ;;  %v11288_v52 = vadd.f32 %v11287_v32, %v11286_v63  ;;  %v106_v15 = vld [vmem:[%s17574_s30 + $0x58] sm:$0xff] }
 0x1f8   :  { %12062 = vpow2.f32 %v2453_v30  ;;  %v2298_v54 = vrot.slane %v2297_v1, 1  ;;  %v2303_v29 = vrot.slane %v2302_v56, 4  ;;  %v11177_v46 = vpop.f32.mrf.mxu0  ;;  %v11289_v51 = vpop.f32.mrf.mxu1 }
 0x1f9   :  { %12064 = vpow2.f32 %v2455_v40  ;;  %v2020_v38 = vadd.f32 %v11176_v22, %v104_v36  ;;  %v2309_v60 = vsel %vm2272_vm1, %v13390_v45, -inf }
 0x1fa   :  { %v2299_v57 = vmax.f32 %v2297_v1, %v2298_v54  ;;  %v2304_v5 = vmax.f32 %v2302_v56, %v2303_v29  ;;  %v11178_v17 = vpop.f32.mrf.mxu0  ;;  %v11290_v53 = vpop.f32.mrf.mxu1 }
 0x1fb   :  { %v13395_v20 = vadd.f32 %v11288_v52, %v2020_v38  ;;  %v11179_v62 = vadd.f32 %v11178_v17, %v11177_v46  ;;  %v11291_v8 = vadd.f32 %v11290_v53, %v11289_v51  ;;  %v107_v46 = vld [vmem:[%s17574_s30 + $0x60] sm:$0xff] }
 0x1fc   :  { %v2421_v31 = vsub.f32 %v13359_v13, %v2299_v57  ;;  %v2422_v59 = vsub.f32 %v13364_v19, %v2299_v57  ;;  %v2305_v0 = vrot.slane %v2304_v5, 2  ;;  %v11180_v58 = vpop.f32.mrf.mxu0  ;;  %v11292_v2 = vpop.f32.mrf.mxu1 }
 0x1fd   :  { %v13399_v25 = vpop.eup %12058  ;;  %v2310_v37 = vsel %vm2272_vm1, %v13395_v20, -inf  ;;  %v2025_v3 = vadd.f32 %v11179_v62, %v105_v18 }
 0x1fe   :  { %v13405_v55 = vpop.eup %12060  ;;  %v2513_v13 = vsel %vm2272_vm1, %v13399_v25, 0.0  ;;  %v2457_v12 = vmul.f32 1.442695, %v2421_v31  ;;  %v2459_v19 = vmul.f32 1.442695, %v2422_v59  ;;  %v2306_v14 = vmax.f32 %v2304_v5, %v2305_v0  ;;  %v11181_v63 = vpop.f32.mrf.mxu0 }
 0x1ff   :  { %v11293_v39 = vpop.f32.mrf.mxu1  ;;  %v2514_v16 = vsel %vm2272_vm1, %v13405_v55, 0.0  ;;  %v2311_v7 = vmax.f32 %v2309_v60, %v2310_v37  ;;  %v11182_v30 = vadd.f32 %v11181_v63, %v11180_v58  ;;  %v13414_v56 = vadd.f32 %v11291_v8, %v2025_v3 }
 0x200   :  { %v2515_v40 = vadd.f32 %v2514_v16, %v2513_v13  ;;  %12066 = vpow2.f32 %v2457_v12  ;;  %v2307_v1 = vrot.slane %v2306_v14, 1  ;;  %v11183_v36 = vpop.f32.mrf.mxu0  ;;  %v11294_v22 = vadd.f32 %v11293_v39, %v11292_v2  ;;  %v108_v16 = vld [vmem:[%s17574_s30 + $0x68] sm:$0xff] }
 0x201   :  { %v11295_v21 = vpop.f32.mrf.mxu1  ;;  %12068 = vpow2.f32 %v2459_v19  ;;  %v2312_v32 = vrot.slane %v2311_v7, 4  ;;  %v2028_v41 = vadd.f32 %v11182_v30, %v106_v15  ;;  %v2318_v62 = vsel %vm2272_vm1, %v13414_v56, -inf }
 0x202   :  { %v2516_v54 = vrot.slane %v2515_v40, 4  ;;  %v2308_v29 = vmax.f32 %v2306_v14, %v2307_v1  ;;  %v11184_v51 = vpop.f32.mrf.mxu0 }
 0x203   :  { %v11296_v38 = vpop.f32.mrf.mxu1  ;;  %v2313_v52 = vmax.f32 %v2311_v7, %v2312_v32  ;;  %v13419_v57 = vadd.f32 %v11294_v22, %v2028_v41  ;;  %v11185_v5 = vadd.f32 %v11184_v51, %v11183_v36 }
 0x204   :  { %v2517_v18 = vadd.f32 %v2516_v54, %v2515_v40  ;;  %v2423_v17 = vsub.f32 %v13374_v33, %v2308_v29  ;;  %v2424_v53 = vsub.f32 %v13379_v4, %v2308_v29  ;;  %v11186_v31 = vpop.f32.mrf.mxu0  ;;  %v11297_v37 = vadd.f32 %v11296_v38, %v11295_v21 }
 0x205   :  { %v11298_v59 = vpop.f32.mrf.mxu1  ;;  %v13425_v0 = vpop.eup %12062  ;;  %v2314_v58 = vrot.slane %v2313_v52, 2  ;;  %v2319_v2 = vsel %vm2272_vm1, %v13419_v57, -inf  ;;  %v2033_v60 = vadd.f32 %v11185_v5, %v107_v46  ;;  %v109_v46 = vld [vmem:[%s17574_s30 + $0x70] sm:$0xff] }
 0x206   :  { %v13429_v3 = vpop.eup %12064  ;;  %v2518_v8 = vrot.slane %v2517_v18, 2  ;;  %v2522_v33 = vsel %vm2272_vm1, %v13425_v0, 0.0  ;;  %v2461_v4 = vmul.f32 1.442695, %v2423_v17  ;;  %v2463_v13 = vmul.f32 1.442695, %v2424_v53  ;;  %v11187_v12 = vpop.f32.mrf.mxu0 }
 0x207   :  { %v11299_v19 = vpop.f32.mrf.mxu1  ;;  %v2523_v14 = vsel %vm2272_vm1, %v13429_v3, 0.0  ;;  %v2315_v15 = vmax.f32 %v2313_v52, %v2314_v58  ;;  %v2320_v63 = vmax.f32 %v2318_v62, %v2319_v2  ;;  %v13435_v39 = vadd.f32 %v11297_v37, %v2033_v60 }
 0x208   :  { %v2519_v7 = vadd.f32 %v2518_v8, %v2517_v18  ;;  %v2524_v30 = vadd.f32 %v2523_v14, %v2522_v33  ;;  %12070 = vpow2.f32 %v2461_v4  ;;  %v11188_v40 = vadd.f32 %v11187_v12, %v11186_v31  ;;  %v11189_v1 = vpop.f32.mrf.mxu0 }
 0x209   :  { %v11301_v36 = vpop.f32.mrf.mxu1  ;;  %12072 = vpow2.f32 %v2463_v13  ;;  %v2316_v21 = vrot.slane %v2315_v15, 1  ;;  %v2321_v32 = vrot.slane %v2320_v63, 4  ;;  %v11300_v29 = vadd.f32 %v11299_v19, %v11298_v59 }
 0x20a   :  { %v2520_v41 = vrot.slane %v2519_v7, 1  ;;  %v2525_v22 = vrot.slane %v2524_v30, 4  ;;  %v2036_v54 = vadd.f32 %v11188_v40, %v108_v16  ;;  %v11190_v51 = vpop.f32.mrf.mxu0  ;;  %v2327_v18 = vsel %vm2272_vm1, %v13435_v39, -inf }
 0x20b   :  { %v11302_v38 = vpop.f32.mrf.mxu1  ;;  %v2317_v52 = vmax.f32 %v2315_v15, %v2316_v21  ;;  %v2322_v5 = vmax.f32 %v2320_v63, %v2321_v32  ;;  %v11191_v17 = vadd.f32 %v11190_v51, %v11189_v1  ;;  %v111_v51 = vld [vmem:[%s17574_s30 + $0x80] sm:$0xff] }
 0x20c   :  { %v2521_v53 = vadd.f32 %v2520_v41, %v2519_v7  ;;  %v2526_v62 = vadd.f32 %v2525_v22, %v2524_v30  ;;  %v13445_v31 = vadd.f32 %v11300_v29, %v2036_v54  ;;  %v11303_v58 = vadd.f32 %v11302_v38, %v11301_v36  ;;  %v11192_v2 = vpop.f32.mrf.mxu0  ;;  %v110_v36 = vld [vmem:[%s17574_s30 + $0x78] sm:$0xff] }
 0x20d   :  { %v11304_v60 = vpop.f32.mrf.mxu1  ;;  %v13447_v59 = vpop.eup %12066  ;;  %v2425_v37 = vsub.f32 %v13390_v45, %v2317_v52  ;;  %v2426_v8 = vsub.f32 %v13395_v20, %v2317_v52  ;;  %v2323_v33 = vrot.slane %v2322_v5, 2  ;;  %v2041_v4 = vadd.f32 %v11191_v17, %v109_v46 }
 0x20e   :  { %v13451_v13 = vpop.eup %12068  ;;  %12074 = vrcp.f32 %v2521_v53  ;;  %v2527_v12 = vrot.slane %v2526_v62, 2  ;;  %v2531_v19 = vsel %vm2272_vm1, %v13447_v59, 0.0  ;;  %v2328_v14 = vsel %vm2272_vm1, %v13445_v31, -inf  ;;  %v11193_v15 = vpop.f32.mrf.mxu0 }
 0x20f   :  { %v11305_v63 = vpop.f32.mrf.mxu1  ;;  %v2532_v16 = vsel %vm2272_vm1, %v13451_v13, 0.0  ;;  %v2465_v45 = vmul.f32 1.442695, %v2425_v37  ;;  %v2467_v7 = vmul.f32 1.442695, %v2426_v8  ;;  %v2324_v20 = vmax.f32 %v2322_v5, %v2323_v33 }
 0x210   :  { %v2533_v30 = vadd.f32 %v2532_v16, %v2531_v19  ;;  %v2329_v40 = vmax.f32 %v2327_v18, %v2328_v14  ;;  %v13459_v1 = vadd.f32 %v11303_v58, %v2041_v4  ;;  %v11194_v21 = vadd.f32 %v11193_v15, %v11192_v2  ;;  %v11195_v32 = vpop.f32.mrf.mxu0 }
 0x211   :  { %v11307_v41 = vpop.f32.mrf.mxu1  ;;  %12076 = vpow2.f32 %v2465_v45  ;;  %v2325_v22 = vrot.slane %v2324_v20, 1  ;;  %v2528_v54 = vadd.f32 %v2527_v12, %v2526_v62  ;;  %v11306_v17 = vadd.f32 %v11305_v63, %v11304_v60 }
 0x212   :  { %v2534_v29 = vrot.slane %v2533_v30, 4  ;;  %12078 = vpow2.f32 %v2467_v7  ;;  %v2330_v46 = vrot.slane %v2329_v40, 4  ;;  %v11196_v38 = vpop.f32.mrf.mxu0  ;;  %v2044_v18 = vadd.f32 %v11194_v21, %v110_v36 }
 0x213   :  { %v11308_v52 = vpop.f32.mrf.mxu1  ;;  %v2326_v5 = vmax.f32 %v2324_v20, %v2325_v22  ;;  %v11197_v53 = vadd.f32 %v11196_v38, %v11195_v32  ;;  %v2336_v37 = vsel %vm2272_vm1, %v13459_v1, -inf  ;;  %v2529_v33 = vrot.slane %v2528_v54, 1 }
 0x214   :  { %v2535_v58 = vadd.f32 %v2534_v29, %v2533_v30  ;;  %v2331_v2 = vmax.f32 %v2329_v40, %v2330_v46  ;;  %v11198_v8 = vpop.f32.mrf.mxu0  ;;  %v13473_v14 = vadd.f32 %v11306_v17, %v2044_v18  ;;  %v11309_v7 = vadd.f32 %v11308_v52, %v11307_v41  ;;  %v112_v46 = vld [vmem:[%s17574_s30 + $0x88] sm:$0xff] }
 0x215   :  { %v11310_v62 = vpop.f32.mrf.mxu1  ;;  %v13469_v4 = vpop.eup %12070  ;;  %v2427_v12 = vsub.f32 %v13414_v56, %v2326_v5  ;;  %v2428_v19 = vsub.f32 %v13419_v57, %v2326_v5  ;;  %v2049_v15 = vadd.f32 %v11197_v53, %v111_v51  ;;  %v2530_v5 = vadd.f32 %v2529_v33, %v2528_v54 }
 0x216   :  { %v13475_v16 = vpop.eup %12072  ;;  %v2536_v60 = vrot.slane %v2535_v58, 2  ;;  %v2540_v63 = vsel %vm2272_vm1, %v13469_v4, 0.0  ;;  %v2332_v45 = vrot.slane %v2331_v2, 2  ;;  %v11199_v20 = vpop.f32.mrf.mxu0  ;;  %v2337_v57 = vsel %vm2272_vm1, %v13473_v14, -inf }
 0x217   :  { %v11311_v30 = vpop.f32.mrf.mxu1  ;;  %v2541_v40 = vsel %vm2272_vm1, %v13475_v16, 0.0  ;;  %v2469_v36 = vmul.f32 1.442695, %v2427_v12  ;;  %v2471_v56 = vmul.f32 1.442695, %v2428_v19  ;;  %v2338_v22 = vmax.f32 %v2336_v37, %v2337_v57 }
 0x218   :  { %v2542_v21 = vadd.f32 %v2541_v40, %v2540_v63  ;;  %v2333_v32 = vmax.f32 %v2331_v2, %v2332_v45  ;;  %v13483_v29 = vadd.f32 %v11309_v7, %v2049_v15  ;;  %v11201_v41 = vpop.f32.mrf.mxu0  ;;  %v11200_v38 = vadd.f32 %v11199_v20, %v11198_v8  ;;  %v113_v2 = vld [vmem:[%s17574_s30 + $0x90] sm:$0xff] }
 0x219   :  { %v11313_v51 = vpop.f32.mrf.mxu1  ;;  %12080 = vpow2.f32 %v2469_v36  ;;  %v11312_v52 = vadd.f32 %v11311_v30, %v11310_v62  ;;  %v2339_v53 = vrot.slane %v2338_v22, 4  ;;  %v2537_v7 = vadd.f32 %v2536_v60, %v2535_v58 }
 0x21a   :  { %v2543_v18 = vrot.slane %v2542_v21, 4  ;;  %12082 = vpow2.f32 %v2471_v56  ;;  %v2334_v17 = vrot.slane %v2333_v32, 1  ;;  %v11202_v37 = vpop.f32.mrf.mxu0  ;;  %v2345_v15 = vsel %vm2272_vm1, %v13483_v29, -inf }
 0x21b   :  { %v11314_v12 = vpop.f32.mrf.mxu1  ;;  %v12075_v19 = vpop.eup %12074  ;;  %v2052_v63 = vadd.f32 %v11200_v38, %v112_v46  ;;  %v11203_v45 = vadd.f32 %v11202_v37, %v11201_v41  ;;  %v2340_v54 = vmax.f32 %v2338_v22, %v2339_v53  ;;  %12084 = vrcp.f32 %v2530_v5 }
 0x21c   :  { %v2544_v8 = vadd.f32 %v2543_v18, %v2542_v21  ;;  %v2335_v62 = vmax.f32 %v2333_v32, %v2334_v17  ;;  %v11204_v33 = vpop.f32.mrf.mxu0  ;;  %v2658_v30 = vmul.f32 %v12075_v19, %v13399_v25  ;;  %v11315_v56 = vadd.f32 %v11314_v12, %v11313_v51  ;;  %v114_v25 = vld [vmem:[%s17574_s30 + $0x98] sm:$0xff] }
 0x21d   :  { %v11316_v20 = vpop.f32.mrf.mxu1  ;;  %v13494_v40 = vadd.f32 %v11312_v52, %v2052_v63  ;;  %v2057_v36 = vadd.f32 %v11203_v45, %v113_v2  ;;  %v2341_v41 = vrot.slane %v2340_v54, 2  ;;  %v2659_v21 = vmul.f32 %v12075_v19, %v13405_v55 }
 0x21e   :  { %v13496_v57 = vpop.eup %12076  ;;  %v2429_v50 = vsub.f32 %v13435_v39, %v2335_v62  ;;  %v2430_v46 = vsub.f32 %v13445_v31, %v2335_v62  ;;  %10873 = vmatmul.mubr.msk.f32.vlgmr.msra.gmra.mxu0 %vm2272_vm1, %v2658_v30  ;;  %10905 = vmatmul.mubr.msk.f32.vlgmr.msra.gmra.mxu1 %vm2272_vm1, %v2658_v30  ;;  %v11205_v58 = vpop.f32.mrf.mxu0  ;;  %v2545_v22 = vrot.slane %v2544_v8, 2 }
 0x21f   :  { %v11317_v60 = vpop.f32.mrf.mxu1  ;;  %v13506_v32 = vpop.eup %12078  ;;  %v2549_v39 = vsel %vm2272_vm1, %v13496_v57, 0.0  ;;  %v2346_v31 = vsel %vm2272_vm1, %v13494_v40, -inf  ;;  %v11206_v51 = vadd.f32 %v11205_v58, %v11204_v33  ;;  %2871 = vmatprep.mubr.f32.mxu0 %v17539_v34  ;;  %3128 = vmatprep.mubr.f32.mxu1 %v17539_v34  ;;  %v2342_v55 = vmax.f32 %v2340_v54, %v2341_v41 }
 0x220   :  { %v2550_v38 = vsel %vm2272_vm1, %v13506_v32, 0.0  ;;  %v2473_v52 = vmul.f32 1.442695, %v2429_v50  ;;  %v2475_v5 = vmul.f32 1.442695, %v2430_v46  ;;  %v11207_v18 = vpop.f32.mrf.mxu0  ;;  %v2347_v2 = vmax.f32 %v2345_v15, %v2346_v31  ;;  %v115_v50 = vld [vmem:[%s17574_s30 + $0xa0] sm:$0xff] }
 0x221   :  { %v11319_v17 = vpop.f32.mrf.mxu1  ;;  %v2551_v53 = vadd.f32 %v2550_v38, %v2549_v39  ;;  %v13516_v37 = vadd.f32 %v11315_v56, %v2057_v36  ;;  %v2060_v12 = vadd.f32 %v11206_v51, %v114_v25  ;;  %v2343_v19 = vrot.slane %v2342_v55, 1 }
 0x222   :  { %12086 = vpow2.f32 %v2473_v52  ;;  %v11318_v63 = vadd.f32 %v11317_v60, %v11316_v20  ;;  %10874 = vmatmul.mubr.msk.f32.gmra.mxu0 %vm2272_vm1, %v2659_v21  ;;  %10906 = vmatmul.mubr.msk.f32.gmra.mxu1 %vm2272_vm1, %v2659_v21  ;;  %v11208_v45 = vpop.f32.mrf.mxu0  ;;  %v2538_v54 = vrot.slane %v2537_v7, 1  ;;  %v2348_v33 = vrot.slane %v2347_v2, 4 }
 0x223   :  { %v11320_v62 = vpop.f32.mrf.mxu1  ;;  %12088 = vpow2.f32 %v2475_v5  ;;  %v11209_v15 = vadd.f32 %v11208_v45, %v11207_v18  ;;  %2877 = vmatprep.mubr.f32.mxu0 %v17539_v34  ;;  %3134 = vmatprep.mubr.f32.mxu1 %v17539_v34  ;;  %v2552_v30 = vrot.slane %v2551_v53, 4  ;;  %v2344_v20 = vmax.f32 %v2342_v55, %v2343_v19 }
 0x224   :  { %v13525_v36 = vadd.f32 %v11318_v63, %v2060_v12  ;;  %v11210_v56 = vpop.f32.mrf.mxu0  ;;  %v2539_v41 = vadd.f32 %v2538_v54, %v2537_v7  ;;  %v2349_v25 = vmax.f32 %v2347_v2, %v2348_v33  ;;  %v2354_v58 = vsel %vm2272_vm1, %v13516_v37, -inf  ;;  %v116_v33 = vld [vmem:[%s17574_s30 + $0xa8] sm:$0xff] }
 0x225   :  { %v11322_v46 = vpop.f32.mrf.mxu1  ;;  %v2065_v60 = vadd.f32 %v11209_v15, %v115_v50  ;;  %v2546_v21 = vadd.f32 %v2545_v22, %v2544_v8  ;;  %v2431_v31 = vsub.f32 %v13459_v1, %v2344_v20  ;;  %v2432_v51 = vsub.f32 %v13473_v14, %v2344_v20 }
 0x226   :  { %v13529_v39 = vpop.eup %12080  ;;  %v2355_v38 = vsel %vm2272_vm1, %v13525_v36, -inf  ;;  %v11211_v52 = vpop.f32.mrf.mxu0  ;;  %12090 = vrcp.f32 %v2539_v41  ;;  %v2350_v18 = vrot.slane %v2349_v25, 2  ;;  %v11321_v8 = vadd.f32 %v11320_v62, %v11319_v17 }
 0x227   :  { %v11323_v5 = vpop.f32.mrf.mxu1  ;;  %v13535_v55 = vpop.eup %12082  ;;  %v2558_v7 = vsel %vm2272_vm1, %v13529_v39, 0.0  ;;  %v2356_v2 = vmax.f32 %v2354_v58, %v2355_v38  ;;  %v13539_v22 = vadd.f32 %v2552_v30, %v2551_v53  ;;  %v2477_v14 = vmul.f32 1.442695, %v2431_v31 }
 0x228   :  { %v2559_v1 = vsel %vm2272_vm1, %v13535_v55, 0.0  ;;  %v2479_v12 = vmul.f32 1.442695, %v2432_v51  ;;  %v11213_v19 = vpop.f32.mrf.mxu0  ;;  %v2351_v45 = vmax.f32 %v2349_v25, %v2350_v18  ;;  %v11212_v15 = vadd.f32 %v11211_v52, %v11210_v56  ;;  %v12085_v20 = vpop.eup %12084  ;;  %v117_v25 = vld [vmem:[%s17574_s30 + $0xb0] sm:$0xff] }
 0x229   :  { %v11325_v63 = vpop.f32.mrf.mxu1  ;;  %v2560_v50 = vadd.f32 %v2559_v1, %v2558_v7  ;;  %v2357_v54 = vrot.slane %v2356_v2, 4  ;;  %12092 = vpow2.f32 %v2477_v14  ;;  %v13546_v17 = vadd.f32 %v11321_v8, %v2065_v60 }
 0x22a   :  { %v11324_v53 = vadd.f32 %v11323_v5, %v11322_v46  ;;  %v11214_v62 = vpop.f32.mrf.mxu0  ;;  %v2547_v41 = vrot.slane %v2546_v21, 1  ;;  %12094 = vpow2.f32 %v2479_v12  ;;  %v2352_v31 = vrot.slane %v2351_v45, 1 }
 0x22b   :  { %v11326_v30 = vpop.f32.mrf.mxu1  ;;  %v2561_v58 = vrot.slane %v2560_v50, 4  ;;  %v2358_v51 = vmax.f32 %v2356_v2, %v2357_v54  ;;  %v2661_v38 = vmul.f32 %v12085_v20, %v13425_v0  ;;  %v2068_v7 = vadd.f32 %v11212_v15, %v116_v33  ;;  %v118_v15 = vld [vmem:[%s17574_s30 + $0xb8] sm:$0xff] }
 0x22c   :  { %v2662_v56 = vmul.f32 %v12085_v20, %v13429_v3  ;;  %v11215_v52 = vadd.f32 %v11214_v62, %v11213_v19  ;;  %v11216_v60 = vpop.f32.mrf.mxu0  ;;  %v2353_v5 = vmax.f32 %v2351_v45, %v2352_v31  ;;  %v11327_v1 = vadd.f32 %v11326_v30, %v11325_v63 }
 0x22d   :  { %v11328_v18 = vpop.f32.mrf.mxu1  ;;  %v13553_v46 = vadd.f32 %v2561_v58, %v2560_v50  ;;  %v2359_v8 = vrot.slane %v2358_v51, 2  ;;  %v2554_v14 = vrot.slane %v13539_v22, 2  ;;  %10875 = vmatmul.mubr.msk.f32.gmra.mxu0 %vm2272_vm1, %v2661_v38  ;;  %10907 = vmatmul.mubr.msk.f32.gmra.mxu1 %vm2272_vm1, %v2661_v38  ;;  %v13558_v2 = vadd.f32 %v11324_v53, %v2068_v7 }
 0x22e   :  { %v2073_v0 = vadd.f32 %v11215_v52, %v117_v25  ;;  %v11217_v12 = vpop.f32.mrf.mxu0  ;;  %v2548_v3 = vadd.f32 %v2547_v41, %v2546_v21  ;;  %v2433_v50 = vsub.f32 %v13483_v29, %v2353_v5  ;;  %v2434_v45 = vsub.f32 %v13494_v40, %v2353_v5  ;;  %2883 = vmatprep.mubr.f32.mxu0 %v17539_v34 }
 0x22f   :  { %v11329_v54 = vpop.f32.mrf.mxu1  ;;  %v13560_v19 = vpop.eup %12086  ;;  %v2360_v33 = vmax.f32 %v2358_v51, %v2359_v8  ;;  %v2363_v63 = vsel %vm2272_vm1, %v13546_v17, -inf  ;;  %3140 = vmatprep.mubr.f32.mxu1 %v17539_v34  ;;  %v2364_v29 = vsel %vm2272_vm1, %v13558_v2, -inf  ;;  %v11218_v53 = vadd.f32 %v11217_v12, %v11216_v60  ;;  %v119_v12 = vld [vmem:[%s17574_s30 + $0xc0] sm:$0xff] }
 0x230   :  { %v13571_v20 = vpop.eup %12088  ;;  %v2567_v21 = vsel %vm2272_vm1, %v13560_v19, 0.0  ;;  %v13577_v40 = vadd.f32 %v11327_v1, %v2073_v0  ;;  %v11219_v62 = vpop.f32.mrf.mxu0  ;;  %v2481_v58 = vmul.f32 1.442695, %v2433_v50  ;;  %v2483_v31 = vmul.f32 1.442695, %v2434_v45 }
 0x231   :  { %v11331_v30 = vpop.f32.mrf.mxu1  ;;  %v2568_v41 = vsel %vm2272_vm1, %v13571_v20, 0.0  ;;  %v2361_v51 = vrot.slane %v2360_v33, 1  ;;  %v2563_v25 = vrot.slane %v13553_v46, 2  ;;  %v2365_v7 = vmax.f32 %v2363_v63, %v2364_v29  ;;  %10876 = vmatmul.mubr.msk.f32.gmra.mxu0 %vm2272_vm1, %v2662_v56  ;;  %10908 = vmatmul.mubr.msk.f32.gmra.mxu1 %vm2272_vm1, %v2662_v56 }
 0x232   :  { %v2569_v38 = vadd.f32 %v2568_v41, %v2567_v21  ;;  %v2076_v52 = vadd.f32 %v11218_v53, %v118_v15  ;;  %v11220_v5 = vpop.f32.mrf.mxu0  ;;  %12096 = vpow2.f32 %v2481_v58  ;;  %2889 = vmatprep.mubr.f32.mxu0 %v17539_v34  ;;  %3146 = vmatprep.mubr.f32.mxu1 %v17539_v34  ;;  %v11330_v0 = vadd.f32 %v11329_v54, %v11328_v18 }
 0x233   :  { %v11332_v8 = vpop.f32.mrf.mxu1  ;;  %v12091_v60 = vpop.eup %12090  ;;  %v2362_v1 = vmax.f32 %v2360_v33, %v2361_v51  ;;  %v11221_v50 = vadd.f32 %v11220_v5, %v11219_v62  ;;  %12098 = vpow2.f32 %v2483_v31  ;;  %v2366_v63 = vrot.slane %v2365_v7, 4 }
 0x234   :  { %v2570_v45 = vrot.slane %v2569_v38, 4  ;;  %v2664_v56 = vmul.f32 %v12091_v60, %v13447_v59  ;;  %v11222_v15 = vpop.f32.mrf.mxu0  ;;  %v2372_v53 = vsel %vm2272_vm1, %v13577_v40, -inf  ;;  %v13594_v18 = vadd.f32 %v11330_v0, %v2076_v52 }
 0x235   :  { %v11334_v21 = vpop.f32.mrf.mxu1  ;;  %v2435_v29 = vsub.f32 %v13516_v37, %v2362_v1  ;;  %v2436_v33 = vsub.f32 %v13525_v36, %v2362_v1  ;;  %v2367_v54 = vmax.f32 %v2365_v7, %v2366_v63  ;;  %v2665_v62 = vmul.f32 %v12091_v60, %v13451_v13  ;;  %v120_v1 = vld [vmem:[%s17574_s30 + $0xc8] sm:$0xff] }
 0x236   :  { %10877 = vmatmul.mubr.msk.f32.gmra.mxu0 %vm2272_vm1, %v2664_v56  ;;  %10909 = vmatmul.mubr.msk.f32.gmra.mxu1 %vm2272_vm1, %v2664_v56  ;;  %v2081_v41 = vadd.f32 %v11221_v50, %v119_v12  ;;  %12100 = vrcp.f32 %v2548_v3  ;;  %v11223_v59 = vpop.f32.mrf.mxu0  ;;  %v13599_v31 = vpop.eup %12092  ;;  %v2373_v51 = vsel %vm2272_vm1, %v13594_v18, -inf  ;;  %v11333_v7 = vadd.f32 %v11332_v8, %v11331_v30  ;;  %v121_v56 = vld [vmem:[%s17574_s30 + $0xd0] sm:$0xff] }
 0x237   :  { %v11335_v58 = vpop.f32.mrf.mxu1  ;;  %v2485_v37 = vmul.f32 1.442695, %v2435_v29  ;;  %v2487_v36 = vmul.f32 1.442695, %v2436_v33  ;;  %2895 = vmatprep.mubr.f32.mxu0 %v17539_v34  ;;  %3152 = vmatprep.mubr.f32.mxu1 %v17539_v34  ;;  %v13605_v52 = vpop.eup %12094  ;;  %v2571_v5 = vadd.f32 %v2570_v45, %v2569_v38  ;;  %v2576_v13 = vsel %vm2272_vm1, %v13599_v31, 0.0 }
 0x238   :  { %v2368_v3 = vrot.slane %v2367_v54, 2  ;;  %v2374_v60 = vmax.f32 %v2372_v53, %v2373_v51  ;;  %v11225_v0 = vpop.f32.mrf.mxu0  ;;  %v2577_v50 = vsel %vm2272_vm1, %v13605_v52, 0.0  ;;  %v13614_v63 = vadd.f32 %v11333_v7, %v2081_v41 }
 0x239   :  { %v11337_v12 = vpop.f32.mrf.mxu1  ;;  %12102 = vpow2.f32 %v2485_v37  ;;  %v11224_v30 = vadd.f32 %v11223_v59, %v11222_v15  ;;  %v2578_v8 = vadd.f32 %v2577_v50, %v2576_v13  ;;  %v11336_v15 = vadd.f32 %v11335_v58, %v11334_v21 }
 0x23a   :  { %12104 = vpow2.f32 %v2487_v36  ;;  %v2369_v38 = vmax.f32 %v2367_v54, %v2368_v3  ;;  %v2375_v45 = vrot.slane %v2374_v60, 4  ;;  %10878 = vmatmul.mubr.msk.f32.gmra.mxu0 %vm2272_vm1, %v2665_v62  ;;  %10910 = vmatmul.mubr.msk.f32.gmra.mxu1 %vm2272_vm1, %v2665_v62  ;;  %v11226_v29 = vpop.f32.mrf.mxu0  ;;  %v2572_v59 = vrot.slane %v2571_v5, 2 }
 0x23b   :  { %v11338_v33 = vpop.f32.mrf.mxu1  ;;  %2901 = vmatprep.mubr.f32.mxu0 %v17539_v34  ;;  %3158 = vmatprep.mubr.f32.mxu1 %v17539_v34  ;;  %v2084_v53 = vadd.f32 %v11224_v30, %v120_v1  ;;  %v11227_v41 = vadd.f32 %v11226_v29, %v11225_v0  ;;  %v2579_v54 = vrot.slane %v2578_v8, 4  ;;  %v2381_v62 = vsel %vm2272_vm1, %v13614_v63, -inf }
 0x23c   :  { %v2370_v37 = vrot.slane %v2369_v38, 1  ;;  %v2376_v36 = vmax.f32 %v2374_v60, %v2375_v45  ;;  %v11228_v51 = vpop.f32.mrf.mxu0  ;;  %v2555_v50 = vadd.f32 %v2554_v14, %v13539_v22  ;;  %v11339_v21 = vadd.f32 %v11338_v33, %v11337_v12 }
 0x23d   :  { %v11340_v7 = vpop.f32.mrf.mxu1  ;;  %v13625_v13 = vadd.f32 %v11336_v15, %v2084_v53  ;;  %v2089_v3 = vadd.f32 %v11227_v41, %v121_v56  ;;  %v13633_v60 = vadd.f32 %v2563_v25, %v13553_v46  ;;  %v13635_v30 = vadd.f32 %v2579_v54, %v2578_v8  ;;  %v122_v46 = vld [vmem:[%s17574_s30 + $0xd8] sm:$0xff] }
 0x23e   :  { %v2371_v49 = vmax.f32 %v2369_v38, %v2370_v37  ;;  %v2377_v1 = vrot.slane %v2376_v36, 2  ;;  %v11229_v58 = vpop.f32.mrf.mxu0  ;;  %v2556_v56 = vrot.slane %v2555_v50, 1  ;;  %v13652_v37 = vadd.f32 %v2572_v59, %v2571_v5 }
 0x23f   :  { %v11341_v0 = vpop.f32.mrf.mxu1  ;;  %v2382_v45 = vsel %vm2272_vm1, %v13625_v13, -inf  ;;  %v11230_v29 = vadd.f32 %v11229_v58, %v11228_v51  ;;  %v13639_v53 = vpop.eup %12096  ;;  %v13643_v38 = vadd.f32 %v11339_v21, %v2089_v3 }
 0x240   :  { %v2437_v22 = vsub.f32 %v13546_v17, %v2371_v49  ;;  %v2438_v14 = vsub.f32 %v13558_v2, %v2371_v49  ;;  %v2378_v12 = vmax.f32 %v2376_v36, %v2377_v1  ;;  %v11231_v25 = vpop.f32.mrf.mxu0  ;;  %v13648_v33 = vpop.eup %12098  ;;  %v2585_v15 = vsel %vm2272_vm1, %v13639_v53, 0.0 }
 0x241   :  { %v11343_v8 = vpop.f32.mrf.mxu1  ;;  %v2383_v41 = vmax.f32 %v2381_v62, %v2382_v45  ;;  %v2557_v54 = vadd.f32 %v2556_v56, %v2555_v50  ;;  %v2586_v49 = vsel %vm2272_vm1, %v13648_v33, 0.0  ;;  %v2092_v48 = vadd.f32 %v11230_v29, %v122_v46 }
 0x242   :  { %v2489_v17 = vmul.f32 1.442695, %v2437_v22  ;;  %v2491_v2 = vmul.f32 1.442695, %v2438_v14  ;;  %v2379_v36 = vrot.slane %v2378_v12, 1  ;;  %v11232_v51 = vpop.f32.mrf.mxu0  ;;  %v2587_v21 = vadd.f32 %v2586_v49, %v2585_v15  ;;  %v123_v14 = vld [vmem:[%s17574_s30 + $0xe0] sm:$0xff] }
 0x243   :  { %v11344_v3 = vpop.f32.mrf.mxu1  ;;  %v12101_v1 = vpop.eup %12100  ;;  %v2384_v58 = vrot.slane %v2383_v41, 4  ;;  %12106 = vrcp.f32 %v2557_v54  ;;  %v2390_v5 = vsel %vm2272_vm1, %v13643_v38, -inf  ;;  %v11342_v22 = vadd.f32 %v11341_v0, %v11340_v7 }
 0x244   :  { %12108 = vpow2.f32 %v2489_v17  ;;  %v2380_v47 = vmax.f32 %v2378_v12, %v2379_v36  ;;  %v2667_v62 = vmul.f32 %v12101_v1, %v13469_v4  ;;  %v11234_v59 = vpop.f32.mrf.mxu0  ;;  %v2588_v45 = vrot.slane %v2587_v21, 4 }
 0x245   :  { %v11346_v50 = vpop.f32.mrf.mxu1  ;;  %12110 = vpow2.f32 %v2491_v2  ;;  %v2385_v56 = vmax.f32 %v2383_v41, %v2384_v58  ;;  %v11233_v4 = vadd.f32 %v11232_v51, %v11231_v25  ;;  %v2565_v46 = vrot.slane %v13633_v60, 1 }
 0x246   :  { %v13662_v15 = vpop.eup %12102  ;;  %v2439_v29 = vsub.f32 %v13577_v40, %v2380_v47  ;;  %v2440_v12 = vsub.f32 %v13594_v18, %v2380_v47  ;;  %10879 = vmatmul.mubr.msk.f32.gmra.mxu0 %vm2272_vm1, %v2667_v62  ;;  %10911 = vmatmul.mubr.msk.f32.gmra.mxu1 %vm2272_vm1, %v2667_v62  ;;  %v11235_v54 = vpop.f32.mrf.mxu0  ;;  %v2668_v47 = vmul.f32 %v12101_v1, %v13475_v16 }
 0x247   :  { %v11347_v41 = vpop.f32.mrf.mxu1  ;;  %v13669_v7 = vpop.eup %12104  ;;  %v2594_v0 = vsel %vm2272_vm1, %v13662_v15, 0.0  ;;  %v2386_v49 = vrot.slane %v2385_v56, 2  ;;  %2907 = vmatprep.mubr.f32.mxu0 %v17539_v34  ;;  %3164 = vmatprep.mubr.f32.mxu1 %v17539_v34  ;;  %v13676_v40 = vadd.f32 %v11342_v22, %v2092_v48  ;;  %v2097_v2 = vadd.f32 %v11233_v4, %v123_v14  ;;  %v124_v22 = vld [vmem:[%s17574_s30 + $0xe8] sm:$0xff] }
 0x248   :  { %v2595_v18 = vsel %vm2272_vm1, %v13669_v7, 0.0  ;;  %v2493_v25 = vmul.f32 1.442695, %v2439_v29  ;;  %v2495_v17 = vmul.f32 1.442695, %v2440_v12  ;;  %v11237_v36 = vpop.f32.mrf.mxu0  ;;  %v13680_v58 = vadd.f32 %v2588_v45, %v2587_v21 }
 0x249   :  { %v11349_v51 = vpop.f32.mrf.mxu1  ;;  %v2596_v62 = vadd.f32 %v2595_v18, %v2594_v0  ;;  %v2387_v11 = vmax.f32 %v2385_v56, %v2386_v49  ;;  %v2391_v10 = vsel %vm2272_vm1, %v13676_v40, -inf  ;;  %v11345_v16 = vadd.f32 %v11344_v3, %v11343_v8 }
 0x24a   :  { %12112 = vpow2.f32 %v2493_v25  ;;  %10880 = vmatmul.mubr.msk.f32.gmra.mxu0 %vm2272_vm1, %v2668_v47  ;;  %10912 = vmatmul.mubr.msk.f32.gmra.mxu1 %vm2272_vm1, %v2668_v47  ;;  %v2392_v48 = vmax.f32 %v2390_v5, %v2391_v10  ;;  %v2566_v1 = vadd.f32 %v2565_v46, %v13633_v60  ;;  %v11238_v21 = vpop.f32.mrf.mxu0  ;;  %v11236_v29 = vadd.f32 %v11235_v54, %v11234_v59  ;;  %v125_v46 = vld [vmem:[%s17574_s30 + $0xf0] sm:$0xff] }
 0x24b   :  { %v11350_v45 = vpop.f32.mrf.mxu1  ;;  %v2597_v14 = vrot.slane %v2596_v62, 4  ;;  %12114 = vpow2.f32 %v2495_v17  ;;  %v2388_v56 = vrot.slane %v2387_v11, 1  ;;  %2913 = vmatprep.mubr.f32.mxu0 %v17539_v34  ;;  %3170 = vmatprep.mubr.f32.mxu1 %v17539_v34  ;;  %v2581_v12 = vrot.slane %v13635_v30, 2 }
 0x24c   :  { %v2393_v10 = vrot.slane %v2392_v48, 4  ;;  %v13693_v8 = vadd.f32 %v11345_v16, %v2097_v2  ;;  %12116 = vrcp.f32 %v2566_v1  ;;  %v11240_v60 = vpop.f32.mrf.mxu0  ;;  %v2100_v5 = vadd.f32 %v11236_v29, %v124_v22 }
 0x24d   :  { %v2389_v3 = vmax.f32 %v2387_v11, %v2388_v56  ;;  %v11348_v4 = vadd.f32 %v11347_v41, %v11346_v50  ;;  %v11239_v0 = vadd.f32 %v11238_v21, %v11237_v36  ;;  %v2590_v49 = vrot.slane %v13680_v58, 2  ;;  %v11352_v54 = vpop.f32.mrf.mxu1 }
 0x24e   :  { %v13699_v47 = vadd.f32 %v2597_v14, %v2596_v62  ;;  %v2394_v59 = vmax.f32 %v2392_v48, %v2393_v10  ;;  %v2574_v18 = vrot.slane %v13652_v37, 1  ;;  %v11241_v25 = vpop.f32.mrf.mxu0  ;;  %v2399_v50 = vsel %vm2272_vm1, %v13693_v8, -inf  ;;  %v126_v62 = vld [vmem:[%s17574_s30 + $0xf8] sm:$0xff] }
 0x24f   :  { %v2441_v17 = vsub.f32 %v13614_v63, %v2389_v3  ;;  %v2442_v11 = vsub.f32 %v13625_v13, %v2389_v3  ;;  %v13706_v41 = vadd.f32 %v11348_v4, %v2100_v5  ;;  %v2105_v16 = vadd.f32 %v11239_v0, %v125_v46 }
 0x250   :  { %v12107_v2 = vpop.eup %12106  ;;  %v2395_v36 = vrot.slane %v2394_v59, 2  ;;  %v11351_v1 = vadd.f32 %v11350_v45, %v11349_v51  ;;  %v11242_v48 = vadd.f32 %v11241_v25, %v11240_v60  ;;  %v2575_v14 = vadd.f32 %v2574_v18, %v13652_v37  ;;  %v11353_v60 = vpop.f32.mrf.mxu1 }
 0x251   :  { %v13711_v22 = vpop.eup %12108  ;;  %v2497_v21 = vmul.f32 1.442695, %v2441_v17  ;;  %v2499_v63 = vmul.f32 1.442695, %v2442_v11  ;;  %v2670_v13 = vmul.f32 %v12107_v2, %v13496_v57  ;;  %v2671_v51 = vmul.f32 %v12107_v2, %v13506_v32 }
 0x252   :  { %v13715_v56 = vpop.eup %12110  ;;  %v2603_v29 = vsel %vm2272_vm1, %v13711_v22, 0.0  ;;  %v2396_v10 = vmax.f32 %v2394_v59, %v2395_v36  ;;  %v2400_v45 = vsel %vm2272_vm1, %v13706_v41, -inf  ;;  %v2108_v37 = vadd.f32 %v11242_v48, %v126_v62 }
 0x253   :  { %v2604_v3 = vsel %vm2272_vm1, %v13715_v56, 0.0  ;;  %12118 = vpow2.f32 %v2497_v21  ;;  %10881 = vmatmul.mubr.msk.f32.gmra.mxu0 %vm2272_vm1, %v2670_v13  ;;  %10913 = vmatmul.mubr.msk.f32.gmra.mxu1 %vm2272_vm1, %v2670_v13  ;;  %v2401_v57 = vmax.f32 %v2399_v50, %v2400_v45  ;;  %v13728_v32 = vadd.f32 %v11351_v1, %v2105_v16 }
 0x254   :  { %v2605_v5 = vadd.f32 %v2604_v3, %v2603_v29  ;;  %12120 = vpow2.f32 %v2499_v63  ;;  %v2397_v4 = vrot.slane %v2396_v10, 1  ;;  %2919 = vmatprep.mubr.f32.mxu0 %v17539_v34  ;;  %3176 = vmatprep.mubr.f32.mxu1 %v17539_v34  ;;  %v11354_v0 = vadd.f32 %v11353_v60, %v11352_v54 }
 0x255   :  { %v2402_v46 = vrot.slane %v2401_v57, 4  ;;  %12122 = vrcp.f32 %v2575_v14  ;;  %v2582_v59 = vadd.f32 %v2581_v12, %v13635_v30  ;;  %v2599_v17 = vrot.slane %v13699_v47, 2 }
 0x256   :  { %v2398_v18 = vmax.f32 %v2396_v10, %v2397_v4  ;;  %v13736_v50 = vadd.f32 %v11354_v0, %v2108_v37  ;;  %v2606_v16 = vrot.slane %v2605_v5, 4  ;;  %v2591_v12 = vadd.f32 %v2590_v49, %v13680_v58 }
 0x257   :  { %v13731_v25 = vpop.eup %12112  ;;  %10882 = vmatmul.mubr.msk.f32.gmra.mxu0 %vm2272_vm1, %v2671_v51  ;;  %10914 = vmatmul.mubr.msk.f32.gmra.mxu1 %vm2272_vm1, %v2671_v51  ;;  %v2403_v11 = vmax.f32 %v2401_v57, %v2402_v46  ;;  %v2583_v2 = vrot.slane %v2582_v59, 1  ;;  %v2408_v21 = vsel %vm2272_vm1, %v13728_v32, -inf }
 0x258   :  { %v13738_v36 = vpop.eup %12114  ;;  %v2443_v54 = vsub.f32 %v13643_v38, %v2398_v18  ;;  %v2444_v30 = vsub.f32 %v13676_v40, %v2398_v18  ;;  %2925 = vmatprep.mubr.f32.mxu0 %v17539_v34  ;;  %3182 = vmatprep.mubr.f32.mxu1 %v17539_v34  ;;  %v2612_v62 = vsel %vm2272_vm1, %v13731_v25, 0.0  ;;  %v2409_v63 = vsel %vm2272_vm1, %v13736_v50, -inf }
 0x259   :  { %v12117_v1 = vpop.eup %12116  ;;  %v2404_v48 = vrot.slane %v2403_v11, 2  ;;  %v2613_v38 = vsel %vm2272_vm1, %v13738_v36, 0.0  ;;  %v2584_v14 = vadd.f32 %v2583_v2, %v2582_v59  ;;  %v2410_v49 = vmax.f32 %v2408_v21, %v2409_v63 }
 0x25a   :  { %v2501_v40 = vmul.f32 1.442695, %v2443_v54  ;;  %v2503_v13 = vmul.f32 1.442695, %v2444_v30  ;;  %v2673_v29 = vmul.f32 %v12117_v1, %v13529_v39  ;;  %v2607_v10 = vadd.f32 %v2606_v16, %v2605_v5 }
 0x25b   :  { %v2405_v58 = vmax.f32 %v2403_v11, %v2404_v48  ;;  %v2592_v51 = vrot.slane %v2591_v12, 1  ;;  %v2614_v45 = vadd.f32 %v2613_v38, %v2612_v62  ;;  %v2411_v3 = vrot.slane %v2410_v49, 4 }
 0x25c   :  { %12124 = vpow2.f32 %v2501_v40  ;;  %10883 = vmatmul.mubr.msk.f32.gmra.mxu0 %vm2272_vm1, %v2673_v29  ;;  %10915 = vmatmul.mubr.msk.f32.gmra.mxu1 %vm2272_vm1, %v2673_v29  ;;  %v2600_v39 = vadd.f32 %v2599_v17, %v13699_v47  ;;  %v2674_v5 = vmul.f32 %v12117_v1, %v13535_v55  ;;  %v2608_v0 = vrot.slane %v2607_v10, 2 }
 0x25d   :  { %12126 = vpow2.f32 %v2503_v13  ;;  %v2406_v60 = vrot.slane %v2405_v58, 1  ;;  %2931 = vmatprep.mubr.f32.mxu0 %v17539_v34  ;;  %3188 = vmatprep.mubr.f32.mxu1 %v17539_v34  ;;  %v2593_v57 = vadd.f32 %v2592_v51, %v2591_v12  ;;  %v2412_v4 = vmax.f32 %v2410_v49, %v2411_v3 }
 0x25e   :  { %12128 = vrcp.f32 %v2584_v14  ;;  %v2615_v18 = vrot.slane %v2614_v45, 4  ;;  %v2609_v1 = vadd.f32 %v2608_v0, %v2607_v10 }
 0x25f   :  { %v2407_v37 = vmax.f32 %v2405_v58, %v2406_v60  ;;  %v2413_v16 = vrot.slane %v2412_v4, 2  ;;  %12130 = vrcp.f32 %v2593_v57 }
 0x260   :  { %v13760_v46 = vpop.eup %12118  ;;  %10884 = vmatmul.mubr.msk.f32.gmra.mxu0 %vm2272_vm1, %v2674_v5  ;;  %10916 = vmatmul.mubr.msk.f32.gmra.mxu1 %vm2272_vm1, %v2674_v5  ;;  %v2616_v48 = vadd.f32 %v2615_v18, %v2614_v45  ;;  %v2610_v13 = vrot.slane %v2609_v1, 1 }
 0x261   :  { %v13762_v59 = vpop.eup %12120  ;;  %v2445_v11 = vsub.f32 %v13693_v8, %v2407_v37  ;;  %v2446_v2 = vsub.f32 %v13706_v41, %v2407_v37  ;;  %v2621_v55 = vsel %vm2272_vm1, %v13760_v46, 0.0  ;;  %2937 = vmatprep.mubr.f32.mxu0 %v17539_v34  ;;  %3194 = vmatprep.mubr.f32.mxu1 %v17539_v34  ;;  %v2601_v8 = vrot.slane %v2600_v39, 1 }
 0x262   :  { %v12123_v47 = vpop.eup %12122  ;;  %v2622_v17 = vsel %vm2272_vm1, %v13762_v59, 0.0  ;;  %v2414_v12 = vmax.f32 %v2412_v4, %v2413_v16  ;;  %v2617_v58 = vrot.slane %v2616_v48, 2 }
 0x263   :  { %v2505_v54 = vmul.f32 1.442695, %v2445_v11  ;;  %v2507_v41 = vmul.f32 1.442695, %v2446_v2  ;;  %v2676_v30 = vmul.f32 %v12123_v47, %v13560_v19  ;;  %v2623_v62 = vadd.f32 %v2622_v17, %v2621_v55 }
 0x264   :  { %v2415_v21 = vrot.slane %v2414_v12, 1  ;;  %v2602_v63 = vadd.f32 %v2601_v8, %v2600_v39  ;;  %v2677_v38 = vmul.f32 %v12123_v47, %v13571_v20 }
 0x265   :  { %12132 = vpow2.f32 %v2505_v54  ;;  %10885 = vmatmul.mubr.msk.f32.gmra.mxu0 %vm2272_vm1, %v2676_v30  ;;  %10917 = vmatmul.mubr.msk.f32.gmra.mxu1 %vm2272_vm1, %v2676_v30  ;;  %v2624_v14 = vrot.slane %v2623_v62, 4 }
 0x266   :  { %12134 = vpow2.f32 %v2507_v41  ;;  %2943 = vmatprep.mubr.f32.mxu0 %v17539_v34  ;;  %3200 = vmatprep.mubr.f32.mxu1 %v17539_v34  ;;  %v2416_v40 = vmax.f32 %v2414_v12, %v2415_v21 }
 0x267   :  { %12136 = vrcp.f32 %v2602_v63  ;;  %v2625_v39 = vadd.f32 %v2624_v14, %v2623_v62 }
 0x268   :  { %v2447_v49 = vsub.f32 %v13728_v32, %v2416_v40  ;;  %v2448_v10 = vsub.f32 %v13736_v50, %v2416_v40  ;;  %v2618_v32 = vadd.f32 %v2617_v58, %v2616_v48  ;;  %v2611_v50 = vadd.f32 %v2610_v13, %v2609_v1 }
 0x269   :  { %v13780_v19 = vpop.eup %12124  ;;  %10886 = vmatmul.mubr.msk.f32.gmra.mxu0 %vm2272_vm1, %v2677_v38  ;;  %10918 = vmatmul.mubr.msk.f32.gmra.mxu1 %vm2272_vm1, %v2677_v38  ;;  %v2626_v0 = vrot.slane %v2625_v39, 2 }
 0x26a   :  { %v13784_v29 = vpop.eup %12126  ;;  %2949 = vmatprep.mubr.f32.mxu0 %v17539_v34  ;;  %3206 = vmatprep.mubr.f32.mxu1 %v17539_v34  ;;  %v2630_v51 = vsel %vm2272_vm1, %v13780_v19, 0.0  ;;  %v2509_v60 = vmul.f32 1.442695, %v2447_v49  ;;  %v2511_v3 = vmul.f32 1.442695, %v2448_v10 }
 0x26b   :  { %v12129_v20 = vpop.eup %12128  ;;  %v2631_v45 = vsel %vm2272_vm1, %v13784_v29, 0.0  ;;  %v2627_v55 = vadd.f32 %v2626_v0, %v2625_v39  ;;  %v214_v39 = vld [vmem:[%s17520_s17 + $0x178] sm:$0xff]  ;;  %v197_v0 = vld [vmem:[%s17520_s17 + $0xf0] sm:$0xff] }
 0x26c   :  { %v2679_v57 = vmul.f32 %v12129_v20, %v13599_v31  ;;  %v2632_v37 = vadd.f32 %v2631_v45, %v2630_v51  ;;  %12138 = vpow2.f32 %v2509_v60  ;;  %v12131_v5 = vpop.eup %12130  ;;  %v2680_v4 = vmul.f32 %v12129_v20, %v13605_v52  ;;  %v198_v45 = vld [vmem:[%s17520_s17 + $0xf8] sm:$0xff] }
 0x26d   :  { %12140 = vpow2.f32 %v2511_v3  ;;  %v2619_v31 = vrot.slane %v2618_v32, 1  ;;  %v2682_v2 = vmul.f32 %v12131_v5, %v13639_v53  ;;  %v2683_v41 = vmul.f32 %v12131_v5, %v13648_v33  ;;  %11355 = vmatprep.subr.mxu0 %v198_v45  ;;  %v230_v60 = vld [vmem:[%s17520_s17 + $0x1f8] sm:$0xff]  ;;  %v224_v45 = vld [vmem:[%s17520_s17 + $0x1c8] sm:$0xff] }
 0x26e   :  { %10887 = vmatmul.mubr.msk.f32.gmra.mxu0 %vm2272_vm1, %v2679_v57  ;;  %10919 = vmatmul.mubr.msk.f32.gmra.mxu1 %vm2272_vm1, %v2679_v57  ;;  %v2633_v11 = vrot.slane %v2632_v37, 4  ;;  %12142 = vrcp.f32 %v2611_v50  ;;  %v2628_v30 = vrot.slane %v2627_v55, 1 }
 0x26f   :  { %2955 = vmatprep.mubr.f32.mxu0 %v17539_v34  ;;  %3212 = vmatprep.mubr.f32.mxu1 %v17539_v34  ;;  %v2620_v53 = vadd.f32 %v2619_v31, %v2618_v32  ;;  %v181_v31 = vld [vmem:[%s17520_s17 + $0x70] sm:$0xff] }
 0x270   :  { %v2634_v17 = vadd.f32 %v2633_v11, %v2632_v37  ;;  %v2629_v38 = vadd.f32 %v2628_v30, %v2627_v55  ;;  %11393 = vmatprep.subr.mxu1 %v230_v60  ;;  %v191_v60 = vld [vmem:[%s17520_s17 + $0xc0] sm:$0xff] }
 0x271   :  { %12144 = vrcp.f32 %v2620_v53  ;;  %11394 = vmatpush3.msra.mxu1 %v214_v39  ;;  %v190_v39 = vld [vmem:[%s17520_s17 + $0xb8] sm:$0xff] }
 0x272   :  { %v13800_v18 = vpop.eup %12132  ;;  %10888 = vmatmul.mubr.msk.f32.gmra.mxu0 %vm2272_vm1, %v2680_v4  ;;  %10920 = vmatmul.mubr.msk.f32.gmra.mxu1 %vm2272_vm1, %v2680_v4  ;;  %v2635_v12 = vrot.slane %v2634_v17, 2  ;;  %12146 = vrcp.f32 %v2629_v38  ;;  %v211_v38 = vld [vmem:[%s17520_s17 + $0x160] sm:$0xff] }
 0x273   :  { %v13805_v16 = vpop.eup %12134  ;;  %v2639_v47 = vsel %vm2272_vm1, %v13800_v18, 0.0  ;;  %2961 = vmatprep.mubr.f32.mxu0 %v17539_v34  ;;  %3218 = vmatprep.mubr.f32.mxu1 %v17539_v34 }
 0x274   :  { %v2640_v52 = vsel %vm2272_vm1, %v13805_v16, 0.0  ;;  %v12137_v54 = vpop.eup %12136  ;;  %v2636_v40 = vadd.f32 %v2635_v12, %v2634_v17 }
 0x275   :  { %v2641_v8 = vadd.f32 %v2640_v52, %v2639_v47  ;;  %v2685_v62 = vmul.f32 %v12137_v54, %v13662_v15  ;;  %v2686_v58 = vmul.f32 %v12137_v54, %v13669_v7  ;;  %v182_v7 = vld [vmem:[%s17520_s17 + $0x78] sm:$0xff]  ;;  %v196_v54 = vld [vmem:[%s17520_s17 + $0xe8] sm:$0xff] }
 0x276   :  { %10889 = vmatmul.mubr.msk.f32.gmra.mxu0 %vm2272_vm1, %v2682_v2  ;;  %10921 = vmatmul.mubr.msk.f32.gmra.mxu1 %vm2272_vm1, %v2682_v2  ;;  %v2637_v49 = vrot.slane %v2636_v40, 1 }
 0x277   :  { %2967 = vmatprep.mubr.f32.mxu0 %v17539_v34  ;;  %3224 = vmatprep.mubr.f32.mxu1 %v17539_v34  ;;  %v2642_v1 = vrot.slane %v2641_v8, 4 }
 0x278   :  { %11356 = vmatpush3.msra.mxu0 %v182_v7  ;;  %v2638_v57 = vadd.f32 %v2637_v49, %v2636_v40  ;;  %v225_v49 = vld [vmem:[%s17520_s17 + $0x1d0] sm:$0xff]  ;;  %v208_v7 = vld [vmem:[%s17520_s17 + $0x148] sm:$0xff] }
 0x279   :  { %v13821_v48 = vpop.eup %12138  ;;  %v2643_v13 = vadd.f32 %v2642_v1, %v2641_v8  ;;  %11357 = vmatprep.subr.mxu0 %v197_v0  ;;  %v173_v0 = vld [vmem:[%s17520_s17 + $0x30] sm:$0xff] }
 0x27a   :  { %10890 = vmatmul.mubr.msk.f32.gmra.mxu0 %vm2272_vm1, %v2683_v41  ;;  %10922 = vmatmul.mubr.msk.f32.gmra.mxu1 %vm2272_vm1, %v2683_v41  ;;  %v13825_v21 = vpop.eup %12140  ;;  %v2648_v33 = vsel %vm2272_vm1, %v13821_v48, 0.0  ;;  %12148 = vrcp.f32 %v2638_v57  ;;  %v180_v41 = vld [vmem:[%s17520_s17 + $0x68] sm:$0xff]  ;;  %v207_v57 = vld [vmem:[%s17520_s17 + $0x140] sm:$0xff] }
 0x27b   :  { %2973 = vmatprep.mubr.f32.mxu0 %v17539_v34  ;;  %3230 = vmatprep.mubr.f32.mxu1 %v17539_v34  ;;  %v2649_v63 = vsel %vm2272_vm1, %v13825_v21, 0.0  ;;  %v12143_v15 = vpop.eup %12142  ;;  %v2644_v10 = vrot.slane %v2643_v13, 2 }
 0x27c   :  { %v2650_v14 = vadd.f32 %v2649_v63, %v2648_v33  ;;  %v2688_v51 = vmul.f32 %v12143_v15, %v13711_v22  ;;  %v2689_v37 = vmul.f32 %v12143_v15, %v13715_v56  ;;  %v229_v56 = vld [vmem:[%s17520_s17 + $0x1f0] sm:$0xff]  ;;  %11358 = vmatpush3.msra.mxu0 %v181_v31  ;;  %v195_v33 = vld [vmem:[%s17520_s17 + $0xe0] sm:$0xff]  ;;  %v188_v31 = vld [vmem:[%s17520_s17 + $0xa8] sm:$0xff] }
 0x27d   :  { %v2645_v3 = vadd.f32 %v2644_v10, %v2643_v13  ;;  %11395 = vmatprep.subr.mxu1 %v229_v56  ;;  %11359 = vmatprep.subr.mxu0 %v196_v54  ;;  %v179_v63 = vld [vmem:[%s17520_s17 + $0x60] sm:$0xff]  ;;  %v178_v13 = vld [vmem:[%s17520_s17 + $0x58] sm:$0xff]  ;;  %v193_v15 = vld [vmem:[%s17520_s17 + $0xd0] sm:$0xff] }
 0x27e   :  { %10891 = vmatmul.mubr.msk.f32.gmra.mxu0 %vm2272_vm1, %v2685_v62  ;;  %10923 = vmatmul.mubr.msk.f32.gmra.mxu1 %vm2272_vm1, %v2685_v62  ;;  %v2651_v20 = vrot.slane %v2650_v14, 4  ;;  %v12145_v32 = vpop.eup %12144  ;;  %v209_v10 = vld [vmem:[%s17520_s17 + $0x150] sm:$0xff] }
 0x27f   :  { %2979 = vmatprep.mubr.f32.mxu0 %v17539_v34  ;;  %3236 = vmatprep.mubr.f32.mxu1 %v17539_v34  ;;  %v2646_v50 = vrot.slane %v2645_v3, 1  ;;  %v2691_v4 = vmul.f32 %v12145_v32, %v13731_v25  ;;  %v213_v25 = vld [vmem:[%s17520_s17 + $0x170] sm:$0xff]  ;;  %v12147_v11 = vpop.eup %12146  ;;  %v2692_v52 = vmul.f32 %v12145_v32, %v13738_v36  ;;  %v222_v32 = vld [vmem:[%s17520_s17 + $0x1b8] sm:$0xff] }
 0x280   :  { %v2652_v22 = vadd.f32 %v2651_v20, %v2650_v14  ;;  %11396 = vmatpush3.msra.mxu1 %v213_v25  ;;  %v2694_v17 = vmul.f32 %v12147_v11, %v13760_v46  ;;  %v2695_v53 = vmul.f32 %v12147_v11, %v13762_v59  ;;  %v228_v59 = vld [vmem:[%s17520_s17 + $0x1e8] sm:$0xff]  ;;  %11360 = vmatpush3.msra.mxu0 %v180_v41  ;;  %v226_v14 = vld [vmem:[%s17520_s17 + $0x1d8] sm:$0xff]  ;;  %v205_v56 = vld [vmem:[%s17520_s17 + $0x130] sm:$0xff] }
 0x281   :  { %v2647_v47 = vadd.f32 %v2646_v50, %v2645_v3  ;;  %11397 = vmatprep.subr.mxu1 %v228_v59  ;;  %11361 = vmatprep.subr.mxu0 %v195_v33  ;;  %v192_v20 = vld [vmem:[%s17520_s17 + $0xc8] sm:$0xff]  ;;  %v223_v3 = vld [vmem:[%s17520_s17 + $0x1c0] sm:$0xff]  ;;  %v206_v50 = vld [vmem:[%s17520_s17 + $0x138] sm:$0xff] }
 0x282   :  { %10892 = vmatmul.mubr.msk.f32.gmra.mxu0 %vm2272_vm1, %v2686_v58  ;;  %10924 = vmatmul.mubr.msk.f32.gmra.mxu1 %vm2272_vm1, %v2686_v58  ;;  %v2653_v5 = vrot.slane %v2652_v22, 2  ;;  %v177_v58 = vld [vmem:[%s17520_s17 + $0x50] sm:$0xff]  ;;  %v220_v25 = vld [vmem:[%s17520_s17 + $0x1a8] sm:$0xff]  ;;  %v215_v33 = vld [vmem:[%s17520_s17 + $0x180] sm:$0xff] }
 0x283   :  { %2985 = vmatprep.mubr.f32.mxu0 %v17539_v34  ;;  %3242 = vmatprep.mubr.f32.mxu1 %v17539_v34  ;;  %12150 = vrcp.f32 %v2647_v47  ;;  %v172_v11 = vld [vmem:[%s17520_s17 + $0x28] sm:$0xff]  ;;  %v187_v47 = vld [vmem:[%s17520_s17 + $0xa0] sm:$0xff]  ;;  %v185_v54 = vld [vmem:[%s17520_s17 + $0x90] sm:$0xff] }
 0x284   :  { %v2654_v2 = vadd.f32 %v2653_v5, %v2652_v22  ;;  %11362 = vmatpush3.msra.mxu0 %v179_v63  ;;  %v175_v22 = vld [vmem:[%s17520_s17 + $0x40] sm:$0xff]  ;;  %v189_v5 = vld [vmem:[%s17520_s17 + $0xb0] sm:$0xff] }
 0x285   :  { %v217_v41 = vld [vmem:[%s17520_s17 + $0x190] sm:$0xff]  ;;  %v199_v63 = vld [vmem:[%s17520_s17 + $0x100] sm:$0xff] }
 0x286   :  { %10893 = vmatmul.mubr.msk.f32.gmra.mxu0 %vm2272_vm1, %v2688_v51  ;;  %10925 = vmatmul.mubr.msk.f32.gmra.mxu1 %vm2272_vm1, %v2688_v51  ;;  %v2655_v55 = vrot.slane %v2654_v2, 1  ;;  %v176_v51 = vld [vmem:[%s17520_s17 + $0x48] sm:$0xff]  ;;  %v169_v59 = vld [vmem:[%s17520_s17 + $0x10] sm:$0xff] }
 0x287   :  { %2991 = vmatprep.mubr.f32.mxu0 %v17539_v34  ;;  %3248 = vmatprep.mubr.f32.mxu1 %v17539_v34  ;;  %v12149_v36 = vpop.eup %12148 }
 0x288   :  { %v2656_v8 = vadd.f32 %v2655_v55, %v2654_v2  ;;  %v2697_v46 = vmul.f32 %v12149_v36, %v13780_v19  ;;  %v212_v19 = vld [vmem:[%s17520_s17 + $0x168] sm:$0xff]  ;;  %v2698_v12 = vmul.f32 %v12149_v36, %v13784_v29  ;;  %v171_v55 = vld [vmem:[%s17520_s17 + $0x20] sm:$0xff]  ;;  %v218_v36 = vld [vmem:[%s17520_s17 + $0x198] sm:$0xff] }
 0x289   :  { %11398 = vmatpush3.msra.mxu1 %v212_v19  ;;  %v204_v2 = vld [vmem:[%s17520_s17 + $0x128] sm:$0xff]  ;;  %v201_v19 = vld [vmem:[%s17520_s17 + $0x110] sm:$0xff] }
 0x28a   :  { %10894 = vmatmul.mubr.msk.f32.gmra.mxu0 %vm2272_vm1, %v2689_v37  ;;  %10926 = vmatmul.mubr.msk.f32.gmra.mxu1 %vm2272_vm1, %v2689_v37  ;;  %12152 = vrcp.f32 %v2656_v8  ;;  %v174_v37 = vld [vmem:[%s17520_s17 + $0x38] sm:$0xff] }
 0x28b   :  { %2997 = vmatprep.mubr.f32.mxu0 %v17539_v34  ;;  %3254 = vmatprep.mubr.f32.mxu1 %v17539_v34  ;;  %v186_v8 = vld [vmem:[%s17520_s17 + $0x98] sm:$0xff] }
 0x28e   :  { %10895 = vmatmul.mubr.msk.f32.gmra.mxu0 %vm2272_vm1, %v2691_v4  ;;  %10927 = vmatmul.mubr.msk.f32.gmra.mxu1 %vm2272_vm1, %v2691_v4  ;;  %v221_v4 = vld [vmem:[%s17520_s17 + $0x1b0] sm:$0xff] }
 0x28f   :  { %3003 = vmatprep.mubr.f32.mxu0 %v17539_v34  ;;  %3260 = vmatprep.mubr.f32.mxu1 %v17539_v34 }
 0x290   :  { %v12151_v30 = vpop.eup %12150 }
 0x291   :  { %v2700_v1 = vmul.f32 %v12151_v30, %v13800_v18  ;;  %v2701_v29 = vmul.f32 %v12151_v30, %v13805_v16  ;;  %v227_v18 = vld [vmem:[%s17520_s17 + $0x1e0] sm:$0xff]  ;;  %v184_v30 = vld [vmem:[%s17520_s17 + $0x88] sm:$0xff] }
 0x292   :  { %10896 = vmatmul.mubr.msk.f32.gmra.mxu0 %vm2272_vm1, %v2692_v52  ;;  %10928 = vmatmul.mubr.msk.f32.gmra.mxu1 %vm2272_vm1, %v2692_v52  ;;  %v219_v52 = vld [vmem:[%s17520_s17 + $0x1a0] sm:$0xff] }
 0x293   :  { %3009 = vmatprep.mubr.f32.mxu0 %v17539_v34  ;;  %3266 = vmatprep.mubr.f32.mxu1 %v17539_v34 }
 0x294   :  { %11399 = vmatprep.subr.mxu1 %v227_v18  ;;  %v167_v18 = vld [vmem:[%s17520_s17] sm:$0xff] }
 0x295   :  { %11400 = vmatpush3.msra.mxu1 %v211_v38 }
 0x296   :  { %10897 = vmatmul.mubr.msk.f32.gmra.mxu0 %vm2272_vm1, %v2694_v17  ;;  %10929 = vmatmul.mubr.msk.f32.gmra.mxu1 %vm2272_vm1, %v2694_v17  ;;  %v203_v17 = vld [vmem:[%s17520_s17 + $0x120] sm:$0xff] }
 0x297   :  { %3015 = vmatprep.mubr.f32.mxu0 %v17539_v34  ;;  %3272 = vmatprep.mubr.f32.mxu1 %v17539_v34  ;;  %v12153_v62 = vpop.eup %12152 }
 0x298   :  { %v2703_v16 = vmul.f32 %v12153_v62, %v13821_v48  ;;  %v2704_v40 = vmul.f32 %v12153_v62, %v13825_v21  ;;  %v194_v48 = vld [vmem:[%s17520_s17 + $0xd8] sm:$0xff]  ;;  %11401 = vmatprep.subr.mxu1 %v226_v14  ;;  %v200_v62 = vld [vmem:[%s17520_s17 + $0x108] sm:$0xff] }
 0x299   :  { %11363 = vmatprep.subr.mxu0 %v194_v48  ;;  %v210_v21 = vld [vmem:[%s17520_s17 + $0x158] sm:$0xff] }
 0x29a   :  { %10898 = vmatmul.mubr.msk.f32.gmra.mxu0 %vm2272_vm1, %v2695_v53  ;;  %10930 = vmatmul.mubr.msk.f32.gmra.mxu1 %vm2272_vm1, %v2695_v53  ;;  %v170_v53 = vld [vmem:[%s17520_s17 + $0x18] sm:$0xff] }
 0x29b   :  { %3021 = vmatprep.mubr.f32.mxu0 %v17539_v34  ;;  %3278 = vmatprep.mubr.f32.mxu1 %v17539_v34 }
 0x29c   :  { %11364 = vmatpush3.msra.mxu0 %v178_v13  ;;  %11402 = vmatpush3.msra.mxu1 %v210_v21 }
 0x29d   :  { %11365 = vmatprep.subr.mxu0 %v193_v15  ;;  %11403 = vmatprep.subr.mxu1 %v225_v49 }
 0x29e   :  { %10899 = vmatmul.mubr.msk.f32.gmra.mxu0 %vm2272_vm1, %v2697_v46  ;;  %10931 = vmatmul.mubr.msk.f32.gmra.mxu1 %vm2272_vm1, %v2697_v46  ;;  %v202_v46 = vld [vmem:[%s17520_s17 + $0x118] sm:$0xff] }
 0x29f   :  { %3027 = vmatprep.mubr.f32.mxu0 %v17539_v34  ;;  %3284 = vmatprep.mubr.f32.mxu1 %v17539_v34 }
 0x2a0   :  { %11366 = vmatpush3.msra.mxu0 %v177_v58  ;;  %11404 = vmatpush3.msra.mxu1 %v209_v10 }
 0x2a1   :  { %11367 = vmatprep.subr.mxu0 %v192_v20  ;;  %11405 = vmatprep.subr.mxu1 %v224_v45 }
 0x2a2   :  { %10900 = vmatmul.mubr.msk.f32.gmra.mxu0 %vm2272_vm1, %v2698_v12  ;;  %10932 = vmatmul.mubr.msk.f32.gmra.mxu1 %vm2272_vm1, %v2698_v12  ;;  %v216_v12 = vld [vmem:[%s17520_s17 + $0x188] sm:$0xff] }
 0x2a3   :  { %3033 = vmatprep.mubr.f32.mxu0 %v17539_v34  ;;  %3290 = vmatprep.mubr.f32.mxu1 %v17539_v34 }
 0x2a4   :  { %11368 = vmatpush3.msra.mxu0 %v176_v51  ;;  %11406 = vmatpush3.msra.mxu1 %v208_v7 }
 0x2a5   :  { %11369 = vmatprep.subr.mxu0 %v191_v60  ;;  %11407 = vmatprep.subr.mxu1 %v223_v3 }
 0x2a6   :  { %10901 = vmatmul.mubr.msk.f32.gmra.mxu0 %vm2272_vm1, %v2700_v1  ;;  %10933 = vmatmul.mubr.msk.f32.gmra.mxu1 %vm2272_vm1, %v2700_v1  ;;  %v168_v1 = vld [vmem:[%s17520_s17 + $0x8] sm:$0xff] }
 0x2a7   :  { %3039 = vmatprep.mubr.f32.mxu0 %v17539_v34  ;;  %3296 = vmatprep.mubr.f32.mxu1 %v17539_v34 }
 0x2a8   :  { %11370 = vmatpush3.msra.mxu0 %v175_v22  ;;  %11408 = vmatpush3.msra.mxu1 %v207_v57 }
 0x2a9   :  { %11371 = vmatprep.subr.mxu0 %v190_v39  ;;  %11409 = vmatprep.subr.mxu1 %v222_v32 }
 0x2aa   :  { %10902 = vmatmul.mubr.msk.f32.gmra.mxu0 %vm2272_vm1, %v2701_v29  ;;  %10934 = vmatmul.mubr.msk.f32.gmra.mxu1 %vm2272_vm1, %v2701_v29  ;;  %v183_v29 = vld [vmem:[%s17520_s17 + $0x80] sm:$0xff] }
 0x2ab   :  { %3045 = vmatprep.mubr.f32.mxu0 %v17539_v34  ;;  %3302 = vmatprep.mubr.f32.mxu1 %v17539_v34 }
 0x2ac   :  { %11372 = vmatpush3.msra.mxu0 %v174_v37  ;;  %11410 = vmatpush3.msra.mxu1 %v206_v50 }
 0x2ad   :  { %11373 = vmatprep.subr.mxu0 %v189_v5  ;;  %11411 = vmatprep.subr.mxu1 %v221_v4 }
 0x2ae   :  { %10903 = vmatmul.mubr.msk.f32.gmra.mxu0 %vm2272_vm1, %v2703_v16  ;;  %10935 = vmatmul.mubr.msk.f32.gmra.mxu1 %vm2272_vm1, %v2703_v16 }
 0x2af   :  { %3051 = vmatprep.mubr.f32.mxu0 %v17539_v34  ;;  %3308 = vmatprep.mubr.f32.mxu1 %v17539_v34 }
 0x2b0   :  { %11374 = vmatpush3.msra.mxu0 %v173_v0  ;;  %11412 = vmatpush3.msra.mxu1 %v205_v56 }
 0x2b1   :  { %11375 = vmatprep.subr.mxu0 %v188_v31  ;;  %11413 = vmatprep.subr.mxu1 %v220_v25 }
 0x2b2   :  { %10904 = vmatmul.mubr.msk.f32.gmra.mxu0 %vm2272_vm1, %v2704_v40  ;;  %10936 = vmatmul.mubr.msk.f32.gmra.mxu1 %vm2272_vm1, %v2704_v40 }
 0x2b3   :  { %11376 = vmatpush3.msra.mxu0 %v172_v11  ;;  %11414 = vmatpush3.msra.mxu1 %v204_v2 }
 0x2b4   :  { %11377 = vmatprep.subr.mxu0 %v187_v47  ;;  %11415 = vmatprep.subr.mxu1 %v219_v52 }
 0x2b5   :  { %11378 = vmatpush3.msra.mxu0 %v171_v55  ;;  %11416 = vmatpush3.msra.mxu1 %v203_v17 }
 0x2b6   :  { %11379 = vmatprep.subr.mxu0 %v186_v8  ;;  %11417 = vmatprep.subr.mxu1 %v218_v36 }
 0x2b7   :  { %11380 = vmatpush3.msra.mxu0 %v170_v53  ;;  %11418 = vmatpush3.msra.mxu1 %v202_v46 }
 0x2b8   :  { %11381 = vmatprep.subr.mxu0 %v185_v54  ;;  %11419 = vmatprep.subr.mxu1 %v217_v41 }
 0x2b9   :  { %11382 = vmatpush3.msra.mxu0 %v169_v59  ;;  %11420 = vmatpush3.msra.mxu1 %v201_v19 }
 0x2ba   :  { %11383 = vmatprep.subr.mxu0 %v184_v30  ;;  %11421 = vmatprep.subr.mxu1 %v216_v12 }
 0x2bb   :  { %11384 = vmatpush3.msra.mxu0 %v168_v1  ;;  %11422 = vmatpush3.msra.mxu1 %v200_v62 }
 0x2bc   :  { %11385 = vmatprep.subr.mxu0 %v183_v29  ;;  %11423 = vmatprep.subr.mxu1 %v215_v33 }
 0x2bd   :  { %11386 = vmatpush3.msra.mxu0 %v167_v18  ;;  %11424 = vmatpush3.msra.mxu1 %v199_v63 }
 0x2de   :  { %v2867_v38 = vpop.f32.mrf.mxu0  ;;  %v3124_v16 = vpop.f32.mrf.mxu1 }
 0x2df   :  { %v3315_v10 = vmul.f32 %v2867_v38, %v13004_v23  ;;  %v3317_v20 = vmul.f32 %v3124_v16, %v13022_v35 }
 0x2e0   :  { %v2869_v40 = vpop.f32.mrf.mxu0  ;;  %v3126_v48 = vpop.f32.mrf.mxu1 }
 0x2e1   :  { %v3316_v45 = vmul.f32 %v2869_v40, %v13029_v43  ;;  %v3318_v50 = vmul.f32 %v3126_v48, %v13031_v44 }
 0x2e2   :  { %v2873_v13 = vpop.f32.mrf.mxu0  ;;  %v3130_v14 = vpop.f32.mrf.mxu1 }
 0x2e3   :  { %v3319_v15 = vmul.f32 %v2873_v13, %v13006_v24  ;;  %v3321_v58 = vmul.f32 %v3130_v14, %v13008_v26 }
 0x2e4   :  { %v2875_v21 = vpop.f32.mrf.mxu0  ;;  %v3132_v49 = vpop.f32.mrf.mxu1 }
 0x2e5   :  { %v3320_v51 = vmul.f32 %v2875_v21, %v13010_v27  ;;  %v3443_v7 = vadd.f32 %v3319_v15, %v3315_v10  ;;  %v3457_v60 = vadd.f32 %v3321_v58, %v3317_v20  ;;  %v3322_v39 = vmul.f32 %v3132_v49, %v13012_v28 }
 0x2e7   :  { %v3450_v57 = vadd.f32 %v3320_v51, %v3316_v45  ;;  %v3444_v5 = vrot.slane %v3443_v7, 4  ;;  %v3458_v4 = vrot.slane %v3457_v60, 4  ;;  %v3464_v52 = vadd.f32 %v3322_v39, %v3318_v50 }
 0x2e9   :  { %v3451_v47 = vrot.slane %v3450_v57, 4  ;;  %v3445_v30 = vadd.f32 %v3444_v5, %v3443_v7  ;;  %v3459_v12 = vadd.f32 %v3458_v4, %v3457_v60  ;;  %v3465_v63 = vrot.slane %v3464_v52, 4 }
 0x2eb   :  { %v3452_v18 = vadd.f32 %v3451_v47, %v3450_v57  ;;  %v3446_v13 = vrot.slane %v3445_v30, 2  ;;  %v3460_v14 = vrot.slane %v3459_v12, 2  ;;  %v3466_v60 = vadd.f32 %v3465_v63, %v3464_v52 }
 0x2ed   :  { %v2879_v3 = vpop.f32.mrf.mxu0  ;;  %v3136_v22 = vpop.f32.mrf.mxu1  ;;  %v3453_v7 = vrot.slane %v3452_v18, 2  ;;  %v3447_v50 = vadd.f32 %v3446_v13, %v3445_v30  ;;  %v3461_v5 = vadd.f32 %v3460_v14, %v3459_v12 }
 0x2ee   :  { %v3323_v31 = vmul.f32 %v2879_v3, %v13004_v23  ;;  %v3325_v25 = vmul.f32 %v3136_v22, %v13022_v35 }
 0x2ef   :  { %v2881_v32 = vpop.f32.mrf.mxu0  ;;  %v3138_v37 = vpop.f32.mrf.mxu1 }
 0x2f0   :  { %v3324_v54 = vmul.f32 %v2881_v32, %v13029_v43  ;;  %v3326_v41 = vmul.f32 %v3138_v37, %v13031_v44 }
 0x2f1   :  { %v2885_v0 = vpop.f32.mrf.mxu0  ;;  %v3142_v56 = vpop.f32.mrf.mxu1 }
 0x2f2   :  { %v3327_v11 = vmul.f32 %v2885_v0, %v13006_v24  ;;  %v3329_v2 = vmul.f32 %v3142_v56, %v13008_v26 }
 0x2f3   :  { %v2887_v55 = vpop.f32.mrf.mxu0  ;;  %v3144_v17 = vpop.f32.mrf.mxu1 }
 0x2f4   :  { %v3471_v8 = vadd.f32 %v3327_v11, %v3323_v31  ;;  %v3485_v36 = vadd.f32 %v3329_v2, %v3325_v25  ;;  %v3328_v53 = vmul.f32 %v2887_v55, %v13010_v27  ;;  %v3330_v46 = vmul.f32 %v3144_v17, %v13012_v28 }
 0x2f5   :  { %v3454_v25 = vadd.f32 %v3453_v7, %v3452_v18  ;;  %v3467_v11 = vrot.slane %v3466_v60, 2 }
 0x2f6   :  { %v2891_v59 = vpop.f32.mrf.mxu0  ;;  %v3148_v19 = vpop.f32.mrf.mxu1  ;;  %v3478_v1 = vadd.f32 %v3328_v53, %v3324_v54  ;;  %v3492_v62 = vadd.f32 %v3330_v46, %v3326_v41  ;;  %v3472_v38 = vrot.slane %v3471_v8, 4  ;;  %v3486_v16 = vrot.slane %v3485_v36, 4 }
 0x2f7   :  { %v3331_v21 = vmul.f32 %v2891_v59, %v13004_v23  ;;  %v3333_v15 = vmul.f32 %v3148_v19, %v13022_v35  ;;  %v3462_v53 = vrot.slane %v3461_v5, 1  ;;  %v3455_v41 = vrot.slane %v3454_v25, 1 }
 0x2f8   :  { %v2893_v29 = vpop.f32.mrf.mxu0  ;;  %v3150_v33 = vpop.f32.mrf.mxu1  ;;  %v3479_v58 = vrot.slane %v3478_v1, 4  ;;  %v3493_v49 = vrot.slane %v3492_v62, 4  ;;  %v3473_v3 = vadd.f32 %v3472_v38, %v3471_v8  ;;  %v3487_v22 = vadd.f32 %v3486_v16, %v3485_v36 }
 0x2f9   :  { %v3332_v56 = vmul.f32 %v2893_v29, %v13029_v43  ;;  %v3334_v31 = vmul.f32 %v3150_v33, %v13031_v44  ;;  %v3448_v36 = vrot.slane %v3447_v50, 1  ;;  %v14114_v59 = vadd.f32 %v3467_v11, %v3466_v60 }
 0x2fa   :  { %v2897_v40 = vpop.f32.mrf.mxu0  ;;  %v3154_v48 = vpop.f32.mrf.mxu1  ;;  %v3480_v4 = vadd.f32 %v3479_v58, %v3478_v1  ;;  %v3494_v0 = vadd.f32 %v3493_v49, %v3492_v62  ;;  %v3474_v2 = vrot.slane %v3473_v3, 2  ;;  %v3488_v47 = vrot.slane %v3487_v22, 2 }
 0x2fb   :  { %v3335_v10 = vmul.f32 %v2897_v40, %v13006_v24  ;;  %v3337_v20 = vmul.f32 %v3154_v48, %v13008_v26  ;;  %v3449_v63 = vadd.f32 %v3448_v36, %v3447_v50  ;;  %v3463_v38 = vadd.f32 %v3462_v53, %v3461_v5 }
 0x2fc   :  { %v2899_v51 = vpop.f32.mrf.mxu0  ;;  %v3156_v45 = vpop.f32.mrf.mxu1  ;;  %v3481_v46 = vrot.slane %v3480_v4, 2  ;;  %v3495_v54 = vrot.slane %v3494_v0, 2  ;;  %v3475_v19 = vadd.f32 %v3474_v2, %v3473_v3  ;;  %v3489_v30 = vadd.f32 %v3488_v47, %v3487_v22 }
 0x2fd   :  { %v3499_v57 = vadd.f32 %v3335_v10, %v3331_v21  ;;  %v3513_v39 = vadd.f32 %v3337_v20, %v3333_v15  ;;  %v3336_v32 = vmul.f32 %v2899_v51, %v13010_v27  ;;  %v3338_v37 = vmul.f32 %v3156_v45, %v13012_v28 }
 0x2fe   :  { %v3482_v16 = vadd.f32 %v3481_v46, %v3480_v4  ;;  %v3496_v40 = vadd.f32 %v3495_v54, %v3494_v0  ;;  %v3456_v14 = vadd.f32 %v3455_v41, %v3454_v25  ;;  %v3469_v21 = vrot.slane %v14114_v59, 1 }
 0x2ff   :  { %v3500_v52 = vrot.slane %v3499_v57, 4  ;;  %v3514_v55 = vrot.slane %v3513_v39, 4  ;;  %v3506_v17 = vadd.f32 %v3336_v32, %v3332_v56  ;;  %v3520_v8 = vadd.f32 %v3338_v37, %v3334_v31 }
 0x300   :  { %v3476_v15 = vrot.slane %v3475_v19, 1  ;;  %v3490_v58 = vrot.slane %v3489_v30, 1  ;;  %v3497_v32 = vrot.slane %v3496_v40, 1 }
 0x301   :  { %v3501_v12 = vadd.f32 %v3500_v52, %v3499_v57  ;;  %v3515_v1 = vadd.f32 %v3514_v55, %v3513_v39  ;;  %v3507_v62 = vrot.slane %v3506_v17, 4  ;;  %v3521_v29 = vrot.slane %v3520_v8, 4 }
 0x302   :  { %v3483_v39 = vrot.slane %v3482_v16, 1  ;;  %v3477_v53 = vadd.f32 %v3476_v15, %v3475_v19  ;;  %v3491_v46 = vadd.f32 %v3490_v58, %v3489_v30  ;;  %v3498_v41 = vadd.f32 %v3497_v32, %v3496_v40 }
 0x303   :  { %v3502_v49 = vrot.slane %v3501_v12, 2  ;;  %v3516_v10 = vrot.slane %v3515_v1, 2  ;;  %v3508_v20 = vadd.f32 %v3507_v62, %v3506_v17  ;;  %v3522_v51 = vadd.f32 %v3521_v29, %v3520_v8 }
 0x304   :  { %v3484_v54 = vadd.f32 %v3483_v39, %v3482_v16  ;;  %v3470_v19 = vadd.f32 %v3469_v21, %v14114_v59  ;;  %v3963_v30 = vsel %vm3962_vm2, %v3477_v53, %v3449_v63  ;;  %v3983_v16 = vsel %vm3962_vm2, %v3491_v46, %v3463_v38 }
 0x305   :  { %v3503_v11 = vadd.f32 %v3502_v49, %v3501_v12  ;;  %v3517_v2 = vadd.f32 %v3516_v10, %v3515_v1  ;;  %v3509_v47 = vrot.slane %v3508_v20, 2  ;;  %v3523_v52 = vrot.slane %v3522_v51, 2 }
 0x306   :  { %v2903_v33 = vpop.f32.mrf.mxu0  ;;  %v3160_v18 = vpop.f32.mrf.mxu1  ;;  %v3976_v40 = vsel %vm3962_vm2, %v3484_v54, %v3456_v14  ;;  %v3990_v39 = vsel %vm3962_vm2, %v3498_v41, %v3470_v19 }
 0x307   :  { %v3339_v60 = vmul.f32 %v2903_v33, %v13004_v23  ;;  %v3341_v3 = vmul.f32 %v3160_v18, %v13022_v35  ;;  %v3524_v12 = vadd.f32 %v3523_v52, %v3522_v51 }
 0x308   :  { %v2905_v48 = vpop.f32.mrf.mxu0  ;;  %v3162_v13 = vpop.f32.mrf.mxu1 }
 0x309   :  { %v3340_v37 = vmul.f32 %v2905_v48, %v13029_v43  ;;  %v3342_v50 = vmul.f32 %v3162_v13, %v13031_v44  ;;  %v3504_v48 = vrot.slane %v3503_v11, 1  ;;  %v3518_v13 = vrot.slane %v3517_v2, 1 }
 0x30a   :  { %v2909_v45 = vpop.f32.mrf.mxu0  ;;  %v3166_v7 = vpop.f32.mrf.mxu1 }
 0x30b   :  { %v3343_v22 = vmul.f32 %v2909_v45, %v13006_v24  ;;  %v3345_v57 = vmul.f32 %v3166_v7, %v13008_v26  ;;  %v3510_v45 = vadd.f32 %v3509_v47, %v3508_v20  ;;  %v3505_v32 = vadd.f32 %v3504_v48, %v3503_v11 }
 0x30c   :  { %v2911_v5 = vpop.f32.mrf.mxu0  ;;  %v3168_v4 = vpop.f32.mrf.mxu1 }
 0x30d   :  { %v3527_v0 = vadd.f32 %v3343_v22, %v3339_v60  ;;  %v3541_v56 = vadd.f32 %v3345_v57, %v3341_v3  ;;  %v3344_v31 = vmul.f32 %v2911_v5, %v13010_v27  ;;  %v3346_v25 = vmul.f32 %v3168_v4, %v13012_v28 }
 0x30e   :  { %v3525_v5 = vrot.slane %v3524_v12, 1 }
 0x30f   :  { %v3528_v55 = vrot.slane %v3527_v0, 4  ;;  %v3542_v17 = vrot.slane %v3541_v56, 4  ;;  %v3534_v8 = vadd.f32 %v3344_v31, %v3340_v37  ;;  %v3548_v36 = vadd.f32 %v3346_v25, %v3342_v50 }
 0x310   :  { %v3519_v37 = vadd.f32 %v3518_v13, %v3517_v2  ;;  %v3511_v50 = vrot.slane %v3510_v45, 1  ;;  %v3526_v54 = vadd.f32 %v3525_v5, %v3524_v12  ;;  %v3965_v13 = vsel %vm3964_vm3, %v3505_v32, %v3963_v30 }
 0x311   :  { %v3529_v62 = vadd.f32 %v3528_v55, %v3527_v0  ;;  %v3543_v29 = vadd.f32 %v3542_v17, %v3541_v56  ;;  %v3535_v33 = vrot.slane %v3534_v8, 4  ;;  %v3549_v18 = vrot.slane %v3548_v36, 4 }
 0x312   :  { %v3512_v46 = vadd.f32 %v3511_v50, %v3510_v45  ;;  %v3991_v30 = vsel %vm3964_vm3, %v3526_v54, %v3990_v39 }
 0x313   :  { %v3530_v1 = vrot.slane %v3529_v62, 2  ;;  %v3544_v49 = vrot.slane %v3543_v29, 2  ;;  %v3536_v10 = vadd.f32 %v3535_v33, %v3534_v8  ;;  %v3550_v7 = vadd.f32 %v3549_v18, %v3548_v36  ;;  %v2915_v60 = vpop.f32.mrf.mxu0  ;;  %v3172_v3 = vpop.f32.mrf.mxu1 }
 0x314   :  { %v3347_v14 = vmul.f32 %v2915_v60, %v13004_v23  ;;  %v3349_v0 = vmul.f32 %v3172_v3, %v13022_v35 }
 0x315   :  { %v3531_v15 = vadd.f32 %v3530_v1, %v3529_v62  ;;  %v3545_v58 = vadd.f32 %v3544_v49, %v3543_v29  ;;  %v3537_v22 = vrot.slane %v3536_v10, 2  ;;  %v3551_v20 = vrot.slane %v3550_v7, 2  ;;  %v2917_v51 = vpop.f32.mrf.mxu0  ;;  %v3174_v57 = vpop.f32.mrf.mxu1 }
 0x316   :  { %v3348_v11 = vmul.f32 %v2917_v51, %v13029_v43  ;;  %v3350_v2 = vmul.f32 %v3174_v57, %v13031_v44  ;;  %v3984_v1 = vsel %vm3964_vm3, %v3519_v37, %v3983_v16  ;;  %v3977_v51 = vsel %vm3964_vm3, %v3512_v46, %v3976_v40 }
 0x317   :  { %v3532_v59 = vrot.slane %v3531_v15, 1  ;;  %v3546_v21 = vrot.slane %v3545_v58, 1  ;;  %v3538_v63 = vadd.f32 %v3537_v22, %v3536_v10  ;;  %v2921_v4 = vpop.f32.mrf.mxu0  ;;  %v3178_v38 = vpop.f32.mrf.mxu1  ;;  %v3552_v47 = vadd.f32 %v3551_v20, %v3550_v7 }
 0x318   :  { %v3351_v56 = vmul.f32 %v2921_v4, %v13006_v24  ;;  %v3353_v31 = vmul.f32 %v3178_v38, %v13008_v26 }
 0x319   :  { %v3539_v25 = vrot.slane %v3538_v63, 1  ;;  %v2923_v52 = vpop.f32.mrf.mxu0  ;;  %v3180_v55 = vpop.f32.mrf.mxu1  ;;  %v3533_v41 = vadd.f32 %v3532_v59, %v3531_v15  ;;  %v3547_v62 = vadd.f32 %v3546_v21, %v3545_v58  ;;  %v3553_v10 = vrot.slane %v3552_v47, 1 }
 0x31a   :  { %v3555_v17 = vadd.f32 %v3351_v56, %v3347_v14  ;;  %v3569_v8 = vadd.f32 %v3353_v31, %v3349_v0  ;;  %v3352_v36 = vmul.f32 %v2923_v52, %v13010_v27  ;;  %v3354_v53 = vmul.f32 %v3180_v55, %v13012_v28 }
 0x31b   :  { %v3540_v49 = vadd.f32 %v3539_v25, %v3538_v63  ;;  %v3967_v12 = vsel %vm3966_vm4, %v3533_v41, %v3965_v13  ;;  %v3985_v15 = vsel %vm3966_vm4, %v3547_v62, %v3984_v1  ;;  %v3554_v50 = vadd.f32 %v3553_v10, %v3552_v47 }
 0x31c   :  { %v3556_v29 = vrot.slane %v3555_v17, 4  ;;  %v3570_v33 = vrot.slane %v3569_v8, 4  ;;  %v3562_v18 = vadd.f32 %v3352_v36, %v3348_v11  ;;  %v3576_v48 = vadd.f32 %v3354_v53, %v3350_v2  ;;  %v2927_v7 = vpop.f32.mrf.mxu0  ;;  %v3184_v60 = vpop.f32.mrf.mxu1 }
 0x31d   :  { %v3355_v5 = vmul.f32 %v2927_v7, %v13004_v23  ;;  %v3357_v59 = vmul.f32 %v3184_v60, %v13022_v35  ;;  %v14147_v4 = vsel %vm3966_vm4, %v3540_v49, %v3977_v51 }
 0x31e   :  { %v3557_v3 = vadd.f32 %v3556_v29, %v3555_v17  ;;  %v3571_v19 = vadd.f32 %v3570_v33, %v3569_v8  ;;  %v3563_v22 = vrot.slane %v3562_v18, 4  ;;  %v3577_v45 = vrot.slane %v3576_v48, 4  ;;  %v2929_v58 = vpop.f32.mrf.mxu0  ;;  %v3186_v20 = vpop.f32.mrf.mxu1 }
 0x31f   :  { %v3356_v39 = vmul.f32 %v2929_v58, %v13029_v43  ;;  %v3358_v56 = vmul.f32 %v3186_v20, %v13031_v44 }
 0x320   :  { %v3558_v16 = vrot.slane %v3557_v3, 2  ;;  %v3572_v57 = vrot.slane %v3571_v19, 2  ;;  %v3564_v32 = vadd.f32 %v3563_v22, %v3562_v18  ;;  %v3578_v37 = vadd.f32 %v3577_v45, %v3576_v48  ;;  %v2933_v21 = vpop.f32.mrf.mxu0  ;;  %v3190_v63 = vpop.f32.mrf.mxu1 }
 0x321   :  { %v3359_v31 = vmul.f32 %v2933_v21, %v13006_v24  ;;  %v3361_v25 = vmul.f32 %v3190_v63, %v13008_v26  ;;  %v14156_v18 = vsel %vm3966_vm4, %v3554_v50, %v3991_v30 }
 0x322   :  { %v3559_v38 = vadd.f32 %v3558_v16, %v3557_v3  ;;  %v3573_v14 = vadd.f32 %v3572_v57, %v3571_v19  ;;  %v3565_v0 = vrot.slane %v3564_v32, 2  ;;  %v3579_v40 = vrot.slane %v3578_v37, 2  ;;  %v2935_v47 = vpop.f32.mrf.mxu0  ;;  %v3192_v11 = vpop.f32.mrf.mxu1 }
 0x323   :  { %v3583_v8 = vadd.f32 %v3359_v31, %v3355_v5  ;;  %v3597_v36 = vadd.f32 %v3361_v25, %v3357_v59  ;;  %v3360_v53 = vmul.f32 %v2935_v47, %v13010_v27  ;;  %v3362_v46 = vmul.f32 %v3192_v11, %v13012_v28 }
 0x324   :  { %v3560_v2 = vrot.slane %v3559_v38, 1  ;;  %v3574_v52 = vrot.slane %v3573_v14, 1  ;;  %v3566_v55 = vadd.f32 %v3565_v0, %v3564_v32  ;;  %v3580_v17 = vadd.f32 %v3579_v40, %v3578_v37 }
 0x325   :  { %v2939_v54 = vpop.f32.mrf.mxu0  ;;  %v3196_v41 = vpop.f32.mrf.mxu1  ;;  %v3584_v48 = vrot.slane %v3583_v8, 4  ;;  %v3598_v13 = vrot.slane %v3597_v36, 4  ;;  %v3590_v1 = vadd.f32 %v3360_v53, %v3356_v39  ;;  %v3604_v49 = vadd.f32 %v3362_v46, %v3358_v56 }
 0x326   :  { %v3561_v62 = vadd.f32 %v3560_v2, %v3559_v38  ;;  %v3575_v29 = vadd.f32 %v3574_v52, %v3573_v14  ;;  %v3567_v33 = vrot.slane %v3566_v55, 1  ;;  %v3581_v22 = vrot.slane %v3580_v17, 1 }
 0x327   :  { %v2941_v10 = vpop.f32.mrf.mxu0  ;;  %v3198_v7 = vpop.f32.mrf.mxu1  ;;  %v3585_v45 = vadd.f32 %v3584_v48, %v3583_v8  ;;  %v3599_v58 = vadd.f32 %v3598_v13, %v3597_v36  ;;  %v3591_v20 = vrot.slane %v3590_v1, 4  ;;  %v3605_v51 = vrot.slane %v3604_v49, 4 }
 0x328   :  { %v14159_v60 = vsel %vm3968_vm5, %v3561_v62, %v3967_v12  ;;  %v14162_v3 = vsel %vm3968_vm5, %v3575_v29, %v3985_v15  ;;  %v14164_v19 = vadd.f32 %v3567_v33, %v3566_v55  ;;  %v3363_v57 = vmul.f32 %v2939_v54, %v13004_v23 }
 0x329   :  { %v2945_v30 = vpop.f32.mrf.mxu0  ;;  %v3202_v16 = vpop.f32.mrf.mxu1  ;;  %v3365_v32 = vmul.f32 %v3196_v41, %v13022_v35  ;;  %v3364_v37 = vmul.f32 %v2941_v10, %v13029_v43  ;;  %v3366_v12 = vmul.f32 %v3198_v7, %v13031_v44  ;;  %v3586_v50 = vrot.slane %v3585_v45, 2 }
 0x32a   :  { %v3600_v15 = vrot.slane %v3599_v58, 2  ;;  %v3592_v5 = vadd.f32 %v3591_v20, %v3590_v1  ;;  %v3606_v59 = vadd.f32 %v3605_v51, %v3604_v49  ;;  %v3367_v38 = vmul.f32 %v2945_v30, %v13006_v24 }
 0x32b   :  { %v2947_v21 = vpop.f32.mrf.mxu0  ;;  %v3204_v63 = vpop.f32.mrf.mxu1  ;;  %v3369_v14 = vmul.f32 %v3202_v16, %v13008_v26  ;;  %v3587_v39 = vadd.f32 %v3586_v50, %v3585_v45  ;;  %v14174_v1 = vadd.f32 %v3581_v22, %v3580_v17 }
 0x32c   :  { %v3368_v0 = vmul.f32 %v2947_v21, %v13010_v27  ;;  %v3370_v40 = vmul.f32 %v3204_v63, %v13012_v28  ;;  %v3601_v56 = vadd.f32 %v3600_v15, %v3599_v58  ;;  %v3593_v31 = vrot.slane %v3592_v5, 2 }
 0x32d   :  { %v3607_v25 = vrot.slane %v3606_v59, 2  ;;  %v3611_v47 = vadd.f32 %v3367_v38, %v3363_v57  ;;  %v3625_v11 = vadd.f32 %v3369_v14, %v3365_v32  ;;  %v3588_v36 = vrot.slane %v3587_v39, 1 }
 0x32e   :  { %v3618_v2 = vadd.f32 %v3368_v0, %v3364_v37  ;;  %v3632_v52 = vadd.f32 %v3370_v40, %v3366_v12  ;;  %v2951_v55 = vpop.f32.mrf.mxu0  ;;  %v3208_v8 = vpop.f32.mrf.mxu1  ;;  %v3602_v53 = vrot.slane %v3601_v56, 1  ;;  %v3594_v46 = vadd.f32 %v3593_v31, %v3592_v5 }
 0x32f   :  { %v3608_v54 = vadd.f32 %v3607_v25, %v3606_v59  ;;  %v3612_v41 = vrot.slane %v3611_v47, 4  ;;  %v3626_v62 = vrot.slane %v3625_v11, 4  ;;  %v14176_v49 = vadd.f32 %v3588_v36, %v3587_v39 }
 0x330   :  { %v3619_v29 = vrot.slane %v3618_v2, 4  ;;  %v3633_v33 = vrot.slane %v3632_v52, 4  ;;  %v2953_v48 = vpop.f32.mrf.mxu0  ;;  %v3210_v13 = vpop.f32.mrf.mxu1  ;;  %v14178_v10 = vadd.f32 %v3602_v53, %v3601_v56  ;;  %v3595_v7 = vrot.slane %v3594_v46, 1 }
 0x331   :  { %v3613_v45 = vadd.f32 %v3612_v41, %v3611_v47  ;;  %v3627_v58 = vadd.f32 %v3626_v62, %v3625_v11  ;;  %v3609_v32 = vrot.slane %v3608_v54, 1  ;;  %v3371_v37 = vmul.f32 %v2951_v55, %v13004_v23 }
 0x332   :  { %v3620_v20 = vadd.f32 %v3619_v29, %v3618_v2  ;;  %v3634_v51 = vadd.f32 %v3633_v33, %v3632_v52  ;;  %v2957_v30 = vpop.f32.mrf.mxu0  ;;  %v3214_v16 = vpop.f32.mrf.mxu1  ;;  %v14180_v57 = vadd.f32 %v3595_v7, %v3594_v46  ;;  %v3373_v12 = vmul.f32 %v3208_v8, %v13022_v35 }
 0x333   :  { %v3614_v17 = vrot.slane %v3613_v45, 2  ;;  %v3628_v22 = vrot.slane %v3627_v58, 2  ;;  %v3372_v21 = vmul.f32 %v2953_v48, %v13029_v43  ;;  %v3374_v63 = vmul.f32 %v3210_v13, %v13031_v44 }
 0x334   :  { %v3621_v50 = vrot.slane %v3620_v20, 2  ;;  %v3635_v15 = vrot.slane %v3634_v51, 2  ;;  %v2959_v5 = vpop.f32.mrf.mxu0  ;;  %v3216_v59 = vpop.f32.mrf.mxu1  ;;  %v3375_v38 = vmul.f32 %v2957_v30, %v13006_v24  ;;  %v3377_v14 = vmul.f32 %v3214_v16, %v13008_v26 }
 0x335   :  { %v3615_v0 = vadd.f32 %v3614_v17, %v3613_v45  ;;  %v3629_v40 = vadd.f32 %v3628_v22, %v3627_v58  ;;  %v3376_v2 = vmul.f32 %v2959_v5, %v13010_v27  ;;  %v3378_v52 = vmul.f32 %v3216_v59, %v13012_v28 }
 0x336   :  { %v14188_v39 = vadd.f32 %v3621_v50, %v3620_v20  ;;  %v14190_v56 = vadd.f32 %v3635_v15, %v3634_v51  ;;  %v2963_v31 = vpop.f32.mrf.mxu0  ;;  %v3220_v25 = vpop.f32.mrf.mxu1  ;;  %v3639_v47 = vadd.f32 %v3375_v38, %v3371_v37  ;;  %v3653_v11 = vadd.f32 %v3377_v14, %v3373_v12 }
 0x337   :  { %v14194_v55 = vadd.f32 %v3609_v32, %v3608_v54  ;;  %v3616_v8 = vrot.slane %v3615_v0, 1  ;;  %v3630_v36 = vrot.slane %v3629_v40, 1  ;;  %v3646_v33 = vadd.f32 %v3376_v2, %v3372_v21 }
 0x338   :  { %v2965_v46 = vpop.f32.mrf.mxu0  ;;  %v3222_v41 = vpop.f32.mrf.mxu1  ;;  %v3640_v62 = vrot.slane %v3639_v47, 4  ;;  %v3654_v29 = vrot.slane %v3653_v11, 4  ;;  %v3660_v48 = vadd.f32 %v3378_v52, %v3374_v63  ;;  %v3379_v45 = vmul.f32 %v2963_v31, %v13004_v23 }
 0x339   :  { %v14197_v13 = vadd.f32 %v3616_v8, %v3615_v0  ;;  %v3381_v58 = vmul.f32 %v3220_v25, %v13022_v35  ;;  %v3647_v16 = vrot.slane %v3646_v33, 4  ;;  %v3380_v37 = vmul.f32 %v2965_v46, %v13029_v43 }
 0x33a   :  { %v2969_v54 = vpop.f32.mrf.mxu0  ;;  %v3226_v20 = vpop.f32.mrf.mxu1  ;;  %v3641_v51 = vadd.f32 %v3640_v62, %v3639_v47  ;;  %v3655_v30 = vadd.f32 %v3654_v29, %v3653_v11  ;;  %v3661_v32 = vrot.slane %v3660_v48, 4  ;;  %v3382_v12 = vmul.f32 %v3222_v41, %v13031_v44 }
 0x33b   :  { %v3383_v17 = vmul.f32 %v2969_v54, %v13006_v24  ;;  %v3385_v22 = vmul.f32 %v3226_v20, %v13008_v26  ;;  %v3648_v21 = vadd.f32 %v3647_v16, %v3646_v33  ;;  %v14208_v33 = vadd.f32 %v3630_v36, %v3629_v40 }
 0x33c   :  { %v2971_v50 = vpop.f32.mrf.mxu0  ;;  %v3228_v15 = vpop.f32.mrf.mxu1  ;;  %v3642_v5 = vrot.slane %v3641_v51, 2  ;;  %v3656_v59 = vrot.slane %v3655_v30, 2  ;;  %v3662_v63 = vadd.f32 %v3661_v32, %v3660_v48 }
 0x33d   :  { %v3667_v38 = vadd.f32 %v3383_v17, %v3379_v45  ;;  %v3681_v14 = vadd.f32 %v3385_v22, %v3381_v58  ;;  %v3384_v0 = vmul.f32 %v2971_v50, %v13010_v27  ;;  %v3386_v31 = vmul.f32 %v3228_v15, %v13012_v28 }
 0x33e   :  { %v2975_v25 = vpop.f32.mrf.mxu0  ;;  %v3232_v47 = vpop.f32.mrf.mxu1  ;;  %v3643_v11 = vadd.f32 %v3642_v5, %v3641_v51  ;;  %v3657_v2 = vadd.f32 %v3656_v59, %v3655_v30  ;;  %v3649_v52 = vrot.slane %v3648_v21, 2  ;;  %v3663_v8 = vrot.slane %v3662_v63, 2 }
 0x33f   :  { %v3668_v46 = vrot.slane %v3667_v38, 4  ;;  %v3682_v41 = vrot.slane %v3681_v14, 4  ;;  %v3674_v62 = vadd.f32 %v3384_v0, %v3380_v37  ;;  %v3688_v29 = vadd.f32 %v3386_v31, %v3382_v12 }
 0x340   :  { %v2977_v54 = vpop.f32.mrf.mxu0  ;;  %v3234_v20 = vpop.f32.mrf.mxu1  ;;  %v3644_v48 = vrot.slane %v3643_v11, 1  ;;  %v3658_v45 = vrot.slane %v3657_v2, 1  ;;  %v14210_v58 = vadd.f32 %v3649_v52, %v3648_v21  ;;  %v14214_v15 = vadd.f32 %v3663_v8, %v3662_v63 }
 0x341   :  { %v3669_v16 = vadd.f32 %v3668_v46, %v3667_v38  ;;  %v3683_v32 = vadd.f32 %v3682_v41, %v3681_v14  ;;  %v3675_v17 = vrot.slane %v3674_v62, 4  ;;  %v3689_v22 = vrot.slane %v3688_v29, 4 }
 0x342   :  { %v2981_v51 = vpop.f32.mrf.mxu0  ;;  %v3238_v30 = vpop.f32.mrf.mxu1  ;;  %v14212_v50 = vadd.f32 %v3644_v48, %v3643_v11  ;;  %v3387_v37 = vmul.f32 %v2975_v25, %v13004_v23  ;;  %v3389_v12 = vmul.f32 %v3232_v47, %v13022_v35  ;;  %v3388_v38 = vmul.f32 %v2977_v54, %v13029_v43 }
 0x343   :  { %v3670_v40 = vrot.slane %v3669_v16, 2  ;;  %v3684_v36 = vrot.slane %v3683_v32, 2  ;;  %v3676_v5 = vadd.f32 %v3675_v17, %v3674_v62  ;;  %v3690_v59 = vadd.f32 %v3689_v22, %v3688_v29 }
 0x344   :  { %v2983_v21 = vpop.f32.mrf.mxu0  ;;  %v3240_v0 = vpop.f32.mrf.mxu1  ;;  %v3390_v14 = vmul.f32 %v3234_v20, %v13031_v44  ;;  %v3391_v31 = vmul.f32 %v2981_v51, %v13006_v24  ;;  %v3393_v11 = vmul.f32 %v3238_v30, %v13008_v26 }
 0x345   :  { %v3671_v63 = vadd.f32 %v3670_v40, %v3669_v16  ;;  %v3685_v52 = vadd.f32 %v3684_v36, %v3683_v32  ;;  %v3677_v8 = vrot.slane %v3676_v5, 2  ;;  %v3691_v25 = vrot.slane %v3690_v59, 2 }
 0x346   :  { %v2987_v46 = vpop.f32.mrf.mxu0  ;;  %v14222_v47 = vpop.f32.mrf.mxu1  ;;  %v3695_v41 = vadd.f32 %v3391_v31, %v3387_v37  ;;  %v3709_v62 = vadd.f32 %v3393_v11, %v3389_v12  ;;  %v3392_v29 = vmul.f32 %v2983_v21, %v13010_v27  ;;  %v3394_v48 = vmul.f32 %v3240_v0, %v13012_v28 }
 0x347   :  { %v3672_v54 = vrot.slane %v3671_v63, 1  ;;  %v3686_v20 = vrot.slane %v3685_v52, 1  ;;  %v3678_v17 = vadd.f32 %v3677_v8, %v3676_v5  ;;  %v3692_v22 = vadd.f32 %v3691_v25, %v3690_v59 }
 0x348   :  { %v14226_v51 = vpop.f32.mrf.mxu0  ;;  %v14228_v16 = vpop.f32.mrf.mxu1  ;;  %v3696_v32 = vrot.slane %v3695_v41, 4  ;;  %v3710_v30 = vrot.slane %v3709_v62, 4  ;;  %v3702_v40 = vadd.f32 %v3392_v29, %v3388_v38  ;;  %v3716_v36 = vadd.f32 %v3394_v48, %v3390_v14 }
 0x349   :  { %v14230_v37 = vadd.f32 %v3658_v45, %v3657_v2  ;;  %v3673_v12 = vadd.f32 %v3672_v54, %v3671_v63  ;;  %v3679_v21 = vrot.slane %v3678_v17, 1  ;;  %v3693_v31 = vrot.slane %v3692_v22, 1 }
 0x34a   :  { %v14232_v0 = vpop.f32.mrf.mxu0  ;;  %v14234_v11 = vpop.f32.mrf.mxu1  ;;  %v3697_v5 = vadd.f32 %v3696_v32, %v3695_v41  ;;  %v3711_v59 = vadd.f32 %v3710_v30, %v3709_v62  ;;  %v3703_v8 = vrot.slane %v3702_v40, 4  ;;  %v3717_v25 = vrot.slane %v3716_v36, 4 }
 0x34b   :  { %v3687_v34 = vadd.f32 %v3686_v20, %v3685_v52  ;;  %v3680_v7 = vadd.f32 %v3679_v21, %v3678_v17  ;;  %v14236_v53 = vadd.f32 %v3693_v31, %v3692_v22  ;;  %v14239_v38 = vmul.f32 %v2987_v46, %v13004_v23 }
 0x34c   :  { %v2995_v2 = vpop.f32.mrf.mxu0  ;;  %v14241_v45 = vpop.f32.mrf.mxu1  ;;  %v3698_v14 = vrot.slane %v3697_v5, 2  ;;  %v3712_v63 = vrot.slane %v3711_v59, 2  ;;  %v3704_v29 = vadd.f32 %v3703_v8, %v3702_v40  ;;  %v3718_v48 = vadd.f32 %v3717_v25, %v3716_v36 }
 0x34d   :  { %v17575_v41 = vrot.slane %v14188_v39, 1  ;;  %v3651_v54 = vrot.slane %v14210_v58, 1  ;;  %v3979_v52 = vsel %vm3968_vm5, %v14164_v19, %v14147_v4  ;;  %v17576_v46 = vrot.slane %v14190_v56, 1 }
 0x34e   :  { %v2999_v17 = vpop.f32.mrf.mxu0  ;;  %v3256_v22 = vpop.f32.mrf.mxu1  ;;  %v3699_v32 = vadd.f32 %v3698_v14, %v3697_v5  ;;  %v3713_v30 = vadd.f32 %v3712_v63, %v3711_v59  ;;  %v3705_v40 = vrot.slane %v3704_v29, 2  ;;  %v3719_v36 = vrot.slane %v3718_v48, 2 }
 0x34f   :  { %v3624_v62 = vadd.f32 %v17575_v41, %v14188_v39  ;;  %v3638_v20 = vadd.f32 %v17576_v46, %v14190_v56  ;;  %v3652_v21 = vadd.f32 %v3651_v54, %v14210_v58  ;;  %v3980_v39 = vsel %vm3970_vm6, %v14180_v57, %v3979_v52 }
 0x350   :  { %v3665_v31 = vrot.slane %v14214_v15, 1  ;;  %v3993_v4 = vsel %vm3968_vm5, %v14174_v1, %v14156_v18  ;;  %v3001_v19 = vpop.f32.mrf.mxu0  ;;  %v3258_v8 = vpop.f32.mrf.mxu1  ;;  %v3700_v56 = vrot.slane %v3699_v32, 1  ;;  %v3714_v25 = vrot.slane %v3713_v30, 1 }
 0x351   :  { %v3706_v41 = vadd.f32 %v3705_v40, %v3704_v29  ;;  %v3720_v5 = vadd.f32 %v3719_v36, %v3718_v48  ;;  %v3981_v59 = vsel %vm3972_vm7, %v3624_v62, %v3980_v39  ;;  %v3994_v58 = vsel %vm3970_vm6, %v14194_v55, %v3993_v4 }
 0x352   :  { %v3666_v14 = vadd.f32 %v3665_v31, %v14214_v15  ;;  %v3971_v57 = vsel %vm3970_vm6, %v14176_v49, %v14159_v60  ;;  %v3005_v63 = vpop.f32.mrf.mxu0  ;;  %v3262_v54 = vpop.f32.mrf.mxu1  ;;  %v3701_v18 = vadd.f32 %v3700_v56, %v3699_v32  ;;  %v3715_v1 = vadd.f32 %v3714_v25, %v3713_v30 }
 0x353   :  { %v3707_v52 = vrot.slane %v3706_v41, 1  ;;  %v3721_v46 = vrot.slane %v3720_v5, 1  ;;  %v3397_v29 = vmul.f32 %v14222_v47, %v13022_v35  ;;  %v3982_v48 = vsel %vm3974_vm8, %v3652_v21, %v3981_v59 }
 0x354   :  { %v3995_v15 = vsel %vm3972_vm7, %v3638_v20, %v3994_v58  ;;  %v3973_v55 = vsel %vm3972_vm7, %v14197_v13, %v3971_v57  ;;  %v3007_v62 = vpop.f32.mrf.mxu0  ;;  %v3264_v40 = vpop.f32.mrf.mxu1  ;;  %v14274_v60 = vsel %vm3962_vm2, %v3701_v18, %v3673_v12  ;;  %v14277_v49 = vsel %vm3962_vm2, %v3715_v1, %v3687_v34  ;;  %4097 = vmatprep.mubr.f32.mxu0 %v3982_v48 }
 0x355   :  { %v3708_v32 = vadd.f32 %v3707_v52, %v3706_v41  ;;  %v3987_v47 = vsel %vm3970_vm6, %v14178_v10, %v14162_v3  ;;  %v14282_v30 = vadd.f32 %v3721_v46, %v3720_v5  ;;  %v3996_v20 = vsel %vm3974_vm8, %v3666_v14, %v3995_v15 }
 0x356   :  { %v3975_v13 = vsel %vm3974_vm8, %v14212_v50, %v3973_v55  ;;  %v3988_v12 = vsel %vm3972_vm7, %v14208_v33, %v3987_v47  ;;  %v14289_v36 = vpop.f32.mrf.mxu0  ;;  %v14291_v34 = vpop.f32.mrf.mxu1  ;;  %4172 = vmatprep.mubr.f32.mxu1 %v3996_v20  ;;  %v3396_v10 = vmul.f32 %v14226_v51, %v13029_v43  ;;  %v3398_v50 = vmul.f32 %v14228_v16, %v13031_v44 }
 0x357   :  { %v14294_v21 = vsel %vm3962_vm2, %v3708_v32, %v3680_v7  ;;  %4098 = vmatmul.mubr.f32.vlgmr.msra.gmra.mxu0 %v3975_v13  ;;  %v3989_v3 = vsel %vm3974_vm8, %v14230_v37, %v3988_v12  ;;  %v3399_v33 = vmul.f32 %v14232_v0, %v13006_v24  ;;  %v3401_v39 = vmul.f32 %v14234_v11, %v13008_v26 }
 0x358   :  { %4173 = vmatmul.mubr.f32.vlgmr.msra.gmra.mxu1 %v3989_v3  ;;  %v3400_v7 = vmul.f32 %v2995_v2, %v13010_v27  ;;  %v14307_v31 = vpop.f32.mrf.mxu0  ;;  %v14309_v4 = vpop.f32.mrf.mxu1  ;;  %v3402_v37 = vmul.f32 %v14241_v45, %v13012_v28  ;;  %v3403_v51 = vmul.f32 %v2999_v17, %v13004_v23  ;;  %v3405_v56 = vmul.f32 %v3256_v22, %v13022_v35 }
 0x359   :  { %v3404_v16 = vmul.f32 %v3001_v19, %v13029_v43  ;;  %v3723_v0 = vadd.f32 %v3399_v33, %v14239_v38  ;;  %v3737_v25 = vadd.f32 %v3401_v39, %v3397_v29  ;;  %v3406_v11 = vmul.f32 %v3258_v8, %v13031_v44 }
 0x35a   :  { %v3730_v41 = vadd.f32 %v3400_v7, %v3396_v10  ;;  %v14318_v2 = vpop.f32.mrf.mxu0  ;;  %v14320_v5 = vpop.f32.mrf.mxu1  ;;  %v3744_v59 = vadd.f32 %v3402_v37, %v3398_v50  ;;  %v3407_v14 = vmul.f32 %v3005_v63, %v13006_v24  ;;  %v3409_v45 = vmul.f32 %v3262_v54, %v13008_v26 }
 0x35b   :  { %v3408_v17 = vmul.f32 %v3007_v62, %v13010_v27  ;;  %v3724_v22 = vrot.slane %v3723_v0, 4  ;;  %v3738_v58 = vrot.slane %v3737_v25, 4  ;;  %v3410_v38 = vmul.f32 %v3264_v40, %v13012_v28 }
 0x35c   :  { %v3731_v19 = vrot.slane %v3730_v41, 4  ;;  %v14326_v57 = vpop.f32.mrf.mxu0  ;;  %v14328_v18 = vpop.f32.mrf.mxu1  ;;  %v3745_v8 = vrot.slane %v3744_v59, 4  ;;  %v3751_v1 = vadd.f32 %v3407_v14, %v3403_v51  ;;  %v3765_v52 = vadd.f32 %v3409_v45, %v3405_v56 }
 0x35d   :  { %v3758_v46 = vadd.f32 %v3408_v17, %v3404_v16  ;;  %v3725_v29 = vadd.f32 %v3724_v22, %v3723_v0  ;;  %v3739_v48 = vadd.f32 %v3738_v58, %v3737_v25  ;;  %v3772_v15 = vadd.f32 %v3410_v38, %v3406_v11 }
 0x35e   :  { %v3732_v63 = vadd.f32 %v3731_v19, %v3730_v41  ;;  %v14330_v54 = vpop.f32.mrf.mxu0  ;;  %v14332_v55 = vpop.f32.mrf.mxu1  ;;  %v3746_v62 = vadd.f32 %v3745_v8, %v3744_v59  ;;  %v3752_v32 = vrot.slane %v3751_v1, 4  ;;  %v3766_v47 = vrot.slane %v3765_v52, 4 }
 0x35f   :  { %v3759_v40 = vrot.slane %v3758_v46, 4  ;;  %v3726_v20 = vrot.slane %v3725_v29, 2  ;;  %v3740_v13 = vrot.slane %v3739_v48, 2  ;;  %v3773_v3 = vrot.slane %v3772_v15, 4 }
 0x360   :  { %v3733_v12 = vrot.slane %v3732_v63, 2  ;;  %v3025_v10 = vpop.f32.mrf.mxu0  ;;  %v3282_v50 = vpop.f32.mrf.mxu1  ;;  %v3747_v33 = vrot.slane %v3746_v62, 2  ;;  %v3753_v39 = vadd.f32 %v3752_v32, %v3751_v1  ;;  %v3767_v7 = vadd.f32 %v3766_v47, %v3765_v52 }
 0x361   :  { %v3760_v37 = vadd.f32 %v3759_v40, %v3758_v46  ;;  %v3727_v51 = vadd.f32 %v3726_v20, %v3725_v29  ;;  %v3741_v56 = vadd.f32 %v3740_v13, %v3739_v48  ;;  %v3774_v0 = vadd.f32 %v3773_v3, %v3772_v15 }
 0x362   :  { %v3734_v16 = vadd.f32 %v3733_v12, %v3732_v63  ;;  %v3029_v25 = vpop.f32.mrf.mxu0  ;;  %v3286_v41 = vpop.f32.mrf.mxu1  ;;  %v3748_v11 = vadd.f32 %v3747_v33, %v3746_v62  ;;  %v3754_v59 = vrot.slane %v3753_v39, 2  ;;  %v3768_v14 = vrot.slane %v3767_v7, 2 }
 0x363   :  { %v3761_v45 = vrot.slane %v3760_v37, 2  ;;  %v3728_v17 = vrot.slane %v3727_v51, 1  ;;  %v3742_v22 = vrot.slane %v3741_v56, 1  ;;  %v3775_v19 = vrot.slane %v3774_v0, 2 }
 0x364   :  { %v3735_v58 = vrot.slane %v3734_v16, 1  ;;  %v3031_v38 = vpop.f32.mrf.mxu0  ;;  %v3288_v8 = vpop.f32.mrf.mxu1  ;;  %v3749_v9 = vrot.slane %v3748_v11, 1  ;;  %v3755_v1 = vadd.f32 %v3754_v59, %v3753_v39  ;;  %v3769_v52 = vadd.f32 %v3768_v14, %v3767_v7 }
 0x365   :  { %v3762_v46 = vadd.f32 %v3761_v45, %v3760_v37  ;;  %v14337_v29 = vsel %vm3962_vm2, %v14282_v30, %v14236_v53  ;;  %v3729_v48 = vadd.f32 %v3728_v17, %v3727_v51  ;;  %v3743_v63 = vadd.f32 %v3742_v22, %v3741_v56 }
 0x366   :  { %v14339_v15 = vadd.f32 %v3775_v19, %v3774_v0  ;;  %v14341_v62 = vpop.f32.mrf.mxu0  ;;  %v14343_v32 = vpop.f32.mrf.mxu1  ;;  %v14345_v47 = vadd.f32 %v3735_v58, %v3734_v16  ;;  %v3756_v40 = vrot.slane %v3755_v1, 1  ;;  %v3770_v20 = vrot.slane %v3769_v52, 1 }
 0x367   :  { %v3763_v13 = vrot.slane %v3762_v46, 1  ;;  %v14349_v12 = vsel %vm3964_vm3, %v3729_v48, %v14274_v60  ;;  %v14353_v53 = vsel %vm3964_vm3, %v3743_v63, %v14277_v49  ;;  %v14355_v30 = vadd.f32 %v3749_v9, %v3748_v11 }
 0x368   :  { %v14358_v33 = vpop.f32.mrf.mxu0  ;;  %v14360_v39 = vpop.f32.mrf.mxu1  ;;  %v14362_v7 = vadd.f32 %v3756_v40, %v3755_v1  ;;  %v14364_v37 = vadd.f32 %v3770_v20, %v3769_v52  ;;  %v3411_v60 = vmul.f32 %v14289_v36, %v13004_v23  ;;  %v3413_v49 = vmul.f32 %v14291_v34, %v13022_v35 }
 0x369   :  { %v14366_v51 = vadd.f32 %v3763_v13, %v3762_v46  ;;  %v3412_v9 = vmul.f32 %v14307_v31, %v13029_v43  ;;  %v3414_v56 = vmul.f32 %v14309_v4, %v13031_v44  ;;  %v3415_v16 = vmul.f32 %v14318_v2, %v13006_v24 }
 0x36a   :  { %v14378_v0 = vpop.f32.mrf.mxu0  ;;  %v14380_v11 = vpop.f32.mrf.mxu1  ;;  %v3417_v59 = vmul.f32 %v14320_v5, %v13008_v26  ;;  %v3416_v36 = vmul.f32 %v14326_v57, %v13010_v27  ;;  %v3418_v34 = vmul.f32 %v14328_v18, %v13012_v28  ;;  %v3419_v31 = vmul.f32 %v14330_v54, %v13004_v23 }
 0x36b   :  { %v3779_v4 = vadd.f32 %v3415_v16, %v3411_v60  ;;  %v3421_v2 = vmul.f32 %v14332_v55, %v13022_v35  ;;  %v3420_v14 = vmul.f32 %v3025_v10, %v13029_v43  ;;  %v3422_v45 = vmul.f32 %v3282_v50, %v13031_v44 }
 0x36c   :  { %v3793_v17 = vadd.f32 %v3417_v59, %v3413_v49  ;;  %v3786_v22 = vadd.f32 %v3416_v36, %v3412_v9  ;;  %v3800_v5 = vadd.f32 %v3418_v34, %v3414_v56  ;;  %v3423_v58 = vmul.f32 %v3029_v25, %v13006_v24  ;;  %v14395_v57 = vpop.f32.mrf.mxu0  ;;  %v14397_v19 = vpop.f32.mrf.mxu1 }
 0x36d   :  { %v3780_v18 = vrot.slane %v3779_v4, 4  ;;  %v3425_v54 = vmul.f32 %v3286_v41, %v13008_v26  ;;  %v3424_v1 = vmul.f32 %v3031_v38, %v13010_v27  ;;  %v3426_v55 = vmul.f32 %v3288_v8, %v13012_v28 }
 0x36e   :  { %v3794_v52 = vrot.slane %v3793_v17, 4  ;;  %v3787_v10 = vrot.slane %v3786_v22, 4  ;;  %v3801_v46 = vrot.slane %v3800_v5, 4  ;;  %v3807_v50 = vadd.f32 %v3423_v58, %v3419_v31  ;;  %v3047_v9 = vpop.f32.mrf.mxu0  ;;  %v3304_v56 = vpop.f32.mrf.mxu1 }
 0x36f   :  { %v3781_v48 = vadd.f32 %v3780_v18, %v3779_v4  ;;  %v3821_v63 = vadd.f32 %v3425_v54, %v3421_v2  ;;  %v3814_v40 = vadd.f32 %v3424_v1, %v3420_v14  ;;  %v3828_v20 = vadd.f32 %v3426_v55, %v3422_v45 }
 0x370   :  { %v3795_v25 = vadd.f32 %v3794_v52, %v3793_v17  ;;  %v3788_v13 = vadd.f32 %v3787_v10, %v3786_v22  ;;  %v3802_v60 = vadd.f32 %v3801_v46, %v3800_v5  ;;  %v3808_v49 = vrot.slane %v3807_v50, 4  ;;  %v3049_v5 = vpop.f32.mrf.mxu0  ;;  %v3306_v58 = vpop.f32.mrf.mxu1 }
 0x371   :  { %v3782_v16 = vrot.slane %v3781_v48, 2  ;;  %v3822_v41 = vrot.slane %v3821_v63, 4  ;;  %v3815_v59 = vrot.slane %v3814_v40, 4  ;;  %v3829_v38 = vrot.slane %v3828_v20, 4 }
 0x372   :  { %v3796_v36 = vrot.slane %v3795_v25, 2  ;;  %v3789_v8 = vrot.slane %v3788_v13, 2  ;;  %v3803_v34 = vrot.slane %v3802_v60, 2  ;;  %v3809_v3 = vadd.f32 %v3808_v49, %v3807_v50 }
 0x373   :  { %v3783_v6 = vadd.f32 %v3782_v16, %v3781_v48  ;;  %v3823_v31 = vadd.f32 %v3822_v41, %v3821_v63  ;;  %v3816_v4 = vadd.f32 %v3815_v59, %v3814_v40  ;;  %v3830_v2 = vadd.f32 %v3829_v38, %v3828_v20  ;;  %v3053_v16 = vpop.f32.mrf.mxu0  ;;  %v3310_v41 = vpop.f32.mrf.mxu1 }
 0x374   :  { %v3797_v14 = vadd.f32 %v3796_v36, %v3795_v25  ;;  %v3790_v45 = vadd.f32 %v3789_v8, %v3788_v13  ;;  %v3804_v17 = vadd.f32 %v3803_v34, %v3802_v60  ;;  %v3810_v22 = vrot.slane %v3809_v3, 2 }
 0x375   :  { %v3784_v18 = vrot.slane %v3783_v6, 1  ;;  %v3824_v54 = vrot.slane %v3823_v31, 2  ;;  %v3817_v1 = vrot.slane %v3816_v4, 2  ;;  %v3831_v55 = vrot.slane %v3830_v2, 2 }
 0x376   :  { %v3798_v52 = vrot.slane %v3797_v14, 1  ;;  %v3791_v10 = vrot.slane %v3790_v45, 1  ;;  %v3805_v46 = vrot.slane %v3804_v17, 1  ;;  %v3811_v61 = vadd.f32 %v3810_v22, %v3809_v3 }
 0x377   :  { %v17577_v50 = vrot.slane %v14339_v15, 1  ;;  %v3825_v63 = vadd.f32 %v3824_v54, %v3823_v31  ;;  %v3818_v40 = vadd.f32 %v3817_v1, %v3816_v4  ;;  %v14407_v20 = vadd.f32 %v3831_v55, %v3830_v2 }
 0x378   :  { %v14409_v25 = vadd.f32 %v3784_v18, %v3783_v6  ;;  %v14411_v13 = vadd.f32 %v3798_v52, %v3797_v14  ;;  %v14413_v60 = vadd.f32 %v3791_v10, %v3790_v45  ;;  %v3812_v49 = vrot.slane %v3811_v61, 1  ;;  %v3055_v45 = vpop.f32.mrf.mxu0 }
 0x379   :  { %v14405_v48 = vadd.f32 %v17577_v50, %v14339_v15  ;;  %v14415_v59 = vadd.f32 %v3805_v46, %v3804_v17  ;;  %v3826_v3 = vrot.slane %v3825_v63, 1  ;;  %v3819_v38 = vrot.slane %v3818_v40, 1  ;;  %v3312_v17 = vpop.f32.mrf.mxu1 }
 0x37a   :  { %v3833_v15 = vrot.slane %v14407_v20, 1  ;;  %v14418_v36 = vadd.f32 %v3812_v49, %v3811_v61  ;;  %v3427_v8 = vmul.f32 %v14341_v62, %v13004_v23  ;;  %v3429_v6 = vmul.f32 %v14343_v32, %v13022_v35 }
 0x37b   :  { %v3428_v34 = vmul.f32 %v14358_v33, %v13029_v43  ;;  %v14426_v31 = vadd.f32 %v3826_v3, %v3825_v63  ;;  %v14428_v4 = vadd.f32 %v3819_v38, %v3818_v40  ;;  %v3430_v2 = vmul.f32 %v14360_v39, %v13031_v44 }
 0x37c   :  { %v3431_v61 = vmul.f32 %v14378_v0, %v13006_v24  ;;  %v3433_v14 = vmul.f32 %v14380_v11, %v13008_v26  ;;  %v3432_v62 = vmul.f32 %v14395_v57, %v13010_v27  ;;  %v3434_v32 = vmul.f32 %v14397_v19, %v13012_v28 }
 0x37d   :  { %v3435_v33 = vmul.f32 %v3047_v9, %v13004_v23  ;;  %v3437_v18 = vmul.f32 %v3304_v56, %v13022_v35  ;;  %v3436_v39 = vmul.f32 %v3049_v5, %v13029_v43  ;;  %v3438_v0 = vmul.f32 %v3306_v58, %v13031_v44 }
 0x37e   :  { %v3835_v22 = vadd.f32 %v3431_v61, %v3427_v8  ;;  %v3849_v54 = vadd.f32 %v3433_v14, %v3429_v6  ;;  %v3842_v1 = vadd.f32 %v3432_v62, %v3428_v34  ;;  %v3856_v11 = vadd.f32 %v3434_v32, %v3430_v2 }
 0x37f   :  { %v3439_v55 = vmul.f32 %v3053_v16, %v13006_v24  ;;  %v3441_v52 = vmul.f32 %v3310_v41, %v13008_v26  ;;  %v3440_v19 = vmul.f32 %v3055_v45, %v13010_v27  ;;  %v3442_v23 = vmul.f32 %v3312_v17, %v13012_v28 }
 0x380   :  { %v3836_v57 = vrot.slane %v3835_v22, 4  ;;  %v3850_v9 = vrot.slane %v3849_v54, 4  ;;  %v3843_v10 = vrot.slane %v3842_v1, 4  ;;  %v3857_v46 = vrot.slane %v3856_v11, 4 }
 0x381   :  { %v3863_v35 = vadd.f32 %v3439_v55, %v3435_v33  ;;  %v3877_v43 = vadd.f32 %v3441_v52, %v3437_v18  ;;  %v3870_v5 = vadd.f32 %v3440_v19, %v3436_v39  ;;  %v3884_v44 = vadd.f32 %v3442_v23, %v3438_v0 }
 0x382   :  { %v3837_v56 = vadd.f32 %v3836_v57, %v3835_v22  ;;  %v3851_v58 = vadd.f32 %v3850_v9, %v3849_v54  ;;  %v3844_v50 = vadd.f32 %v3843_v10, %v3842_v1  ;;  %v3858_v63 = vadd.f32 %v3857_v46, %v3856_v11 }
 0x383   :  { %v3864_v40 = vrot.slane %v3863_v35, 4  ;;  %v3878_v49 = vrot.slane %v3877_v43, 4  ;;  %v3871_v16 = vrot.slane %v3870_v5, 4  ;;  %v3885_v26 = vrot.slane %v3884_v44, 4 }
 0x384   :  { %v3838_v24 = vrot.slane %v3837_v56, 2  ;;  %v3852_v41 = vrot.slane %v3851_v58, 2  ;;  %v3845_v27 = vrot.slane %v3844_v50, 2  ;;  %v3859_v3 = vrot.slane %v3858_v63, 2 }
 0x385   :  { %v3865_v28 = vadd.f32 %v3864_v40, %v3863_v35  ;;  %v3879_v8 = vadd.f32 %v3878_v49, %v3877_v43  ;;  %v3872_v6 = vadd.f32 %v3871_v16, %v3870_v5  ;;  %v3886_v34 = vadd.f32 %v3885_v26, %v3884_v44 }
 0x386   :  { %v3839_v38 = vadd.f32 %v3838_v24, %v3837_v56  ;;  %v3853_v2 = vadd.f32 %v3852_v41, %v3851_v58  ;;  %v3846_v61 = vadd.f32 %v3845_v27, %v3844_v50  ;;  %v3860_v14 = vadd.f32 %v3859_v3, %v3858_v63  ;;  %v89_v41 = vld [vmem:[%s17523_s20 + $0x18] sm:$0xff]  ;;  %v88_v27 = vld [vmem:[%s17523_s20 + $0x10] sm:$0xff]  ;;  %v87_v3 = vld [vmem:[%s17523_s20 + $0x8] sm:$0xff] }
 0x387   :  { %v3866_v62 = vrot.slane %v3865_v28, 2  ;;  %v3880_v33 = vrot.slane %v3879_v8, 2  ;;  %v3873_v45 = vrot.slane %v3872_v6, 2  ;;  %v3887_v17 = vrot.slane %v3886_v34, 2 }
 0x388   :  { %v3840_v32 = vrot.slane %v3839_v38, 1  ;;  %v3834_v22 = vadd.f32 %v3833_v15, %v14407_v20  ;;  %v3847_v18 = vrot.slane %v3846_v61, 1  ;;  %v3861_v39 = vrot.slane %v3860_v14, 1 }
 0x389   :  { %v3867_v0 = vadd.f32 %v3866_v62, %v3865_v28  ;;  %v3854_v54 = vrot.slane %v3853_v2, 1  ;;  %v3881_v1 = vadd.f32 %v3880_v33, %v3879_v8  ;;  %v3874_v11 = vadd.f32 %v3873_v45, %v3872_v6  ;;  %v86_v28 = vld [vmem:[%s17523_s20] sm:$0xff] }
 0x38a   :  { %v3888_v55 = vadd.f32 %v3887_v17, %v3886_v34  ;;  %v3841_v57 = vadd.f32 %v3840_v32, %v3839_v38  ;;  %v3848_v19 = vadd.f32 %v3847_v18, %v3846_v61  ;;  %v4005_v23 = vsel %vm3964_vm3, %v14345_v47, %v14294_v21  ;;  %v10937_v6 = vld [vmem:[%s17510_s7] ss:$0 sm:$0xff] }
 0x38b   :  { %v3868_v52 = vrot.slane %v3867_v0, 1  ;;  %v3882_v9 = vrot.slane %v3881_v1, 1  ;;  %v3875_v10 = vrot.slane %v3874_v11, 1  ;;  %v4006_v46 = vsel %vm3966_vm4, %v14366_v51, %v4005_v23  ;;  %v12370_v45 = vld [vmem:[%s17566_s24] sm:$0xff] }
 0x38c   :  { %v3862_v20 = vadd.f32 %v3861_v39, %v3860_v14  ;;  %v4007_v15 = vsel %vm3968_vm5, %v14413_v60, %v4006_v46  ;;  %v3889_v35 = vrot.slane %v3888_v55, 1  ;;  %v4019_v56 = vsel %vm3964_vm3, %v14355_v30, %v14337_v29 }
 0x38d   :  { %v3869_v43 = vadd.f32 %v3868_v52, %v3867_v0  ;;  %v3876_v5 = vadd.f32 %v3875_v10, %v3874_v11  ;;  %v4008_v44 = vsel %vm3970_vm6, %v14428_v4, %v4007_v15  ;;  %v4020_v21 = vsel %vm3966_vm4, %v14405_v48, %v4019_v56  ;;  %v12371_v52 = vld [vmem:[%s17566_s24 + $0x8] sm:$0xff] }
 0x38e   :  { %v3999_v47 = vsel %vm3966_vm4, %v14362_v7, %v14349_v12  ;;  %v4009_v51 = vsel %vm3972_vm7, %v3848_v19, %v4008_v44  ;;  %v3890_v60 = vadd.f32 %v3889_v35, %v3888_v55  ;;  %v4021_v58 = vsel %vm3968_vm5, %v14415_v59, %v4020_v21 }
 0x38f   :  { %v4000_v29 = vsel %vm3968_vm5, %v14409_v25, %v3999_v47  ;;  %v3855_v30 = vadd.f32 %v3854_v54, %v3853_v2  ;;  %v4010_v50 = vsel %vm3974_vm8, %v3876_v5, %v4009_v51  ;;  %v4022_v4 = vsel %vm3970_vm6, %v3834_v22, %v4021_v58 }
 0x390   :  { %v4001_v48 = vsel %vm3970_vm6, %v14418_v36, %v4000_v29  ;;  %4102 = vmatprep.mubr.f32.mxu0 %v4010_v50  ;;  %v4023_v12 = vsel %vm3972_vm7, %v3862_v20, %v4022_v4  ;;  %v3883_v63 = vadd.f32 %v3882_v9, %v3881_v1  ;;  %v4013_v59 = vsel %vm3966_vm4, %v14364_v37, %v14353_v53  ;;  %v93_v53 = vld [vmem:[%s17523_s20 + $0x38] sm:$0xff]  ;;  %v92_v37 = vld [vmem:[%s17523_s20 + $0x30] sm:$0xff]  ;;  %v10938_v9 = vld [vmem:[#allocation3] ss:$0 sm:$0xff] }
 0x391   :  { %v4002_v7 = vsel %vm3972_vm7, %v3841_v57, %v4001_v48  ;;  %v4024_v25 = vsel %vm3974_vm8, %v3890_v60, %v4023_v12  ;;  %v4014_v24 = vsel %vm3968_vm5, %v14411_v13, %v4013_v59  ;;  %v17578_v26 = vmov 0.0   ;;  %11911 = vmatprep.subr.mxu0 %v93_v53  ;;  %v91_v13 = vld [vmem:[%s17523_s20 + $0x28] sm:$0xff]  ;;  %v4397_v50 = vld [vmem:[%s17511_s8 + $0x1c0] sm:$0xff]  ;;  %v4399_v4 = vld [vmem:[%s17511_s8 + $0x1d0] sm:$0xff] }
 0x392   :  { %v4003_v40 = vsel %vm3974_vm8, %v3869_v43, %v4002_v7  ;;  %4177 = vmatprep.mubr.f32.mxu1 %v4024_v25  ;;  %v4015_v36 = vsel %vm3970_vm6, %v14426_v31, %v4014_v24  ;;  %11912 = vmatpush3.msra.mxu0 %v93_v53  ;;  %v90_v31 = vld [vmem:[%s17523_s20 + $0x20] sm:$0xff]  ;;  %v12519_v23 = vmov 0   ;;  %v4398_v29 = vld [vmem:[%s17511_s8 + $0x1c8] sm:$0xff]  ;;  %v4392_v12 = vld [vmem:[%s17511_s8 + $0x198] sm:$0xff] }
 0x393   :  { %4103 = vmatmul.mubr.f32.gmra.mxu0 %v4003_v40  ;;  %v4016_v49 = vsel %vm3972_vm7, %v3855_v30, %v4015_v36  ;;  %11913 = vmatprep.subr.mxu0 %v92_v37  ;;  %v4400_v30 = vld [vmem:[%s17511_s8 + $0x1d8] sm:$0xff]  ;;  %v4390_v48 = vld [vmem:[%s17511_s8 + $0x188] sm:$0xff]  ;;  %v4391_v59 = vld [vmem:[%s17511_s8 + $0x190] sm:$0xff] }
 0x394   :  { %v4017_v16 = vsel %vm3974_vm8, %v3883_v63, %v4016_v49  ;;  %11914 = vmatpush3.msra.mxu0 %v92_v37  ;;  %11977 = vset.pattern.permute.xlu1 %v12519_v23  ;;  %v4389_v63 = vld [vmem:[%s17511_s8 + $0x180] sm:$0xff]  ;;  %v4382_v25 = vld [vmem:[%s17511_s8 + $0x148] sm:$0xff]  ;;  %v4384_v24 = vld [vmem:[%s17511_s8 + $0x158] sm:$0xff] }
 0x395   :  { %4178 = vmatmul.mubr.f32.gmra.mxu1 %v4017_v16  ;;  %11915 = vmatprep.subr.mxu0 %v91_v13  ;;  %v4381_v36 = vld [vmem:[%s17511_s8 + $0x140] sm:$0xff]  ;;  %v4383_v49 = vld [vmem:[%s17511_s8 + $0x150] sm:$0xff]  ;;  %v4374_v16 = vld [vmem:[%s17511_s8 + $0x108] sm:$0xff] }
 0x396   :  { %4517 = vmatprep.mubr.f32.mxu1 %v17578_v26  ;;  %11916 = vmatpush3.msra.mxu0 %v91_v13  ;;  %v4376_v53 = vld [vmem:[%s17511_s8 + $0x118] sm:$0xff]  ;;  %v4373_v37 = vld [vmem:[%s17511_s8 + $0x100] sm:$0xff] }
 0x397   :  { %11917 = vmatprep.subr.mxu0 %v90_v31  ;;  %11976 = vset.pattern.permute.xlu0 %v12519_v23 }
 0x398   :  { %11918 = vmatpush3.msra.mxu0 %v90_v31  ;;  %4469 = vmatprep.subr.mxu1 %v4398_v29  ;;  %v4375_v31 = vld [vmem:[%s17511_s8 + $0x110] sm:$0xff] }
 0x399   :  { %11919 = vmatprep.subr.mxu0 %v89_v41  ;;  %4470 = vmatpush1.msra.mxu1 %v4397_v50  ;;  %v4386_v50 = vld [vmem:[%s17511_s8 + $0x168] sm:$0xff] }
 0x39a   :  { %11920 = vmatpush3.msra.mxu0 %v89_v41  ;;  %4471 = vmatprep.subr.mxu1 %v4390_v48 }
 0x39b   :  { %11921 = vmatprep.subr.mxu0 %v88_v27  ;;  %4472 = vmatpush1.msra.mxu1 %v4389_v63  ;;  %v4380_v63 = vld [vmem:[%s17511_s8 + $0x138] sm:$0xff] }
 0x39c   :  { %11922 = vmatpush3.msra.mxu0 %v88_v27  ;;  %4473 = vmatprep.subr.mxu1 %v4382_v25  ;;  %v4366_v27 = vld [vmem:[%s17511_s8 + $0xc8] sm:$0xff]  ;;  %v4379_v25 = vld [vmem:[%s17511_s8 + $0x130] sm:$0xff] }
 0x39d   :  { %11923 = vmatprep.subr.mxu0 %v87_v3  ;;  %4474 = vmatpush1.msra.mxu1 %v4381_v36  ;;  %v4369_v36 = vld [vmem:[%s17511_s8 + $0xe0] sm:$0xff] }
 0x39e   :  { %11924 = vmatpush3.msra.mxu0 %v87_v3  ;;  %4475 = vmatprep.subr.mxu1 %v4374_v16  ;;  %v4368_v3 = vld [vmem:[%s17511_s8 + $0xd8] sm:$0xff]  ;;  %v4362_v16 = vld [vmem:[%s17511_s8 + $0xa8] sm:$0xff] }
 0x39f   :  { %11925 = vmatprep.subr.mxu0 %v86_v28  ;;  %4476 = vmatpush1.msra.mxu1 %v4373_v37  ;;  %v4361_v37 = vld [vmem:[%s17511_s8 + $0xa0] sm:$0xff] }
 0x3a0   :  { %11926 = vmatpush3.msra.mxu0 %v86_v28  ;;  %v4365_v28 = vld [vmem:[%s17511_s8 + $0xc0] sm:$0xff]  ;;  %4477 = vmatprep.subr.mxu1 %v4366_v27 }
 0x3a1   :  { %4546 = vmatprep.subr.mxu0 %v4400_v30  ;;  %4478 = vmatpush1.msra.mxu1 %v4365_v28  ;;  %v4353_v27 = vld [vmem:[%s17511_s8 + $0x60] sm:$0xff]  ;;  %v4346_v28 = vld [vmem:[%s17511_s8 + $0x28] sm:$0xff] }
 0x417   :  { %v11387_v38 = vpop.f32.mrf.mxu0 }
 0x418   :  { %v11425_v8 = vpop.f32.mrf.mxu1 }
 0x419   :  { %v11388_v34 = vpop.f32.mrf.mxu0 }
 0x41a   :  { %v11389_v2 = vadd.f32 %v11388_v34, %v11387_v38  ;;  %v11426_v61 = vpop.f32.mrf.mxu1  ;;  %v4367_v38 = vld [vmem:[%s17511_s8 + $0xd0] sm:$0xff]  ;;  %v4357_v34 = vld [vmem:[%s17511_s8 + $0x80] sm:$0xff] }
 0x41b   :  { %v11427_v62 = vadd.f32 %v11426_v61, %v11425_v8  ;;  %v4358_v8 = vld [vmem:[%s17511_s8 + $0x88] sm:$0xff] }
 0x41c   :  { %v4100_v14 = vadd.f32 %v11389_v2, %v10937_v6  ;;  %v4359_v2 = vld [vmem:[%s17511_s8 + $0x90] sm:$0xff]  ;;  %v4350_v61 = vld [vmem:[%s17511_s8 + $0x48] sm:$0xff]  ;;  %4479 = vmatprep.subr.mxu1 %v4358_v8  ;;  %v4345_v8 = vld [vmem:[%s17511_s8 + $0x20] sm:$0xff] }
 0x41d   :  { %4480 = vmatpush1.msra.mxu1 %v4357_v34  ;;  %v12010_v34 = vld [vmem:[%s17513_s10 + $0x78] sm:$0xff]  }
 0x41e   :  { %v4175_v32 = vadd.f32 %v11427_v62, %v4100_v14  ;;  %v4352_v14 = vld [vmem:[%s17511_s8 + $0x58] sm:$0xff]  ;;  %v4349_v62 = vld [vmem:[%s17511_s8 + $0x40] sm:$0xff]  ;;  %4481 = vmatprep.subr.mxu1 %v4350_v61 }
 0x41f   :  { %4482 = vmatpush1.msra.mxu1 %v4349_v62  ;;  %v12012_v61 = vld [vmem:[%s17513_s10 + $0x38] sm:$0xff]   ;;  %v12014_v62 = vld [vmem:[%s17513_s10 + $0x70] sm:$0xff]  }
 0x420   :  { %v4183_v33 = vmax.f32 %v4175_v32, 0.0  ;;  %v4351_v32 = vld [vmem:[%s17511_s8 + $0x50] sm:$0xff] }
 0x422   :  { %v14519_v17 = vadd.f32 %v12370_v45, %v4183_v33  ;;  %v4342_v33 = vld [vmem:[%s17511_s8 + $0x8] sm:$0xff]  ;;  %v4344_v45 = vld [vmem:[%s17511_s8 + $0x18] sm:$0xff] }
 0x423   :  { %4483 = vmatprep.subr.mxu1 %v4342_v33  ;;  %v12016_v33 = vld [vmem:[%s17513_s10 + $0x30] sm:$0xff]  }
 0x424   :  { %11927 = vmatprep.mubr.msk.f32.mxu0 %vm371_vm0, %v14519_v17 }
 0x453   :  { %v11390_v22 = vpop.f32.mrf.mxu0 }
 0x455   :  { %v11391_v18 = vpop.f32.mrf.mxu0  ;;  %v11428_v39 = vpop.f32.mrf.mxu1 }
 0x456   :  { %v11392_v0 = vadd.f32 %v11391_v18, %v11390_v22  ;;  %v4341_v22 = vld [vmem:[%s17511_s8] sm:$0xff]  ;;  %v4343_v18 = vld [vmem:[%s17511_s8 + $0x10] sm:$0xff] }
 0x457   :  { %v11429_v1 = vpop.f32.mrf.mxu1  ;;  %4484 = vmatpush1.msra.mxu1 %v4341_v22  ;;  %v12018_v22 = vld [vmem:[%s17513_s10 + $0x68] sm:$0xff]  }
 0x458   :  { %v4105_v54 = vadd.f32 %v11392_v0, %v10937_v6  ;;  %v11430_v11 = vadd.f32 %v11429_v1, %v11428_v39  ;;  %v4360_v6 = vld [vmem:[%s17511_s8 + $0x98] sm:$0xff]  ;;  %v4402_v39 = vld [vmem:[%s17511_s8 + $0x1e8] sm:$0xff] }
 0x459   :  { %v4404_v0 = vld [vmem:[%s17511_s8 + $0x1f8] sm:$0xff]  ;;  %4623 = vmatprep.subr.mxu1 %v4402_v39  ;;  %v12020_v39 = vld [vmem:[%s17513_s10 + $0x28] sm:$0xff]  }
 0x45a   :  { %v4180_v55 = vadd.f32 %v11430_v11, %v4105_v54 }
 0x45c   :  { %v4184_v57 = vmax.f32 %v4180_v55, 0.0 }
 0x45e   :  { %v14526_v19 = vadd.f32 %v12371_v52, %v4184_v57 }
 0x460   :  { %11928 = vmatmul.mubr.msk.f32.vlgmr.msra.gmra.mxu0 %vm371_vm0, %v14526_v19 }
 0x461   :  { %4594 = vmatprep.mubr.f32.mxu0 %v17578_v26  ;;  %4547 = vmatpush1.msra.mxu0 %v4399_v4  ;;  %v4388_v4 = vld [vmem:[%s17511_s8 + $0x178] sm:$0xff] }
 0x462   :  { %4548 = vmatprep.subr.mxu0 %v4392_v12  ;;  %v4385_v12 = vld [vmem:[%s17511_s8 + $0x160] sm:$0xff] }
 0x463   :  { %4549 = vmatpush1.msra.mxu0 %v4391_v59  ;;  %v4377_v59 = vld [vmem:[%s17511_s8 + $0x120] sm:$0xff] }
 0x464   :  { %4550 = vmatprep.subr.mxu0 %v4384_v24  ;;  %v4372_v24 = vld [vmem:[%s17511_s8 + $0xf8] sm:$0xff] }
 0x465   :  { %4551 = vmatpush1.msra.mxu0 %v4383_v49  ;;  %v4371_v49 = vld [vmem:[%s17511_s8 + $0xf0] sm:$0xff] }
 0x466   :  { %4552 = vmatprep.subr.mxu0 %v4376_v53  ;;  %v4364_v53 = vld [vmem:[%s17511_s8 + $0xb8] sm:$0xff] }
 0x467   :  { %4553 = vmatpush1.msra.mxu0 %v4375_v31  ;;  %v4354_v31 = vld [vmem:[%s17511_s8 + $0x68] sm:$0xff] }
 0x468   :  { %4554 = vmatprep.subr.mxu0 %v4368_v3  ;;  %v4355_v3 = vld [vmem:[%s17511_s8 + $0x70] sm:$0xff] }
 0x469   :  { %4555 = vmatpush1.msra.mxu0 %v4367_v38  ;;  %v4348_v38 = vld [vmem:[%s17511_s8 + $0x38] sm:$0xff] }
 0x46a   :  { %4556 = vmatprep.subr.mxu0 %v4360_v6  ;;  %v4347_v6 = vld [vmem:[%s17511_s8 + $0x30] sm:$0xff] }
 0x46b   :  { %4557 = vmatpush1.msra.mxu0 %v4359_v2  ;;  %v12011_v2 = vld [vmem:[%s17513_s10 + $0xf8] sm:$0xff]  }
 0x46c   :  { %4558 = vmatprep.subr.mxu0 %v4352_v14  ;;  %v12013_v14 = vld [vmem:[%s17513_s10 + $0xb8] sm:$0xff]  }
 0x46d   :  { %4559 = vmatpush1.msra.mxu0 %v4351_v32  ;;  %v12015_v32 = vld [vmem:[%s17513_s10 + $0xf0] sm:$0xff]  }
 0x46e   :  { %4560 = vmatprep.subr.mxu0 %v4344_v45  ;;  %v12017_v45 = vld [vmem:[%s17513_s10 + $0xb0] sm:$0xff]  }
 0x46f   :  { %4561 = vmatpush1.msra.mxu0 %v4343_v18  ;;  %v12019_v18 = vld [vmem:[%s17513_s10 + $0xe8] sm:$0xff]  }
 0x470   :  { %4700 = vmatprep.subr.mxu0 %v4404_v0  ;;  %v12021_v0 = vld [vmem:[%s17513_s10 + $0xa8] sm:$0xff]  }
 0x520   :  { %v11929_v10 = vpop.f32.mrf.mxu0 }
 0x521   :  { %v4271_v46 = vadd.f32 %v11929_v10, %v10938_v9 }
 0x522   :  { %v4265_v20 = vpop.f32.mrf.mxu0 }
 0x523   :  { %v10942_v15 = vmul.f32 -1.442695, %v4271_v46  ;;  %v4266_v35 = vadd.f32 %v10938_v9, %v4265_v20  ;;  %v83_v20 = vstv %s17579_s3 }
 0x524   :  { %vm14645_vm10 = vcmp.lt.s32.totalorder %v12965_v42, %v83_v20 }
 0x525   :  { %12154 = vpow2.f32 %v10942_v15  ;;  %v10941_v56 = vmul.f32 -1.442695, %v4266_v35  ;;  %v17580_v15 = vmov 0  ;;  %v82_v35 = vadd.s32 8, %v12965_v42 }
 0x526   :  { %v17581_v15 = vsel %vm14645_vm10, 4294967295, %v17580_v15 }
 0x527   :  { %12156 = vpow2.f32 %v10941_v56  ;;  %17582 = vst [vmem:[#allocation12_spill] sm:$0xff] %v17581_v15  ;;  %vm14672_vm11 = vcmp.lt.s32.totalorder %v82_v35, %v83_v20  ;;  %v12032_v20 = vld [vmem:[%s17513_s10 + $0x10] sm:$0xff]  }
 0x528   :  { %v12033_v35 = vld [vmem:[%s17513_s10 + $0x90] sm:$0xff]  }
 0x532   :  { %v12155_v43 = vpop.eup %12154 }
 0x533   :  { %v4281_v44 = vadd.f32 1.0, %v12155_v43 }
 0x534   :  { %v12157_v5 = vpop.eup %12156 }
 0x535   :  { %v4280_v21 = vadd.f32 1.0, %v12157_v5  ;;  %v4401_v5 = vld [vmem:[%s17511_s8 + $0x1e0] sm:$0xff] }
 0x537   :  { %12158 = vrcp.f32 %v4280_v21 }
 0x538   :  { %12160 = vrcp.f32 %v4281_v44  ;;  %v4403_v44 = vld [vmem:[%s17511_s8 + $0x1f0] sm:$0xff] }
 0x544   :  { %v12159_v47 = vpop.eup %12158 }
 0x545   :  { %4288 = vperm.xlu1 %11977, %v12159_v47   ;;  %v4298_v51 = vsub.f32 1.0, %v12159_v47  ;;  %v12161_v60 = vpop.eup %12160  ;;  %v4394_v47 = vld [vmem:[%s17511_s8 + $0x1a8] sm:$0xff] }
 0x546   :  { %v4299_v58 = vsub.f32 1.0, %v12161_v60 }
 0x547   :  { %4302 = vperm.xlu0 %11976, %v4298_v51   ;;  %v4396_v51 = vld [vmem:[%s17511_s8 + $0x1b8] sm:$0xff] }
 0x54b   :  { %4307 = vperm.xlu0 %11976, %v4299_v58   ;;  %v4395_v58 = vld [vmem:[%s17511_s8 + $0x1b0] sm:$0xff] }
 0x54f   :  { %4293 = vperm.xlu0 %11976, %v12161_v60   ;;  %v17584_v60 = vmov 0 }
 0x550   :  { %v17585_v60 = vsel %vm14672_vm11, 4294967295, %v17584_v60 }
 0x551   :  { %17586 = vst [vmem:[#allocation14_spill] sm:$0xff] %v17585_v60 }
 0x5c0   :  { %v4289_v54 = vpop.permute.xlu1 %4288 }
 0x5c1   :  { %v4296_v1 = vmul.f32 %v4289_v54, %v14519_v17  ;;  %v12022_v54 = vld [vmem:[%s17513_s10 + $0x60] sm:$0xff]  }
 0x5c2   :  { %v4303_v7 = vpop.permute.xlu0 %4302 }
 0x5c3   :  { %v4310_v40 = vmul.f32 %v4303_v7, %v14519_v17  ;;  %v4387_v7 = vld [vmem:[%s17511_s8 + $0x170] sm:$0xff] }
 0x5c5   :  { %4314 = vrot.lane.b32.xlu1 %v4310_v40, %s12520_s27  ;;  %v4370_v40 = vld [vmem:[%s17511_s8 + $0xe8] sm:$0xff] }
 0x5c6   :  { %v4308_v13 = vpop.permute.xlu0 %4307 }
 0x5c7   :  { %v4311_v41 = vmul.f32 %v4308_v13, %v14526_v19  ;;  %v4363_v13 = vld [vmem:[%s17511_s8 + $0xb0] sm:$0xff] }
 0x5c9   :  { %4316 = vrot.lane.b32.xlu1 %v4311_v41, %s12520_s27  ;;  %v4356_v41 = vld [vmem:[%s17511_s8 + $0x78] sm:$0xff] }
 0x5ca   :  { %v4294_v11 = vpop.permute.xlu0 %4293 }
 0x5cb   :  { %v4297_v52 = vmul.f32 %v4294_v11, %v14526_v19  ;;  %v12024_v11 = vld [vmem:[%s17513_s10 + $0x20] sm:$0xff]  }
 0x637   :  { %v4315_v55 = vpop.permute.xlu1 %4314 }
 0x638   :  { %v4320_v57 = vadd.f32 %v4315_v55, %v4296_v1  ;;  %v12023_v1 = vld [vmem:[%s17513_s10 + $0xe0] sm:$0xff]  }
 0x639   :  { %v12025_v55 = vld [vmem:[%s17513_s10 + $0xa0] sm:$0xff]  }
 0x63a   :  { %v4322_v23 = vmax.f32 %v4320_v57, 0.0  ;;  %v12026_v57 = vld [vmem:[%s17513_s10 + $0x58] sm:$0xff]  }
 0x63b   :  { %v4317_v9 = vpop.permute.xlu1 %4316 }
 0x63c   :  { %v4321_v10 = vadd.f32 %v4317_v9, %v4297_v52  ;;  %4326 = vrot.lane.b32.xlu0 %v4322_v23, %s12521_s26  ;;  %v12027_v52 = vld [vmem:[%s17513_s10 + $0xd8] sm:$0xff]  }
 0x63d   :  { %v12029_v9 = vld [vmem:[%s17513_s10 + $0x98] sm:$0xff]  }
 0x63e   :  { %v4323_v46 = vmax.f32 %v4321_v10, 0.0  ;;  %v12030_v10 = vld [vmem:[%s17513_s10 + $0x50] sm:$0xff]  }
 0x640   :  { %4328 = vrot.lane.b32.xlu1 %v4323_v46, %s12521_s26 }
 0x6ae   :  { %v4327_v56 = vpop.permute.xlu0 %4326 }
 0x6af   :  { %v4333_v43 = vsel %vm4332_vm9, %v4322_v23, %v4327_v56  ;;  %v12028_v23 = vld [vmem:[%s17513_s10 + $0x18] sm:$0xff]   ;;  %v12034_v56 = vld [vmem:[%s17513_s10 + $0x48] sm:$0xff]  }
 0x6b0   :  { %v14660_v21 = vsel %vm14645_vm10, %v4333_v43, %v14519_v17  ;;  %v4393_v17 = vld [vmem:[%s17511_s8 + $0x1a0] sm:$0xff]  ;;  %v12035_v43 = vld [vmem:[%s17513_s10 + $0xc8] sm:$0xff]  }
 0x6b1   :  { %17583 = vst [vmem:[#allocation13_spill] sm:$0xff] %v14660_v21  ;;  %10943 = vmatmul.mubr.msk.f32.vlgmr.msra.gmra.mxu1 %vm371_vm0, %v14660_v21  ;;  %10945 = vmatmul.mubr.msk.f32.vlgmr.msra.gmra.mxu0 %vm371_vm0, %v14660_v21 }
 0x6b2   :  { %4624 = vmatpush1.msra.mxu1 %v4401_v5  ;;  %4701 = vmatpush1.msra.mxu0 %v4403_v44  ;;  %v4329_v29 = vpop.permute.xlu1 %4328  ;;  %v12036_v5 = vld [vmem:[%s17513_s10 + $0x8] sm:$0xff]  }
 0x6b3   :  { %v4334_v30 = vsel %vm4332_vm9, %v4323_v46, %v4329_v29  ;;  %4625 = vmatprep.subr.mxu1 %v4394_v47  ;;  %4702 = vmatprep.subr.mxu0 %v4396_v51  ;;  %v12031_v46 = vld [vmem:[%s17513_s10 + $0xd0] sm:$0xff]   ;;  %v12037_v44 = vld [vmem:[%s17513_s10 + $0x88] sm:$0xff]   ;;  %v12038_v47 = vld [vmem:[%s17513_s10 + $0x40] sm:$0xff]  }
 0x6b4   :  { %v14692_v48 = vsel %vm14672_vm11, %v4334_v30, %v14526_v19  ;;  %4626 = vmatpush1.msra.mxu1 %v4393_v17  ;;  %4703 = vmatpush1.msra.mxu0 %v4395_v58  ;;  %v4378_v19 = vld [vmem:[%s17511_s8 + $0x128] sm:$0xff]  ;;  %v12039_v51 = vld [vmem:[%s17513_s10 + $0xc0] sm:$0xff]   ;;  %v12373_v30 = vld [vmem:[%s17519_s16 + $0x38] sm:$0xff] }
 0x6b5   :  { %17587 = vst [vmem:[#allocation15_spill] sm:$0xff] %v14692_v48  ;;  %4523 = vmatprep.mubr.f32.mxu1 %v17578_v26  ;;  %4600 = vmatprep.mubr.f32.mxu0 %v17578_v26  ;;  %v12040_v17 = vld [vmem:[%s17513_s10] sm:$0xff]   ;;  %v12372_v29 = vld [vmem:[%s17519_s16 + $0x28] sm:$0xff] }
 0x6b6   :  { %4627 = vmatprep.subr.mxu1 %v4386_v50  ;;  %4704 = vmatprep.subr.mxu0 %v4388_v4  ;;  %v12041_v58 = vld [vmem:[%s17513_s10 + $0x80] sm:$0xff]  }
 0x6b7   :  { %10944 = vmatmul.mubr.msk.f32.gmra.mxu1 %vm371_vm0, %v14692_v48  ;;  %10946 = vmatmul.mubr.msk.f32.gmra.mxu0 %vm371_vm0, %v14692_v48 }
 0x6b8   :  { %4628 = vmatpush1.msra.mxu1 %v4385_v12  ;;  %4705 = vmatpush1.msra.mxu0 %v4387_v7 }
 0x6b9   :  { %4629 = vmatprep.subr.mxu1 %v4378_v19  ;;  %4706 = vmatprep.subr.mxu0 %v4380_v63 }
 0x6ba   :  { %4630 = vmatpush1.msra.mxu1 %v4377_v59  ;;  %4707 = vmatpush1.msra.mxu0 %v4379_v25  ;;  %v4405_v59 = vld [vmem:[%s17512_s9] sm:$0xff] }
 0x6bb   :  { %4631 = vmatprep.subr.mxu1 %v4370_v40  ;;  %4708 = vmatprep.subr.mxu0 %v4372_v24  ;;  %v17588_v24 = vsub.s32 4, %v12965_v42 }
 0x6bc   :  { %4632 = vmatpush1.msra.mxu1 %v4369_v36  ;;  %4709 = vmatpush1.msra.mxu0 %v4371_v49  ;;  %v17589_v49 = vsub.s32 6, %v12965_v42 }
 0x6bd   :  { %4633 = vmatprep.subr.mxu1 %v4362_v16  ;;  %4710 = vmatprep.subr.mxu0 %v4364_v53  ;;  %v4426_v36 = vrot.slane %v4405_v59, %v17588_v24  ;;  %v17590_v53 = vsub.s32 5, %v12965_v42 }
 0x6be   :  { %4634 = vmatpush1.msra.mxu1 %v4361_v37  ;;  %4711 = vmatpush1.msra.mxu0 %v4363_v13  ;;  %v4434_v16 = vrot.slane %v4405_v59, %v17589_v49  ;;  %v17591_v13 = vsub.s32 7, %v12965_v42 }
 0x6bf   :  { %4635 = vmatprep.subr.mxu1 %v4354_v31  ;;  %4712 = vmatprep.subr.mxu0 %v4356_v41  ;;  %v4430_v37 = vrot.slane %v4405_v59, %v17590_v53 }
 0x6c0   :  { %4636 = vmatpush1.msra.mxu1 %v4353_v27  ;;  %4713 = vmatpush1.msra.mxu0 %v4355_v3  ;;  %v4438_v31 = vrot.slane %v4405_v59, %v17591_v13 }
 0x6c1   :  { %4637 = vmatprep.subr.mxu1 %v4346_v28  ;;  %4714 = vmatprep.subr.mxu0 %v4348_v38 }
 0x6c2   :  { %4638 = vmatpush1.msra.mxu1 %v4345_v8  ;;  %4671 = vmatprep.mubr.f32.mxu1 %v17578_v26 }
 0x6c3   :  { %4715 = vmatpush1.msra.mxu0 %v4347_v6  ;;  %4748 = vmatprep.mubr.f32.mxu0 %v17578_v26 }
 0x6c4   :  { %10947 = vmatmul.mubr.msk.f32.vlgmr.msra.gmra.mxu1 %vm371_vm0, %v14660_v21  ;;  %10949 = vmatmul.mubr.msk.f32.vlgmr.msra.gmra.mxu0 %vm371_vm0, %v14660_v21 }
 0x6c5   :  { %4677 = vmatprep.mubr.f32.mxu1 %v17578_v26  ;;  %4754 = vmatprep.mubr.f32.mxu0 %v17578_v26 }
 0x6c6   :  { %11441 = vmatprep.subr.bf16.mxu1 %v12010_v34  ;;  %11553 = vmatprep.subr.bf16.mxu0 %v12011_v2 }
 0x6c7   :  { %11442 = vmatpush3.bf16.msra.mxu1 %v12012_v61  ;;  %11554 = vmatpush3.bf16.msra.mxu0 %v12013_v14 }
 0x6c8   :  { %10948 = vmatmul.mubr.msk.f32.gmra.mxu1 %vm371_vm0, %v14692_v48  ;;  %10950 = vmatmul.mubr.msk.f32.gmra.mxu0 %vm371_vm0, %v14692_v48 }
 0x6c9   :  { %11443 = vmatprep.subr.bf16.mxu1 %v12014_v62  ;;  %11555 = vmatprep.subr.bf16.mxu0 %v12015_v32  ;;  %v17592_v62 = vld [vmem:[#allocation7_spill] sm:$0xff] }
 0x6cb   :  { %11444 = vmatpush3.bf16.msra.mxu1 %v12016_v33  ;;  %11556 = vmatpush3.bf16.msra.mxu0 %v12017_v45 }
 0x6cc   :  { %11445 = vmatprep.subr.bf16.mxu1 %v12018_v22  ;;  %11557 = vmatprep.subr.bf16.mxu0 %v12019_v18  ;;  %v17593_v18 = vld [vmem:[#allocation8_spill] sm:$0xff] }
 0x6cd   :  { %v4410_v42 = vrot.slane %v4405_v59, %v17593_v18 }
 0x6cf   :  { %11446 = vmatpush3.bf16.msra.mxu1 %v12020_v39  ;;  %11558 = vmatpush3.bf16.msra.mxu0 %v12021_v0  ;;  %v17594_v39 = vld [vmem:[#allocation9_spill] sm:$0xff] }
 0x6d0   :  { %11447 = vmatprep.subr.bf16.mxu1 %v12022_v54  ;;  %11559 = vmatprep.subr.bf16.mxu0 %v12023_v1  ;;  %v4418_v0 = vrot.slane %v4405_v59, %v17594_v39  ;;  %v17595_v1 = vld [vmem:[#allocation10_spill] sm:$0xff] }
 0x6d3   :  { %11448 = vmatpush3.bf16.msra.mxu1 %v12024_v11  ;;  %11560 = vmatpush3.bf16.msra.mxu0 %v12025_v55  ;;  %v4414_v11 = vrot.slane %v4405_v59, %v17595_v1 }
 0x6d4   :  { %11449 = vmatprep.subr.bf16.mxu1 %v12026_v57  ;;  %11561 = vmatprep.subr.bf16.mxu0 %v12027_v52 }
 0x6d7   :  { %11450 = vmatpush3.bf16.msra.mxu1 %v12028_v23  ;;  %11562 = vmatpush3.bf16.msra.mxu0 %v12029_v9  ;;  %v17596_v23 = vld [vmem:[#allocation11_spill] sm:$0xff] }
 0x6d8   :  { %11451 = vmatprep.subr.bf16.mxu1 %v12030_v10  ;;  %11563 = vmatprep.subr.bf16.mxu0 %v12031_v46  ;;  %v4422_v9 = vrot.slane %v4405_v59, %v17596_v23 }
 0x6db   :  { %11452 = vmatpush3.bf16.msra.mxu1 %v12032_v20  ;;  %11564 = vmatpush3.bf16.msra.mxu0 %v12033_v35 }
 0x6dc   :  { %11453 = vmatprep.subr.bf16.mxu1 %v12034_v56  ;;  %11565 = vmatprep.subr.bf16.mxu0 %v12035_v43 }
 0x6df   :  { %11454 = vmatpush3.bf16.msra.mxu1 %v12036_v5  ;;  %11566 = vmatpush3.bf16.msra.mxu0 %v12037_v44 }
 0x6e0   :  { %11455 = vmatprep.subr.bf16.mxu1 %v12038_v47  ;;  %11567 = vmatprep.subr.bf16.mxu0 %v12039_v51 }
 0x6e3   :  { %11456 = vmatpush3.bf16.msra.mxu1 %v12040_v17  ;;  %11568 = vmatpush3.bf16.msra.mxu0 %v12041_v58 }
 0x6e4   :  { %6903 = vmatprep.subr.mxu1 %v12372_v29  ;;  %7160 = vmatprep.subr.mxu0 %v12373_v30 }
 0x771   :  { %v4519_v50 = vpop.f32.mrf.mxu1  ;;  %v4596_v4 = vpop.f32.mrf.mxu0 }
 0x772   :  { %v14898_v46 = vadd.f32 %v4519_v50, %v4410_v42  ;;  %v14900_v20 = vadd.f32 %v4596_v4, %v4418_v0 }
 0x773   :  { %v4521_v12 = vpop.f32.mrf.mxu1  ;;  %v4598_v7 = vpop.f32.mrf.mxu0 }
 0x774   :  { %v14902_v43 = vadd.f32 %v4521_v12, %v4414_v11  ;;  %v14917_v59 = vadd.f32 %v4598_v7, %v4422_v9 }
 0x777   :  { %v4525_v19 = vpop.f32.mrf.mxu1  ;;  %v4602_v63 = vpop.f32.mrf.mxu0 }
 0x778   :  { %v14904_v5 = vadd.f32 %v4525_v19, %v4410_v42  ;;  %v14911_v30 = vadd.f32 %v4602_v63, %v4418_v0 }
 0x779   :  { %v4527_v25 = vpop.f32.mrf.mxu1  ;;  %v4604_v40 = vpop.f32.mrf.mxu0 }
 0x77a   :  { %v14913_v50 = vadd.f32 %v4527_v25, %v4414_v11  ;;  %v14915_v4 = vadd.f32 %v4604_v40, %v4422_v9  ;;  %v14926_v63 = vpack.c.bf16 %v14904_v5, %v14898_v46  ;;  %v14930_v7 = vpack.c.bf16 %v14911_v30, %v14900_v20 }
 0x784   :  { %v4673_v41 = vpop.f32.mrf.mxu1  ;;  %v4750_v27 = vpop.f32.mrf.mxu0 }
 0x785   :  { %v4674_v38 = vadd.f32 %v4673_v41, %v4426_v36  ;;  %v4751_v8 = vadd.f32 %v4750_v27, %v4434_v16  ;;  %v14937_v41 = vpack.c.bf16 %v14913_v50, %v14902_v43  ;;  %v14941_v27 = vpack.c.bf16 %v14915_v4, %v14917_v59 }
 0x786   :  { %v4675_v3 = vpop.f32.mrf.mxu1  ;;  %v4752_v28 = vpop.f32.mrf.mxu0 }
 0x787   :  { %v4676_v6 = vadd.f32 %v4675_v3, %v4430_v37  ;;  %v4753_v34 = vadd.f32 %v4752_v28, %v4438_v31 }
 0x788   :  { %v4679_v14 = vpop.f32.mrf.mxu1  ;;  %v4756_v45 = vpop.f32.mrf.mxu0 }
 0x789   :  { %v10951_v2 = vpack.c.bf16 %v4676_v6, %v4674_v38  ;;  %v10953_v61 = vpack.c.bf16 %v4753_v34, %v4751_v8  ;;  %v4680_v47 = vadd.f32 %v4679_v14, %v4426_v36  ;;  %v4757_v29 = vadd.f32 %v4756_v45, %v4434_v16 }
 0x78a   :  { %v4681_v54 = vpop.f32.mrf.mxu1  ;;  %v4758_v52 = vpop.f32.mrf.mxu0 }
 0x78b   :  { %v4783_v32 = vrot.slane %v10951_v2, %v17592_v62  ;;  %v4797_v33 = vrot.slane %v10953_v61, %v17592_v62  ;;  %v4682_v10 = vadd.f32 %v4681_v54, %v4430_v37  ;;  %v4759_v56 = vadd.f32 %v4758_v52, %v4438_v31 }
 0x78d   :  { %v4805_v22 = vcombine.low %v4783_v32, %v4797_v33  ;;  %v4806_v55 = vcombine.high %v4783_v32, %v4797_v33  ;;  %v10952_v12 = vpack.c.bf16 %v4682_v10, %v4680_v47  ;;  %v10954_v19 = vpack.c.bf16 %v4759_v56, %v4757_v29 }
 0x78f   :  { %v4815_v57 = vrot.slane %v4805_v22, %v17592_v62  ;;  %v14907_v44 = vrot.slane %v4806_v55, %v17592_v62  ;;  %v14933_v31 = vrot.slane %v10952_v12, %v17592_v62  ;;  %v14946_v28 = vrot.slane %v10954_v19, %v17592_v62 }
 0x791   :  { %v10955_v35 = vpack.i.b16 %v4815_v57, %v4815_v57  ;;  %v4842_v51 = vunpack.i.h.s16 %v4815_v57  ;;  %v14921_v49 = vcombine.high %v4815_v57, %v4815_v57  ;;  %v4844_v53 = vunpack.i.h.s16 %v14907_v44 }
 0x792   :  { %v10956_v3 = vpack.i.b16 %v14907_v44, %v14907_v44 }
 0x793   :  { %v4876_v17 = vrot.slane %v10955_v35, %v17593_v18  ;;  %v4884_v58 = vrot.slane %v10955_v35, %v17594_v39  ;;  %v4880_v24 = vrot.slane %v10955_v35, %v17595_v1  ;;  %v4888_v36 = vrot.slane %v10955_v35, %v17596_v23 }
 0x794   :  { %v4858_v25 = vpack.i.b16 %v4842_v51, %v4842_v51  ;;  %v14950_v6 = vpack.i.b16 %v4844_v53, %v4844_v53  ;;  %v14954_v34 = vpack.i.b16 %v14921_v49, %v14921_v49 }
 0x795   :  { %v5130_v37 = vpack.i.b16 %v4876_v17, %v4876_v17  ;;  %v5144_v16 = vpack.i.b16 %v4884_v58, %v4884_v58  ;;  %v5137_v40 = vpack.i.b16 %v4880_v24, %v4880_v24  ;;  %v5151_v13 = vpack.i.b16 %v4888_v36, %v4888_v36 }
 0x796   :  { %v4896_v33 = vrot.slane %v4858_v25, %v17595_v1  ;;  %v4904_v45 = vrot.slane %v4858_v25, %v17596_v23  ;;  %v4892_v0 = vrot.slane %v4858_v25, %v17593_v18  ;;  %v4900_v54 = vrot.slane %v4858_v25, %v17594_v39 }
 0x797   :  { %v5142_v38 = vrot.slane %v5137_v40, %v17593_v18  ;;  %v5156_v8 = vrot.slane %v5151_v13, %v17593_v18  ;;  %v5135_v2 = vrot.slane %v5130_v37, %v17593_v18  ;;  %v5149_v61 = vrot.slane %v5144_v16, %v17593_v18 }
 0x798   :  { %v5165_v57 = vpack.i.b16 %v4896_v33, %v4896_v33  ;;  %v5179_v52 = vpack.i.b16 %v4904_v45, %v4904_v45  ;;  %v5158_v35 = vpack.i.b16 %v4892_v0, %v4892_v0  ;;  %v5172_v56 = vpack.i.b16 %v4900_v54, %v4900_v54  ;;  %v12377_v0 = vld [vmem:[%s17519_s16 + $0x18] sm:$0xff] }
 0x799   :  { %v5578_v14 = vadd.bf16 %v5142_v38, %v14937_v41  ;;  %v5580_v32 = vadd.bf16 %v5156_v8, %v14941_v27  ;;  %v5577_v22 = vadd.bf16 %v5135_v2, %v14926_v63  ;;  %v5579_v42 = vadd.bf16 %v5149_v61, %v14930_v7  ;;  %v12374_v61 = vld [vmem:[%s17519_s16 + $0x20] sm:$0xff] }
 0x79a   :  { %v5170_v17 = vrot.slane %v5165_v57, %v17593_v18  ;;  %v5184_v58 = vrot.slane %v5179_v52, %v17593_v18  ;;  %v5163_v19 = vrot.slane %v5158_v35, %v17593_v18  ;;  %v5177_v24 = vrot.slane %v5172_v56, %v17593_v18  ;;  %v12378_v52 = vld [vmem:[%s17519_s16] sm:$0xff]  ;;  %v12379_v56 = vld [vmem:[%s17519_s16 + $0x10] sm:$0xff] }
 0x79b   :  { %v5642_v11 = vmul.bf16 1045249613, %v5578_v14  ;;  %v5644_v55 = vmul.bf16 1045249613, %v5580_v32  ;;  %v5641_v9 = vmul.bf16 1045249613, %v5577_v22  ;;  %v4912_v37 = vrot.slane %v10956_v3, %v17595_v1 }
 0x79c   :  { %v5643_v10 = vmul.bf16 1045249613, %v5579_v42  ;;  %v5582_v36 = vadd.bf16 %v5170_v17, %v14937_v41  ;;  %v5584_v53 = vadd.bf16 %v5184_v58, %v14941_v27  ;;  %v5581_v16 = vadd.bf16 %v5163_v19, %v14926_v63 }
 0x79d   :  { %v5706_v47 = vmax.bf16 %v5642_v11, %v5578_v14  ;;  %v5708_v51 = vmax.bf16 %v5644_v55, %v5580_v32  ;;  %v5705_v29 = vmax.bf16 %v5641_v9, %v5577_v22  ;;  %v5583_v25 = vadd.bf16 %v5177_v24, %v14930_v7  ;;  %v12375_v14 = vld [vmem:[%s17519_s16 + $0x30] sm:$0xff] }
 0x79e   :  { %v5707_v12 = vmax.bf16 %v5643_v10, %v5579_v42  ;;  %v4920_v40 = vrot.slane %v10956_v3, %v17596_v23  ;;  %v5646_v13 = vmul.bf16 1045249613, %v5582_v36  ;;  %v5648_v38 = vmul.bf16 1045249613, %v5584_v53  ;;  %v12376_v42 = vld [vmem:[%s17519_s16 + $0x8] sm:$0xff] }
 0x79f   :  { %6057 = vmatprep.mubr.bf16.mxu1 %v5706_v47  ;;  %6218 = vmatprep.mubr.bf16.mxu0 %v5708_v51  ;;  %v5193_v8 = vpack.i.b16 %v4912_v37, %v4912_v37  ;;  %v4908_v2 = vrot.slane %v10956_v3, %v17593_v18  ;;  %v5645_v32 = vmul.bf16 1045249613, %v5581_v16  ;;  %v5647_v33 = vmul.bf16 1045249613, %v5583_v25 }
 0x7a0   :  { %6058 = vmatmul.mubr.bf16.vlgmr.msra.gmra.mxu1 %v5705_v29  ;;  %6219 = vmatmul.mubr.bf16.vlgmr.msra.gmra.mxu0 %v5707_v12  ;;  %v5207_v45 = vpack.i.b16 %v4920_v40, %v4920_v40  ;;  %v4916_v22 = vrot.slane %v10956_v3, %v17594_v39  ;;  %v5710_v54 = vmax.bf16 %v5646_v13, %v5582_v36  ;;  %v4846_v47 = vunpack.i.h.s16 %v14921_v49  ;;  %v12380_v49 = vld [vmem:[%s17520_s17 + $0xf8] sm:$0xff] }
 0x7a1   :  { %6904 = vmatpush1.msra.mxu1 %v12374_v61  ;;  %7161 = vmatpush1.msra.mxu0 %v12375_v14  ;;  %v5712_v11 = vmax.bf16 %v5648_v38, %v5584_v53  ;;  %v5198_v55 = vrot.slane %v5193_v8, %v17593_v18  ;;  %v5186_v57 = vpack.i.b16 %v4908_v2, %v4908_v2 }
 0x7a2   :  { %6905 = vmatprep.subr.mxu1 %v12376_v42  ;;  %7162 = vmatprep.subr.mxu0 %v12377_v0  ;;  %v5709_v3 = vmax.bf16 %v5645_v32, %v5581_v16  ;;  %v5711_v9 = vmax.bf16 %v5647_v33, %v5583_v25  ;;  %v5212_v10 = vrot.slane %v5207_v45, %v17593_v18  ;;  %v12381_v25 = vld [vmem:[%s17520_s17 + $0x1f8] sm:$0xff] }
 0x7a3   :  { %6906 = vmatpush1.msra.mxu1 %v12378_v52  ;;  %v5200_v35 = vpack.i.b16 %v4916_v22, %v4916_v22  ;;  %7163 = vmatpush1.msra.mxu0 %v12379_v56  ;;  %v5586_v51 = vadd.bf16 %v5198_v55, %v14937_v41  ;;  %v5191_v17 = vrot.slane %v5186_v57, %v17593_v18 }
 0x7a4   :  { %6065 = vmatprep.mubr.bf16.mxu1 %v5710_v54  ;;  %6226 = vmatprep.mubr.bf16.mxu0 %v5712_v11  ;;  %v4928_v58 = vrot.slane %v14950_v6, %v17595_v1  ;;  %v5588_v29 = vadd.bf16 %v5212_v10, %v14941_v27  ;;  %v4936_v19 = vrot.slane %v14950_v6, %v17596_v23 }
 0x7a5   :  { %v5205_v12 = vrot.slane %v5200_v35, %v17593_v18  ;;  %v4924_v24 = vrot.slane %v14950_v6, %v17593_v18  ;;  %11665 = vmatprep.subr.mxu1 %v12380_v49  ;;  %v5650_v36 = vmul.bf16 1045249613, %v5586_v51  ;;  %v5585_v53 = vadd.bf16 %v5191_v17, %v14926_v63  ;;  %11703 = vmatprep.subr.mxu0 %v12381_v25 }
 0x7a6   :  { %v5221_v37 = vpack.i.b16 %v4928_v58, %v4928_v58  ;;  %v4932_v16 = vrot.slane %v14950_v6, %v17594_v39  ;;  %v5652_v40 = vmul.bf16 1045249613, %v5588_v29  ;;  %v5235_v38 = vpack.i.b16 %v4936_v19, %v4936_v19 }
 0x7a7   :  { %v5587_v13 = vadd.bf16 %v5205_v12, %v14930_v7  ;;  %v5214_v8 = vpack.i.b16 %v4924_v24, %v4924_v24  ;;  %v5714_v2 = vmax.bf16 %v5650_v36, %v5586_v51  ;;  %v5649_v61 = vmul.bf16 1045249613, %v5585_v53 }
 0x7a8   :  { %6066 = vmatmul.mubr.bf16.gmra.mxu1 %v5709_v3  ;;  %6227 = vmatmul.mubr.bf16.gmra.mxu0 %v5711_v9  ;;  %v5226_v14 = vrot.slane %v5221_v37, %v17593_v18  ;;  %v5228_v32 = vpack.i.b16 %v4932_v16, %v4932_v16  ;;  %v5716_v33 = vmax.bf16 %v5652_v40, %v5588_v29 }
 0x7a9   :  { %v5651_v45 = vmul.bf16 1045249613, %v5587_v13  ;;  %v5240_v6 = vrot.slane %v5235_v38, %v17593_v18  ;;  %v5219_v22 = vrot.slane %v5214_v8, %v17593_v18  ;;  %v4862_v42 = vpack.i.b16 %v4846_v47, %v4846_v47  ;;  %6073 = vmatprep.mubr.bf16.mxu1 %v5714_v2 }
 0x7aa   :  { %v5590_v0 = vadd.bf16 %v5226_v14, %v14937_v41  ;;  %v5233_v54 = vrot.slane %v5228_v32, %v17593_v18  ;;  %v4944_v11 = vrot.slane %v14954_v34, %v17595_v1  ;;  %6234 = vmatprep.mubr.bf16.mxu0 %v5716_v33  ;;  %v5713_v55 = vmax.bf16 %v5649_v61, %v5585_v53 }
 0x7ab   :  { %v5592_v57 = vadd.bf16 %v5240_v6, %v14941_v27  ;;  %v5589_v52 = vadd.bf16 %v5219_v22, %v14926_v63  ;;  %v4952_v3 = vrot.slane %v14954_v34, %v17596_v23  ;;  %v4940_v56 = vrot.slane %v14954_v34, %v17593_v18 }
 0x7ac   :  { %v5654_v9 = vmul.bf16 1045249613, %v5590_v0  ;;  %v5591_v10 = vadd.bf16 %v5233_v54, %v14930_v7  ;;  %v5249_v35 = vpack.i.b16 %v4944_v11, %v4944_v11  ;;  %v5715_v47 = vmax.bf16 %v5651_v45, %v5587_v13 }
 0x7ad   :  { %v5656_v51 = vmul.bf16 1045249613, %v5592_v57  ;;  %v5263_v17 = vpack.i.b16 %v4952_v3, %v4952_v3  ;;  %v4948_v58 = vrot.slane %v14954_v34, %v17594_v39  ;;  %v4839_v29 = vcombine.high %v14907_v44, %v14907_v44 }
 0x7ae   :  { %v5718_v12 = vmax.bf16 %v5654_v9, %v5590_v0  ;;  %v5254_v19 = vrot.slane %v5249_v35, %v17593_v18  ;;  %v5242_v24 = vpack.i.b16 %v4940_v56, %v4940_v56  ;;  %v4807_v49 = vcombine.low %v14933_v31, %v14946_v28 }
 0x7af   :  { %v5720_v36 = vmax.bf16 %v5656_v51, %v5592_v57  ;;  %v5653_v53 = vmul.bf16 1045249613, %v5589_v52  ;;  %v5268_v37 = vrot.slane %v5263_v17, %v17593_v18  ;;  %v5655_v16 = vmul.bf16 1045249613, %v5591_v10 }
 0x7b0   :  { %6074 = vmatmul.mubr.bf16.gmra.mxu1 %v5713_v55  ;;  %6235 = vmatmul.mubr.bf16.gmra.mxu0 %v5715_v47  ;;  %v5594_v34 = vadd.bf16 %v5254_v19, %v14937_v41  ;;  %v5247_v25 = vrot.slane %v5242_v24, %v17593_v18  ;;  %v5256_v44 = vpack.i.b16 %v4948_v58, %v4948_v58  ;;  %v4848_v0 = vunpack.i.h.s16 %v4839_v29 }
 0x7b1   :  { %6081 = vmatprep.mubr.bf16.mxu1 %v5718_v12  ;;  %6242 = vmatprep.mubr.bf16.mxu0 %v5720_v36  ;;  %v5596_v40 = vadd.bf16 %v5268_v37, %v14941_v27  ;;  %v4960_v13 = vrot.slane %v4862_v42, %v17595_v1  ;;  %v4968_v38 = vrot.slane %v4862_v42, %v17596_v23 }
 0x7b2   :  { %v4956_v8 = vrot.slane %v4862_v42, %v17593_v18  ;;  %v10958_v2 = vpack.i.b16 %v4839_v29, %v4839_v29  ;;  %v5658_v61 = vmul.bf16 1045249613, %v5594_v34  ;;  %v5261_v14 = vrot.slane %v5256_v44, %v17593_v18 }
 0x7b3   :  { %v4964_v32 = vrot.slane %v4862_v42, %v17594_v39  ;;  %v5660_v33 = vmul.bf16 1045249613, %v5596_v40  ;;  %v5277_v45 = vpack.i.b16 %v4960_v13, %v4960_v13  ;;  %v5291_v6 = vpack.i.b16 %v4968_v38, %v4968_v38 }
 0x7b4   :  { %v5270_v22 = vpack.i.b16 %v4956_v8, %v4956_v8  ;;  %v5717_v54 = vmax.bf16 %v5653_v53, %v5589_v52  ;;  %v5593_v11 = vadd.bf16 %v5247_v25, %v14926_v63  ;;  %v5595_v55 = vadd.bf16 %v5261_v14, %v14930_v7 }
 0x7b5   :  { %v5719_v57 = vmax.bf16 %v5655_v16, %v5591_v10  ;;  %v5282_v3 = vrot.slane %v5277_v45, %v17593_v18  ;;  %v5296_v9 = vrot.slane %v5291_v6, %v17593_v18  ;;  %v5284_v35 = vpack.i.b16 %v4964_v32, %v4964_v32 }
 0x7b6   :  { %v15054_v56 = vrot.slane %v4807_v49, %v17592_v62  ;;  %v5722_v42 = vmax.bf16 %v5658_v61, %v5594_v34  ;;  %v5724_v47 = vmax.bf16 %v5660_v33, %v5596_v40  ;;  %v4976_v51 = vrot.slane %v10958_v2, %v17595_v1 }
 0x7b7   :  { %v5598_v52 = vadd.bf16 %v5282_v3, %v14937_v41  ;;  %v5600_v17 = vadd.bf16 %v5296_v9, %v14941_v27  ;;  %v5275_v10 = vrot.slane %v5270_v22, %v17593_v18  ;;  %v5657_v58 = vmul.bf16 1045249613, %v5593_v11 }
 0x7b8   :  { %6082 = vmatmul.mubr.bf16.gmra.mxu1 %v5717_v54  ;;  %6243 = vmatmul.mubr.bf16.gmra.mxu0 %v5719_v57  ;;  %v5659_v29 = vmul.bf16 1045249613, %v5595_v55  ;;  %v5305_v12 = vpack.i.b16 %v4976_v51, %v4976_v51  ;;  %v4864_v19 = vpack.i.b16 %v4848_v0, %v4848_v0  ;;  %v5289_v49 = vrot.slane %v5284_v35, %v17593_v18 }
 0x7b9   :  { %6089 = vmatprep.mubr.bf16.mxu1 %v5722_v42  ;;  %6250 = vmatprep.mubr.bf16.mxu0 %v5724_v47  ;;  %v5662_v24 = vmul.bf16 1045249613, %v5598_v52  ;;  %v4984_v36 = vrot.slane %v10958_v2, %v17596_v23  ;;  %v5664_v53 = vmul.bf16 1045249613, %v5600_v17  ;;  %v4972_v16 = vrot.slane %v10958_v2, %v17593_v18 }
 0x7ba   :  { %v5310_v37 = vrot.slane %v5305_v12, %v17593_v18  ;;  %v4980_v34 = vrot.slane %v10958_v2, %v17594_v39  ;;  %v10959_v25 = vpack.i.b16 %v15054_v56, %v15054_v56  ;;  %v5597_v44 = vadd.bf16 %v5275_v10, %v14926_v63 }
 0x7bb   :  { %v5319_v40 = vpack.i.b16 %v4984_v36, %v4984_v36  ;;  %v5721_v13 = vmax.bf16 %v5657_v58, %v5593_v11  ;;  %v5723_v38 = vmax.bf16 %v5659_v29, %v5595_v55  ;;  %v5298_v8 = vpack.i.b16 %v4972_v16, %v4972_v16 }
 0x7bc   :  { %v5312_v61 = vpack.i.b16 %v4980_v34, %v4980_v34  ;;  %v5599_v14 = vadd.bf16 %v5289_v49, %v14930_v7  ;;  %v4992_v33 = vrot.slane %v4864_v19, %v17595_v1  ;;  %v5000_v45 = vrot.slane %v4864_v19, %v17596_v23 }
 0x7bd   :  { %v5324_v32 = vrot.slane %v5319_v40, %v17593_v18  ;;  %v5726_v6 = vmax.bf16 %v5662_v24, %v5598_v52  ;;  %v5728_v2 = vmax.bf16 %v5664_v53, %v5600_v17  ;;  %v5602_v22 = vadd.bf16 %v5310_v37, %v14937_v41 }
 0x7be   :  { %v4988_v0 = vrot.slane %v4864_v19, %v17593_v18  ;;  %v5661_v54 = vmul.bf16 1045249613, %v5597_v44  ;;  %v5333_v55 = vpack.i.b16 %v4992_v33, %v4992_v33  ;;  %v5347_v57 = vpack.i.b16 %v5000_v45, %v5000_v45 }
 0x7bf   :  { %v5604_v11 = vadd.bf16 %v5324_v32, %v14941_v27  ;;  %v5303_v3 = vrot.slane %v5298_v8, %v17593_v18  ;;  %v5317_v9 = vrot.slane %v5312_v61, %v17593_v18  ;;  %v4996_v35 = vrot.slane %v4864_v19, %v17594_v39 }
 0x7c0   :  { %6090 = vmatmul.mubr.bf16.gmra.mxu1 %v5721_v13  ;;  %6251 = vmatmul.mubr.bf16.gmra.mxu0 %v5723_v38  ;;  %v4850_v42 = vunpack.i.h.s16 %v15054_v56  ;;  %v5663_v47 = vmul.bf16 1045249613, %v5599_v14  ;;  %v5338_v51 = vrot.slane %v5333_v55, %v17593_v18  ;;  %v5666_v52 = vmul.bf16 1045249613, %v5602_v22 }
 0x7c1   :  { %6097 = vmatprep.mubr.bf16.mxu1 %v5726_v6  ;;  %6258 = vmatprep.mubr.bf16.mxu0 %v5728_v2  ;;  %v5668_v17 = vmul.bf16 1045249613, %v5604_v11  ;;  %v5352_v10 = vrot.slane %v5347_v57, %v17593_v18  ;;  %v5008_v58 = vrot.slane %v10959_v25, %v17595_v1  ;;  %v4808_v29 = vcombine.high %v14933_v31, %v14946_v28 }
 0x7c2   :  { %v5725_v12 = vmax.bf16 %v5661_v54, %v5597_v44  ;;  %v5601_v24 = vadd.bf16 %v5303_v3, %v14926_v63  ;;  %v5603_v49 = vadd.bf16 %v5317_v9, %v14930_v7  ;;  %v5326_v19 = vpack.i.b16 %v4988_v0, %v4988_v0 }
 0x7c3   :  { %v5340_v36 = vpack.i.b16 %v4996_v35, %v4996_v35  ;;  %v5727_v53 = vmax.bf16 %v5663_v47, %v5599_v14  ;;  %v5606_v37 = vadd.bf16 %v5338_v51, %v14937_v41  ;;  %v5361_v16 = vpack.i.b16 %v5008_v58, %v5008_v58 }
 0x7c4   :  { %v5016_v34 = vrot.slane %v10959_v25, %v17596_v23  ;;  %v4866_v40 = vpack.i.b16 %v4850_v42, %v4850_v42  ;;  %v5730_v13 = vmax.bf16 %v5666_v52, %v5602_v22  ;;  %v5732_v38 = vmax.bf16 %v5668_v17, %v5604_v11 }
 0x7c5   :  { %v5608_v8 = vadd.bf16 %v5352_v10, %v14941_v27  ;;  %v15090_v31 = vrot.slane %v4808_v29, %v17592_v62  ;;  %v5665_v44 = vmul.bf16 1045249613, %v5601_v24  ;;  %v5667_v61 = vmul.bf16 1045249613, %v5603_v49 }
 0x7c6   :  { %v5375_v28 = vpack.i.b16 %v5016_v34, %v5016_v34  ;;  %v5331_v14 = vrot.slane %v5326_v19, %v17593_v18  ;;  %v5345_v32 = vrot.slane %v5340_v36, %v17593_v18  ;;  %v5670_v33 = vmul.bf16 1045249613, %v5606_v37 }
 0x7c7   :  { %v5366_v45 = vrot.slane %v5361_v16, %v17593_v18  ;;  %v5004_v6 = vrot.slane %v10959_v25, %v17593_v18  ;;  %v5012_v2 = vrot.slane %v10959_v25, %v17594_v39  ;;  %v5672_v22 = vmul.bf16 1045249613, %v5608_v8 }
 0x7c8   :  { %6098 = vmatmul.mubr.bf16.gmra.mxu1 %v5725_v12  ;;  %6259 = vmatmul.mubr.bf16.gmra.mxu0 %v5727_v53  ;;  %v5380_v0 = vrot.slane %v5375_v28, %v17593_v18  ;;  %v5024_v54 = vrot.slane %v4866_v40, %v17595_v1  ;;  %v5032_v11 = vrot.slane %v4866_v40, %v17596_v23  ;;  %v4852_v12 = vunpack.i.h.s16 %v15090_v31 }
 0x7c9   :  { %6105 = vmatprep.mubr.bf16.mxu1 %v5730_v13  ;;  %6266 = vmatprep.mubr.bf16.mxu0 %v5732_v38  ;;  %v10960_v55 = vpack.i.b16 %v15090_v31, %v15090_v31  ;;  %v5729_v57 = vmax.bf16 %v5665_v44, %v5601_v24  ;;  %v5731_v3 = vmax.bf16 %v5667_v61, %v5603_v49 }
 0x7ca   :  { %v5605_v9 = vadd.bf16 %v5331_v14, %v14926_v63  ;;  %v5607_v35 = vadd.bf16 %v5345_v32, %v14930_v7  ;;  %v5734_v42 = vmax.bf16 %v5670_v33, %v5606_v37  ;;  %v5610_v47 = vadd.bf16 %v5366_v45, %v14937_v41 }
 0x7cb   :  { %v5354_v25 = vpack.i.b16 %v5004_v6, %v5004_v6  ;;  %v5368_v51 = vpack.i.b16 %v5012_v2, %v5012_v2  ;;  %v5736_v52 = vmax.bf16 %v5672_v22, %v5608_v8  ;;  %v5612_v17 = vadd.bf16 %v5380_v0, %v14941_v27 }
 0x7cc   :  { %v5389_v10 = vpack.i.b16 %v5024_v54, %v5024_v54  ;;  %v5403_v58 = vpack.i.b16 %v5032_v11, %v5032_v11  ;;  %v5020_v29 = vrot.slane %v4866_v40, %v17593_v18  ;;  %v5669_v24 = vmul.bf16 1045249613, %v5605_v9 }
 0x7cd   :  { %v5671_v49 = vmul.bf16 1045249613, %v5607_v35  ;;  %v5028_v19 = vrot.slane %v4866_v40, %v17594_v39  ;;  %v5674_v36 = vmul.bf16 1045249613, %v5610_v47  ;;  %v5359_v53 = vrot.slane %v5354_v25, %v17593_v18 }
 0x7ce   :  { %v5373_v37 = vrot.slane %v5368_v51, %v17593_v18  ;;  %v5040_v16 = vrot.slane %v10960_v55, %v17595_v1  ;;  %v5676_v34 = vmul.bf16 1045249613, %v5612_v17  ;;  %v5394_v13 = vrot.slane %v5389_v10, %v17593_v18 }
 0x7cf   :  { %v5408_v38 = vrot.slane %v5403_v58, %v17593_v18  ;;  %v5048_v8 = vrot.slane %v10960_v55, %v17596_v23  ;;  %v5382_v28 = vpack.i.b16 %v5020_v29, %v5020_v29  ;;  %v4868_v44 = vpack.i.b16 %v4852_v12, %v4852_v12 }
 0x7d0   :  { %6106 = vmatmul.mubr.bf16.gmra.mxu1 %v5729_v57  ;;  %6267 = vmatmul.mubr.bf16.gmra.mxu0 %v5731_v3  ;;  %v5733_v61 = vmax.bf16 %v5669_v24, %v5605_v9  ;;  %v5735_v14 = vmax.bf16 %v5671_v49, %v5607_v35  ;;  %v5396_v32 = vpack.i.b16 %v5028_v19, %v5028_v19 }
 0x7d1   :  { %6113 = vmatprep.mubr.bf16.mxu1 %v5734_v42  ;;  %6274 = vmatprep.mubr.bf16.mxu0 %v5736_v52  ;;  %v5738_v40 = vmax.bf16 %v5674_v36, %v5610_v47  ;;  %v5609_v33 = vadd.bf16 %v5359_v53, %v14926_v63  ;;  %v5611_v45 = vadd.bf16 %v5373_v37, %v14930_v7 }
 0x7d2   :  { %v5417_v6 = vpack.i.b16 %v5040_v16, %v5040_v16  ;;  %v5740_v2 = vmax.bf16 %v5676_v34, %v5612_v17  ;;  %v5614_v22 = vadd.bf16 %v5394_v13, %v14937_v41  ;;  %v5616_v0 = vadd.bf16 %v5408_v38, %v14941_v27 }
 0x7d3   :  { %v5431_v54 = vpack.i.b16 %v5048_v8, %v5048_v8  ;;  %v4838_v11 = vcombine.high %v15054_v56, %v15054_v56  ;;  %v5387_v57 = vrot.slane %v5382_v28, %v17593_v18  ;;  %v5401_v3 = vrot.slane %v5396_v32, %v17593_v18 }
 0x7d4   :  { %v5036_v9 = vrot.slane %v10960_v55, %v17593_v18  ;;  %v5044_v35 = vrot.slane %v10960_v55, %v17594_v39  ;;  %v5673_v42 = vmul.bf16 1045249613, %v5609_v33  ;;  %v5675_v47 = vmul.bf16 1045249613, %v5611_v45 }
 0x7d5   :  { %v5422_v25 = vrot.slane %v5417_v6, %v17593_v18  ;;  %v5056_v51 = vrot.slane %v4868_v44, %v17595_v1  ;;  %v5678_v52 = vmul.bf16 1045249613, %v5614_v22  ;;  %v5680_v56 = vmul.bf16 1045249613, %v5616_v0 }
 0x7d6   :  { %v5436_v17 = vrot.slane %v5431_v54, %v17593_v18  ;;  %v5064_v10 = vrot.slane %v4868_v44, %v17596_v23  ;;  %v10961_v58 = vpack.i.b16 %v4838_v11, %v4838_v11  ;;  %v5613_v29 = vadd.bf16 %v5387_v57, %v14926_v63 }
 0x7d7   :  { %v5615_v12 = vadd.bf16 %v5401_v3, %v14930_v7  ;;  %v5410_v24 = vpack.i.b16 %v5036_v9, %v5036_v9  ;;  %v5424_v49 = vpack.i.b16 %v5044_v35, %v5044_v35  ;;  %v5737_v55 = vmax.bf16 %v5673_v42, %v5609_v33 }
 0x7d8   :  { %6114 = vmatmul.mubr.bf16.gmra.mxu1 %v5733_v61  ;;  %6275 = vmatmul.mubr.bf16.gmra.mxu0 %v5735_v14  ;;  %v5739_v19 = vmax.bf16 %v5675_v47, %v5611_v45  ;;  %v5618_v36 = vadd.bf16 %v5422_v25, %v14937_v41  ;;  %v5445_v53 = vpack.i.b16 %v5056_v51, %v5056_v51  ;;  %v4854_v38 = vunpack.i.h.s16 %v4838_v11 }
 0x7d9   :  { %6121 = vmatprep.mubr.bf16.mxu1 %v5738_v40  ;;  %6282 = vmatprep.mubr.bf16.mxu0 %v5740_v2  ;;  %v5742_v37 = vmax.bf16 %v5678_v52, %v5614_v22  ;;  %v5744_v16 = vmax.bf16 %v5680_v56, %v5616_v0  ;;  %v5620_v34 = vadd.bf16 %v5436_v17, %v14941_v27  ;;  %v5677_v8 = vmul.bf16 1045249613, %v5613_v29 }
 0x7da   :  { %v5459_v13 = vpack.i.b16 %v5064_v10, %v5064_v10  ;;  %v5679_v28 = vmul.bf16 1045249613, %v5615_v12  ;;  %v5415_v61 = vrot.slane %v5410_v24, %v17593_v18  ;;  %v5429_v14 = vrot.slane %v5424_v49, %v17593_v18 }
 0x7db   :  { %v5682_v32 = vmul.bf16 1045249613, %v5618_v36  ;;  %v5450_v40 = vrot.slane %v5445_v53, %v17593_v18  ;;  %v5052_v33 = vrot.slane %v4868_v44, %v17593_v18  ;;  %v5060_v45 = vrot.slane %v4868_v44, %v17594_v39 }
 0x7dc   :  { %v5684_v6 = vmul.bf16 1045249613, %v5620_v34  ;;  %v5464_v2 = vrot.slane %v5459_v13, %v17593_v18  ;;  %v5072_v22 = vrot.slane %v10961_v58, %v17595_v1  ;;  %v5080_v0 = vrot.slane %v10961_v58, %v17596_v23 }
 0x7dd   :  { %v4870_v54 = vpack.i.b16 %v4854_v38, %v4854_v38  ;;  %v5741_v11 = vmax.bf16 %v5677_v8, %v5613_v29  ;;  %v5743_v57 = vmax.bf16 %v5679_v28, %v5615_v12  ;;  %v5617_v3 = vadd.bf16 %v5415_v61, %v14926_v63 }
 0x7de   :  { %v5619_v9 = vadd.bf16 %v5429_v14, %v14930_v7  ;;  %v5746_v35 = vmax.bf16 %v5682_v32, %v5618_v36  ;;  %v5622_v42 = vadd.bf16 %v5450_v40, %v14937_v41  ;;  %v5438_v47 = vpack.i.b16 %v5052_v33, %v5052_v33 }
 0x7df   :  { %v5452_v25 = vpack.i.b16 %v5060_v45, %v5060_v45  ;;  %v5748_v44 = vmax.bf16 %v5684_v6, %v5620_v34  ;;  %v5624_v51 = vadd.bf16 %v5464_v2, %v14941_v27  ;;  %v5473_v52 = vpack.i.b16 %v5072_v22, %v5072_v22 }
 0x7e0   :  { %6122 = vmatmul.mubr.bf16.gmra.mxu1 %v5737_v55  ;;  %6283 = vmatmul.mubr.bf16.gmra.mxu0 %v5739_v19  ;;  %v5487_v56 = vpack.i.b16 %v5080_v0, %v5080_v0  ;;  %v5068_v17 = vrot.slane %v10961_v58, %v17593_v18  ;;  %v4840_v10 = vcombine.high %v15090_v31, %v15090_v31  ;;  %v5681_v29 = vmul.bf16 1045249613, %v5617_v3 }
 0x7e1   :  { %6129 = vmatprep.mubr.bf16.mxu1 %v5742_v37  ;;  %6290 = vmatprep.mubr.bf16.mxu0 %v5744_v16  ;;  %v5683_v12 = vmul.bf16 1045249613, %v5619_v9  ;;  %v5076_v24 = vrot.slane %v10961_v58, %v17594_v39  ;;  %v5443_v49 = vrot.slane %v5438_v47, %v17593_v18  ;;  %v5457_v55 = vrot.slane %v5452_v25, %v17593_v18 }
 0x7e2   :  { %v5088_v19 = vrot.slane %v4870_v54, %v17595_v1  ;;  %v5096_v36 = vrot.slane %v4870_v54, %v17596_v23  ;;  %v5686_v53 = vmul.bf16 1045249613, %v5622_v42  ;;  %v5688_v37 = vmul.bf16 1045249613, %v5624_v51 }
 0x7e3   :  { %v5478_v16 = vrot.slane %v5473_v52, %v17593_v18  ;;  %v5492_v31 = vrot.slane %v5487_v56, %v17593_v18  ;;  %v5466_v34 = vpack.i.b16 %v5068_v17, %v5068_v17  ;;  %v10962_v13 = vpack.i.b16 %v4840_v10, %v4840_v10 }
 0x7e4   :  { %v5745_v38 = vmax.bf16 %v5681_v29, %v5617_v3  ;;  %v5747_v8 = vmax.bf16 %v5683_v12, %v5619_v9  ;;  %v5480_v28 = vpack.i.b16 %v5076_v24, %v5076_v24  ;;  %v5621_v58 = vadd.bf16 %v5443_v49, %v14926_v63 }
 0x7e5   :  { %v5623_v61 = vadd.bf16 %v5457_v55, %v14930_v7  ;;  %v5501_v14 = vpack.i.b16 %v5088_v19, %v5088_v19  ;;  %v5515_v32 = vpack.i.b16 %v5096_v36, %v5096_v36  ;;  %v5750_v40 = vmax.bf16 %v5686_v53, %v5622_v42 }
 0x7e6   :  { %v5752_v33 = vmax.bf16 %v5688_v37, %v5624_v51  ;;  %v5626_v45 = vadd.bf16 %v5478_v16, %v14937_v41  ;;  %v5628_v6 = vadd.bf16 %v5492_v31, %v14941_v27  ;;  %v4856_v2 = vunpack.i.h.s16 %v4840_v10 }
 0x7e7   :  { %v5471_v22 = vrot.slane %v5466_v34, %v17593_v18  ;;  %v5485_v0 = vrot.slane %v5480_v28, %v17593_v18  ;;  %v5685_v3 = vmul.bf16 1045249613, %v5621_v58  ;;  %v5687_v9 = vmul.bf16 1045249613, %v5623_v61 }
 0x7e8   :  { %6130 = vmatmul.mubr.bf16.gmra.mxu1 %v5741_v11  ;;  %6291 = vmatmul.mubr.bf16.gmra.mxu0 %v5743_v57  ;;  %v5084_v11 = vrot.slane %v4870_v54, %v17593_v18  ;;  %v5092_v57 = vrot.slane %v4870_v54, %v17594_v39  ;;  %v5520_v42 = vrot.slane %v5515_v32, %v17593_v18  ;;  %v5690_v47 = vmul.bf16 1045249613, %v5626_v45 }
 0x7e9   :  { %6137 = vmatprep.mubr.bf16.mxu1 %v5746_v35  ;;  %6298 = vmatprep.mubr.bf16.mxu0 %v5748_v44  ;;  %v5506_v35 = vrot.slane %v5501_v14, %v17593_v18  ;;  %v5692_v25 = vmul.bf16 1045249613, %v5628_v6  ;;  %v5104_v44 = vrot.slane %v10962_v13, %v17595_v1  ;;  %v5112_v51 = vrot.slane %v10962_v13, %v17596_v23 }
 0x7ea   :  { %v4872_v52 = vpack.i.b16 %v4856_v2, %v4856_v2  ;;  %v5625_v56 = vadd.bf16 %v5471_v22, %v14926_v63  ;;  %v5627_v17 = vadd.bf16 %v5485_v0, %v14930_v7  ;;  %v5494_v10 = vpack.i.b16 %v5084_v11, %v5084_v11 }
 0x7eb   :  { %v5508_v29 = vpack.i.b16 %v5092_v57, %v5092_v57  ;;  %v5749_v54 = vmax.bf16 %v5685_v3, %v5621_v58  ;;  %v5751_v12 = vmax.bf16 %v5687_v9, %v5623_v61  ;;  %v5630_v24 = vadd.bf16 %v5506_v35, %v14937_v41 }
 0x7ec   :  { %v5632_v49 = vadd.bf16 %v5520_v42, %v14941_v27  ;;  %v5754_v55 = vmax.bf16 %v5690_v47, %v5626_v45  ;;  %v5756_v19 = vmax.bf16 %v5692_v25, %v5628_v6  ;;  %v5529_v36 = vpack.i.b16 %v5104_v44, %v5104_v44 }
 0x7ed   :  { %v5543_v53 = vpack.i.b16 %v5112_v51, %v5112_v51  ;;  %v5689_v37 = vmul.bf16 1045249613, %v5625_v56  ;;  %v5691_v16 = vmul.bf16 1045249613, %v5627_v17  ;;  %v5499_v31 = vrot.slane %v5494_v10, %v17593_v18 }
 0x7ee   :  { %v5513_v34 = vrot.slane %v5508_v29, %v17593_v18  ;;  %v5100_v28 = vrot.slane %v10962_v13, %v17593_v18  ;;  %v5108_v58 = vrot.slane %v10962_v13, %v17594_v39  ;;  %v5534_v61 = vrot.slane %v5529_v36, %v17593_v18 }
 0x7ef   :  { %v5548_v14 = vrot.slane %v5543_v53, %v17593_v18  ;;  %v5120_v32 = vrot.slane %v4872_v52, %v17595_v1  ;;  %v5755_v45 = vmax.bf16 %v5691_v16, %v5627_v17  ;;  %v5629_v6 = vadd.bf16 %v5499_v31, %v14926_v63 }
 0x7f0   :  { %6138 = vmatmul.mubr.bf16.gmra.mxu1 %v5745_v38  ;;  %6299 = vmatmul.mubr.bf16.gmra.mxu0 %v5747_v8  ;;  %v5694_v38 = vmul.bf16 1045249613, %v5630_v24  ;;  %v5696_v8 = vmul.bf16 1045249613, %v5632_v49  ;;  %v5631_v2 = vadd.bf16 %v5513_v34, %v14930_v7  ;;  %v5522_v11 = vpack.i.b16 %v5100_v28, %v5100_v28 }
 0x7f1   :  { %6145 = vmatprep.mubr.bf16.mxu1 %v5750_v40  ;;  %6306 = vmatprep.mubr.bf16.mxu0 %v5752_v33  ;;  %v5128_v40 = vrot.slane %v4872_v52, %v17596_v23  ;;  %v5753_v33 = vmax.bf16 %v5689_v37, %v5625_v56  ;;  %v5536_v57 = vpack.i.b16 %v5108_v58, %v5108_v58  ;;  %v5693_v42 = vmul.bf16 1045249613, %v5629_v6 }
 0x7f2   :  { %v5758_v22 = vmax.bf16 %v5694_v38, %v5630_v24  ;;  %v5760_v0 = vmax.bf16 %v5696_v8, %v5632_v49  ;;  %v5634_v13 = vadd.bf16 %v5534_v61, %v14937_v41  ;;  %v5636_v3 = vadd.bf16 %v5548_v14, %v14941_v27 }
 0x7f3   :  { %v5557_v9 = vpack.i.b16 %v5120_v32, %v5120_v32  ;;  %v5571_v35 = vpack.i.b16 %v5128_v40, %v5128_v40  ;;  %v5695_v47 = vmul.bf16 1045249613, %v5631_v2  ;;  %v5527_v25 = vrot.slane %v5522_v11, %v17593_v18 }
 0x7f4   :  { %v5541_v44 = vrot.slane %v5536_v57, %v17593_v18  ;;  %v5116_v51 = vrot.slane %v4872_v52, %v17593_v18  ;;  %v5124_v56 = vrot.slane %v4872_v52, %v17594_v39  ;;  %v5698_v17 = vmul.bf16 1045249613, %v5634_v13 }
 0x7f5   :  { %v5700_v10 = vmul.bf16 1045249613, %v5636_v3  ;;  %v5562_v29 = vrot.slane %v5557_v9, %v17593_v18  ;;  %v5759_v24 = vmax.bf16 %v5695_v47, %v5631_v2  ;;  %v5633_v49 = vadd.bf16 %v5527_v25, %v14926_v63 }
 0x7f6   :  { %v5564_v36 = vpack.i.b16 %v5124_v56, %v5124_v56  ;;  %v5762_v53 = vmax.bf16 %v5698_v17, %v5634_v13  ;;  %v12383_v17 = vld [vmem:[%s17574_s30 + $0x8] sm:$0xff] }
 0x7f7   :  { %v5764_v37 = vmax.bf16 %v5700_v10, %v5636_v3  ;;  %v5638_v16 = vadd.bf16 %v5562_v29, %v14937_v41  ;;  %v5697_v31 = vmul.bf16 1045249613, %v5633_v49  ;;  %v12382_v3 = vld [vmem:[%s17574_s30] sm:$0xff] }
 0x7f8   :  { %6146 = vmatmul.mubr.bf16.gmra.mxu1 %v5749_v54  ;;  %6307 = vmatmul.mubr.bf16.gmra.mxu0 %v5751_v12  ;;  %v5576_v54 = vrot.slane %v5571_v35, %v17593_v18  ;;  %v5757_v12 = vmax.bf16 %v5693_v42, %v5629_v6  ;;  %v5569_v8 = vrot.slane %v5564_v36, %v17593_v18 }
 0x7f9   :  { %6153 = vmatprep.mubr.bf16.mxu1 %v5754_v55  ;;  %6314 = vmatprep.mubr.bf16.mxu0 %v5756_v19  ;;  %v5635_v55 = vadd.bf16 %v5541_v44, %v14930_v7  ;;  %v5550_v19 = vpack.i.b16 %v5116_v51, %v5116_v51  ;;  %v5702_v28 = vmul.bf16 1045249613, %v5638_v16  ;;  %v5761_v61 = vmax.bf16 %v5697_v31, %v5633_v49 }
 0x7fa   :  { %v5640_v52 = vadd.bf16 %v5576_v54, %v14941_v27  ;;  %v5639_v41 = vadd.bf16 %v5569_v8, %v14930_v7 }
 0x7fb   :  { %v5699_v34 = vmul.bf16 1045249613, %v5635_v55  ;;  %v5555_v38 = vrot.slane %v5550_v19, %v17593_v18  ;;  %v5766_v40 = vmax.bf16 %v5702_v28, %v5638_v16 }
 0x7fc   :  { %v5704_v58 = vmul.bf16 1045249613, %v5640_v52 }
 0x7fd   :  { %v5763_v14 = vmax.bf16 %v5699_v34, %v5635_v55  ;;  %v5637_v32 = vadd.bf16 %v5555_v38, %v14926_v63 }
 0x7fe   :  { %v5768_v27 = vmax.bf16 %v5704_v58, %v5640_v52 }
 0x800   :  { %6154 = vmatmul.mubr.bf16.gmra.mxu1 %v5753_v33  ;;  %6315 = vmatmul.mubr.bf16.gmra.mxu0 %v5755_v45  ;;  %v5701_v33 = vmul.bf16 1045249613, %v5637_v32  ;;  %v5703_v45 = vmul.bf16 1045249613, %v5639_v41 }
 0x801   :  { %6161 = vmatprep.mubr.bf16.mxu1 %v5758_v22  ;;  %6322 = vmatprep.mubr.bf16.mxu0 %v5760_v0 }
 0x802   :  { %v5765_v6 = vmax.bf16 %v5701_v33, %v5637_v32  ;;  %v5767_v2 = vmax.bf16 %v5703_v45, %v5639_v41  ;;  %v12385_v32 = vld [vmem:[%s17574_s30 + $0x18] sm:$0xff] }
 0x808   :  { %6162 = vmatmul.mubr.bf16.gmra.mxu1 %v5757_v12  ;;  %6323 = vmatmul.mubr.bf16.gmra.mxu0 %v5759_v24 }
 0x809   :  { %6169 = vmatprep.mubr.bf16.mxu1 %v5762_v53  ;;  %6330 = vmatprep.mubr.bf16.mxu0 %v5764_v37  ;;  %v12384_v37 = vld [vmem:[%s17574_s30 + $0x10] sm:$0xff] }
 0x810   :  { %6170 = vmatmul.mubr.bf16.gmra.mxu1 %v5761_v61  ;;  %6331 = vmatmul.mubr.bf16.gmra.mxu0 %v5763_v14 }
 0x811   :  { %6177 = vmatprep.mubr.bf16.mxu1 %v5766_v40  ;;  %6338 = vmatprep.mubr.bf16.mxu0 %v5768_v27 }
 0x818   :  { %6178 = vmatmul.mubr.bf16.gmra.mxu1 %v5765_v6  ;;  %6339 = vmatmul.mubr.bf16.gmra.mxu0 %v5767_v2 }
 0x819   :  { %6939 = vmatprep.mubr.f32.mxu1 %v17578_v26  ;;  %7196 = vmatprep.mubr.f32.mxu0 %v17578_v26 }
 0x860   :  { %v11457_v22 = vpop.f32.mrf.mxu1  ;;  %v11569_v63 = vpop.f32.mrf.mxu0 }
 0x862   :  { %v11458_v0 = vpop.f32.mrf.mxu1  ;;  %v11570_v7 = vpop.f32.mrf.mxu0 }
 0x863   :  { %v11459_v11 = vadd.f32 %v11458_v0, %v11457_v22  ;;  %v11571_v47 = vadd.f32 %v11570_v7, %v11569_v63 }
 0x864   :  { %v11460_v57 = vpop.f32.mrf.mxu1  ;;  %v11572_v13 = vpop.f32.mrf.mxu0 }
 0x865   :  { %v6060_v9 = vadd.f32 %v12382_v3, %v11459_v11 }
 0x866   :  { %v11461_v35 = vpop.f32.mrf.mxu1  ;;  %v11573_v42 = vpop.f32.mrf.mxu0 }
 0x867   :  { %v11462_v25 = vadd.f32 %v11461_v35, %v11460_v57  ;;  %v15202_v56 = vadd.f32 %v11571_v47, %v6060_v9  ;;  %v11574_v29 = vadd.f32 %v11573_v42, %v11572_v13  ;;  %v12386_v57 = vld [vmem:[%s17574_s30 + $0x20] sm:$0xff] }
 0x868   :  { %v11463_v44 = vpop.f32.mrf.mxu1  ;;  %v11575_v51 = vpop.f32.mrf.mxu0 }
 0x869   :  { %v6063_v10 = vadd.f32 %v12383_v17, %v11462_v25  ;;  %v6347_v36 = vsel %vm2272_vm1, %v15202_v56, -inf }
 0x86a   :  { %v11464_v54 = vpop.f32.mrf.mxu1  ;;  %v11576_v12 = vpop.f32.mrf.mxu0 }
 0x86b   :  { %v6224_v24 = vadd.f32 %v11574_v29, %v6063_v10  ;;  %v11465_v49 = vadd.f32 %v11464_v54, %v11463_v44  ;;  %v11577_v38 = vadd.f32 %v11576_v12, %v11575_v51  ;;  %v12387_v54 = vld [vmem:[%s17574_s30 + $0x28] sm:$0xff] }
 0x86c   :  { %v11466_v55 = vpop.f32.mrf.mxu1  ;;  %v11578_v19 = vpop.f32.mrf.mxu0 }
 0x86d   :  { %v6348_v53 = vsel %vm2272_vm1, %v6224_v24, -inf  ;;  %v6068_v16 = vadd.f32 %v12384_v37, %v11465_v49 }
 0x86e   :  { %v6349_v52 = vmax.f32 %v6347_v36, %v6348_v53  ;;  %v11467_v31 = vpop.f32.mrf.mxu1  ;;  %v11579_v34 = vpop.f32.mrf.mxu0 }
 0x86f   :  { %v11468_v8 = vadd.f32 %v11467_v31, %v11466_v55  ;;  %v15213_v14 = vadd.f32 %v11577_v38, %v6068_v16  ;;  %v11580_v40 = vadd.f32 %v11579_v34, %v11578_v19 }
 0x870   :  { %v6350_v28 = vrot.slane %v6349_v52, 4  ;;  %v11469_v58 = vpop.f32.mrf.mxu1  ;;  %v11581_v61 = vpop.f32.mrf.mxu0 }
 0x871   :  { %v6071_v41 = vadd.f32 %v12385_v32, %v11468_v8  ;;  %v6356_v7 = vsel %vm2272_vm1, %v15213_v14, -inf }
 0x872   :  { %v6351_v27 = vmax.f32 %v6349_v52, %v6350_v28  ;;  %v11470_v33 = vpop.f32.mrf.mxu1  ;;  %v11582_v45 = vpop.f32.mrf.mxu0 }
 0x873   :  { %v15218_v6 = vadd.f32 %v11580_v40, %v6071_v41  ;;  %v11471_v2 = vadd.f32 %v11470_v33, %v11469_v58  ;;  %v11583_v47 = vadd.f32 %v11582_v45, %v11581_v61  ;;  %v12388_v61 = vld [vmem:[%s17574_s30 + $0x30] sm:$0xff] }
 0x874   :  { %v6352_v22 = vrot.slane %v6351_v27, 2  ;;  %v11472_v63 = vpop.f32.mrf.mxu1  ;;  %v11584_v0 = vpop.f32.mrf.mxu0 }
 0x875   :  { %v6357_v11 = vsel %vm2272_vm1, %v15218_v6, -inf  ;;  %v6076_v13 = vadd.f32 %v12386_v57, %v11471_v2  ;;  %v12389_v57 = vld [vmem:[%s17574_s30 + $0x38] sm:$0xff] }
 0x876   :  { %v6353_v3 = vmax.f32 %v6351_v27, %v6352_v22  ;;  %v6358_v9 = vmax.f32 %v6356_v7, %v6357_v11  ;;  %v11473_v35 = vpop.f32.mrf.mxu1  ;;  %v11585_v42 = vpop.f32.mrf.mxu0 }
 0x877   :  { %v11474_v25 = vadd.f32 %v11473_v35, %v11472_v63  ;;  %v15227_v29 = vadd.f32 %v11583_v47, %v6076_v13  ;;  %v11586_v49 = vadd.f32 %v11585_v42, %v11584_v0 }
 0x878   :  { %v6354_v44 = vrot.slane %v6353_v3, 1  ;;  %v6359_v51 = vrot.slane %v6358_v9, 4  ;;  %v11475_v17 = vpop.f32.mrf.mxu1  ;;  %v11587_v10 = vpop.f32.mrf.mxu0 }
 0x879   :  { %v6079_v12 = vadd.f32 %v12387_v54, %v11474_v25  ;;  %v6365_v28 = vsel %vm2272_vm1, %v15227_v29, -inf }
 0x87a   :  { %v6355_v55 = vmax.f32 %v6353_v3, %v6354_v44  ;;  %v6360_v19 = vmax.f32 %v6358_v9, %v6359_v51  ;;  %v11476_v36 = vpop.f32.mrf.mxu1  ;;  %v11588_v53 = vpop.f32.mrf.mxu0 }
 0x87b   :  { %v15232_v37 = vadd.f32 %v11586_v49, %v6079_v12  ;;  %v11477_v16 = vadd.f32 %v11476_v36, %v11475_v17  ;;  %v11589_v45 = vadd.f32 %v11588_v53, %v11587_v10 }
 0x87c   :  { %v6491_v52 = vsub.f32 %v15202_v56, %v6355_v55  ;;  %v6492_v31 = vsub.f32 %v6224_v24, %v6355_v55  ;;  %v6361_v34 = vrot.slane %v6360_v19, 2  ;;  %v11478_v38 = vpop.f32.mrf.mxu1  ;;  %v11590_v8 = vpop.f32.mrf.mxu0 }
 0x87d   :  { %v6366_v58 = vsel %vm2272_vm1, %v15232_v37, -inf  ;;  %v6084_v32 = vadd.f32 %v12388_v61, %v11477_v16 }
 0x87e   :  { %v6523_v41 = vmul.f32 1.442695, %v6491_v52  ;;  %v6525_v40 = vmul.f32 1.442695, %v6492_v31  ;;  %v6362_v27 = vmax.f32 %v6360_v19, %v6361_v34  ;;  %v6367_v33 = vmax.f32 %v6365_v28, %v6366_v58  ;;  %v11479_v56 = vpop.f32.mrf.mxu1  ;;  %v11591_v24 = vpop.f32.mrf.mxu0  ;;  %v12390_v19 = vld [vmem:[%s17574_s30 + $0x40] sm:$0xff] }
 0x87f   :  { %v11480_v2 = vadd.f32 %v11479_v56, %v11478_v38  ;;  %v15242_v11 = vadd.f32 %v11589_v45, %v6084_v32  ;;  %v11592_v3 = vadd.f32 %v11591_v24, %v11590_v8 }
 0x880   :  { %12162 = vpow2.f32 %v6523_v41  ;;  %v6363_v22 = vrot.slane %v6362_v27, 1  ;;  %v6368_v63 = vrot.slane %v6367_v33, 4  ;;  %v11481_v0 = vpop.f32.mrf.mxu1  ;;  %v11593_v7 = vpop.f32.mrf.mxu0  ;;  %v12391_v41 = vld [vmem:[%s17574_s30 + $0x48] sm:$0xff] }
 0x881   :  { %12164 = vpow2.f32 %v6525_v40  ;;  %v6087_v13 = vadd.f32 %v12389_v57, %v11480_v2  ;;  %v6374_v49 = vsel %vm2272_vm1, %v15242_v11, -inf }
 0x882   :  { %v6364_v9 = vmax.f32 %v6362_v27, %v6363_v22  ;;  %v6369_v35 = vmax.f32 %v6367_v33, %v6368_v63  ;;  %v11482_v42 = vpop.f32.mrf.mxu1  ;;  %v11594_v47 = vpop.f32.mrf.mxu0 }
 0x883   :  { %v15247_v25 = vadd.f32 %v11592_v3, %v6087_v13  ;;  %v11483_v44 = vadd.f32 %v11482_v42, %v11481_v0  ;;  %v11595_v34 = vadd.f32 %v11594_v47, %v11593_v7  ;;  %v12392_v42 = vld [vmem:[%s17574_s30 + $0x50] sm:$0xff] }
 0x884   :  { %v6493_v51 = vsub.f32 %v15213_v14, %v6364_v9  ;;  %v6494_v17 = vsub.f32 %v15218_v6, %v6364_v9  ;;  %v6370_v10 = vrot.slane %v6369_v35, 2  ;;  %v11484_v54 = vpop.f32.mrf.mxu1  ;;  %v11596_v12 = vpop.f32.mrf.mxu0 }
 0x885   :  { %v6375_v55 = vsel %vm2272_vm1, %v15247_v25, -inf  ;;  %v6092_v36 = vadd.f32 %v12390_v19, %v11483_v44 }
 0x886   :  { %v6527_v53 = vmul.f32 1.442695, %v6493_v51  ;;  %v6529_v16 = vmul.f32 1.442695, %v6494_v17  ;;  %v6371_v52 = vmax.f32 %v6369_v35, %v6370_v10  ;;  %v6376_v14 = vmax.f32 %v6374_v49, %v6375_v55  ;;  %v11485_v31 = vpop.f32.mrf.mxu1  ;;  %v11597_v6 = vpop.f32.mrf.mxu0 }
 0x887   :  { %v11486_v38 = vadd.f32 %v11485_v31, %v11484_v54  ;;  %v15258_v32 = vadd.f32 %v11595_v34, %v6092_v36  ;;  %v11598_v27 = vadd.f32 %v11597_v6, %v11596_v12  ;;  %v12393_v6 = vld [vmem:[%s17574_s30 + $0x58] sm:$0xff] }
 0x888   :  { %12166 = vpow2.f32 %v6527_v53  ;;  %v6372_v8 = vrot.slane %v6371_v52, 1  ;;  %v6377_v28 = vrot.slane %v6376_v14, 4  ;;  %v11487_v58 = vpop.f32.mrf.mxu1  ;;  %v11599_v61 = vpop.f32.mrf.mxu0 }
 0x889   :  { %12168 = vpow2.f32 %v6529_v16  ;;  %v6095_v40 = vadd.f32 %v12391_v41, %v11486_v38  ;;  %v6383_v9 = vsel %vm2272_vm1, %v15258_v32, -inf }
 0x88a   :  { %v6373_v33 = vmax.f32 %v6371_v52, %v6372_v8  ;;  %v6378_v56 = vmax.f32 %v6376_v14, %v6377_v28  ;;  %v11488_v24 = vpop.f32.mrf.mxu1  ;;  %v11600_v45 = vpop.f32.mrf.mxu0 }
 0x88b   :  { %v15263_v2 = vadd.f32 %v11598_v27, %v6095_v40  ;;  %v11489_v22 = vadd.f32 %v11488_v24, %v11487_v58  ;;  %v11601_v44 = vadd.f32 %v11600_v45, %v11599_v61 }
 0x88c   :  { %v6495_v63 = vsub.f32 %v15227_v29, %v6373_v33  ;;  %v6496_v0 = vsub.f32 %v15232_v37, %v6373_v33  ;;  %v6379_v7 = vrot.slane %v6378_v56, 2  ;;  %v11490_v57 = vpop.f32.mrf.mxu1  ;;  %v11602_v13 = vpop.f32.mrf.mxu0 }
 0x88d   :  { %v15267_v3 = vpop.eup %12162  ;;  %v6384_v35 = vsel %vm2272_vm1, %v15263_v2, -inf  ;;  %v6100_v47 = vadd.f32 %v12392_v42, %v11489_v22 }
 0x88e   :  { %v15276_v29 = vpop.eup %12164  ;;  %v6587_v37 = vsel %vm2272_vm1, %v15267_v3, 0.0  ;;  %v6531_v51 = vmul.f32 1.442695, %v6495_v63  ;;  %v6533_v17 = vmul.f32 1.442695, %v6496_v0  ;;  %v6380_v10 = vmax.f32 %v6378_v56, %v6379_v7  ;;  %v11491_v54 = vpop.f32.mrf.mxu1 }
 0x88f   :  { %v11603_v12 = vpop.f32.mrf.mxu0  ;;  %v6588_v49 = vsel %vm2272_vm1, %v15276_v29, 0.0  ;;  %v6385_v55 = vmax.f32 %v6383_v9, %v6384_v35  ;;  %v11492_v19 = vadd.f32 %v11491_v54, %v11490_v57  ;;  %v15282_v16 = vadd.f32 %v11601_v44, %v6100_v47 }
 0x890   :  { %v6589_v36 = vadd.f32 %v6588_v49, %v6587_v37  ;;  %12170 = vpow2.f32 %v6531_v51  ;;  %v6381_v53 = vrot.slane %v6380_v10, 1  ;;  %v11493_v52 = vpop.f32.mrf.mxu1  ;;  %v11604_v38 = vadd.f32 %v11603_v12, %v11602_v13  ;;  %v12394_v13 = vld [vmem:[%s17574_s30 + $0x60] sm:$0xff] }
 0x891   :  { %v11605_v14 = vpop.f32.mrf.mxu0  ;;  %12172 = vpow2.f32 %v6533_v17  ;;  %v6386_v31 = vrot.slane %v6385_v55, 4  ;;  %v6103_v34 = vadd.f32 %v12393_v6, %v11492_v19  ;;  %v6392_v45 = vsel %vm2272_vm1, %v15282_v16, -inf }
 0x892   :  { %v6590_v8 = vrot.slane %v6589_v36, 4  ;;  %v6382_v28 = vmax.f32 %v6380_v10, %v6381_v53  ;;  %v11494_v58 = vpop.f32.mrf.mxu1 }
 0x893   :  { %v11606_v61 = vpop.f32.mrf.mxu0  ;;  %v6387_v41 = vmax.f32 %v6385_v55, %v6386_v31  ;;  %v15287_v40 = vadd.f32 %v11604_v38, %v6103_v34  ;;  %v11495_v27 = vadd.f32 %v11494_v58, %v11493_v52  ;;  %v12395_v34 = vld [vmem:[%s17574_s30 + $0x68] sm:$0xff] }
 0x894   :  { %v6591_v33 = vadd.f32 %v6590_v8, %v6589_v36  ;;  %v6497_v56 = vsub.f32 %v15242_v11, %v6382_v28  ;;  %v6498_v24 = vsub.f32 %v15247_v25, %v6382_v28  ;;  %v11496_v22 = vpop.f32.mrf.mxu1  ;;  %v11607_v35 = vadd.f32 %v11606_v61, %v11605_v14 }
 0x895   :  { %v11608_v63 = vpop.f32.mrf.mxu0  ;;  %v15293_v0 = vpop.eup %12166  ;;  %v6388_v7 = vrot.slane %v6387_v41, 2  ;;  %v6393_v57 = vsel %vm2272_vm1, %v15287_v40, -inf  ;;  %v6108_v9 = vadd.f32 %v12394_v13, %v11495_v27 }
 0x896   :  { %v15300_v11 = vpop.eup %12168  ;;  %v6592_v25 = vrot.slane %v6591_v33, 2  ;;  %v6596_v42 = vsel %vm2272_vm1, %v15293_v0, 0.0  ;;  %v6535_v47 = vmul.f32 1.442695, %v6497_v56  ;;  %v6537_v44 = vmul.f32 1.442695, %v6498_v24  ;;  %v11497_v37 = vpop.f32.mrf.mxu1 }
 0x897   :  { %v11609_v51 = vpop.f32.mrf.mxu0  ;;  %v6597_v17 = vsel %vm2272_vm1, %v15300_v11, 0.0  ;;  %v6389_v10 = vmax.f32 %v6387_v41, %v6388_v7  ;;  %v6394_v54 = vmax.f32 %v6392_v45, %v6393_v57  ;;  %v15306_v12 = vadd.f32 %v11607_v35, %v6108_v9 }
 0x898   :  { %v6593_v49 = vadd.f32 %v6592_v25, %v6591_v33  ;;  %v6598_v55 = vadd.f32 %v6597_v17, %v6596_v42  ;;  %12174 = vpow2.f32 %v6535_v47  ;;  %v11498_v19 = vadd.f32 %v11497_v37, %v11496_v22  ;;  %v11499_v36 = vpop.f32.mrf.mxu1  ;;  %v12396_v25 = vld [vmem:[%s17574_s30 + $0x70] sm:$0xff] }
 0x899   :  { %v11611_v53 = vpop.f32.mrf.mxu0  ;;  %12176 = vpow2.f32 %v6537_v44  ;;  %v6390_v52 = vrot.slane %v6389_v10, 1  ;;  %v6395_v14 = vrot.slane %v6394_v54, 4  ;;  %v11610_v8 = vadd.f32 %v11609_v51, %v11608_v63 }
 0x89a   :  { %v6594_v31 = vrot.slane %v6593_v49, 1  ;;  %v6599_v6 = vrot.slane %v6598_v55, 4  ;;  %v6111_v38 = vadd.f32 %v12395_v34, %v11498_v19  ;;  %v11500_v28 = vpop.f32.mrf.mxu1  ;;  %v6401_v27 = vsel %vm2272_vm1, %v15306_v12, -inf }
 0x89b   :  { %v11612_v58 = vpop.f32.mrf.mxu0  ;;  %v6391_v61 = vmax.f32 %v6389_v10, %v6390_v52  ;;  %v6396_v41 = vmax.f32 %v6394_v54, %v6395_v14  ;;  %v11501_v33 = vadd.f32 %v11500_v28, %v11499_v36 }
 0x89c   :  { %v6595_v56 = vadd.f32 %v6594_v31, %v6593_v49  ;;  %v6600_v24 = vadd.f32 %v6599_v6, %v6598_v55  ;;  %v15313_v45 = vadd.f32 %v11610_v8, %v6111_v38  ;;  %v11613_v22 = vadd.f32 %v11612_v58, %v11611_v53  ;;  %v11502_v7 = vpop.f32.mrf.mxu1 }
 0x89d   :  { %v11614_v57 = vpop.f32.mrf.mxu0  ;;  %v15315_v13 = vpop.eup %12170  ;;  %v6499_v9 = vsub.f32 %v15258_v32, %v6391_v61  ;;  %v6500_v63 = vsub.f32 %v15263_v2, %v6391_v61  ;;  %v6397_v35 = vrot.slane %v6396_v41, 2  ;;  %v6116_v42 = vadd.f32 %v12396_v25, %v11501_v33 }
 0x89e   :  { %v15322_v47 = vpop.eup %12172  ;;  %12178 = vrcp.f32 %v6595_v56  ;;  %v6601_v44 = vrot.slane %v6600_v24, 2  ;;  %v6605_v37 = vsel %vm2272_vm1, %v15315_v13, 0.0  ;;  %v6402_v51 = vsel %vm2272_vm1, %v15313_v45, -inf  ;;  %v11503_v17 = vpop.f32.mrf.mxu1 }
 0x89f   :  { %v11615_v32 = vpop.f32.mrf.mxu0  ;;  %v6606_v2 = vsel %vm2272_vm1, %v15322_v47, 0.0  ;;  %v6539_v10 = vmul.f32 1.442695, %v6499_v9  ;;  %v6541_v54 = vmul.f32 1.442695, %v6500_v63  ;;  %v6398_v49 = vmax.f32 %v6396_v41, %v6397_v35 }
 0x8a0   :  { %v6602_v55 = vadd.f32 %v6601_v44, %v6600_v24  ;;  %v6607_v19 = vadd.f32 %v6606_v2, %v6605_v37  ;;  %v6403_v36 = vmax.f32 %v6401_v27, %v6402_v51  ;;  %v15330_v53 = vadd.f32 %v11613_v22, %v6116_v42  ;;  %v11505_v52 = vpop.f32.mrf.mxu1  ;;  %v12397_v27 = vld [vmem:[%s17574_s30 + $0x78] sm:$0xff]  ;;  %v12398_v51 = vld [vmem:[%s17574_s30 + $0x80] sm:$0xff] }
 0x8a1   :  { %v11617_v14 = vpop.f32.mrf.mxu0  ;;  %12180 = vpow2.f32 %v6539_v10  ;;  %v6399_v31 = vrot.slane %v6398_v49, 1  ;;  %v11504_v6 = vadd.f32 %v11503_v17, %v11502_v7  ;;  %v11616_v34 = vadd.f32 %v11615_v32, %v11614_v57 }
 0x8a2   :  { %v6603_v38 = vrot.slane %v6602_v55, 1  ;;  %v6608_v8 = vrot.slane %v6607_v19, 4  ;;  %12182 = vpow2.f32 %v6541_v54  ;;  %v6404_v28 = vrot.slane %v6403_v36, 4  ;;  %v11506_v58 = vpop.f32.mrf.mxu1 }
 0x8a3   :  { %v11618_v61 = vpop.f32.mrf.mxu0  ;;  %v6400_v33 = vmax.f32 %v6398_v49, %v6399_v31  ;;  %v6410_v41 = vsel %vm2272_vm1, %v15330_v53, -inf  ;;  %v6119_v56 = vadd.f32 %v12397_v27, %v11504_v6  ;;  %v11507_v24 = vadd.f32 %v11506_v58, %v11505_v52 }
 0x8a4   :  { %v6609_v22 = vadd.f32 %v6608_v8, %v6607_v19  ;;  %v6405_v9 = vmax.f32 %v6403_v36, %v6404_v28  ;;  %v11619_v7 = vadd.f32 %v11618_v61, %v11617_v14  ;;  %v11508_v57 = vpop.f32.mrf.mxu1  ;;  %v6604_v35 = vadd.f32 %v6603_v38, %v6602_v55 }
 0x8a5   :  { %v11620_v63 = vpop.f32.mrf.mxu0  ;;  %v15337_v25 = vpop.eup %12174  ;;  %v6501_v42 = vsub.f32 %v15282_v16, %v6400_v33  ;;  %v6502_v44 = vsub.f32 %v15287_v40, %v6400_v33  ;;  %v15341_v37 = vadd.f32 %v11616_v34, %v6119_v56  ;;  %v6124_v17 = vadd.f32 %v12398_v51, %v11507_v24 }
 0x8a6   :  { %v15346_v32 = vpop.eup %12176  ;;  %v6610_v2 = vrot.slane %v6609_v22, 2  ;;  %v6614_v10 = vsel %vm2272_vm1, %v15337_v25, 0.0  ;;  %v6406_v54 = vrot.slane %v6405_v9, 2  ;;  %v11509_v49 = vpop.f32.mrf.mxu1  ;;  %12184 = vrcp.f32 %v6604_v35 }
 0x8a7   :  { %v11621_v55 = vpop.f32.mrf.mxu0  ;;  %v6615_v16 = vsel %vm2272_vm1, %v15346_v32, 0.0  ;;  %v6543_v40 = vmul.f32 1.442695, %v6501_v42  ;;  %v6545_v19 = vmul.f32 1.442695, %v6502_v44  ;;  %v6411_v36 = vsel %vm2272_vm1, %v15341_v37, -inf }
 0x8a8   :  { %v6611_v52 = vadd.f32 %v6610_v2, %v6609_v22  ;;  %v6616_v14 = vadd.f32 %v6615_v16, %v6614_v10  ;;  %v6407_v31 = vmax.f32 %v6405_v9, %v6406_v54  ;;  %v6412_v6 = vmax.f32 %v6410_v41, %v6411_v36  ;;  %v11511_v34 = vpop.f32.mrf.mxu1  ;;  %v12399_v41 = vld [vmem:[%s17574_s30 + $0x88] sm:$0xff] }
 0x8a9   :  { %v11623_v38 = vpop.f32.mrf.mxu0  ;;  %12186 = vpow2.f32 %v6543_v40  ;;  %v15354_v8 = vadd.f32 %v11619_v7, %v6124_v17  ;;  %v11510_v28 = vadd.f32 %v11509_v49, %v11508_v57  ;;  %v11622_v58 = vadd.f32 %v11621_v55, %v11620_v63  ;;  %v12400_v49 = vld [vmem:[%s17574_s30 + $0x90] sm:$0xff] }
 0x8aa   :  { %v6612_v61 = vrot.slane %v6611_v52, 1  ;;  %v6617_v33 = vrot.slane %v6616_v14, 4  ;;  %12188 = vpow2.f32 %v6545_v19  ;;  %v6408_v27 = vrot.slane %v6407_v31, 1  ;;  %v11512_v56 = vpop.f32.mrf.mxu1 }
 0x8ab   :  { %v11624_v24 = vpop.f32.mrf.mxu0  ;;  %v12179_v35 = vpop.eup %12178  ;;  %v6413_v42 = vrot.slane %v6412_v6, 4  ;;  %v6419_v22 = vsel %vm2272_vm1, %v15354_v8, -inf  ;;  %v6127_v9 = vadd.f32 %v12399_v41, %v11510_v28  ;;  %v11513_v7 = vadd.f32 %v11512_v56, %v11511_v34  ;;  %v12401_v56 = vld [vmem:[%s17520_s17 + $0x78] sm:$0xff] }
 0x8ac   :  { %v6618_v44 = vadd.f32 %v6617_v33, %v6616_v14  ;;  %v6409_v57 = vmax.f32 %v6407_v31, %v6408_v27  ;;  %v11625_v63 = vadd.f32 %v11624_v24, %v11623_v38  ;;  %v11514_v51 = vpop.f32.mrf.mxu1  ;;  %v6732_v2 = vmul.f32 %v12179_v35, %v15267_v3  ;;  %v12402_v24 = vld [vmem:[%s17520_s17 + $0x178] sm:$0xff] }
 0x8ad   :  { %v11626_v17 = vpop.f32.mrf.mxu0  ;;  %v6414_v10 = vmax.f32 %v6412_v6, %v6413_v42  ;;  %v15362_v54 = vadd.f32 %v11622_v58, %v6127_v9  ;;  %v6132_v55 = vadd.f32 %v12400_v49, %v11513_v7  ;;  %v6733_v16 = vmul.f32 %v12179_v35, %v15276_v29  ;;  %v12403_v7 = vld [vmem:[%s17520_s17 + $0xf0] sm:$0xff] }
 0x8ae   :  { %v15368_v40 = vpop.eup %12180  ;;  %v6619_v19 = vrot.slane %v6618_v44, 2  ;;  %v6503_v36 = vsub.f32 %v15306_v12, %v6409_v57  ;;  %v6504_v14 = vsub.f32 %v15313_v45, %v6409_v57  ;;  %10995 = vmatmul.mubr.msk.f32.vlgmr.msra.gmra.mxu1 %vm2272_vm1, %v6732_v2  ;;  %11027 = vmatmul.mubr.msk.f32.vlgmr.msra.gmra.mxu0 %vm2272_vm1, %v6732_v2  ;;  %v11515_v3 = vpop.f32.mrf.mxu1  ;;  %v15374_v6 = vadd.f32 %v6612_v61, %v6611_v52 }
 0x8af   :  { %v11627_v31 = vpop.f32.mrf.mxu0  ;;  %v15376_v34 = vpop.eup %12182  ;;  %v6623_v29 = vsel %vm2272_vm1, %v15368_v40, 0.0  ;;  %v6415_v38 = vrot.slane %v6414_v10, 2  ;;  %v6420_v28 = vsel %vm2272_vm1, %v15362_v54, -inf  ;;  %v15382_v12 = vadd.f32 %v11625_v63, %v6132_v55  ;;  %6945 = vmatprep.mubr.f32.mxu1 %v17578_v26  ;;  %7202 = vmatprep.mubr.f32.mxu0 %v17578_v26 }
 0x8b0   :  { %v6620_v45 = vadd.f32 %v6619_v19, %v6618_v44  ;;  %v6624_v52 = vsel %vm2272_vm1, %v15376_v34, 0.0  ;;  %v6547_v58 = vmul.f32 1.442695, %v6503_v36  ;;  %v6549_v61 = vmul.f32 1.442695, %v6504_v14  ;;  %v11517_v33 = vpop.f32.mrf.mxu1  ;;  %11666 = vmatpush3.msra.mxu1 %v12401_v56  ;;  %11704 = vmatpush3.msra.mxu0 %v12402_v24  ;;  %v12404_v44 = vld [vmem:[%s17520_s17 + $0x1f0] sm:$0xff] }
 0x8b1   :  { %v11629_v27 = vpop.f32.mrf.mxu0  ;;  %v6625_v35 = vadd.f32 %v6624_v52, %v6623_v29  ;;  %v6416_v42 = vmax.f32 %v6414_v10, %v6415_v38  ;;  %v6421_v41 = vmax.f32 %v6419_v22, %v6420_v28  ;;  %v15396_v9 = vsel %vm2272_vm1, %v15382_v12, -inf  ;;  %11667 = vmatprep.subr.mxu1 %v12403_v7  ;;  %11705 = vmatprep.subr.mxu0 %v12404_v44  ;;  %v12406_v38 = vld [vmem:[%s17520_s17 + $0x70] sm:$0xff] }
 0x8b2   :  { %v6621_v57 = vrot.slane %v6620_v45, 1  ;;  %12190 = vpow2.f32 %v6547_v58  ;;  %v11516_v63 = vadd.f32 %v11515_v3, %v11514_v51  ;;  %v11628_v2 = vadd.f32 %v11627_v31, %v11626_v17  ;;  %10996 = vmatmul.mubr.msk.f32.gmra.mxu1 %vm2272_vm1, %v6733_v16  ;;  %11028 = vmatmul.mubr.msk.f32.gmra.mxu0 %vm2272_vm1, %v6733_v16  ;;  %v11518_v22 = vpop.f32.mrf.mxu1  ;;  %v12405_v51 = vld [vmem:[%s17574_s30 + $0x98] sm:$0xff]  ;;  %v12407_v56 = vld [vmem:[%s17520_s17 + $0x170] sm:$0xff] }
 0x8b3   :  { %v11630_v10 = vpop.f32.mrf.mxu0  ;;  %v12185_v49 = vpop.eup %12184  ;;  %v6626_v55 = vrot.slane %v6625_v35, 4  ;;  %12192 = vpow2.f32 %v6549_v61  ;;  %v6417_v19 = vrot.slane %v6416_v42, 1  ;;  %v6422_v36 = vrot.slane %v6421_v41, 4  ;;  %6951 = vmatprep.mubr.f32.mxu1 %v17578_v26  ;;  %7208 = vmatprep.mubr.f32.mxu0 %v17578_v26 }
 0x8b4   :  { %v6135_v17 = vadd.f32 %v12405_v51, %v11516_v63  ;;  %v11519_v14 = vadd.f32 %v11518_v22, %v11517_v33  ;;  %v11631_v3 = vadd.f32 %v11630_v10, %v11629_v27  ;;  %v11520_v31 = vpop.f32.mrf.mxu1  ;;  %v6735_v29 = vmul.f32 %v12185_v49, %v15293_v0  ;;  %11668 = vmatpush3.msra.mxu1 %v12406_v38  ;;  %v12408_v0 = vld [vmem:[%s17574_s30 + $0xa0] sm:$0xff] }
 0x8b5   :  { %v11632_v16 = vpop.f32.mrf.mxu0  ;;  %v6627_v28 = vadd.f32 %v6626_v55, %v6625_v35  ;;  %v6418_v52 = vmax.f32 %v6416_v42, %v6417_v19  ;;  %v6423_v58 = vmax.f32 %v6421_v41, %v6422_v36  ;;  %v6736_v61 = vmul.f32 %v12185_v49, %v15300_v11  ;;  %11706 = vmatpush3.msra.mxu0 %v12407_v56 }
 0x8b6   :  { %v15419_v33 = vpop.eup %12186  ;;  %v15421_v27 = vadd.f32 %v11628_v2, %v6135_v17  ;;  %v6140_v24 = vadd.f32 %v12408_v0, %v11519_v14  ;;  %10997 = vmatmul.mubr.msk.f32.gmra.mxu1 %vm2272_vm1, %v6735_v29  ;;  %11029 = vmatmul.mubr.msk.f32.gmra.mxu0 %vm2272_vm1, %v6735_v29  ;;  %v11521_v35 = vpop.f32.mrf.mxu1  ;;  %12194 = vrcp.f32 %v15374_v6  ;;  %v6622_v42 = vadd.f32 %v6621_v57, %v6620_v45  ;;  %v12411_v17 = vld [vmem:[%s17520_s17 + $0x68] sm:$0xff] }
 0x8b7   :  { %v11633_v11 = vpop.f32.mrf.mxu0  ;;  %v15429_v41 = vpop.eup %12188  ;;  %v6628_v7 = vrot.slane %v6627_v28, 2  ;;  %v6632_v44 = vsel %vm2272_vm1, %v15419_v33, 0.0  ;;  %v6505_v63 = vsub.f32 %v15330_v53, %v6418_v52  ;;  %v6506_v2 = vsub.f32 %v15341_v37, %v6418_v52  ;;  %6957 = vmatprep.mubr.f32.mxu1 %v17578_v26  ;;  %7214 = vmatprep.mubr.f32.mxu0 %v17578_v26  ;;  %v12409_v53 = vld [vmem:[%s17520_s17 + $0xe8] sm:$0xff] }
 0x8b8   :  { %v6633_v22 = vsel %vm2272_vm1, %v15429_v41, 0.0  ;;  %v6424_v10 = vrot.slane %v6423_v58, 2  ;;  %v6429_v6 = vsel %vm2272_vm1, %v15421_v27, -inf  ;;  %v15441_v45 = vadd.f32 %v11631_v3, %v6140_v24  ;;  %v11523_v57 = vpop.f32.mrf.mxu1  ;;  %11669 = vmatprep.subr.mxu1 %v12409_v53  ;;  %v12410_v37 = vld [vmem:[%s17520_s17 + $0x1e8] sm:$0xff] }
 0x8b9   :  { %v11635_v49 = vpop.f32.mrf.mxu0  ;;  %11707 = vmatprep.subr.mxu0 %v12410_v37  ;;  %v6629_v55 = vadd.f32 %v6628_v7, %v6627_v28  ;;  %v6634_v19 = vadd.f32 %v6633_v22, %v6632_v44  ;;  %v6551_v36 = vmul.f32 1.442695, %v6505_v63  ;;  %v6553_v51 = vmul.f32 1.442695, %v6506_v2  ;;  %11670 = vmatpush3.msra.mxu1 %v12411_v17  ;;  %v12412_v14 = vld [vmem:[%s17520_s17 + $0x168] sm:$0xff]  ;;  %v12414_v44 = vld [vmem:[%s17520_s17 + $0xe0] sm:$0xff] }
 0x8ba   :  { %11708 = vmatpush3.msra.mxu0 %v12412_v14  ;;  %v6425_v3 = vmax.f32 %v6423_v58, %v6424_v10  ;;  %v6430_v29 = vmax.f32 %v15396_v9, %v6429_v6  ;;  %v11522_v38 = vadd.f32 %v11521_v35, %v11520_v31  ;;  %10998 = vmatmul.mubr.msk.f32.gmra.mxu1 %vm2272_vm1, %v6736_v61  ;;  %v11524_v28 = vpop.f32.mrf.mxu1  ;;  %v12413_v9 = vld [vmem:[%s17574_s30 + $0xa8] sm:$0xff]  ;;  %v6437_v63 = vsel %vm2272_vm1, %v15441_v45, -inf  ;;  %v12416_v22 = vld [vmem:[%s17520_s17 + $0x60] sm:$0xff]  ;;  %v12419_v14 = vld [vmem:[%s17574_s30 + $0xb0] sm:$0xff] }
 0x8bb   :  { %11030 = vmatmul.mubr.msk.f32.gmra.mxu0 %vm2272_vm1, %v6736_v61  ;;  %v11636_v52 = vpop.f32.mrf.mxu0  ;;  %v6630_v56 = vrot.slane %v6629_v55, 1  ;;  %v6635_v0 = vrot.slane %v6634_v19, 4  ;;  %12196 = vpow2.f32 %v6551_v36  ;;  %v11634_v24 = vadd.f32 %v11633_v11, %v11632_v16  ;;  %6963 = vmatprep.mubr.f32.mxu1 %v17578_v26  ;;  %v12415_v16 = vld [vmem:[%s17520_s17 + $0x1e0] sm:$0xff] }
 0x8bc   :  { %7220 = vmatprep.mubr.f32.mxu0 %v17578_v26  ;;  %12198 = vpow2.f32 %v6553_v51  ;;  %v6426_v7 = vrot.slane %v6425_v3, 1  ;;  %v6431_v58 = vrot.slane %v6430_v29, 4  ;;  %v6143_v31 = vadd.f32 %v12413_v9, %v11522_v38  ;;  %v11526_v35 = vpop.f32.mrf.mxu1  ;;  %11671 = vmatprep.subr.mxu1 %v12414_v44  ;;  %v12417_v10 = vld [vmem:[%s17520_s17 + $0x160] sm:$0xff]  ;;  %v12422_v9 = vld [vmem:[%s17520_s17 + $0x158] sm:$0xff] }
 0x8bd   :  { %v11638_v61 = vpop.f32.mrf.mxu0  ;;  %11709 = vmatprep.subr.mxu0 %v12415_v16  ;;  %v6636_v11 = vadd.f32 %v6635_v0, %v6634_v19  ;;  %v11525_v2 = vadd.f32 %v11524_v28, %v11523_v57  ;;  %12200 = vrcp.f32 %v6622_v42  ;;  %11672 = vmatpush3.msra.mxu1 %v12416_v22  ;;  %v11637_v19 = vadd.f32 %v11636_v52, %v11635_v49  ;;  %v12418_v42 = vld [vmem:[%s17520_s17 + $0xd8] sm:$0xff]  ;;  %v12424_v16 = vld [vmem:[%s17520_s17 + $0x50] sm:$0xff] }
 0x8be   :  { %11710 = vmatpush3.msra.mxu0 %v12417_v10  ;;  %v6427_v6 = vmax.f32 %v6425_v3, %v6426_v7  ;;  %v6432_v53 = vmax.f32 %v6430_v29, %v6431_v58  ;;  %v15477_v37 = vadd.f32 %v11634_v24, %v6143_v31  ;;  %v11527_v36 = vpop.f32.mrf.mxu1  ;;  %11673 = vmatprep.subr.mxu1 %v12418_v42  ;;  %v12420_v49 = vld [vmem:[%s17520_s17 + $0x58] sm:$0xff]  ;;  %v12423_v31 = vld [vmem:[%s17520_s17 + $0xd0] sm:$0xff] }
 0x8bf   :  { %v11639_v51 = vpop.f32.mrf.mxu0  ;;  %v15482_v57 = vpop.eup %12190  ;;  %v6637_v17 = vrot.slane %v6636_v11, 2  ;;  %v6148_v38 = vadd.f32 %v12419_v14, %v11525_v2  ;;  %v11528_v3 = vadd.f32 %v11527_v36, %v11526_v35  ;;  %v15487_v29 = vadd.f32 %v6630_v56, %v6629_v55  ;;  %11674 = vmatpush3.msra.mxu1 %v12420_v49  ;;  %v12421_v28 = vld [vmem:[%s17520_s17 + $0x1d8] sm:$0xff]  ;;  %v12425_v2 = vld [vmem:[%s17520_s17 + $0x1d0] sm:$0xff] }
 0x8c0   :  { %11711 = vmatprep.subr.mxu0 %v12421_v28  ;;  %v15495_v52 = vpop.eup %12192  ;;  %v6641_v0 = vsel %vm2272_vm1, %v15482_v57, 0.0  ;;  %v6507_v24 = vsub.f32 %v15354_v8, %v6427_v6  ;;  %v6508_v55 = vsub.f32 %v15362_v54, %v6427_v6  ;;  %v6433_v56 = vrot.slane %v6432_v53, 2  ;;  %v11529_v7 = vpop.f32.mrf.mxu1  ;;  %11675 = vmatprep.subr.mxu1 %v12423_v31  ;;  %v12432_v31 = vld [vmem:[%s17520_s17 + $0xc0] sm:$0xff] }
 0x8c1   :  { %v15501_v58 = vpop.f32.mrf.mxu0  ;;  %11712 = vmatpush3.msra.mxu0 %v12422_v9  ;;  %v6642_v35 = vsel %vm2272_vm1, %v15495_v52, 0.0  ;;  %v6438_v8 = vsel %vm2272_vm1, %v15477_v37, -inf  ;;  %v15513_v54 = vadd.f32 %v11637_v19, %v6148_v38  ;;  %v11640_v44 = vadd.f32 %v11639_v51, %v11638_v61  ;;  %11676 = vmatpush3.msra.mxu1 %v12424_v16  ;;  %v12426_v61 = vld [vmem:[%s17520_s17 + $0x150] sm:$0xff]  ;;  %v12427_v19 = vld [vmem:[%s17520_s17 + $0xc8] sm:$0xff] }
 0x8c2   :  { %11713 = vmatprep.subr.mxu0 %v12425_v2  ;;  %v6643_v22 = vadd.f32 %v6642_v35, %v6641_v0  ;;  %v6555_v10 = vmul.f32 1.442695, %v6507_v24  ;;  %v6557_v6 = vmul.f32 1.442695, %v6508_v55  ;;  %v6434_v36 = vmax.f32 %v6432_v53, %v6433_v56  ;;  %v11530_v42 = vpop.f32.mrf.mxu1  ;;  %11677 = vmatprep.subr.mxu1 %v12427_v19  ;;  %v12428_v53 = vld [vmem:[%s17574_s30 + $0xb8] sm:$0xff]  ;;  %v12429_v24 = vld [vmem:[%s17520_s17 + $0x48] sm:$0xff] }
 0x8c3   :  { %v11642_v14 = vpop.f32.mrf.mxu0  ;;  %11714 = vmatpush3.msra.mxu0 %v12426_v61  ;;  %v12195_v51 = vpop.eup %12194  ;;  %v15527_v38 = vadd.f32 %v6637_v17, %v6636_v11  ;;  %v6439_v49 = vmax.f32 %v6437_v63, %v6438_v8  ;;  %v6446_v28 = vsel %vm2272_vm1, %v15513_v54, -inf  ;;  %v6151_v0 = vadd.f32 %v12428_v53, %v11528_v3  ;;  %11678 = vmatpush3.msra.mxu1 %v12429_v24  ;;  %v12430_v55 = vld [vmem:[%s17520_s17 + $0x1c8] sm:$0xff]  ;;  %v12434_v2 = vld [vmem:[%s17520_s17 + $0x40] sm:$0xff] }
 0x8c4   :  { %11715 = vmatprep.subr.mxu0 %v12430_v55  ;;  %v6644_v11 = vrot.slane %v6643_v22, 4  ;;  %12202 = vpow2.f32 %v6555_v10  ;;  %v6435_v63 = vrot.slane %v6434_v36, 1  ;;  %v6738_v17 = vmul.f32 %v12195_v51, %v15315_v13  ;;  %v11532_v56 = vpop.f32.mrf.mxu1  ;;  %v12431_v3 = vld [vmem:[%s17520_s17 + $0x148] sm:$0xff]  ;;  %11679 = vmatprep.subr.mxu1 %v12432_v31  ;;  %v12433_v13 = vld [vmem:[%s17520_s17 + $0x1c0] sm:$0xff] }
 0x8c5   :  { %v15541_v9 = vpop.f32.mrf.mxu0  ;;  %11716 = vmatpush3.msra.mxu0 %v12431_v3  ;;  %12204 = vpow2.f32 %v6557_v6  ;;  %v6440_v35 = vrot.slane %v6439_v49, 4  ;;  %v15549_v8 = vadd.f32 %v11640_v44, %v6151_v0  ;;  %v6739_v16 = vmul.f32 %v12195_v51, %v15322_v47  ;;  %11680 = vmatpush3.msra.mxu1 %v12434_v2  ;;  %v12437_v55 = vld [vmem:[%s17574_s30 + $0xc0] sm:$0xff] }
 0x8c6   :  { %11717 = vmatprep.subr.mxu0 %v12433_v13  ;;  %v15558_v10 = vadd.f32 %v6644_v11, %v6643_v22  ;;  %v6436_v61 = vmax.f32 %v6434_v36, %v6435_v63  ;;  %10999 = vmatmul.mubr.msk.f32.gmra.mxu1 %vm2272_vm1, %v6738_v17  ;;  %v11531_v44 = vadd.f32 %v11530_v42, %v11529_v7  ;;  %v11533_v6 = vpop.f32.mrf.mxu1  ;;  %12206 = vrcp.f32 %v15487_v29  ;;  %v12438_v63 = vld [vmem:[%s17520_s17 + $0x1b8] sm:$0xff]  ;;  %v12440_v13 = vld [vmem:[%s17574_s30 + $0xc8] sm:$0xff] }
 0x8c7   :  { %11031 = vmatmul.mubr.msk.f32.gmra.mxu0 %vm2272_vm1, %v6738_v17  ;;  %v11645_v47 = vpop.f32.mrf.mxu0  ;;  %v6441_v19 = vmax.f32 %v6439_v49, %v6440_v35  ;;  %v6447_v51 = vsel %vm2272_vm1, %v15549_v8, -inf  ;;  %6969 = vmatprep.mubr.f32.mxu1 %v17578_v26  ;;  %v11643_v22 = vadd.f32 %v11642_v14, %v15501_v58  ;;  %v11534_v36 = vadd.f32 %v11533_v6, %v11532_v56  ;;  %v12435_v49 = vld [vmem:[%s17520_s17 + $0x140] sm:$0xff]  ;;  %v12436_v58 = vld [vmem:[%s17520_s17 + $0xb8] sm:$0xff] }
 0x8c8   :  { %7226 = vmatprep.mubr.f32.mxu0 %v17578_v26  ;;  %v15568_v53 = vpop.eup %12196  ;;  %v6509_v0 = vsub.f32 %v15382_v12, %v6436_v61  ;;  %v6510_v7 = vsub.f32 %v15421_v27, %v6436_v61  ;;  %v6448_v42 = vmax.f32 %v6446_v28, %v6447_v51  ;;  %v11535_v24 = vpop.f32.mrf.mxu1  ;;  %11718 = vmatpush3.msra.mxu0 %v12435_v49  ;;  %v6646_v12 = vrot.slane %v15558_v10, 2  ;;  %v12439_v17 = vld [vmem:[%s17520_s17 + $0x38] sm:$0xff] }
 0x8c9   :  { %v15572_v29 = vpop.f32.mrf.mxu0  ;;  %11681 = vmatprep.subr.mxu1 %v12436_v58  ;;  %v15580_v14 = vpop.eup %12198  ;;  %v6650_v27 = vsel %vm2272_vm1, %v15568_v53, 0.0  ;;  %v6442_v28 = vrot.slane %v6441_v19, 2  ;;  %v6156_v11 = vadd.f32 %v12437_v55, %v11531_v44  ;;  %11719 = vmatprep.subr.mxu0 %v12438_v63  ;;  %v6159_v2 = vadd.f32 %v12440_v13, %v11534_v36 }
 0x8ca   :  { %11682 = vmatpush3.msra.mxu1 %v12439_v17  ;;  %v12201_v56 = vpop.eup %12200  ;;  %v6651_v3 = vsel %vm2272_vm1, %v15580_v14, 0.0  ;;  %v6559_v31 = vmul.f32 1.442695, %v6509_v0  ;;  %v6561_v35 = vmul.f32 1.442695, %v6510_v7  ;;  %v11536_v61 = vpop.f32.mrf.mxu1  ;;  %v6449_v49 = vrot.slane %v6448_v42, 4 }
 0x8cb   :  { %11000 = vmatmul.mubr.msk.f32.gmra.mxu1 %vm2272_vm1, %v6739_v16  ;;  %11032 = vmatmul.mubr.msk.f32.gmra.mxu0 %vm2272_vm1, %v6739_v16  ;;  %v11648_v44 = vpop.f32.mrf.mxu0  ;;  %v6652_v6 = vadd.f32 %v6651_v3, %v6650_v27  ;;  %v6443_v51 = vmax.f32 %v6441_v19, %v6442_v28  ;;  %v15601_v58 = vadd.f32 %v11643_v22, %v6156_v11  ;;  %v6639_v0 = vrot.slane %v15527_v38, 1  ;;  %v12441_v19 = vld [vmem:[%s17520_s17 + $0x138] sm:$0xff]  ;;  %v12442_v22 = vld [vmem:[%s17520_s17 + $0xb0] sm:$0xff] }
 0x8cc   :  { %6975 = vmatprep.mubr.f32.mxu1 %v17578_v26  ;;  %7232 = vmatprep.mubr.f32.mxu0 %v17578_v26  ;;  %12208 = vpow2.f32 %v6559_v31  ;;  %v6741_v16 = vmul.f32 %v12201_v56, %v15337_v25  ;;  %v11646_v7 = vadd.f32 %v11645_v47, %v15541_v9  ;;  %v11538_v55 = vpop.f32.mrf.mxu1  ;;  %v6450_v11 = vmax.f32 %v6448_v42, %v6449_v49  ;;  %v12443_v25 = vld [vmem:[%s17520_s17 + $0x1b0] sm:$0xff] }
 0x8cd   :  { %v15608_v36 = vpop.f32.mrf.mxu0  ;;  %11720 = vmatpush3.msra.mxu0 %v12441_v19  ;;  %11683 = vmatprep.subr.mxu1 %v12442_v22  ;;  %v6653_v27 = vrot.slane %v6652_v6, 4  ;;  %12210 = vpow2.f32 %v6561_v35  ;;  %v6444_v28 = vrot.slane %v6443_v51, 1  ;;  %v12444_v9 = vld [vmem:[%s17520_s17 + $0x30] sm:$0xff]  ;;  %v15623_v47 = vadd.f32 %v6646_v12, %v15558_v10  ;;  %v12448_v22 = vld [vmem:[%s17520_s17 + $0x1a8] sm:$0xff] }
 0x8ce   :  { %11721 = vmatprep.subr.mxu0 %v12443_v25  ;;  %11684 = vmatpush3.msra.mxu1 %v12444_v9  ;;  %v6455_v63 = vsel %vm2272_vm1, %v15601_v58, -inf  ;;  %v15629_v42 = vadd.f32 %v11646_v7, %v6159_v2  ;;  %v11537_v17 = vadd.f32 %v11536_v61, %v11535_v24  ;;  %v11539_v3 = vpop.f32.mrf.mxu1  ;;  %v6451_v49 = vrot.slane %v6450_v11, 2  ;;  %v12445_v2 = vld [vmem:[%s17574_s30 + $0xd0] sm:$0xff] }
 0x8cf   :  { %11001 = vmatmul.mubr.msk.f32.gmra.mxu1 %vm2272_vm1, %v6741_v16  ;;  %11033 = vmatmul.mubr.msk.f32.gmra.mxu0 %vm2272_vm1, %v6741_v16  ;;  %v11651_v31 = vpop.f32.mrf.mxu0  ;;  %v6654_v35 = vadd.f32 %v6653_v27, %v6652_v6  ;;  %v6445_v13 = vmax.f32 %v6443_v51, %v6444_v28  ;;  %v6742_v10 = vmul.f32 %v12201_v56, %v15346_v32  ;;  %v12446_v7 = vld [vmem:[%s17520_s17 + $0x130] sm:$0xff]  ;;  %v12447_v32 = vld [vmem:[%s17520_s17 + $0xa8] sm:$0xff] }
 0x8d0   :  { %6981 = vmatprep.mubr.f32.mxu1 %v17578_v26  ;;  %7238 = vmatprep.mubr.f32.mxu0 %v17578_v26  ;;  %v6456_v12 = vsel %vm2272_vm1, %v15629_v42, -inf  ;;  %v6164_v16 = vadd.f32 %v12445_v2, %v11537_v17  ;;  %v11649_v24 = vadd.f32 %v11648_v44, %v15572_v29  ;;  %v11540_v61 = vadd.f32 %v11539_v3, %v11538_v55  ;;  %v15640_v6 = vpop.f32.mrf.mxu1  ;;  %v12449_v27 = vld [vmem:[%s17520_s17 + $0x28] sm:$0xff] }
 0x8d1   :  { %v15642_v51 = vpop.f32.mrf.mxu0  ;;  %11722 = vmatpush3.msra.mxu0 %v12446_v7  ;;  %11685 = vmatprep.subr.mxu1 %v12447_v32  ;;  %v15650_v56 = vpop.eup %12202  ;;  %v6655_v19 = vrot.slane %v6654_v35, 2  ;;  %v6511_v29 = vsub.f32 %v15441_v45, %v6445_v13  ;;  %v6512_v44 = vsub.f32 %v15477_v37, %v6445_v13  ;;  %v6452_v55 = vmax.f32 %v6450_v11, %v6451_v49  ;;  %v12450_v37 = vld [vmem:[%s17574_s30 + $0xd8] sm:$0xff] }
 0x8d2   :  { %11723 = vmatprep.subr.mxu0 %v12448_v22  ;;  %11686 = vmatpush3.msra.mxu1 %v12449_v27  ;;  %v15660_v28 = vpop.eup %12204  ;;  %v6659_v25 = vsel %vm2272_vm1, %v15650_v56, 0.0  ;;  %v6457_v9 = vmax.f32 %v6455_v63, %v6456_v12  ;;  %v15666_v45 = vadd.f32 %v11649_v24, %v6164_v16  ;;  %v6167_v11 = vadd.f32 %v12450_v37, %v11540_v61  ;;  %v11542_v17 = vpop.f32.mrf.mxu1  ;;  %v12451_v22 = vld [vmem:[%s17520_s17 + $0x128] sm:$0xff] }
 0x8d3   :  { %11002 = vmatmul.mubr.msk.f32.gmra.mxu1 %vm2272_vm1, %v6742_v10  ;;  %11034 = vmatmul.mubr.msk.f32.gmra.mxu0 %vm2272_vm1, %v6742_v10  ;;  %v11654_v3 = vpop.f32.mrf.mxu0  ;;  %v12207_v13 = vpop.eup %12206  ;;  %v6660_v49 = vsel %vm2272_vm1, %v15660_v28, 0.0  ;;  %v6563_v2 = vmul.f32 1.442695, %v6511_v29  ;;  %v6565_v7 = vmul.f32 1.442695, %v6512_v44  ;;  %v11652_v63 = vadd.f32 %v11651_v31, %v15608_v36  ;;  %v12452_v29 = vld [vmem:[%s17520_s17 + $0xa0] sm:$0xff] }
 0x8d4   :  { %6987 = vmatprep.mubr.f32.mxu1 %v17578_v26  ;;  %7244 = vmatprep.mubr.f32.mxu0 %v17578_v26  ;;  %v15676_v10 = vadd.f32 %v6655_v19, %v6654_v35  ;;  %v6661_v12 = vadd.f32 %v6660_v49, %v6659_v25  ;;  %v6453_v16 = vrot.slane %v6452_v55, 1  ;;  %v6458_v24 = vrot.slane %v6457_v9, 4  ;;  %v11544_v61 = vpop.f32.mrf.mxu1  ;;  %v12453_v19 = vld [vmem:[%s17520_s17 + $0x1a0] sm:$0xff] }
 0x8d5   :  { %v15678_v32 = vpop.f32.mrf.mxu0  ;;  %11724 = vmatpush3.msra.mxu0 %v12451_v22  ;;  %11687 = vmatprep.subr.mxu1 %v12452_v29  ;;  %12212 = vpow2.f32 %v6563_v2  ;;  %v6464_v36 = vsel %vm2272_vm1, %v15666_v45, -inf  ;;  %v6744_v31 = vmul.f32 %v12207_v13, %v15368_v40  ;;  %v15689_v35 = vadd.f32 %v11652_v63, %v6167_v11  ;;  %v12454_v44 = vld [vmem:[%s17520_s17 + $0x20] sm:$0xff]  ;;  %v12456_v11 = vld [vmem:[%s17520_s17 + $0x98] sm:$0xff] }
 0x8d6   :  { %11725 = vmatprep.subr.mxu0 %v12453_v19  ;;  %11688 = vmatpush3.msra.mxu1 %v12454_v44  ;;  %v6662_v27 = vrot.slane %v6661_v12, 4  ;;  %12214 = vpow2.f32 %v6565_v7  ;;  %v6454_v25 = vmax.f32 %v6452_v55, %v6453_v16  ;;  %v6459_v37 = vmax.f32 %v6457_v9, %v6458_v24  ;;  %v11545_v49 = vpop.f32.mrf.mxu1  ;;  %v12455_v40 = vld [vmem:[%s17520_s17 + $0x120] sm:$0xff] }
 0x8d7   :  { %v11657_v2 = vpop.f32.mrf.mxu0  ;;  %11726 = vmatpush3.msra.mxu0 %v12455_v40  ;;  %11689 = vmatprep.subr.mxu1 %v12456_v11  ;;  %v6465_v55 = vsel %vm2272_vm1, %v15689_v35, -inf  ;;  %v6745_v9 = vmul.f32 %v12207_v13, %v15376_v34  ;;  %v11543_v7 = vadd.f32 %v11542_v17, %v15640_v6  ;;  %v11655_v63 = vadd.f32 %v11654_v3, %v15642_v51  ;;  %v12457_v6 = vld [vmem:[%s17574_s30 + $0xe0] sm:$0xff]  ;;  %v12458_v17 = vld [vmem:[%s17520_s17 + $0x198] sm:$0xff] }
 0x8d8   :  { %11003 = vmatmul.mubr.msk.f32.gmra.mxu1 %vm2272_vm1, %v6744_v31  ;;  %11035 = vmatmul.mubr.msk.f32.gmra.mxu0 %vm2272_vm1, %v6744_v31  ;;  %v6663_v16 = vadd.f32 %v6662_v27, %v6661_v12  ;;  %v6513_v24 = vsub.f32 %v15513_v54, %v6454_v25  ;;  %v6514_v22 = vsub.f32 %v15549_v8, %v6454_v25  ;;  %v6460_v29 = vrot.slane %v6459_v37, 2  ;;  %v11547_v31 = vpop.f32.mrf.mxu1 }
 0x8d9   :  { %6993 = vmatprep.mubr.f32.mxu1 %v17578_v26  ;;  %7250 = vmatprep.mubr.f32.mxu0 %v17578_v26  ;;  %v15714_v19 = vpop.f32.mrf.mxu0  ;;  %v15716_v44 = vpop.eup %12208  ;;  %v6466_v34 = vmax.f32 %v6464_v36, %v6465_v55  ;;  %v6172_v51 = vadd.f32 %v12457_v6, %v11543_v7  ;;  %v6640_v54 = vadd.f32 %v6639_v0, %v15527_v38  ;;  %v12459_v38 = vld [vmem:[%s17520_s17 + $0x18] sm:$0xff]  ;;  %v6648_v7 = vrot.slane %v15623_v47, 1 }
 0x8da   :  { %v11546_v8 = vadd.f32 %v11545_v49, %v11544_v61  ;;  %11727 = vmatprep.subr.mxu0 %v12458_v17  ;;  %v15727_v3 = vpop.eup %12210  ;;  %v6664_v13 = vrot.slane %v6663_v16, 2  ;;  %v6668_v12 = vsel %vm2272_vm1, %v15716_v44, 0.0  ;;  %v6567_v36 = vmul.f32 1.442695, %v6513_v24  ;;  %v11548_v25 = vpop.f32.mrf.mxu1  ;;  %11690 = vmatpush3.msra.mxu1 %v12459_v38  ;;  %v12460_v0 = vld [vmem:[%s17520_s17 + $0x118] sm:$0xff]  ;;  %v12465_v38 = vld [vmem:[%s17520_s17 + $0x110] sm:$0xff] }
 0x8db   :  { %v6569_v27 = vmul.f32 1.442695, %v6514_v22  ;;  %v11660_v40 = vpop.f32.mrf.mxu0  ;;  %11728 = vmatpush3.msra.mxu0 %v12460_v0  ;;  %v6669_v61 = vsel %vm2272_vm1, %v15727_v3, 0.0  ;;  %v6461_v49 = vmax.f32 %v6459_v37, %v6460_v29  ;;  %v6467_v11 = vrot.slane %v6466_v34, 4  ;;  %v12461_v37 = vld [vmem:[%s17574_s30 + $0xe8] sm:$0xff] }
 0x8dc   :  { %11004 = vmatmul.mubr.msk.f32.gmra.mxu1 %vm2272_vm1, %v6745_v9  ;;  %11036 = vmatmul.mubr.msk.f32.gmra.mxu0 %vm2272_vm1, %v6745_v9  ;;  %v15741_v55 = vadd.f32 %v11655_v63, %v6172_v51  ;;  %v15744_v24 = vadd.f32 %v6669_v61, %v6668_v12  ;;  %12216 = vpow2.f32 %v6567_v36  ;;  %v6175_v22 = vadd.f32 %v12461_v37, %v11546_v8  ;;  %v11550_v29 = vpop.f32.mrf.mxu1  ;;  %v12462_v63 = vld [vmem:[%s17520_s17 + $0x90] sm:$0xff] }
 0x8dd   :  { %6999 = vmatprep.mubr.f32.mxu1 %v17578_v26  ;;  %7256 = vmatprep.mubr.f32.mxu0 %v17578_v26  ;;  %12218 = vpow2.f32 %v6569_v27  ;;  %v6462_v6 = vrot.slane %v6461_v49, 1  ;;  %v6468_v9 = vmax.f32 %v6466_v34, %v6467_v11  ;;  %v12463_v51 = vld [vmem:[%s17520_s17 + $0x190] sm:$0xff]  ;;  %v6657_v17 = vrot.slane %v15676_v10, 1  ;;  %v11662_v36 = vpop.f32.mrf.mxu0 }
 0x8de   :  { %11691 = vmatprep.subr.mxu1 %v12462_v63  ;;  %11729 = vmatprep.subr.mxu0 %v12463_v51  ;;  %v15758_v12 = vadd.f32 %v6664_v13, %v6663_v16  ;;  %12220 = vrcp.f32 %v6640_v54  ;;  %v11658_v8 = vadd.f32 %v11657_v2, %v15678_v32  ;;  %v11551_v27 = vpop.f32.mrf.mxu1  ;;  %v12464_v34 = vld [vmem:[%s17520_s17 + $0x10] sm:$0xff]  ;;  %v6473_v16 = vsel %vm2272_vm1, %v15741_v55, -inf  ;;  %v12466_v32 = vld [vmem:[%s17520_s17 + $0x88] sm:$0xff] }
 0x8df   :  { %11692 = vmatpush3.msra.mxu1 %v12464_v34  ;;  %11730 = vmatpush3.msra.mxu0 %v12465_v38  ;;  %v6463_v0 = vmax.f32 %v6461_v49, %v6462_v6  ;;  %v6469_v61 = vrot.slane %v6468_v9, 2  ;;  %v11549_v54 = vadd.f32 %v11548_v25, %v11547_v31  ;;  %v12467_v2 = vld [vmem:[%s17520_s17 + $0x188] sm:$0xff]  ;;  %v6671_v13 = vrot.slane %v15744_v24, 4  ;;  %v12469_v51 = vld [vmem:[%s17574_s30 + $0xf0] sm:$0xff] }
 0x8e0   :  { %11693 = vmatprep.subr.mxu1 %v12466_v32  ;;  %11731 = vmatprep.subr.mxu0 %v12467_v2  ;;  %v15776_v11 = vadd.f32 %v11658_v8, %v6175_v22  ;;  %v6649_v49 = vadd.f32 %v6648_v7, %v15623_v47  ;;  %v11552_v37 = vadd.f32 %v11551_v27, %v11550_v29  ;;  %v12468_v31 = vld [vmem:[%s17520_s17 + $0x8] sm:$0xff]  ;;  %v12472_v8 = vld [vmem:[%s17520_s17 + $0x80] sm:$0xff] }
 0x8e1   :  { %11694 = vmatpush3.msra.mxu1 %v12468_v31  ;;  %v6515_v25 = vsub.f32 %v15601_v58, %v6463_v0  ;;  %v6516_v6 = vsub.f32 %v15629_v42, %v6463_v0  ;;  %v6470_v63 = vmax.f32 %v6468_v9, %v6469_v61  ;;  %v6180_v34 = vadd.f32 %v12469_v51, %v11549_v54  ;;  %v12470_v47 = vld [vmem:[%s17520_s17 + $0x108] sm:$0xff]  ;;  %v12471_v42 = vld [vmem:[%s17574_s30 + $0xf8] sm:$0xff]  ;;  %v11663_v9 = vpop.f32.mrf.mxu0  ;;  %v12473_v27 = vld [vmem:[%s17520_s17 + $0x180] sm:$0xff] }
 0x8e2   :  { %11732 = vmatpush3.msra.mxu0 %v12470_v47  ;;  %v15790_v7 = vpop.eup %12212  ;;  %v6474_v22 = vsel %vm2272_vm1, %v15776_v11, -inf  ;;  %v11661_v58 = vadd.f32 %v11660_v40, %v15714_v19  ;;  %12222 = vrcp.f32 %v6649_v49  ;;  %v6183_v29 = vadd.f32 %v12471_v42, %v11552_v37  ;;  %11695 = vmatprep.subr.mxu1 %v12472_v8  ;;  %v12474_v54 = vld [vmem:[%s17520_s17] sm:$0xff] }
 0x8e3   :  { %11733 = vmatprep.subr.mxu0 %v12473_v27  ;;  %v15804_v38 = vpop.eup %12214  ;;  %v6677_v19 = vsel %vm2272_vm1, %v15790_v7, 0.0  ;;  %v6571_v40 = vmul.f32 1.442695, %v6515_v25  ;;  %v6573_v0 = vmul.f32 1.442695, %v6516_v6  ;;  %v6471_v61 = vrot.slane %v6470_v63, 1  ;;  %11696 = vmatpush3.msra.mxu1 %v12474_v54 }
 0x8e4   :  { %v12475_v32 = vld [vmem:[%s17520_s17 + $0x100] sm:$0xff]  ;;  %v6672_v2 = vadd.f32 %v6671_v13, %v15744_v24  ;;  %v6678_v49 = vsel %vm2272_vm1, %v15804_v38, 0.0  ;;  %v6475_v37 = vmax.f32 %v6473_v16, %v6474_v22  ;;  %v15817_v31 = vadd.f32 %v11661_v58, %v6180_v34  ;;  %v12476_v25 = vld [vmem:[%s17523_s20 + $0x38] sm:$0xff] }
 0x8e5   :  { %11734 = vmatpush3.msra.mxu0 %v12475_v32  ;;  %11930 = vmatprep.subr.mxu1 %v12476_v25  ;;  %v6679_v6 = vadd.f32 %v6678_v49, %v6677_v19  ;;  %12224 = vpow2.f32 %v6571_v40  ;;  %v6472_v51 = vmax.f32 %v6470_v63, %v6471_v61  ;;  %v11664_v47 = vadd.f32 %v11663_v9, %v11662_v36 }
 0x8e6   :  { %12226 = vpow2.f32 %v6573_v0  ;;  %v6476_v42 = vrot.slane %v6475_v37, 4  ;;  %v6666_v8 = vrot.slane %v15758_v12, 1  ;;  %v6673_v34 = vrot.slane %v6672_v2, 2 }
 0x8e7   :  { %v6517_v24 = vsub.f32 %v15666_v45, %v6472_v51  ;;  %v6518_v13 = vsub.f32 %v15689_v35, %v6472_v51  ;;  %v15825_v16 = vadd.f32 %v11664_v47, %v6183_v29  ;;  %v6482_v58 = vsel %vm2272_vm1, %v15817_v31, -inf }
 0x8e8   :  { %v6477_v22 = vmax.f32 %v6475_v37, %v6476_v42  ;;  %v6658_v63 = vadd.f32 %v6657_v17, %v15676_v10  ;;  %v6680_v9 = vrot.slane %v6679_v6, 4  ;;  %v6674_v32 = vadd.f32 %v6673_v34, %v6672_v2 }
 0x8e9   :  { %v15832_v36 = vpop.eup %12216  ;;  %v6575_v27 = vmul.f32 1.442695, %v6517_v24  ;;  %v6577_v19 = vmul.f32 1.442695, %v6518_v13  ;;  %v6483_v45 = vsel %vm2272_vm1, %v15825_v16, -inf  ;;  %v6667_v25 = vadd.f32 %v6666_v8, %v15758_v12 }
 0x8ea   :  { %v15836_v35 = vpop.eup %12218  ;;  %v6478_v29 = vrot.slane %v6477_v22, 2  ;;  %v6484_v40 = vmax.f32 %v6482_v58, %v6483_v45  ;;  %12228 = vrcp.f32 %v6658_v63  ;;  %v6686_v61 = vsel %vm2272_vm1, %v15832_v36, 0.0 }
 0x8eb   :  { %v12221_v0 = vpop.eup %12220  ;;  %v6687_v10 = vsel %vm2272_vm1, %v15836_v35, 0.0  ;;  %12230 = vpow2.f32 %v6575_v27  ;;  %v6681_v49 = vadd.f32 %v6680_v9, %v6679_v6  ;;  %v6675_v2 = vrot.slane %v6674_v32, 1 }
 0x8ec   :  { %12232 = vpow2.f32 %v6577_v19  ;;  %v6747_v17 = vmul.f32 %v12221_v0, %v15419_v33  ;;  %v6479_v54 = vmax.f32 %v6477_v22, %v6478_v29  ;;  %v6485_v37 = vrot.slane %v6484_v40, 4 }
 0x8ed   :  { %v6688_v51 = vadd.f32 %v6687_v10, %v6686_v61  ;;  %v6748_v33 = vmul.f32 %v12221_v0, %v15429_v41  ;;  %v6682_v6 = vrot.slane %v6681_v49, 2  ;;  %12234 = vrcp.f32 %v6667_v25 }
 0x8ee   :  { %11005 = vmatmul.mubr.msk.f32.gmra.mxu1 %vm2272_vm1, %v6747_v17  ;;  %11037 = vmatmul.mubr.msk.f32.gmra.mxu0 %vm2272_vm1, %v6747_v17  ;;  %v6480_v47 = vrot.slane %v6479_v54, 1  ;;  %v6486_v24 = vmax.f32 %v6484_v40, %v6485_v37 }
 0x8ef   :  { %v12223_v42 = vpop.eup %12222  ;;  %7005 = vmatprep.mubr.f32.mxu1 %v17578_v26  ;;  %7262 = vmatprep.mubr.f32.mxu0 %v17578_v26  ;;  %v6689_v8 = vrot.slane %v6688_v51, 4  ;;  %v6683_v45 = vadd.f32 %v6682_v6, %v6681_v49 }
 0x8f0   :  { %v6481_v13 = vmax.f32 %v6479_v54, %v6480_v47  ;;  %v6487_v34 = vrot.slane %v6486_v24, 2  ;;  %v6750_v63 = vmul.f32 %v12223_v42, %v15482_v57  ;;  %v6676_v57 = vadd.f32 %v6675_v2, %v6674_v32 }
 0x8f1   :  { %v6690_v0 = vadd.f32 %v6689_v8, %v6688_v51  ;;  %v6751_v54 = vmul.f32 %v12223_v42, %v15495_v52  ;;  %v6684_v37 = vrot.slane %v6683_v45, 1 }
 0x8f2   :  { %v15849_v12 = vpop.eup %12224  ;;  %v6519_v22 = vsub.f32 %v15741_v55, %v6481_v13  ;;  %v6520_v58 = vsub.f32 %v15776_v11, %v6481_v13  ;;  %11006 = vmatmul.mubr.msk.f32.gmra.mxu1 %vm2272_vm1, %v6748_v33  ;;  %11038 = vmatmul.mubr.msk.f32.gmra.mxu0 %vm2272_vm1, %v6748_v33  ;;  %v6488_v27 = vmax.f32 %v6486_v24, %v6487_v34 }
 0x8f3   :  { %v15856_v9 = vpop.eup %12226  ;;  %v6695_v41 = vsel %vm2272_vm1, %v15849_v12, 0.0  ;;  %7011 = vmatprep.mubr.f32.mxu1 %v17578_v26  ;;  %7268 = vmatprep.mubr.f32.mxu0 %v17578_v26  ;;  %v6691_v32 = vrot.slane %v6690_v0, 2 }
 0x8f4   :  { %v6696_v55 = vsel %vm2272_vm1, %v15856_v9, 0.0  ;;  %v6579_v11 = vmul.f32 1.442695, %v6519_v22  ;;  %v6581_v19 = vmul.f32 1.442695, %v6520_v58  ;;  %v6489_v40 = vrot.slane %v6488_v27, 1 }
 0x8f5   :  { %v6697_v29 = vadd.f32 %v6696_v55, %v6695_v41  ;;  %v6692_v6 = vadd.f32 %v6691_v32, %v6690_v0 }
 0x8f6   :  { %12236 = vpow2.f32 %v6579_v11  ;;  %11007 = vmatmul.mubr.msk.f32.gmra.mxu1 %vm2272_vm1, %v6750_v63  ;;  %11039 = vmatmul.mubr.msk.f32.gmra.mxu0 %vm2272_vm1, %v6750_v63  ;;  %v6490_v10 = vmax.f32 %v6488_v27, %v6489_v40 }
 0x8f7   :  { %v12229_v61 = vpop.eup %12228  ;;  %12238 = vpow2.f32 %v6581_v19  ;;  %7017 = vmatprep.mubr.f32.mxu1 %v17578_v26  ;;  %7274 = vmatprep.mubr.f32.mxu0 %v17578_v26  ;;  %v6698_v25 = vrot.slane %v6697_v29, 4  ;;  %v6693_v22 = vrot.slane %v6692_v6, 1 }
 0x8f8   :  { %v15868_v17 = vpop.eup %12230  ;;  %v6521_v51 = vsub.f32 %v15817_v31, %v6490_v10  ;;  %v6522_v47 = vsub.f32 %v15825_v16, %v6490_v10  ;;  %v6753_v24 = vmul.f32 %v12229_v61, %v15568_v53  ;;  %12240 = vrcp.f32 %v6676_v57 }
 0x8f9   :  { %v15871_v49 = vpop.eup %12232  ;;  %v6704_v13 = vsel %vm2272_vm1, %v15868_v17, 0.0  ;;  %v6699_v31 = vadd.f32 %v6698_v25, %v6697_v29  ;;  %v6685_v16 = vadd.f32 %v6684_v37, %v6683_v45  ;;  %v6754_v53 = vmul.f32 %v12229_v61, %v15580_v14 }
 0x8fa   :  { %11008 = vmatmul.mubr.msk.f32.gmra.mxu1 %vm2272_vm1, %v6751_v54  ;;  %11040 = vmatmul.mubr.msk.f32.gmra.mxu0 %vm2272_vm1, %v6751_v54  ;;  %v6705_v52 = vsel %vm2272_vm1, %v15871_v49, 0.0  ;;  %v6583_v42 = vmul.f32 1.442695, %v6521_v51  ;;  %v6585_v33 = vmul.f32 1.442695, %v6522_v47  ;;  %v12235_v2 = vpop.eup %12234 }
 0x8fb   :  { %7023 = vmatprep.mubr.f32.mxu1 %v17578_v26  ;;  %7280 = vmatprep.mubr.f32.mxu0 %v17578_v26  ;;  %v6706_v34 = vadd.f32 %v6705_v52, %v6704_v13  ;;  %v6700_v8 = vrot.slane %v6699_v31, 2  ;;  %v6756_v63 = vmul.f32 %v12235_v2, %v15650_v56  ;;  %v6694_v56 = vadd.f32 %v6693_v22, %v6692_v6 }
 0x8fc   :  { %12242 = vpow2.f32 %v6583_v42  ;;  %v6757_v40 = vmul.f32 %v12235_v2, %v15660_v28 }
 0x8fd   :  { %12244 = vpow2.f32 %v6585_v33  ;;  %v6707_v58 = vrot.slane %v6706_v34, 4  ;;  %v6701_v55 = vadd.f32 %v6700_v8, %v6699_v31 }
 0x8fe   :  { %11009 = vmatmul.mubr.msk.f32.gmra.mxu1 %vm2272_vm1, %v6753_v24  ;;  %11041 = vmatmul.mubr.msk.f32.gmra.mxu0 %vm2272_vm1, %v6753_v24  ;;  %12246 = vrcp.f32 %v6685_v16 }
 0x8ff   :  { %7029 = vmatprep.mubr.f32.mxu1 %v17578_v26  ;;  %7286 = vmatprep.mubr.f32.mxu0 %v17578_v26  ;;  %v6708_v19 = vadd.f32 %v6707_v58, %v6706_v34  ;;  %v6702_v0 = vrot.slane %v6701_v55, 1  ;;  %12248 = vrcp.f32 %v6694_v56 }
 0x901   :  { %v6709_v61 = vrot.slane %v6708_v19, 2  ;;  %v6703_v51 = vadd.f32 %v6702_v0, %v6701_v55 }
 0x902   :  { %11010 = vmatmul.mubr.msk.f32.gmra.mxu1 %vm2272_vm1, %v6754_v53  ;;  %11042 = vmatmul.mubr.msk.f32.gmra.mxu0 %vm2272_vm1, %v6754_v53 }
 0x903   :  { %v15892_v41 = vpop.eup %12236  ;;  %7035 = vmatprep.mubr.f32.mxu1 %v17578_v26  ;;  %7292 = vmatprep.mubr.f32.mxu0 %v17578_v26  ;;  %v6710_v32 = vadd.f32 %v6709_v61, %v6708_v19  ;;  %12250 = vrcp.f32 %v6703_v51 }
 0x904   :  { %v15896_v27 = vpop.eup %12238  ;;  %v6713_v14 = vsel %vm2272_vm1, %v15892_v41, 0.0 }
 0x905   :  { %v6714_v11 = vsel %vm2272_vm1, %v15896_v27, 0.0  ;;  %v12241_v29 = vpop.eup %12240  ;;  %v6711_v42 = vrot.slane %v6710_v32, 1 }
 0x906   :  { %v6715_v45 = vadd.f32 %v6714_v11, %v6713_v14  ;;  %11011 = vmatmul.mubr.msk.f32.gmra.mxu1 %vm2272_vm1, %v6756_v63  ;;  %11043 = vmatmul.mubr.msk.f32.gmra.mxu0 %vm2272_vm1, %v6756_v63  ;;  %v6759_v54 = vmul.f32 %v12241_v29, %v15716_v44  ;;  %v6760_v44 = vmul.f32 %v12241_v29, %v15727_v3 }
 0x907   :  { %7041 = vmatprep.mubr.f32.mxu1 %v17578_v26  ;;  %7298 = vmatprep.mubr.f32.mxu0 %v17578_v26  ;;  %v6712_v3 = vadd.f32 %v6711_v42, %v6710_v32 }
 0x908   :  { %v6716_v10 = vrot.slane %v6715_v45, 4 }
 0x909   :  { %v15907_v57 = vpop.eup %12242  ;;  %12252 = vrcp.f32 %v6712_v3 }
 0x90a   :  { %11012 = vmatmul.mubr.msk.f32.gmra.mxu1 %vm2272_vm1, %v6757_v40  ;;  %11044 = vmatmul.mubr.msk.f32.gmra.mxu0 %vm2272_vm1, %v6757_v40  ;;  %v15912_v37 = vpop.eup %12244  ;;  %v6722_v25 = vsel %vm2272_vm1, %v15907_v57, 0.0  ;;  %v6717_v24 = vadd.f32 %v6716_v10, %v6715_v45 }
 0x90b   :  { %7047 = vmatprep.mubr.f32.mxu1 %v17578_v26  ;;  %7304 = vmatprep.mubr.f32.mxu0 %v17578_v26  ;;  %v6723_v28 = vsel %vm2272_vm1, %v15912_v37, 0.0  ;;  %v12247_v47 = vpop.eup %12246 }
 0x90c   :  { %v6724_v13 = vadd.f32 %v6723_v28, %v6722_v25  ;;  %v6762_v52 = vmul.f32 %v12247_v47, %v15790_v7  ;;  %v6718_v33 = vrot.slane %v6717_v24, 2  ;;  %v12249_v7 = vpop.eup %12248  ;;  %v6763_v6 = vmul.f32 %v12247_v47, %v15804_v38 }
 0x90d   :  { %v6765_v8 = vmul.f32 %v12249_v7, %v15832_v36  ;;  %v6766_v63 = vmul.f32 %v12249_v7, %v15836_v35 }
 0x90e   :  { %11013 = vmatmul.mubr.msk.f32.gmra.mxu1 %vm2272_vm1, %v6759_v54  ;;  %11045 = vmatmul.mubr.msk.f32.gmra.mxu0 %vm2272_vm1, %v6759_v54  ;;  %v6725_v31 = vrot.slane %v6724_v13, 4  ;;  %v6719_v16 = vadd.f32 %v6718_v33, %v6717_v24 }
 0x90f   :  { %7053 = vmatprep.mubr.f32.mxu1 %v17578_v26  ;;  %7310 = vmatprep.mubr.f32.mxu0 %v17578_v26 }
 0x910   :  { %v6726_v2 = vadd.f32 %v6725_v31, %v6724_v13  ;;  %v6720_v34 = vrot.slane %v6719_v16, 1  ;;  %v12251_v38 = vpop.eup %12250 }
 0x911   :  { %v6768_v36 = vmul.f32 %v12251_v38, %v15849_v12  ;;  %v6769_v35 = vmul.f32 %v12251_v38, %v15856_v9 }
 0x912   :  { %11014 = vmatmul.mubr.msk.f32.gmra.mxu1 %vm2272_vm1, %v6760_v44  ;;  %11046 = vmatmul.mubr.msk.f32.gmra.mxu0 %vm2272_vm1, %v6760_v44  ;;  %v6727_v53 = vrot.slane %v6726_v2, 2  ;;  %v6721_v58 = vadd.f32 %v6720_v34, %v6719_v16 }
 0x913   :  { %7059 = vmatprep.mubr.f32.mxu1 %v17578_v26  ;;  %7316 = vmatprep.mubr.f32.mxu0 %v17578_v26 }
 0x914   :  { %v6728_v22 = vadd.f32 %v6727_v53, %v6726_v2  ;;  %12254 = vrcp.f32 %v6721_v58 }
 0x916   :  { %11015 = vmatmul.mubr.msk.f32.gmra.mxu1 %vm2272_vm1, %v6762_v52  ;;  %11047 = vmatmul.mubr.msk.f32.gmra.mxu0 %vm2272_vm1, %v6762_v52  ;;  %v6729_v14 = vrot.slane %v6728_v22, 1  ;;  %v12253_v11 = vpop.eup %12252 }
 0x917   :  { %7065 = vmatprep.mubr.f32.mxu1 %v17578_v26  ;;  %7322 = vmatprep.mubr.f32.mxu0 %v17578_v26  ;;  %v6771_v12 = vmul.f32 %v12253_v11, %v15868_v17  ;;  %v6772_v9 = vmul.f32 %v12253_v11, %v15871_v49 }
 0x918   :  { %v6730_v55 = vadd.f32 %v6729_v14, %v6728_v22 }
 0x91a   :  { %11016 = vmatmul.mubr.msk.f32.gmra.mxu1 %vm2272_vm1, %v6763_v6  ;;  %11048 = vmatmul.mubr.msk.f32.gmra.mxu0 %vm2272_vm1, %v6763_v6  ;;  %12256 = vrcp.f32 %v6730_v55 }
 0x91b   :  { %7071 = vmatprep.mubr.f32.mxu1 %v17578_v26  ;;  %7328 = vmatprep.mubr.f32.mxu0 %v17578_v26 }
 0x91e   :  { %11017 = vmatmul.mubr.msk.f32.gmra.mxu1 %vm2272_vm1, %v6765_v8  ;;  %11049 = vmatmul.mubr.msk.f32.gmra.mxu0 %vm2272_vm1, %v6765_v8 }
 0x91f   :  { %7077 = vmatprep.mubr.f32.mxu1 %v17578_v26  ;;  %7334 = vmatprep.mubr.f32.mxu0 %v17578_v26 }
 0x921   :  { %v12255_v19 = vpop.eup %12254 }
 0x922   :  { %11018 = vmatmul.mubr.msk.f32.gmra.mxu1 %vm2272_vm1, %v6766_v63  ;;  %11050 = vmatmul.mubr.msk.f32.gmra.mxu0 %vm2272_vm1, %v6766_v63  ;;  %v6774_v17 = vmul.f32 %v12255_v19, %v15892_v41  ;;  %v6775_v49 = vmul.f32 %v12255_v19, %v15896_v27 }
 0x923   :  { %7083 = vmatprep.mubr.f32.mxu1 %v17578_v26  ;;  %7340 = vmatprep.mubr.f32.mxu0 %v17578_v26 }
 0x926   :  { %11019 = vmatmul.mubr.msk.f32.gmra.mxu1 %vm2272_vm1, %v6768_v36  ;;  %11051 = vmatmul.mubr.msk.f32.gmra.mxu0 %vm2272_vm1, %v6768_v36 }
 0x927   :  { %7089 = vmatprep.mubr.f32.mxu1 %v17578_v26  ;;  %7346 = vmatprep.mubr.f32.mxu0 %v17578_v26  ;;  %v12257_v45 = vpop.eup %12256 }
 0x928   :  { %v6777_v41 = vmul.f32 %v12257_v45, %v15907_v57  ;;  %v6778_v27 = vmul.f32 %v12257_v45, %v15912_v37 }
 0x92a   :  { %11020 = vmatmul.mubr.msk.f32.gmra.mxu1 %vm2272_vm1, %v6769_v35  ;;  %11052 = vmatmul.mubr.msk.f32.gmra.mxu0 %vm2272_vm1, %v6769_v35 }
 0x92b   :  { %7095 = vmatprep.mubr.f32.mxu1 %v17578_v26  ;;  %7352 = vmatprep.mubr.f32.mxu0 %v17578_v26 }
 0x92e   :  { %11021 = vmatmul.mubr.msk.f32.gmra.mxu1 %vm2272_vm1, %v6771_v12  ;;  %11053 = vmatmul.mubr.msk.f32.gmra.mxu0 %vm2272_vm1, %v6771_v12 }
 0x92f   :  { %7101 = vmatprep.mubr.f32.mxu1 %v17578_v26  ;;  %7358 = vmatprep.mubr.f32.mxu0 %v17578_v26 }
 0x932   :  { %11022 = vmatmul.mubr.msk.f32.gmra.mxu1 %vm2272_vm1, %v6772_v9  ;;  %11054 = vmatmul.mubr.msk.f32.gmra.mxu0 %vm2272_vm1, %v6772_v9 }
 0x933   :  { %7107 = vmatprep.mubr.f32.mxu1 %v17578_v26  ;;  %7364 = vmatprep.mubr.f32.mxu0 %v17578_v26 }
 0x936   :  { %11023 = vmatmul.mubr.msk.f32.gmra.mxu1 %vm2272_vm1, %v6774_v17  ;;  %11055 = vmatmul.mubr.msk.f32.gmra.mxu0 %vm2272_vm1, %v6774_v17 }
 0x937   :  { %7113 = vmatprep.mubr.f32.mxu1 %v17578_v26  ;;  %7370 = vmatprep.mubr.f32.mxu0 %v17578_v26 }
 0x93a   :  { %11024 = vmatmul.mubr.msk.f32.gmra.mxu1 %vm2272_vm1, %v6775_v49  ;;  %11056 = vmatmul.mubr.msk.f32.gmra.mxu0 %vm2272_vm1, %v6775_v49 }
 0x93b   :  { %7119 = vmatprep.mubr.f32.mxu1 %v17578_v26  ;;  %7376 = vmatprep.mubr.f32.mxu0 %v17578_v26 }
 0x93e   :  { %11025 = vmatmul.mubr.msk.f32.gmra.mxu1 %vm2272_vm1, %v6777_v41  ;;  %11057 = vmatmul.mubr.msk.f32.gmra.mxu0 %vm2272_vm1, %v6777_v41 }
 0x93f   :  { %7125 = vmatprep.mubr.f32.mxu1 %v17578_v26  ;;  %7382 = vmatprep.mubr.f32.mxu0 %v17578_v26 }
 0x942   :  { %11026 = vmatmul.mubr.msk.f32.gmra.mxu1 %vm2272_vm1, %v6778_v27  ;;  %11058 = vmatmul.mubr.msk.f32.gmra.mxu0 %vm2272_vm1, %v6778_v27 }
 0x96e   :  { %v6941_v56 = vpop.f32.mrf.mxu1  ;;  %v7198_v29 = vpop.f32.mrf.mxu0 }
 0x96f   :  { %v7389_v44 = vmul.f32 %v6941_v56, %v14898_v46  ;;  %v7391_v52 = vmul.f32 %v7198_v29, %v14900_v20 }
 0x970   :  { %v6943_v40 = vpop.f32.mrf.mxu1  ;;  %v7200_v0 = vpop.f32.mrf.mxu0 }
 0x971   :  { %v7390_v42 = vmul.f32 %v6943_v40, %v14902_v43  ;;  %v7392_v33 = vmul.f32 %v7200_v0, %v14917_v59 }
 0x972   :  { %v6947_v57 = vpop.f32.mrf.mxu1  ;;  %v7204_v61 = vpop.f32.mrf.mxu0 }
 0x973   :  { %v7393_v51 = vmul.f32 %v6947_v57, %v14904_v5  ;;  %v7395_v47 = vmul.f32 %v7204_v61, %v14911_v30 }
 0x974   :  { %v6949_v10 = vpop.f32.mrf.mxu1  ;;  %v7206_v54 = vpop.f32.mrf.mxu0 }
 0x975   :  { %v7394_v37 = vmul.f32 %v6949_v10, %v14913_v50  ;;  %v7396_v32 = vmul.f32 %v7206_v54, %v14915_v4  ;;  %v7517_v31 = vadd.f32 %v7393_v51, %v7389_v44  ;;  %v7531_v16 = vadd.f32 %v7395_v47, %v7391_v52 }
 0x976   :  { %v6953_v25 = vpop.f32.mrf.mxu1  ;;  %v7210_v28 = vpop.f32.mrf.mxu0 }
 0x977   :  { %v7524_v2 = vadd.f32 %v7394_v37, %v7390_v42  ;;  %v7538_v3 = vadd.f32 %v7396_v32, %v7392_v33  ;;  %v7518_v34 = vrot.slane %v7517_v31, 4  ;;  %v7532_v53 = vrot.slane %v7531_v16, 4 }
 0x978   :  { %v6955_v24 = vpop.f32.mrf.mxu1  ;;  %v7212_v13 = vpop.f32.mrf.mxu0  ;;  %v7397_v55 = vmul.f32 %v6953_v25, %v14898_v46  ;;  %v7399_v45 = vmul.f32 %v7210_v28, %v14900_v20 }
 0x979   :  { %v7525_v8 = vrot.slane %v7524_v2, 4  ;;  %v7539_v22 = vrot.slane %v7538_v3, 4  ;;  %v7519_v14 = vadd.f32 %v7518_v34, %v7517_v31  ;;  %v7533_v36 = vadd.f32 %v7532_v53, %v7531_v16 }
 0x97a   :  { %v6959_v7 = vpop.f32.mrf.mxu1  ;;  %v7398_v51 = vmul.f32 %v6955_v24, %v14902_v43  ;;  %v7400_v47 = vmul.f32 %v7212_v13, %v14917_v59 }
 0x97b   :  { %v7216_v6 = vpop.f32.mrf.mxu0  ;;  %v7401_v63 = vmul.f32 %v6959_v7, %v14904_v5  ;;  %v7526_v11 = vadd.f32 %v7525_v8, %v7524_v2  ;;  %v7540_v35 = vadd.f32 %v7539_v22, %v7538_v3  ;;  %v7520_v27 = vrot.slane %v7519_v14, 2 }
 0x97c   :  { %v6961_v58 = vpop.f32.mrf.mxu1  ;;  %v7403_v12 = vmul.f32 %v7216_v6, %v14911_v30  ;;  %v7534_v56 = vrot.slane %v7533_v36, 2 }
 0x97d   :  { %v7218_v38 = vpop.f32.mrf.mxu0  ;;  %v7545_v17 = vadd.f32 %v7401_v63, %v7397_v55  ;;  %v7527_v29 = vrot.slane %v7526_v11, 2  ;;  %v7541_v40 = vrot.slane %v7540_v35, 2  ;;  %v7402_v57 = vmul.f32 %v6961_v58, %v14913_v50 }
 0x97e   :  { %v7559_v0 = vadd.f32 %v7403_v12, %v7399_v45  ;;  %v7404_v25 = vmul.f32 %v7218_v38, %v14915_v4  ;;  %v7521_v32 = vadd.f32 %v7520_v27, %v7519_v14  ;;  %v7535_v44 = vadd.f32 %v7534_v56, %v7533_v36 }
 0x97f   :  { %v7546_v54 = vrot.slane %v7545_v17, 4  ;;  %v7528_v33 = vadd.f32 %v7527_v29, %v7526_v11  ;;  %v7542_v31 = vadd.f32 %v7541_v40, %v7540_v35  ;;  %v7552_v2 = vadd.f32 %v7402_v57, %v7398_v51 }
 0x980   :  { %v7560_v16 = vrot.slane %v7559_v0, 4  ;;  %v7566_v34 = vadd.f32 %v7404_v25, %v7400_v47  ;;  %v7522_v22 = vrot.slane %v7521_v32, 1  ;;  %v7536_v58 = vrot.slane %v7535_v44, 1 }
 0x981   :  { %v7547_v6 = vadd.f32 %v7546_v54, %v7545_v17  ;;  %v7529_v14 = vrot.slane %v7528_v33, 1  ;;  %v7543_v36 = vrot.slane %v7542_v31, 1  ;;  %v7553_v11 = vrot.slane %v7552_v2, 4 }
 0x982   :  { %v16007_v55 = vadd.f32 %v7560_v16, %v7559_v0  ;;  %v7567_v17 = vrot.slane %v7566_v34, 4 }
 0x983   :  { %v7548_v45 = vrot.slane %v7547_v6, 2 }
 0x986   :  { %v6965_v19 = vpop.f32.mrf.mxu1 }
 0x987   :  { %v7222_v9 = vpop.f32.mrf.mxu0  ;;  %v7405_v24 = vmul.f32 %v6965_v19, %v14898_v46 }
 0x988   :  { %v6967_v49 = vpop.f32.mrf.mxu1  ;;  %v7407_v13 = vmul.f32 %v7222_v9, %v14900_v20 }
 0x989   :  { %v7224_v41 = vpop.f32.mrf.mxu0 }
 0x98b   :  { %v6971_v61 = vpop.f32.mrf.mxu1  ;;  %v7228_v10 = vpop.f32.mrf.mxu0 }
 0x98c   :  { %v7409_v52 = vmul.f32 %v6971_v61, %v14904_v5  ;;  %v7411_v42 = vmul.f32 %v7228_v10, %v14911_v30  ;;  %v7406_v61 = vmul.f32 %v6967_v49, %v14902_v43  ;;  %v7408_v10 = vmul.f32 %v7224_v41, %v14917_v59 }
 0x98d   :  { %v6973_v37 = vpop.f32.mrf.mxu1  ;;  %v7230_v28 = vpop.f32.mrf.mxu0 }
 0x98e   :  { %v7573_v38 = vadd.f32 %v7409_v52, %v7405_v24  ;;  %v7587_v63 = vadd.f32 %v7411_v42, %v7407_v13  ;;  %v7410_v27 = vmul.f32 %v6973_v37, %v14913_v50  ;;  %v7412_v19 = vmul.f32 %v7230_v28, %v14915_v4 }
 0x98f   :  { %v6977_v3 = vpop.f32.mrf.mxu1  ;;  %v7234_v7 = vpop.f32.mrf.mxu0  ;;  %v7554_v52 = vadd.f32 %v7553_v11, %v7552_v2  ;;  %v7568_v42 = vadd.f32 %v7567_v17, %v7566_v34  ;;  %v16023_v2 = vadd.f32 %v7536_v58, %v7535_v44  ;;  %v16025_v34 = vadd.f32 %v7529_v14, %v7528_v33 }
 0x990   :  { %v7413_v9 = vmul.f32 %v6977_v3, %v14898_v46  ;;  %v7415_v56 = vmul.f32 %v7234_v7, %v14900_v20  ;;  %v7574_v54 = vrot.slane %v7573_v38, 4  ;;  %v7588_v25 = vrot.slane %v7587_v63, 4 }
 0x991   :  { %v6979_v53 = vpop.f32.mrf.mxu1  ;;  %v7236_v8 = vpop.f32.mrf.mxu0  ;;  %v7580_v13 = vadd.f32 %v7410_v27, %v7406_v61  ;;  %v7594_v49 = vadd.f32 %v7412_v19, %v7408_v10  ;;  %v7562_v11 = vrot.slane %v16007_v55, 2  ;;  %v7555_v17 = vrot.slane %v7554_v52, 2 }
 0x992   :  { %v7414_v16 = vmul.f32 %v6979_v53, %v14902_v43  ;;  %v7416_v3 = vmul.f32 %v7236_v8, %v14917_v59  ;;  %v7589_v1 = vadd.f32 %v7588_v25, %v7587_v63  ;;  %v16027_v53 = vadd.f32 %v7543_v36, %v7542_v31 }
 0x993   :  { %v6983_v35 = vpop.f32.mrf.mxu1  ;;  %v7240_v12 = vpop.f32.mrf.mxu0  ;;  %v16029_v8 = vadd.f32 %v7548_v45, %v7547_v6  ;;  %v7569_v27 = vrot.slane %v7568_v42, 2  ;;  %v7581_v19 = vrot.slane %v7580_v13, 4  ;;  %v7556_v18 = vadd.f32 %v7555_v17, %v7554_v52 }
 0x994   :  { %v7417_v29 = vmul.f32 %v6983_v35, %v14904_v5  ;;  %v7419_v40 = vmul.f32 %v7240_v12, %v14911_v30  ;;  %v7575_v12 = vadd.f32 %v7574_v54, %v7573_v38 }
 0x995   :  { %v6985_v57 = vpop.f32.mrf.mxu1  ;;  %v7242_v0 = vpop.f32.mrf.mxu0 }
 0x996   :  { %v7601_v51 = vadd.f32 %v7417_v29, %v7413_v9  ;;  %v7615_v47 = vadd.f32 %v7419_v40, %v7415_v56  ;;  %v7418_v37 = vmul.f32 %v6985_v57, %v14913_v50  ;;  %v7420_v28 = vmul.f32 %v7242_v0, %v14915_v4 }
 0x997   :  { %v16021_v57 = vadd.f32 %v7522_v22, %v7521_v32  ;;  %v7595_v0 = vrot.slane %v7594_v49, 4  ;;  %v7576_v32 = vrot.slane %v7575_v12, 2  ;;  %v7590_v22 = vrot.slane %v7589_v1, 2 }
 0x998   :  { %v6989_v7 = vpop.f32.mrf.mxu1  ;;  %v7246_v24 = vpop.f32.mrf.mxu0  ;;  %v7602_v35 = vrot.slane %v7601_v51, 4  ;;  %v7616_v41 = vrot.slane %v7615_v47, 4  ;;  %v7608_v9 = vadd.f32 %v7418_v37, %v7414_v16  ;;  %v7622_v56 = vadd.f32 %v7420_v28, %v7416_v3 }
 0x999   :  { %v7421_v31 = vmul.f32 %v6989_v7, %v14898_v46  ;;  %v7423_v6 = vmul.f32 %v7246_v24, %v14900_v20  ;;  %v7582_v37 = vadd.f32 %v7581_v19, %v7580_v13  ;;  %v7596_v28 = vadd.f32 %v7595_v0, %v7594_v49 }
 0x99a   :  { %v6991_v29 = vpop.f32.mrf.mxu1  ;;  %v7248_v40 = vpop.f32.mrf.mxu0  ;;  %v7603_v61 = vadd.f32 %v7602_v35, %v7601_v51  ;;  %v7617_v10 = vadd.f32 %v7616_v41, %v7615_v47  ;;  %v7609_v44 = vrot.slane %v7608_v9, 4  ;;  %v7623_v58 = vrot.slane %v7622_v56, 4 }
 0x99b   :  { %v7422_v36 = vmul.f32 %v6991_v29, %v14902_v43  ;;  %v7424_v45 = vmul.f32 %v7248_v40, %v14917_v59  ;;  %v7563_v29 = vadd.f32 %v7562_v11, %v16007_v55  ;;  %v7591_v60 = vadd.f32 %v7590_v22, %v7589_v1 }
 0x99c   :  { %v6995_v38 = vpop.f32.mrf.mxu1  ;;  %v7252_v63 = vpop.f32.mrf.mxu0  ;;  %v7604_v16 = vrot.slane %v7603_v61, 2  ;;  %v7618_v3 = vrot.slane %v7617_v10, 2  ;;  %v7610_v40 = vadd.f32 %v7609_v44, %v7608_v9  ;;  %v7624_v62 = vadd.f32 %v7623_v58, %v7622_v56 }
 0x99d   :  { %v7425_v54 = vmul.f32 %v6995_v38, %v14904_v5  ;;  %v7427_v25 = vmul.f32 %v7252_v63, %v14911_v30  ;;  %v7570_v38 = vadd.f32 %v7569_v27, %v7568_v42  ;;  %v7597_v49 = vrot.slane %v7596_v28, 2 }
 0x99e   :  { %v6997_v33 = vpop.f32.mrf.mxu1  ;;  %v7254_v14 = vpop.f32.mrf.mxu0  ;;  %v7605_v19 = vadd.f32 %v7604_v16, %v7603_v61  ;;  %v7619_v0 = vadd.f32 %v7618_v3, %v7617_v10  ;;  %v7550_v55 = vrot.slane %v16029_v8, 1  ;;  %v7564_v52 = vrot.slane %v7563_v29, 1 }
 0x99f   :  { %v7426_v51 = vmul.f32 %v6997_v33, %v14913_v50  ;;  %v7428_v47 = vmul.f32 %v7254_v14, %v14915_v4  ;;  %v7629_v35 = vadd.f32 %v7425_v54, %v7421_v31  ;;  %v7643_v7 = vadd.f32 %v7427_v25, %v7423_v6 }
 0x9a0   :  { %v7577_v33 = vadd.f32 %v7576_v32, %v7575_v12  ;;  %v7583_v14 = vrot.slane %v7582_v37, 2  ;;  %v7611_v6 = vrot.slane %v7610_v40, 2  ;;  %v7557_v9 = vrot.slane %v7556_v18, 1 }
 0x9a1   :  { %v7636_v41 = vadd.f32 %v7426_v51, %v7422_v36  ;;  %v7650_v24 = vadd.f32 %v7428_v47, %v7424_v45  ;;  %v7630_v23 = vrot.slane %v7629_v35, 4  ;;  %v7644_v63 = vrot.slane %v7643_v7, 4 }
 0x9a2   :  { %v7625_v36 = vrot.slane %v7624_v62, 2  ;;  %v7571_v42 = vrot.slane %v7570_v38, 1  ;;  %v7578_v56 = vrot.slane %v7577_v33, 1  ;;  %v7592_v11 = vrot.slane %v7591_v60, 1 }
 0x9a3   :  { %v7637_v39 = vrot.slane %v7636_v41, 4  ;;  %v7651_v13 = vrot.slane %v7650_v24, 4  ;;  %v7631_v31 = vadd.f32 %v7630_v23, %v7629_v35  ;;  %v7645_v45 = vadd.f32 %v7644_v63, %v7643_v7 }
 0x9a4   :  { %v7584_v1 = vadd.f32 %v7583_v14, %v7582_v37  ;;  %v7598_v27 = vadd.f32 %v7597_v49, %v7596_v28  ;;  %v7606_v32 = vrot.slane %v7605_v19, 1  ;;  %v7620_v22 = vrot.slane %v7619_v0, 1 }
 0x9a5   :  { %v7638_v54 = vadd.f32 %v7637_v39, %v7636_v41  ;;  %v7632_v17 = vrot.slane %v7631_v31, 2  ;;  %v7652_v12 = vadd.f32 %v7651_v13, %v7650_v24  ;;  %v7612_v61 = vadd.f32 %v7611_v6, %v7610_v40 }
 0x9a6   :  { %v7626_v10 = vadd.f32 %v7625_v36, %v7624_v62  ;;  %v7646_v23 = vrot.slane %v7645_v45, 2  ;;  %v7551_v58 = vadd.f32 %v7550_v55, %v16029_v8  ;;  %v7565_v39 = vadd.f32 %v7564_v52, %v7563_v29 }
 0x9a7   :  { %v7639_v44 = vrot.slane %v7638_v54, 2  ;;  %v7558_v25 = vadd.f32 %v7557_v9, %v7556_v18  ;;  %v7572_v51 = vadd.f32 %v7571_v42, %v7570_v38  ;;  %v7579_v47 = vadd.f32 %v7578_v56, %v7577_v33 }
 0x9a8   :  { %v7593_v16 = vadd.f32 %v7592_v11, %v7591_v60  ;;  %v7633_v3 = vadd.f32 %v7632_v17, %v7631_v31  ;;  %v7653_v35 = vrot.slane %v7652_v12, 2  ;;  %v7585_v7 = vrot.slane %v7584_v1, 1 }
 0x9a9   :  { %v7599_v41 = vrot.slane %v7598_v27, 1  ;;  %v7607_v24 = vadd.f32 %v7606_v32, %v7605_v19  ;;  %v7621_v37 = vadd.f32 %v7620_v22, %v7619_v0  ;;  %v7613_v28 = vrot.slane %v7612_v61, 1 }
 0x9aa   :  { %v7627_v63 = vrot.slane %v7626_v10, 1  ;;  %v7647_v14 = vadd.f32 %v7646_v23, %v7645_v45  ;;  %v7640_v40 = vadd.f32 %v7639_v44, %v7638_v54  ;;  %v8036_v8 = vsel %vm3962_vm2, %v7551_v58, %v16021_v57 }
 0x9ab   :  { %v8050_v18 = vsel %vm3962_vm2, %v7565_v39, %v16023_v2  ;;  %v8043_v60 = vsel %vm3962_vm2, %v7558_v25, %v16025_v34  ;;  %v8057_v29 = vsel %vm3962_vm2, %v7572_v51, %v16027_v53  ;;  %v8037_v38 = vsel %vm3964_vm3, %v7579_v47, %v8036_v8 }
 0x9ac   :  { %v8051_v33 = vsel %vm3964_vm3, %v7593_v16, %v8050_v18  ;;  %v7634_v49 = vrot.slane %v7633_v3, 1  ;;  %v7654_v19 = vadd.f32 %v7653_v35, %v7652_v12  ;;  %v7586_v6 = vadd.f32 %v7585_v7, %v7584_v1 }
 0x9ad   :  { %v7600_v36 = vadd.f32 %v7599_v41, %v7598_v27  ;;  %v8038_v57 = vsel %vm3966_vm4, %v7607_v24, %v8037_v38  ;;  %v8052_v2 = vsel %vm3966_vm4, %v7621_v37, %v8051_v33  ;;  %v7614_v45 = vadd.f32 %v7613_v28, %v7612_v61 }
 0x9ae   :  { %v7001_v62 = vpop.f32.mrf.mxu1  ;;  %v7258_v13 = vpop.f32.mrf.mxu0  ;;  %v7628_v54 = vadd.f32 %v7627_v63, %v7626_v10  ;;  %v7648_v34 = vrot.slane %v7647_v14, 1  ;;  %v7641_v55 = vrot.slane %v7640_v40, 1  ;;  %v7635_v17 = vadd.f32 %v7634_v49, %v7633_v3 }
 0x9af   :  { %v7429_v9 = vmul.f32 %v7001_v62, %v14898_v46  ;;  %v7431_v42 = vmul.f32 %v7258_v13, %v14900_v20  ;;  %v7655_v12 = vrot.slane %v7654_v19, 1  ;;  %v8044_v47 = vsel %vm3964_vm3, %v7586_v6, %v8043_v60 }
 0x9b0   :  { %v7003_v0 = vpop.f32.mrf.mxu1  ;;  %v7260_v31 = vpop.f32.mrf.mxu0  ;;  %v7649_v58 = vadd.f32 %v7648_v34, %v7647_v14  ;;  %v7642_v39 = vadd.f32 %v7641_v55, %v7640_v40  ;;  %v8058_v16 = vsel %vm3964_vm3, %v7600_v36, %v8057_v29  ;;  %v16066_v24 = vsel %vm3968_vm5, %v7635_v17, %v8038_v57 }
 0x9b1   :  { %v7430_v1 = vmul.f32 %v7003_v0, %v14902_v43  ;;  %v7432_v27 = vmul.f32 %v7260_v31, %v14917_v59  ;;  %v7656_v37 = vadd.f32 %v7655_v12, %v7654_v19  ;;  %v8045_v62 = vsel %vm3966_vm4, %v7614_v45, %v8044_v47 }
 0x9b2   :  { %v7007_v52 = vpop.f32.mrf.mxu1  ;;  %v7264_v53 = vpop.f32.mrf.mxu0  ;;  %v8059_v14 = vsel %vm3966_vm4, %v7628_v54, %v8058_v16  ;;  %v16071_v60 = vsel %vm3968_vm5, %v7649_v58, %v8052_v2  ;;  %v16076_v19 = vsel %vm3968_vm5, %v7642_v39, %v8045_v62 }
 0x9b3   :  { %v7433_v56 = vmul.f32 %v7007_v52, %v14904_v5  ;;  %v7435_v11 = vmul.f32 %v7264_v53, %v14911_v30 }
 0x9b4   :  { %v7009_v32 = vpop.f32.mrf.mxu1  ;;  %v7266_v22 = vpop.f32.mrf.mxu0 }
 0x9b5   :  { %v7657_v61 = vadd.f32 %v7433_v56, %v7429_v9  ;;  %v7671_v10 = vadd.f32 %v7435_v11, %v7431_v42  ;;  %v7434_v23 = vmul.f32 %v7009_v32, %v14913_v50  ;;  %v7436_v44 = vmul.f32 %v7266_v22, %v14915_v4 }
 0x9b6   :  { %v7013_v25 = vpop.f32.mrf.mxu1  ;;  %v7270_v51 = vpop.f32.mrf.mxu0 }
 0x9b7   :  { %v7658_v3 = vrot.slane %v7657_v61, 4  ;;  %v7672_v35 = vrot.slane %v7671_v10, 4  ;;  %v7664_v7 = vadd.f32 %v7434_v23, %v7430_v1  ;;  %v7678_v41 = vadd.f32 %v7436_v44, %v7432_v27 }
 0x9b8   :  { %v7015_v28 = vpop.f32.mrf.mxu1  ;;  %v7272_v63 = vpop.f32.mrf.mxu0  ;;  %v7437_v29 = vmul.f32 %v7013_v25, %v14898_v46  ;;  %v7439_v38 = vmul.f32 %v7270_v51, %v14900_v20 }
 0x9b9   :  { %v7659_v40 = vadd.f32 %v7658_v3, %v7657_v61  ;;  %v7673_v13 = vadd.f32 %v7672_v35, %v7671_v10  ;;  %v7665_v8 = vrot.slane %v7664_v7, 4  ;;  %v7679_v18 = vrot.slane %v7678_v41, 4 }
 0x9ba   :  { %v7019_v33 = vpop.f32.mrf.mxu1  ;;  %v7276_v49 = vpop.f32.mrf.mxu0  ;;  %v7438_v57 = vmul.f32 %v7015_v28, %v14902_v43  ;;  %v7440_v45 = vmul.f32 %v7272_v63, %v14917_v59  ;;  %v16089_v35 = vsel %vm3968_vm5, %v7656_v37, %v8059_v14 }
 0x9bb   :  { %v7660_v0 = vrot.slane %v7659_v40, 2  ;;  %v7674_v31 = vrot.slane %v7673_v13, 2  ;;  %v7666_v6 = vadd.f32 %v7665_v8, %v7664_v7  ;;  %v7680_v36 = vadd.f32 %v7679_v18, %v7678_v41 }
 0x9bc   :  { %v7441_v2 = vmul.f32 %v7019_v33, %v14904_v5  ;;  %v7443_v54 = vmul.f32 %v7276_v49, %v14911_v30  ;;  %v7021_v34 = vpop.f32.mrf.mxu1  ;;  %v7278_v55 = vpop.f32.mrf.mxu0 }
 0x9bd   :  { %v7661_v52 = vadd.f32 %v7660_v0, %v7659_v40  ;;  %v7675_v53 = vadd.f32 %v7674_v31, %v7673_v13  ;;  %v7667_v9 = vrot.slane %v7666_v6, 2  ;;  %v7681_v42 = vrot.slane %v7680_v36, 2 }
 0x9be   :  { %v7685_v56 = vadd.f32 %v7441_v2, %v7437_v29  ;;  %v7699_v11 = vadd.f32 %v7443_v54, %v7439_v38  ;;  %v7442_v17 = vmul.f32 %v7021_v34, %v14913_v50  ;;  %v7444_v12 = vmul.f32 %v7278_v55, %v14915_v4  ;;  %v7025_v1 = vpop.f32.mrf.mxu1  ;;  %v7282_v27 = vpop.f32.mrf.mxu0 }
 0x9bf   :  { %v7662_v32 = vrot.slane %v7661_v52, 1  ;;  %v7676_v22 = vrot.slane %v7675_v53, 1  ;;  %v7668_v61 = vadd.f32 %v7667_v9, %v7666_v6  ;;  %v7682_v10 = vadd.f32 %v7681_v42, %v7680_v36 }
 0x9c0   :  { %v7686_v23 = vrot.slane %v7685_v56, 4  ;;  %v7700_v44 = vrot.slane %v7699_v11, 4  ;;  %v7692_v58 = vadd.f32 %v7442_v17, %v7438_v57  ;;  %v7706_v39 = vadd.f32 %v7444_v12, %v7440_v45  ;;  %v7027_v25 = vpop.f32.mrf.mxu1  ;;  %v7284_v51 = vpop.f32.mrf.mxu0 }
 0x9c1   :  { %v16084_v47 = vadd.f32 %v7662_v32, %v7661_v52  ;;  %v16086_v16 = vadd.f32 %v7676_v22, %v7675_v53  ;;  %v7669_v3 = vrot.slane %v7668_v61, 1  ;;  %v7683_v8 = vrot.slane %v7682_v10, 1 }
 0x9c2   :  { %v7687_v7 = vadd.f32 %v7686_v23, %v7685_v56  ;;  %v7701_v41 = vadd.f32 %v7700_v44, %v7699_v11  ;;  %v7693_v28 = vrot.slane %v7692_v58, 4  ;;  %v7707_v63 = vrot.slane %v7706_v39, 4  ;;  %v7031_v62 = vpop.f32.mrf.mxu1  ;;  %v7288_v40 = vpop.f32.mrf.mxu0 }
 0x9c3   :  { %v16091_v13 = vadd.f32 %v7669_v3, %v7668_v61  ;;  %v7445_v18 = vmul.f32 %v7025_v1, %v14898_v46  ;;  %v7447_v29 = vmul.f32 %v7282_v27, %v14900_v20  ;;  %v7446_v14 = vmul.f32 %v7027_v25, %v14902_v43 }
 0x9c4   :  { %v7688_v38 = vrot.slane %v7687_v7, 2  ;;  %v7702_v33 = vrot.slane %v7701_v41, 2  ;;  %v7694_v49 = vadd.f32 %v7693_v28, %v7692_v58  ;;  %v7708_v0 = vadd.f32 %v7707_v63, %v7706_v39  ;;  %v7033_v31 = vpop.f32.mrf.mxu1  ;;  %v7290_v37 = vpop.f32.mrf.mxu0 }
 0x9c5   :  { %v7448_v6 = vmul.f32 %v7284_v51, %v14917_v59  ;;  %v7449_v36 = vmul.f32 %v7031_v62, %v14904_v5  ;;  %v7451_v57 = vmul.f32 %v7288_v40, %v14911_v30  ;;  %v7450_v42 = vmul.f32 %v7033_v31, %v14913_v50 }
 0x9c6   :  { %v7689_v45 = vadd.f32 %v7688_v38, %v7687_v7  ;;  %v7703_v2 = vadd.f32 %v7702_v33, %v7701_v41  ;;  %v7695_v54 = vrot.slane %v7694_v49, 2  ;;  %v7709_v34 = vrot.slane %v7708_v0, 2  ;;  %v7037_v55 = vpop.f32.mrf.mxu1  ;;  %v7294_v52 = vpop.f32.mrf.mxu0 }
 0x9c7   :  { %v7713_v53 = vadd.f32 %v7449_v36, %v7445_v18  ;;  %v7727_v9 = vadd.f32 %v7451_v57, %v7447_v29  ;;  %v7452_v56 = vmul.f32 %v7290_v37, %v14915_v4  ;;  %v16101_v11 = vadd.f32 %v7683_v8, %v7682_v10 }
 0x9c8   :  { %v7690_v17 = vrot.slane %v7689_v45, 1  ;;  %v7704_v12 = vrot.slane %v7703_v2, 1  ;;  %v16103_v1 = vadd.f32 %v7695_v54, %v7694_v49  ;;  %v7039_v27 = vpop.f32.mrf.mxu1  ;;  %v7296_v32 = vpop.f32.mrf.mxu0  ;;  %v7720_v23 = vadd.f32 %v7450_v42, %v7446_v14 }
 0x9c9   :  { %v7714_v22 = vrot.slane %v7713_v53, 4  ;;  %v7728_v61 = vrot.slane %v7727_v9, 4  ;;  %v7734_v44 = vadd.f32 %v7452_v56, %v7448_v6  ;;  %v16110_v51 = vadd.f32 %v7709_v34, %v7708_v0 }
 0x9ca   :  { %v16105_v58 = vadd.f32 %v7690_v17, %v7689_v45  ;;  %v16107_v39 = vadd.f32 %v7704_v12, %v7703_v2  ;;  %v7043_v10 = vpop.f32.mrf.mxu1  ;;  %v7300_v3 = vpop.f32.mrf.mxu0  ;;  %v7721_v28 = vrot.slane %v7720_v23, 4  ;;  %v7453_v62 = vmul.f32 %v7037_v55, %v14898_v46 }
 0x9cb   :  { %v7715_v7 = vadd.f32 %v7714_v22, %v7713_v53  ;;  %v7729_v41 = vadd.f32 %v7728_v61, %v7727_v9  ;;  %v7735_v63 = vrot.slane %v7734_v44, 4  ;;  %v7455_v40 = vmul.f32 %v7294_v52, %v14900_v20 }
 0x9cc   :  { %v7454_v8 = vmul.f32 %v7039_v27, %v14902_v43  ;;  %v7456_v18 = vmul.f32 %v7296_v32, %v14917_v59  ;;  %v7045_v29 = vpop.f32.mrf.mxu1  ;;  %v7302_v38 = vpop.f32.mrf.mxu0  ;;  %v7722_v0 = vadd.f32 %v7721_v28, %v7720_v23  ;;  %v7457_v37 = vmul.f32 %v7043_v10, %v14904_v5 }
 0x9cd   :  { %v7716_v33 = vrot.slane %v7715_v7, 2  ;;  %v7730_v49 = vrot.slane %v7729_v41, 2  ;;  %v7736_v31 = vadd.f32 %v7735_v63, %v7734_v44  ;;  %v7459_v14 = vmul.f32 %v7300_v3, %v14911_v30 }
 0x9ce   :  { %v7458_v6 = vmul.f32 %v7045_v29, %v14913_v50  ;;  %v7460_v36 = vmul.f32 %v7302_v38, %v14915_v4  ;;  %v7049_v57 = vpop.f32.mrf.mxu1  ;;  %v7306_v45 = vpop.f32.mrf.mxu0  ;;  %v7723_v34 = vrot.slane %v7722_v0, 2  ;;  %v7741_v52 = vadd.f32 %v7457_v37, %v7453_v62 }
 0x9cf   :  { %v7717_v2 = vadd.f32 %v7716_v33, %v7715_v7  ;;  %v16120_v54 = vadd.f32 %v7730_v49, %v7729_v41  ;;  %v7737_v55 = vrot.slane %v7736_v31, 2  ;;  %v7755_v53 = vadd.f32 %v7459_v14, %v7455_v40 }
 0x9d0   :  { %v7748_v9 = vadd.f32 %v7458_v6, %v7454_v8  ;;  %v7762_v42 = vadd.f32 %v7460_v36, %v7456_v18  ;;  %v7051_v56 = vpop.f32.mrf.mxu1  ;;  %v7308_v17 = vpop.f32.mrf.mxu0  ;;  %v16124_v22 = vadd.f32 %v7723_v34, %v7722_v0  ;;  %v7742_v61 = vrot.slane %v7741_v52, 4 }
 0x9d1   :  { %v7718_v27 = vrot.slane %v7717_v2, 1  ;;  %v7732_v32 = vrot.slane %v16120_v54, 1  ;;  %v7756_v23 = vrot.slane %v7755_v53, 4  ;;  %v16128_v28 = vadd.f32 %v7737_v55, %v7736_v31 }
 0x9d2   :  { %v7749_v44 = vrot.slane %v7748_v9, 4  ;;  %v7763_v10 = vrot.slane %v7762_v42, 4  ;;  %v7055_v3 = vpop.f32.mrf.mxu1  ;;  %v7312_v7 = vpop.f32.mrf.mxu0  ;;  %v7461_v63 = vmul.f32 %v7049_v57, %v14898_v46  ;;  %v7463_v62 = vmul.f32 %v7306_v45, %v14900_v20 }
 0x9d3   :  { %v16126_v41 = vadd.f32 %v7718_v27, %v7717_v2  ;;  %v7743_v40 = vadd.f32 %v7742_v61, %v7741_v52  ;;  %v7757_v8 = vadd.f32 %v7756_v23, %v7755_v53  ;;  %v7462_v49 = vmul.f32 %v7051_v56, %v14902_v43 }
 0x9d4   :  { %v7750_v18 = vadd.f32 %v7749_v44, %v7748_v9  ;;  %v7764_v29 = vadd.f32 %v7763_v10, %v7762_v42  ;;  %v7057_v38 = vpop.f32.mrf.mxu1  ;;  %v7314_v33 = vpop.f32.mrf.mxu0  ;;  %v7464_v0 = vmul.f32 %v7308_v17, %v14917_v59  ;;  %v7465_v37 = vmul.f32 %v7055_v3, %v14904_v5 }
 0x9d5   :  { %v7467_v14 = vmul.f32 %v7312_v7, %v14911_v30  ;;  %v7744_v31 = vrot.slane %v7743_v40, 2  ;;  %v7758_v6 = vrot.slane %v7757_v8, 2  ;;  %v7466_v52 = vmul.f32 %v7057_v38, %v14913_v50 }
 0x9d6   :  { %v7751_v36 = vrot.slane %v7750_v18, 2  ;;  %v7765_v57 = vrot.slane %v7764_v29, 2  ;;  %v7061_v2 = vpop.f32.mrf.mxu1  ;;  %v16136_v45 = vpop.f32.mrf.mxu0  ;;  %v7769_v34 = vadd.f32 %v7465_v37, %v7461_v63  ;;  %v7468_v53 = vmul.f32 %v7314_v33, %v14915_v4 }
 0x9d7   :  { %v7783_v55 = vadd.f32 %v7467_v14, %v7463_v62  ;;  %v7745_v9 = vadd.f32 %v7744_v31, %v7743_v40  ;;  %v7759_v42 = vadd.f32 %v7758_v6, %v7757_v8  ;;  %v7776_v10 = vadd.f32 %v7466_v52, %v7462_v49 }
 0x9d8   :  { %v7752_v56 = vadd.f32 %v7751_v36, %v7750_v18  ;;  %v7766_v17 = vadd.f32 %v7765_v57, %v7764_v29  ;;  %v16140_v27 = vpop.f32.mrf.mxu1  ;;  %v16142_v61 = vpop.f32.mrf.mxu0  ;;  %v7770_v23 = vrot.slane %v7769_v34, 4  ;;  %v7790_v3 = vadd.f32 %v7468_v53, %v7464_v0 }
 0x9d9   :  { %v7784_v44 = vrot.slane %v7783_v55, 4  ;;  %v7746_v7 = vrot.slane %v7745_v9, 1  ;;  %v7760_v12 = vrot.slane %v7759_v42, 1  ;;  %v7777_v18 = vrot.slane %v7776_v10, 4 }
 0x9da   :  { %v7753_v63 = vrot.slane %v7752_v56, 1  ;;  %v7767_v62 = vrot.slane %v7766_v17, 1  ;;  %v16144_v37 = vpop.f32.mrf.mxu1  ;;  %v16146_v38 = vpop.f32.mrf.mxu0  ;;  %v7771_v40 = vadd.f32 %v7770_v23, %v7769_v34  ;;  %v7791_v29 = vrot.slane %v7790_v3, 4 }
 0x9db   :  { %v7785_v8 = vadd.f32 %v7784_v44, %v7783_v55  ;;  %v7733_v33 = vadd.f32 %v7732_v32, %v16120_v54  ;;  %v7747_v14 = vadd.f32 %v7746_v7, %v7745_v9  ;;  %v7761_v31 = vadd.f32 %v7760_v12, %v7759_v42 }
 0x9dc   :  { %v7754_v6 = vadd.f32 %v7753_v63, %v7752_v56  ;;  %v7069_v36 = vpop.f32.mrf.mxu1  ;;  %v16149_v49 = vpop.f32.mrf.mxu0  ;;  %v7772_v0 = vrot.slane %v7771_v40, 2  ;;  %v7778_v52 = vadd.f32 %v7777_v18, %v7776_v10  ;;  %v7792_v53 = vadd.f32 %v7791_v29, %v7790_v3 }
 0x9dd   :  { %v7786_v57 = vrot.slane %v7785_v8, 2  ;;  %v16151_v25 = vadd.f32 %v7767_v62, %v7766_v17  ;;  %v16154_v15 = vmul.f32 %v7061_v2, %v14898_v46  ;;  %v17597_v34 = vrot.slane %v16103_v1, 1 }
 0x9de   :  { %v7725_v54 = vrot.slane %v16124_v22, 1  ;;  %v7073_v12 = vpop.f32.mrf.mxu1  ;;  %v7330_v32 = vpop.f32.mrf.mxu0  ;;  %v7773_v9 = vadd.f32 %v7772_v0, %v7771_v40  ;;  %v7779_v56 = vrot.slane %v7778_v52, 2  ;;  %v7793_v23 = vrot.slane %v7792_v53, 2 }
 0x9df   :  { %v7698_v55 = vadd.f32 %v17597_v34, %v16103_v1  ;;  %v7787_v42 = vadd.f32 %v7786_v57, %v7785_v8  ;;  %v8047_v17 = vsel %vm3970_vm6, %v16091_v13, %v16076_v19  ;;  %v17598_v2 = vrot.slane %v16110_v51, 1 }
 0x9e0   :  { %v7726_v44 = vadd.f32 %v7725_v54, %v16124_v22  ;;  %v7739_v1 = vrot.slane %v16128_v28, 1  ;;  %v7075_v3 = vpop.f32.mrf.mxu1  ;;  %v7332_v7 = vpop.f32.mrf.mxu0  ;;  %v7774_v63 = vrot.slane %v7773_v9, 1  ;;  %v7780_v40 = vadd.f32 %v7779_v56, %v7778_v52 }
 0x9e1   :  { %v7712_v10 = vadd.f32 %v17598_v2, %v16110_v51  ;;  %v7788_v62 = vrot.slane %v7787_v42, 1  ;;  %v7794_v8 = vadd.f32 %v7793_v23, %v7792_v53  ;;  %v8048_v18 = vsel %vm3972_vm7, %v7698_v55, %v8047_v17 }
 0x9e2   :  { %v7740_v22 = vadd.f32 %v7739_v1, %v16128_v28  ;;  %v8061_v19 = vsel %vm3970_vm6, %v16101_v11, %v16089_v35  ;;  %v8040_v13 = vsel %vm3970_vm6, %v16084_v47, %v16066_v24  ;;  %v7079_v51 = vpop.f32.mrf.mxu1  ;;  %v7336_v29 = vpop.f32.mrf.mxu0  ;;  %v7775_v0 = vadd.f32 %v7774_v63, %v7773_v9 }
 0x9e3   :  { %v7789_v57 = vadd.f32 %v7788_v62, %v7787_v42  ;;  %v7781_v34 = vrot.slane %v7780_v40, 1  ;;  %v7795_v54 = vrot.slane %v7794_v8, 1  ;;  %v7471_v52 = vmul.f32 %v16136_v45, %v14900_v20 }
 0x9e4   :  { %v8049_v53 = vsel %vm3974_vm8, %v7726_v44, %v8048_v18  ;;  %v8062_v28 = vsel %vm3972_vm7, %v7712_v10, %v8061_v19  ;;  %v8041_v35 = vsel %vm3972_vm7, %v16105_v58, %v8040_v13  ;;  %v7081_v11 = vpop.f32.mrf.mxu1  ;;  %v7338_v55 = vpop.f32.mrf.mxu0  ;;  %v16183_v24 = vsel %vm3962_vm2, %v7775_v0, %v7747_v14 }
 0x9e5   :  { %v16186_v47 = vsel %vm3962_vm2, %v7789_v57, %v7761_v31  ;;  %v7782_v9 = vadd.f32 %v7781_v34, %v7780_v40  ;;  %8164 = vmatprep.mubr.f32.mxu1 %v8049_v53  ;;  %v8054_v45 = vsel %vm3970_vm6, %v16086_v16, %v16071_v60  ;;  %v16191_v42 = vadd.f32 %v7795_v54, %v7794_v8  ;;  %v12479_v57 = vld [vmem:[%s17523_s20 + $0x28] sm:$0xff] }
 0x9e6   :  { %v8063_v56 = vsel %vm3974_vm8, %v7740_v22, %v8062_v28  ;;  %v8042_v58 = vsel %vm3974_vm8, %v16126_v41, %v8041_v35  ;;  %v8055_v14 = vsel %vm3972_vm7, %v16107_v39, %v8054_v45  ;;  %v16198_v23 = vpop.f32.mrf.mxu1  ;;  %v16200_v31 = vpop.f32.mrf.mxu0  ;;  %v7470_v16 = vmul.f32 %v16140_v27, %v14902_v43 }
 0x9e7   :  { %v16203_v44 = vsel %vm3962_vm2, %v7782_v9, %v7754_v6  ;;  %8239 = vmatprep.mubr.f32.mxu0 %v8063_v56  ;;  %8165 = vmatmul.mubr.f32.vlgmr.msra.gmra.mxu1 %v8042_v58  ;;  %v8056_v60 = vsel %vm3974_vm8, %v7733_v33, %v8055_v14  ;;  %v7472_v41 = vmul.f32 %v16142_v61, %v14917_v59  ;;  %v12480_v9 = vld [vmem:[%s17523_s20 + $0x20] sm:$0xff] }
 0x9e8   :  { %8240 = vmatmul.mubr.f32.vlgmr.msra.gmra.mxu0 %v8056_v60  ;;  %v7473_v39 = vmul.f32 %v16144_v37, %v14904_v5  ;;  %v7475_v17 = vmul.f32 %v16146_v38, %v14911_v30  ;;  %v7474_v6 = vmul.f32 %v7069_v36, %v14913_v50  ;;  %v16215_v2 = vpop.f32.mrf.mxu1  ;;  %v16217_v10 = vpop.f32.mrf.mxu0  ;;  %v7476_v33 = vmul.f32 %v16149_v49, %v14915_v4  ;;  %v12477_v37 = vld [vmem:[%s17523_s20 + $0x38] sm:$0xff] }
 0x9e9   :  { %v7477_v27 = vmul.f32 %v7073_v12, %v14898_v46  ;;  %v7479_v1 = vmul.f32 %v7330_v32, %v14900_v20  ;;  %v7478_v61 = vmul.f32 %v7075_v3, %v14902_v43  ;;  %11931 = vmatpush3.msra.mxu1 %v12477_v37  ;;  %v7480_v62 = vmul.f32 %v7332_v7, %v14917_v59  ;;  %v12478_v12 = vld [vmem:[%s17523_s20 + $0x30] sm:$0xff] }
 0x9ea   :  { %v7797_v38 = vadd.f32 %v7473_v39, %v16154_v15  ;;  %v7811_v36 = vadd.f32 %v7475_v17, %v7471_v52  ;;  %v7804_v63 = vadd.f32 %v7474_v6, %v7470_v16  ;;  %v16229_v40 = vpop.f32.mrf.mxu1  ;;  %v16231_v49 = vpop.f32.mrf.mxu0  ;;  %11932 = vmatprep.subr.mxu1 %v12478_v12  ;;  %v7818_v32 = vadd.f32 %v7476_v33, %v7472_v41  ;;  %v12481_v33 = vld [vmem:[%s17523_s20 + $0x18] sm:$0xff] }
 0x9eb   :  { %v7481_v3 = vmul.f32 %v7079_v51, %v14904_v5  ;;  %v7483_v8 = vmul.f32 %v7336_v29, %v14911_v30  ;;  %v7482_v15 = vmul.f32 %v7081_v11, %v14913_v50  ;;  %11933 = vmatpush3.msra.mxu1 %v12478_v12  ;;  %v7484_v19 = vmul.f32 %v7338_v55, %v14915_v4 }
 0x9ec   :  { %v7798_v18 = vrot.slane %v7797_v38, 4  ;;  %v7812_v22 = vrot.slane %v7811_v36, 4  ;;  %v7805_v7 = vrot.slane %v7804_v63, 4  ;;  %v16240_v13 = vpop.f32.mrf.mxu1  ;;  %v16242_v0 = vpop.f32.mrf.mxu0  ;;  %11934 = vmatprep.subr.mxu1 %v12479_v57  ;;  %v7819_v51 = vrot.slane %v7818_v32, 4 }
 0x9ed   :  { %v7825_v34 = vadd.f32 %v7481_v3, %v7477_v27  ;;  %v7839_v29 = vadd.f32 %v7483_v8, %v7479_v1  ;;  %v7832_v54 = vadd.f32 %v7482_v15, %v7478_v61  ;;  %11935 = vmatpush3.msra.mxu1 %v12479_v57  ;;  %v7846_v35 = vadd.f32 %v7484_v19, %v7480_v62  ;;  %v12482_v3 = vld [vmem:[%s17523_s20 + $0x10] sm:$0xff] }
 0x9ee   :  { %v7799_v52 = vadd.f32 %v7798_v18, %v7797_v38  ;;  %v7813_v53 = vadd.f32 %v7812_v22, %v7811_v36  ;;  %v7806_v28 = vadd.f32 %v7805_v7, %v7804_v63  ;;  %v16247_v11 = vpop.f32.mrf.mxu1  ;;  %v16249_v55 = vpop.f32.mrf.mxu0  ;;  %11936 = vmatprep.subr.mxu1 %v12480_v9  ;;  %v7820_v45 = vadd.f32 %v7819_v51, %v7818_v32 }
 0x9ef   :  { %v7826_v56 = vrot.slane %v7825_v34, 4  ;;  %v7840_v58 = vrot.slane %v7839_v29, 4  ;;  %v7833_v14 = vrot.slane %v7832_v54, 4  ;;  %11937 = vmatpush3.msra.mxu1 %v12480_v9  ;;  %v7847_v39 = vrot.slane %v7846_v35, 4 }
 0x9f0   :  { %v7800_v60 = vrot.slane %v7799_v52, 2  ;;  %v7814_v16 = vrot.slane %v7813_v53, 2  ;;  %v7807_v41 = vrot.slane %v7806_v28, 2  ;;  %v16254_v17 = vpop.f32.mrf.mxu1  ;;  %v16256_v6 = vpop.f32.mrf.mxu0  ;;  %11938 = vmatprep.subr.mxu1 %v12481_v33  ;;  %v7821_v27 = vrot.slane %v7820_v45, 2 }
 0x9f1   :  { %v7827_v1 = vadd.f32 %v7826_v56, %v7825_v34  ;;  %v7841_v61 = vadd.f32 %v7840_v58, %v7839_v29  ;;  %v7834_v37 = vadd.f32 %v7833_v14, %v7832_v54  ;;  %11939 = vmatpush3.msra.mxu1 %v12481_v33  ;;  %v7848_v62 = vadd.f32 %v7847_v39, %v7846_v35  ;;  %v12483_v54 = vld [vmem:[%s17523_s20 + $0x8] sm:$0xff] }
 0x9f2   :  { %v7801_v38 = vadd.f32 %v7800_v60, %v7799_v52  ;;  %v7815_v36 = vadd.f32 %v7814_v16, %v7813_v53  ;;  %v7808_v63 = vadd.f32 %v7807_v41, %v7806_v28  ;;  %v7103_v12 = vpop.f32.mrf.mxu1  ;;  %v16261_v32 = vpop.f32.mrf.mxu0  ;;  %11940 = vmatprep.subr.mxu1 %v12482_v3  ;;  %v7822_v8 = vadd.f32 %v7821_v27, %v7820_v45  ;;  %v12484_v16 = vld [vmem:[%s17523_s20] sm:$0xff] }
 0x9f3   :  { %v7828_v15 = vrot.slane %v7827_v1, 2  ;;  %v7842_v18 = vrot.slane %v7841_v61, 2  ;;  %v7835_v22 = vrot.slane %v7834_v37, 2  ;;  %11941 = vmatpush3.msra.mxu1 %v12482_v3  ;;  %v7849_v51 = vrot.slane %v7848_v62, 2 }
 0x9f4   :  { %v7802_v7 = vrot.slane %v7801_v38, 1  ;;  %v7816_v19 = vrot.slane %v7815_v36, 1  ;;  %v7809_v57 = vrot.slane %v7808_v63, 1  ;;  %v7105_v34 = vpop.f32.mrf.mxu1  ;;  %v7362_v29 = vpop.f32.mrf.mxu0  ;;  %11942 = vmatprep.subr.mxu1 %v12483_v54  ;;  %v7823_v52 = vrot.slane %v7822_v8, 1 }
 0x9f5   :  { %v7829_v53 = vadd.f32 %v7828_v15, %v7827_v1  ;;  %v7843_v28 = vadd.f32 %v7842_v18, %v7841_v61  ;;  %v7836_v35 = vadd.f32 %v7835_v22, %v7834_v37  ;;  %11943 = vmatpush3.msra.mxu1 %v12483_v54  ;;  %v16272_v9 = vsel %vm3962_vm2, %v16191_v42, %v16151_v25 }
 0x9f6   :  { %v7803_v45 = vadd.f32 %v7802_v7, %v7801_v38  ;;  %v7817_v56 = vadd.f32 %v7816_v19, %v7815_v36  ;;  %v16274_v58 = vadd.f32 %v7849_v51, %v7848_v62  ;;  %v16276_v14 = vpop.f32.mrf.mxu1  ;;  %v16278_v60 = vpop.f32.mrf.mxu0  ;;  %11944 = vmatprep.subr.mxu1 %v12484_v16  ;;  %v16283_v41 = vadd.f32 %v7809_v57, %v7808_v63 }
 0x9f7   :  { %v7830_v39 = vrot.slane %v7829_v53, 1  ;;  %v7844_v33 = vrot.slane %v7843_v28, 1  ;;  %v7837_v27 = vrot.slane %v7836_v35, 1  ;;  %11945 = vmatpush3.msra.mxu1 %v12484_v16  ;;  %v16293_v1 = vadd.f32 %v7823_v52, %v7822_v8 }
 0x9f8   :  { %v16287_v25 = vsel %vm3964_vm3, %v7803_v45, %v16183_v24  ;;  %v16291_v42 = vsel %vm3964_vm3, %v7817_v56, %v16186_v47  ;;  %v16296_v37 = vpop.f32.mrf.mxu1  ;;  %v16298_v38 = vpop.f32.mrf.mxu0  ;;  %v7485_v24 = vmul.f32 %v16198_v23, %v14898_v46  ;;  %v7487_v47 = vmul.f32 %v16200_v31, %v14900_v20 }
 0x9f9   :  { %v16300_v36 = vadd.f32 %v7830_v39, %v7829_v53  ;;  %v16302_v63 = vadd.f32 %v7844_v33, %v7843_v28  ;;  %v16304_v62 = vadd.f32 %v7837_v27, %v7836_v35  ;;  %v7486_v3 = vmul.f32 %v16215_v2, %v14902_v43 }
 0x9fa   :  { %v7488_v8 = vmul.f32 %v16217_v10, %v14917_v59  ;;  %v7489_v15 = vmul.f32 %v16229_v40, %v14904_v5  ;;  %v16316_v18 = vpop.f32.mrf.mxu1  ;;  %v16318_v22 = vpop.f32.mrf.mxu0  ;;  %v7491_v7 = vmul.f32 %v16231_v49, %v14911_v30  ;;  %v7490_v23 = vmul.f32 %v16240_v13, %v14913_v50 }
 0x9fb   :  { %v7492_v31 = vmul.f32 %v16242_v0, %v14915_v4  ;;  %v7493_v2 = vmul.f32 %v16247_v11, %v14898_v46  ;;  %v7495_v40 = vmul.f32 %v16249_v55, %v14900_v20  ;;  %v7494_v19 = vmul.f32 %v16254_v17, %v14902_v43 }
 0x9fc   :  { %v7853_v10 = vadd.f32 %v7489_v15, %v7485_v24  ;;  %v7496_v57 = vmul.f32 %v16256_v6, %v14917_v59  ;;  %v7867_v49 = vadd.f32 %v7491_v7, %v7487_v47  ;;  %v7860_v51 = vadd.f32 %v7490_v23, %v7486_v3  ;;  %v16335_v52 = vpop.f32.mrf.mxu1  ;;  %v16337_v0 = vpop.f32.mrf.mxu0 }
 0x9fd   :  { %v7874_v54 = vadd.f32 %v7492_v31, %v7488_v8  ;;  %v7497_v13 = vmul.f32 %v7103_v12, %v14904_v5  ;;  %v7499_v53 = vmul.f32 %v16261_v32, %v14911_v30  ;;  %v7498_v55 = vmul.f32 %v7105_v34, %v14913_v50 }
 0x9fe   :  { %v7854_v11 = vrot.slane %v7853_v10, 4  ;;  %v7500_v17 = vmul.f32 %v7362_v29, %v14915_v4  ;;  %v7868_v28 = vrot.slane %v7867_v49, 4  ;;  %v7861_v35 = vrot.slane %v7860_v51, 4  ;;  %v7121_v3 = vpop.f32.mrf.mxu1  ;;  %v7378_v8 = vpop.f32.mrf.mxu0 }
 0x9ff   :  { %v7875_v6 = vrot.slane %v7874_v54, 4  ;;  %v7881_v45 = vadd.f32 %v7497_v13, %v7493_v2  ;;  %v7895_v16 = vadd.f32 %v7499_v53, %v7495_v40  ;;  %v7888_v39 = vadd.f32 %v7498_v55, %v7494_v19 }
 0xa00   :  { %v7855_v56 = vadd.f32 %v7854_v11, %v7853_v10  ;;  %v7902_v12 = vadd.f32 %v7500_v17, %v7496_v57  ;;  %v7869_v33 = vadd.f32 %v7868_v28, %v7867_v49  ;;  %v7862_v27 = vadd.f32 %v7861_v35, %v7860_v51  ;;  %v7380_v13 = vpop.f32.mrf.mxu0 }
 0xa01   :  { %v7876_v24 = vadd.f32 %v7875_v6, %v7874_v54  ;;  %v7882_v47 = vrot.slane %v7881_v45, 4  ;;  %v7896_v32 = vrot.slane %v7895_v16, 4  ;;  %v7889_v7 = vrot.slane %v7888_v39, 4  ;;  %v7123_v54 = vpop.f32.mrf.mxu1 }
 0xa02   :  { %v7856_v15 = vrot.slane %v7855_v56, 2  ;;  %v7903_v34 = vrot.slane %v7902_v12, 4  ;;  %v7870_v23 = vrot.slane %v7869_v33, 2  ;;  %v7863_v29 = vrot.slane %v7862_v27, 2 }
 0xa03   :  { %v7877_v31 = vrot.slane %v7876_v24, 2  ;;  %v7883_v61 = vadd.f32 %v7882_v47, %v7881_v45  ;;  %v7897_v2 = vadd.f32 %v7896_v32, %v7895_v16  ;;  %v7890_v10 = vadd.f32 %v7889_v7, %v7888_v39  ;;  %v7384_v32 = vpop.f32.mrf.mxu0 }
 0xa04   :  { %v7857_v48 = vadd.f32 %v7856_v15, %v7855_v56  ;;  %v7904_v40 = vadd.f32 %v7903_v34, %v7902_v12  ;;  %v7871_v19 = vadd.f32 %v7870_v23, %v7869_v33  ;;  %v7864_v57 = vadd.f32 %v7863_v29, %v7862_v27  ;;  %v7127_v15 = vpop.f32.mrf.mxu1 }
 0xa05   :  { %v7878_v49 = vadd.f32 %v7877_v31, %v7876_v24  ;;  %v7884_v51 = vrot.slane %v7883_v61, 2  ;;  %v7898_v53 = vrot.slane %v7897_v2, 2  ;;  %v7891_v55 = vrot.slane %v7890_v10, 2 }
 0xa06   :  { %v7858_v11 = vrot.slane %v7857_v48, 1  ;;  %v7905_v17 = vrot.slane %v7904_v40, 2  ;;  %v7872_v28 = vrot.slane %v7871_v19, 1  ;;  %v7865_v35 = vrot.slane %v7864_v57, 1 }
 0xa07   :  { %v7879_v6 = vrot.slane %v7878_v49, 1  ;;  %v7885_v21 = vadd.f32 %v7884_v51, %v7883_v61  ;;  %v17599_v45 = vrot.slane %v16274_v58, 1  ;;  %v7899_v16 = vadd.f32 %v7898_v53, %v7897_v2 }
 0xa08   :  { %v7892_v39 = vadd.f32 %v7891_v55, %v7890_v10  ;;  %v16348_v12 = vadd.f32 %v7905_v17, %v7904_v40  ;;  %v16350_v33 = vadd.f32 %v7858_v11, %v7857_v48  ;;  %v16352_v27 = vadd.f32 %v7872_v28, %v7871_v19 }
 0xa09   :  { %v16346_v56 = vadd.f32 %v17599_v45, %v16274_v58  ;;  %v16354_v24 = vadd.f32 %v7865_v35, %v7864_v57  ;;  %v7886_v47 = vrot.slane %v7885_v21, 1  ;;  %v16356_v7 = vadd.f32 %v7879_v6, %v7878_v49  ;;  %v7129_v57 = vpop.f32.mrf.mxu1  ;;  %v7386_v49 = vpop.f32.mrf.mxu0 }
 0xa0a   :  { %v7900_v61 = vrot.slane %v7899_v16, 1  ;;  %v7893_v34 = vrot.slane %v7892_v39, 1  ;;  %v7907_v58 = vrot.slane %v16348_v12, 1  ;;  %v7501_v29 = vmul.f32 %v16276_v14, %v14898_v46 }
 0xa0b   :  { %v16359_v23 = vadd.f32 %v7886_v47, %v7885_v21  ;;  %v7503_v48 = vmul.f32 %v16278_v60, %v14900_v20  ;;  %v7502_v31 = vmul.f32 %v16296_v37, %v14902_v43  ;;  %v7504_v40 = vmul.f32 %v16298_v38, %v14917_v59 }
 0xa0c   :  { %v16367_v2 = vadd.f32 %v7900_v61, %v7899_v16  ;;  %v16369_v10 = vadd.f32 %v7893_v34, %v7892_v39  ;;  %v7505_v21 = vmul.f32 %v16316_v18, %v14904_v5  ;;  %v7507_v19 = vmul.f32 %v16318_v22, %v14911_v30 }
 0xa0d   :  { %v7506_v14 = vmul.f32 %v16335_v52, %v14913_v50  ;;  %v7508_v60 = vmul.f32 %v16337_v0, %v14915_v4  ;;  %v7509_v37 = vmul.f32 %v7121_v3, %v14898_v46  ;;  %v7511_v11 = vmul.f32 %v7378_v8, %v14900_v20 }
 0xa0e   :  { %v7909_v51 = vadd.f32 %v7505_v21, %v7501_v29  ;;  %v7510_v38 = vmul.f32 %v7123_v54, %v14902_v43  ;;  %v7512_v18 = vmul.f32 %v7380_v13, %v14917_v59  ;;  %v7923_v53 = vadd.f32 %v7507_v19, %v7503_v48 }
 0xa0f   :  { %v7916_v55 = vadd.f32 %v7506_v14, %v7502_v31  ;;  %v7930_v22 = vadd.f32 %v7508_v60, %v7504_v40  ;;  %v7513_v17 = vmul.f32 %v7127_v15, %v14904_v5  ;;  %v7515_v28 = vmul.f32 %v7384_v32, %v14911_v30 }
 0xa10   :  { %v7910_v52 = vrot.slane %v7909_v51, 4  ;;  %v7514_v0 = vmul.f32 %v7129_v57, %v14913_v50  ;;  %v7516_v46 = vmul.f32 %v7386_v49, %v14915_v4  ;;  %v7924_v3 = vrot.slane %v7923_v53, 4 }
 0xa11   :  { %v7917_v35 = vrot.slane %v7916_v55, 4  ;;  %v7931_v6 = vrot.slane %v7930_v22, 4  ;;  %v7937_v20 = vadd.f32 %v7513_v17, %v7509_v37  ;;  %v7951_v43 = vadd.f32 %v7515_v28, %v7511_v11 }
 0xa12   :  { %v7911_v8 = vadd.f32 %v7910_v52, %v7909_v51  ;;  %v7944_v54 = vadd.f32 %v7514_v0, %v7510_v38  ;;  %v7958_v59 = vadd.f32 %v7516_v46, %v7512_v18  ;;  %v7925_v13 = vadd.f32 %v7924_v3, %v7923_v53 }
 0xa13   :  { %v7918_v45 = vadd.f32 %v7917_v35, %v7916_v55  ;;  %v7932_v16 = vadd.f32 %v7931_v6, %v7930_v22  ;;  %v7938_v39 = vrot.slane %v7937_v20, 4  ;;  %v7952_v47 = vrot.slane %v7951_v43, 4 }
 0xa14   :  { %v7912_v5 = vrot.slane %v7911_v8, 2  ;;  %v7945_v15 = vrot.slane %v7944_v54, 4  ;;  %v7959_v30 = vrot.slane %v7958_v59, 4  ;;  %v7926_v32 = vrot.slane %v7925_v13, 2 }
 0xa15   :  { %v7919_v50 = vrot.slane %v7918_v45, 2  ;;  %v7933_v61 = vrot.slane %v7932_v16, 2  ;;  %v7939_v4 = vadd.f32 %v7938_v39, %v7937_v20  ;;  %v7953_v29 = vadd.f32 %v7952_v47, %v7951_v43 }
 0xa16   :  { %v7913_v34 = vadd.f32 %v7912_v5, %v7911_v8  ;;  %v7946_v48 = vadd.f32 %v7945_v15, %v7944_v54  ;;  %v7960_v31 = vadd.f32 %v7959_v30, %v7958_v59  ;;  %v7927_v40 = vadd.f32 %v7926_v32, %v7925_v13  ;;  %v11059_v30 = vld [vmem:[%s17514_s11] ss:$0 sm:$0xff] }
 0xa17   :  { %v7920_v21 = vadd.f32 %v7919_v50, %v7918_v45  ;;  %v7934_v19 = vadd.f32 %v7933_v61, %v7932_v16  ;;  %v7940_v14 = vrot.slane %v7939_v4, 2  ;;  %v7954_v37 = vrot.slane %v7953_v29, 2 }
 0xa18   :  { %v7914_v60 = vrot.slane %v7913_v34, 1  ;;  %v7947_v57 = vrot.slane %v7946_v48, 2  ;;  %v7961_v49 = vrot.slane %v7960_v31, 2  ;;  %v7908_v51 = vadd.f32 %v7907_v58, %v16348_v12 }
 0xa19   :  { %v7921_v11 = vrot.slane %v7920_v21, 1  ;;  %v7935_v38 = vrot.slane %v7934_v19, 1  ;;  %v7941_v18 = vadd.f32 %v7940_v14, %v7939_v4  ;;  %v7928_v53 = vrot.slane %v7927_v40, 1 }
 0xa1a   :  { %v7955_v55 = vadd.f32 %v7954_v37, %v7953_v29  ;;  %v7948_v22 = vadd.f32 %v7947_v57, %v7946_v48  ;;  %v7962_v17 = vadd.f32 %v7961_v49, %v7960_v31  ;;  %v7915_v52 = vadd.f32 %v7914_v60, %v7913_v34  ;;  %v17600_v29 = vld [vmem:[#allocation13_spill] sm:$0xff] }
 0xa1b   :  { %v7942_v28 = vrot.slane %v7941_v18, 1  ;;  %v7922_v0 = vadd.f32 %v7921_v11, %v7920_v21  ;;  %v8072_v46 = vsel %vm3964_vm3, %v16283_v41, %v16203_v44  ;;  %v7936_v12 = vadd.f32 %v7935_v38, %v7934_v19 }
 0xa1c   :  { %v7956_v3 = vrot.slane %v7955_v55, 1  ;;  %v7949_v35 = vrot.slane %v7948_v22, 1  ;;  %v8073_v6 = vsel %vm3966_vm4, %v16304_v62, %v8072_v46  ;;  %v7963_v20 = vrot.slane %v7962_v17, 1 }
 0xa1d   :  { %v8074_v58 = vsel %vm3968_vm5, %v16354_v24, %v8073_v6  ;;  %v8086_v8 = vsel %vm3964_vm3, %v16293_v1, %v16272_v9  ;;  %v7943_v43 = vadd.f32 %v7942_v28, %v7941_v18  ;;  %v8066_v41 = vsel %vm3966_vm4, %v16300_v36, %v16287_v25  ;;  %v12485_v18 = vld [vmem:[#allocation3] ss:$0 sm:$0xff] }
 0xa1e   :  { %v7950_v54 = vadd.f32 %v7949_v35, %v7948_v22  ;;  %v8075_v59 = vsel %vm3970_vm6, %v16369_v10, %v8074_v58  ;;  %v8087_v44 = vsel %vm3966_vm4, %v16346_v56, %v8086_v8  ;;  %v7964_v24 = vadd.f32 %v7963_v20, %v7962_v17  ;;  %v8426_v20 = vld [vmem:[%s17515_s12 + $0xe8] sm:$0xff]  ;;  %v8428_v8 = vld [vmem:[%s17515_s12 + $0xf8] sm:$0xff] }
 0xa1f   :  { %v8076_v62 = vsel %vm3972_vm7, %v7922_v0, %v8075_v59  ;;  %v8088_v13 = vsel %vm3968_vm5, %v16356_v7, %v8087_v44  ;;  %v8067_v9 = vsel %vm3968_vm5, %v16350_v33, %v8066_v41  ;;  %v7929_v1 = vadd.f32 %v7928_v53, %v7927_v40  ;;  %8473 = vmatprep.subr.mxu0 %v8426_v20  ;;  %v8422_v59 = vld [vmem:[%s17515_s12 + $0xc8] sm:$0xff]  ;;  %v8424_v44 = vld [vmem:[%s17515_s12 + $0xd8] sm:$0xff] }
 0xa20   :  { %v8077_v45 = vsel %vm3974_vm8, %v7950_v54, %v8076_v62  ;;  %v8089_v10 = vsel %vm3970_vm6, %v7908_v51, %v8088_v13  ;;  %v8068_v56 = vsel %vm3970_vm6, %v16359_v23, %v8067_v9  ;;  %v7957_v16 = vadd.f32 %v7956_v3, %v7955_v55  ;;  %v17601_v51 = vld [vmem:[#allocation15_spill] sm:$0xff]  ;;  %8550 = vmatprep.subr.mxu1 %v8428_v8  ;;  %v8421_v62 = vld [vmem:[%s17515_s12 + $0xc0] sm:$0xff]  ;;  %v8418_v13 = vld [vmem:[%s17515_s12 + $0xa8] sm:$0xff] }
 0xa21   :  { %8169 = vmatprep.mubr.f32.mxu1 %v8077_v45  ;;  %v8090_v25 = vsel %vm3972_vm7, %v7936_v12, %v8089_v10  ;;  %v8069_v36 = vsel %vm3972_vm7, %v7915_v52, %v8068_v56  ;;  %v8080_v7 = vsel %vm3966_vm4, %v16302_v63, %v16291_v42  ;;  %v8427_v54 = vld [vmem:[%s17515_s12 + $0xf0] sm:$0xff]  ;;  %v8417_v45 = vld [vmem:[%s17515_s12 + $0xa0] sm:$0xff]  ;;  %v12051_v20 = vld [vmem:[%s17517_s14 + $0x18] sm:$0xff]  }
 0xa22   :  { %v8091_v33 = vsel %vm3974_vm8, %v7964_v24, %v8090_v25  ;;  %v8070_v39 = vsel %vm3974_vm8, %v7943_v43, %v8069_v36  ;;  %v8081_v5 = vsel %vm3968_vm5, %v16352_v27, %v8080_v7  ;;  %v8425_v43 = vld [vmem:[%s17515_s12 + $0xe0] sm:$0xff]  ;;  %v8423_v24 = vld [vmem:[%s17515_s12 + $0xd0] sm:$0xff]  ;;  %v8414_v25 = vld [vmem:[%s17515_s12 + $0x88] sm:$0xff] }
 0xa23   :  { %8244 = vmatprep.mubr.f32.mxu0 %v8091_v33  ;;  %8170 = vmatmul.mubr.f32.gmra.mxu1 %v8070_v39  ;;  %v8082_v23 = vsel %vm3970_vm6, %v16367_v2, %v8081_v5  ;;  %v8419_v56 = vld [vmem:[%s17515_s12 + $0xb0] sm:$0xff]  ;;  %v8416_v36 = vld [vmem:[%s17515_s12 + $0x98] sm:$0xff]  ;;  %v8410_v39 = vld [vmem:[%s17515_s12 + $0x68] sm:$0xff] }
 0xa24   :  { %v8083_v47 = vsel %vm3972_vm7, %v7929_v1, %v8082_v23  ;;  %8474 = vmatpush1.msra.mxu0 %v8425_v43  ;;  %v8420_v1 = vld [vmem:[%s17515_s12 + $0xb8] sm:$0xff]  ;;  %v8415_v7 = vld [vmem:[%s17515_s12 + $0x90] sm:$0xff]  ;;  %v8409_v23 = vld [vmem:[%s17515_s12 + $0x60] sm:$0xff] }
 0xa25   :  { %v8084_v15 = vsel %vm3974_vm8, %v7957_v16, %v8083_v47  ;;  %8475 = vmatprep.subr.mxu0 %v8422_v59  ;;  %v8413_v16 = vld [vmem:[%s17515_s12 + $0x80] sm:$0xff]  ;;  %v8412_v5 = vld [vmem:[%s17515_s12 + $0x78] sm:$0xff]  ;;  %v8411_v47 = vld [vmem:[%s17515_s12 + $0x70] sm:$0xff] }
 0xa26   :  { %8245 = vmatmul.mubr.f32.gmra.mxu0 %v8084_v15  ;;  %v8406_v15 = vld [vmem:[%s17515_s12 + $0x48] sm:$0xff]  ;;  %v12052_v8 = vld [vmem:[%s17517_s14 + $0x50] sm:$0xff]  }
 0xa27   :  { %8521 = vmatprep.mubr.f32.mxu0 %v17578_v26  ;;  %8476 = vmatpush1.msra.mxu0 %v8421_v62  ;;  %v12053_v43 = vld [vmem:[%s17517_s14 + $0x10] sm:$0xff]   ;;  %v12055_v59 = vld [vmem:[%s17517_s14 + $0x8] sm:$0xff]   ;;  %v8429_v62 = vld [vmem:[%s17516_s13] sm:$0xf] }
 0xa28   :  { %8477 = vmatprep.subr.mxu0 %v8418_v13 }
 0xa29   :  { %8478 = vmatpush1.msra.mxu0 %v8417_v45 }
 0xa2a   :  { %8479 = vmatprep.subr.mxu0 %v8414_v25 }
 0xa2b   :  { %8480 = vmatpush1.msra.mxu0 %v8413_v16 }
 0xa2c   :  { %8481 = vmatprep.subr.mxu0 %v8410_v39  ;;  %v17606_v39 = vld [vmem:[#allocation7_spill] sm:$0xff] }
 0xa2d   :  { %8482 = vmatpush1.msra.mxu0 %v8409_v23 }
 0xa2e   :  { %8483 = vmatprep.subr.mxu0 %v8406_v15 }
 0xaa7   :  { %v11697_v42 = vpop.f32.mrf.mxu1 }
 0xaa8   :  { %v11735_v63 = vpop.f32.mrf.mxu0 }
 0xaa9   :  { %v11698_v32 = vpop.f32.mrf.mxu1 }
 0xaaa   :  { %v11699_v27 = vadd.f32 %v11698_v32, %v11697_v42  ;;  %v11736_v50 = vpop.f32.mrf.mxu0  ;;  %v8408_v42 = vld [vmem:[%s17515_s12 + $0x58] sm:$0xff]  ;;  %v8402_v32 = vld [vmem:[%s17515_s12 + $0x28] sm:$0xff] }
 0xaab   :  { %v11737_v4 = vadd.f32 %v11736_v50, %v11735_v63  ;;  %v8405_v63 = vld [vmem:[%s17515_s12 + $0x40] sm:$0xff] }
 0xaac   :  { %v8167_v61 = vadd.f32 %v11699_v27, %v11059_v30  ;;  %v8404_v27 = vld [vmem:[%s17515_s12 + $0x38] sm:$0xff]  ;;  %v8401_v50 = vld [vmem:[%s17515_s12 + $0x20] sm:$0xff]  ;;  %8484 = vmatpush1.msra.mxu0 %v8405_v63 }
 0xaad   :  { %8485 = vmatprep.subr.mxu0 %v8402_v32 }
 0xaae   :  { %v8242_v34 = vadd.f32 %v11737_v4, %v8167_v61  ;;  %v8403_v61 = vld [vmem:[%s17515_s12 + $0x30] sm:$0xff]  ;;  %8486 = vmatpush1.msra.mxu0 %v8401_v50  ;;  %v8398_v4 = vld [vmem:[%s17515_s12 + $0x8] sm:$0xff] }
 0xaaf   :  { %8487 = vmatprep.subr.mxu0 %v8398_v4 }
 0xab0   :  { %v8250_v2 = vmax.f32 %v8242_v34, 0.0  ;;  %v8400_v34 = vld [vmem:[%s17515_s12 + $0x18] sm:$0xff] }
 0xab2   :  { %v16434_v48 = vadd.f32 %v8250_v2, %v17600_v29  ;;  %v8397_v2 = vld [vmem:[%s17515_s12] sm:$0xff] }
 0xab3   :  { %8488 = vmatpush1.msra.mxu0 %v8397_v2 }
 0xab4   :  { %11946 = vmatprep.mubr.msk.f32.mxu1 %vm371_vm0, %v16434_v48 }
 0xae3   :  { %v11700_v31 = vpop.f32.mrf.mxu1 }
 0xae5   :  { %v11701_v40 = vpop.f32.mrf.mxu1 }
 0xae6   :  { %v11738_v21 = vpop.f32.mrf.mxu0  ;;  %v11702_v19 = vadd.f32 %v11701_v40, %v11700_v31  ;;  %v8399_v31 = vld [vmem:[%s17515_s12 + $0x10] sm:$0xff]  ;;  %v12042_v40 = vld [vmem:[%s17517_s14 + $0x78] sm:$0xff]  }
 0xae7   :  { %11751 = vmatprep.subr.bf16.mxu0 %v12042_v40 }
 0xae8   :  { %v8172_v14 = vadd.f32 %v11702_v19, %v11059_v30  ;;  %v11739_v60 = vpop.f32.mrf.mxu0  ;;  %v8407_v30 = vld [vmem:[%s17515_s12 + $0x50] sm:$0xff] }
 0xae9   :  { %v11740_v37 = vadd.f32 %v11739_v60, %v11738_v21 }
 0xaeb   :  { %v8247_v57 = vadd.f32 %v11740_v37, %v8172_v14 }
 0xaed   :  { %v8251_v49 = vmax.f32 %v8247_v57, 0.0 }
 0xaef   :  { %v16439_v11 = vadd.f32 %v8251_v49, %v17601_v51 }
 0xaf1   :  { %11947 = vmatmul.mubr.msk.f32.vlgmr.msra.gmra.mxu1 %vm371_vm0, %v16439_v11 }
 0xaf2   :  { %8598 = vmatprep.mubr.f32.mxu1 %v17578_v26  ;;  %8551 = vmatpush1.msra.mxu1 %v8427_v54  ;;  %v12054_v54 = vld [vmem:[%s17517_s14 + $0x48] sm:$0xff]  }
 0xaf3   :  { %8552 = vmatprep.subr.mxu1 %v8424_v44  ;;  %v12056_v44 = vld [vmem:[%s17517_s14 + $0x40] sm:$0xff]  }
 0xaf4   :  { %8553 = vmatpush1.msra.mxu1 %v8423_v24  ;;  %v17604_v24 = vld [vmem:[#allocation9_spill] sm:$0xff] }
 0xaf5   :  { %8554 = vmatprep.subr.mxu1 %v8420_v1  ;;  %v16623_v13 = vrot.slane %v8429_v62, %v17604_v24 }
 0xaf6   :  { %8555 = vmatpush1.msra.mxu1 %v8419_v56 }
 0xaf7   :  { %8556 = vmatprep.subr.mxu1 %v8416_v36 }
 0xaf8   :  { %8557 = vmatpush1.msra.mxu1 %v8415_v7 }
 0xaf9   :  { %8558 = vmatprep.subr.mxu1 %v8412_v5 }
 0xafa   :  { %8559 = vmatpush1.msra.mxu1 %v8411_v47 }
 0xafb   :  { %8560 = vmatprep.subr.mxu1 %v8408_v42  ;;  %v17607_v42 = vld [vmem:[#allocation8_spill] sm:$0xff] }
 0xafc   :  { %8561 = vmatpush1.msra.mxu1 %v8407_v30  ;;  %v8434_v63 = vrot.slane %v8429_v62, %v17607_v42  ;;  %v17608_v30 = vld [vmem:[#allocation10_spill] sm:$0xff] }
 0xafd   :  { %8562 = vmatprep.subr.mxu1 %v8404_v27  ;;  %v8438_v32 = vrot.slane %v8429_v62, %v17608_v30 }
 0xafe   :  { %8563 = vmatpush1.msra.mxu1 %v8403_v61 }
 0xaff   :  { %8564 = vmatprep.subr.mxu1 %v8400_v34 }
 0xb00   :  { %8565 = vmatpush1.msra.mxu1 %v8399_v31 }
 0xbb1   :  { %v11948_v38 = vpop.f32.mrf.mxu1 }
 0xbb2   :  { %v8332_v53 = vadd.f32 %v12485_v18, %v11948_v38 }
 0xbb3   :  { %v8326_v55 = vpop.f32.mrf.mxu1 }
 0xbb4   :  { %v11063_v22 = vmul.f32 -1.442695, %v8332_v53  ;;  %v8327_v17 = vadd.f32 %v12485_v18, %v8326_v55  ;;  %v12043_v55 = vld [vmem:[%s17517_s14 + $0x38] sm:$0xff]  }
 0xbb6   :  { %12258 = vpow2.f32 %v11063_v22  ;;  %v11062_v52 = vmul.f32 -1.442695, %v8327_v17 }
 0xbb8   :  { %12260 = vpow2.f32 %v11062_v52  ;;  %v12044_v52 = vld [vmem:[%s17517_s14 + $0x70] sm:$0xff]  }
 0xbc3   :  { %v12259_v28 = vpop.eup %12258 }
 0xbc4   :  { %v8342_v0 = vadd.f32 1.0, %v12259_v28 }
 0xbc5   :  { %v12261_v46 = vpop.eup %12260 }
 0xbc6   :  { %12262 = vrcp.f32 %v8342_v0  ;;  %v8341_v3 = vadd.f32 1.0, %v12261_v46 }
 0xbc8   :  { %12264 = vrcp.f32 %v8341_v3 }
 0xbd3   :  { %v12263_v35 = vpop.eup %12262 }
 0xbd4   :  { %v8360_v6 = vsub.f32 1.0, %v12263_v35 }
 0xbd5   :  { %v12265_v12 = vpop.eup %12264 }
 0xbd6   :  { %8368 = vperm.xlu1 %11977, %v8360_v6   ;;  %v8359_v58 = vsub.f32 1.0, %v12265_v12  ;;  %v12047_v6 = vld [vmem:[%s17517_s14 + $0x28] sm:$0xff]  }
 0xbd8   :  { %8363 = vperm.xlu0 %11976, %v8359_v58   ;;  %v12050_v58 = vld [vmem:[%s17517_s14 + $0x58] sm:$0xff]  }
 0xbdc   :  { %8349 = vperm.xlu0 %11976, %v12265_v12   ;;  %v12049_v12 = vld [vmem:[%s17517_s14 + $0x20] sm:$0xff]  }
 0xbe0   :  { %8354 = vperm.xlu0 %11976, %v12263_v35   ;;  %v12046_v35 = vld [vmem:[%s17517_s14 + $0x68] sm:$0xff]  }
 0xc51   :  { %v8369_v10 = vpop.permute.xlu1 %8368 }
 0xc52   :  { %v8372_v33 = vmul.f32 %v8369_v10, %v16439_v11 }
 0xc53   :  { %v8364_v41 = vpop.permute.xlu0 %8363 }
 0xc54   :  { %v8371_v9 = vmul.f32 %v8364_v41, %v16434_v48  ;;  %v12057_v41 = vld [vmem:[%s17517_s14] sm:$0xff]  }
 0xc56   :  { %8375 = vrot.lane.b32.xlu1 %v8371_v9, %s12520_s27  ;;  %v17605_v9 = vld [vmem:[#allocation11_spill] sm:$0xff] }
 0xc57   :  { %v8350_v29 = vpop.permute.xlu0 %8349  ;;  %v16626_v1 = vrot.slane %v8429_v62, %v17605_v9 }
 0xc58   :  { %v8357_v21 = vmul.f32 %v8350_v29, %v16434_v48 }
 0xc5a   :  { %8377 = vrot.lane.b32.xlu1 %v8372_v33, %s12520_s27 }
 0xc5b   :  { %v8355_v19 = vpop.permute.xlu0 %8354 }
 0xc5c   :  { %v8358_v37 = vmul.f32 %v8355_v19, %v16439_v11 }
 0xcc8   :  { %v8376_v14 = vpop.permute.xlu1 %8375 }
 0xcc9   :  { %v8381_v60 = vadd.f32 %v8376_v14, %v8357_v21 }
 0xccb   :  { %v8383_v57 = vmax.f32 %v8381_v60, 0.0 }
 0xccc   :  { %v8378_v49 = vpop.permute.xlu1 %8377 }
 0xccd   :  { %v8382_v51 = vadd.f32 %v8378_v49, %v8358_v37  ;;  %8387 = vrot.lane.b32.xlu0 %v8383_v57, %s12521_s26 }
 0xccf   :  { %v8384_v38 = vmax.f32 %v8382_v51, 0.0 }
 0xcd1   :  { %8389 = vrot.lane.b32.xlu1 %v8384_v38, %s12521_s26 }
 0xd3f   :  { %v8388_v18 = vpop.permute.xlu0 %8387 }
 0xd40   :  { %v8393_v53 = vsel %vm4332_vm9, %v8383_v57, %v8388_v18 }
 0xd41   :  { %v16558_v17 = vsel %vm14645_vm10, %v8393_v53, %v16434_v48  ;;  %v12045_v48 = vld [vmem:[%s17517_s14 + $0x30] sm:$0xff]  }
 0xd42   :  { %11064 = vmatmul.mubr.msk.f32.vlgmr.msra.gmra.mxu0 %vm371_vm0, %v16558_v17  ;;  %11066 = vmatmul.mubr.msk.f32.vlgmr.msra.gmra.mxu1 %vm371_vm0, %v16558_v17 }
 0xd43   :  { %v8390_v28 = vpop.permute.xlu1 %8389  ;;  %8527 = vmatprep.mubr.f32.mxu0 %v17578_v26  ;;  %8604 = vmatprep.mubr.f32.mxu1 %v17578_v26 }
 0xd44   :  { %v8394_v0 = vsel %vm4332_vm9, %v8384_v38, %v8390_v28  ;;  %11752 = vmatpush3.bf16.msra.mxu0 %v12043_v55 }
 0xd45   :  { %v16576_v3 = vsel %vm14672_vm11, %v8394_v0, %v16439_v11  ;;  %11753 = vmatprep.subr.bf16.mxu0 %v12044_v52  ;;  %v12048_v11 = vld [vmem:[%s17517_s14 + $0x60] sm:$0xff]  }
 0xd46   :  { %11065 = vmatmul.mubr.msk.f32.gmra.mxu0 %vm371_vm0, %v16576_v3  ;;  %11067 = vmatmul.mubr.msk.f32.gmra.mxu1 %vm371_vm0, %v16576_v3 }
 0xd47   :  { %10029 = vmatprep.mubr.f32.mxu1 %v17578_v26 }
 0xd48   :  { %11754 = vmatpush3.bf16.msra.mxu0 %v12045_v48 }
 0xd49   :  { %11755 = vmatprep.subr.bf16.mxu0 %v12046_v35 }
 0xd4c   :  { %11756 = vmatpush3.bf16.msra.mxu0 %v12047_v6 }
 0xd4d   :  { %11757 = vmatprep.subr.bf16.mxu0 %v12048_v11 }
 0xd50   :  { %11758 = vmatpush3.bf16.msra.mxu0 %v12049_v12 }
 0xd51   :  { %11759 = vmatprep.subr.bf16.mxu0 %v12050_v58 }
 0xd54   :  { %11760 = vmatpush3.bf16.msra.mxu0 %v12051_v20 }
 0xd55   :  { %11761 = vmatprep.subr.bf16.mxu0 %v12052_v8 }
 0xd58   :  { %11762 = vmatpush3.bf16.msra.mxu0 %v12053_v43 }
 0xd59   :  { %11763 = vmatprep.subr.bf16.mxu0 %v12054_v54 }
 0xd5c   :  { %11764 = vmatpush3.bf16.msra.mxu0 %v12055_v59 }
 0xd5d   :  { %11765 = vmatprep.subr.bf16.mxu0 %v12056_v44 }
 0xd60   :  { %11766 = vmatpush3.bf16.msra.mxu0 %v12057_v41 }
 0xe02   :  { %v8523_v45 = vpop.f32.mrf.mxu0  ;;  %v8600_v10 = vpop.f32.mrf.mxu1 }
 0xe03   :  { %v8601_v36 = vadd.f32 %v8600_v10, %v16623_v13  ;;  %v16643_v40 = vadd.f32 %v8523_v45, %v8434_v63 }
 0xe04   :  { %v8525_v56 = vpop.f32.mrf.mxu0  ;;  %v8602_v25 = vpop.f32.mrf.mxu1 }
 0xe05   :  { %v8603_v16 = vadd.f32 %v8602_v25, %v16626_v1  ;;  %v16645_v21 = vadd.f32 %v8525_v56, %v8438_v32 }
 0xe06   :  { %v8529_v33 = vpop.f32.mrf.mxu0 }
 0xe07   :  { %v11068_v7 = vpack.c.bf16 %v8603_v16, %v8601_v36  ;;  %v16637_v4 = vadd.f32 %v8529_v33, %v8434_v63 }
 0xe08   :  { %v8531_v15 = vpop.f32.mrf.mxu0 }
 0xe09   :  { %v8625_v5 = vrot.slane %v11068_v7, %v17606_v39  ;;  %v16639_v34 = vadd.f32 %v8531_v15, %v8438_v32  ;;  %v16653_v49 = vpack.c.bf16 %v16637_v4, %v16643_v40 }
 0xe0b   :  { %v8633_v23 = vcombine.high %v8625_v5, %v8625_v5  ;;  %v8641_v47 = vrot.slane %v8625_v5, %v17606_v39  ;;  %v16657_v51 = vpack.c.bf16 %v16639_v34, %v16645_v21 }
 0xe0d   :  { %v16635_v27 = vrot.slane %v8633_v23, %v17606_v39  ;;  %v8668_v50 = vunpack.i.h.s16 %v8641_v47  ;;  %v11070_v61 = vpack.i.b16 %v8641_v47, %v8641_v47  ;;  %v8663_v20 = vcombine.high %v8641_v47, %v8641_v47 }
 0xe0f   :  { %v8684_v2 = vpack.i.b16 %v8668_v50, %v8668_v50  ;;  %v8702_v29 = vrot.slane %v11070_v61, %v17607_v42  ;;  %v8706_v31 = vrot.slane %v11070_v61, %v17608_v30  ;;  %v11071_v19 = vpack.i.b16 %v16635_v27, %v16635_v27  ;;  %v8606_v61 = vpop.f32.mrf.mxu1 }
 0xe10   :  { %v8670_v38 = vunpack.i.h.s16 %v16635_v27  ;;  %v11072_v36 = vpack.i.b16 %v8663_v20, %v8663_v20  ;;  %v8672_v15 = vunpack.i.h.s16 %v8663_v20 }
 0xe11   :  { %v8710_v14 = vrot.slane %v8684_v2, %v17607_v42  ;;  %v8828_v60 = vpack.i.b16 %v8702_v29, %v8702_v29  ;;  %v8835_v37 = vpack.i.b16 %v8706_v31, %v8706_v31  ;;  %v8714_v57 = vrot.slane %v8684_v2, %v17608_v30 }
 0xe12   :  { %v8722_v28 = vrot.slane %v11071_v19, %v17608_v30  ;;  %v8718_v12 = vrot.slane %v11071_v19, %v17607_v42  ;;  %v8686_v58 = vpack.i.b16 %v8670_v38, %v8670_v38  ;;  %v8738_v47 = vrot.slane %v11072_v36, %v17608_v30  ;;  %v8608_v38 = vpop.f32.mrf.mxu1 }
 0xe13   :  { %v8833_v18 = vrot.slane %v8828_v60, %v17607_v42  ;;  %v8840_v53 = vrot.slane %v8835_v37, %v17607_v42  ;;  %v8849_v55 = vpack.i.b16 %v8714_v57, %v8714_v57  ;;  %v8842_v52 = vpack.i.b16 %v8710_v14, %v8710_v14 }
 0xe14   :  { %v8863_v11 = vpack.i.b16 %v8722_v28, %v8722_v28  ;;  %v8730_v44 = vrot.slane %v8686_v58, %v17608_v30  ;;  %v8856_v45 = vpack.i.b16 %v8718_v12, %v8718_v12  ;;  %v8726_v33 = vrot.slane %v8686_v58, %v17607_v42 }
 0xe15   :  { %v9052_v0 = vadd.bf16 %v8840_v53, %v16657_v51  ;;  %v9051_v48 = vadd.bf16 %v8833_v18, %v16653_v49  ;;  %v8854_v35 = vrot.slane %v8849_v55, %v17607_v42  ;;  %v8847_v6 = vrot.slane %v8842_v52, %v17607_v42 }
 0xe16   :  { %v8868_v59 = vrot.slane %v8863_v11, %v17607_v42  ;;  %v8877_v25 = vpack.i.b16 %v8730_v44, %v8730_v44  ;;  %v8861_v7 = vrot.slane %v8856_v45, %v17607_v42  ;;  %v8870_v50 = vpack.i.b16 %v8726_v33, %v8726_v33 }
 0xe17   :  { %v9084_v8 = vmul.bf16 1045249613, %v9052_v0  ;;  %v9083_v43 = vmul.bf16 1045249613, %v9051_v48  ;;  %v9054_v54 = vadd.bf16 %v8854_v35, %v16657_v51  ;;  %v9053_v9 = vadd.bf16 %v8847_v6, %v16653_v49 }
 0xe18   :  { %v9056_v56 = vadd.bf16 %v8868_v59, %v16657_v51  ;;  %v8882_v23 = vrot.slane %v8877_v25, %v17607_v42  ;;  %v9055_v32 = vadd.bf16 %v8861_v7, %v16653_v49  ;;  %v8891_v31 = vpack.i.b16 %v8738_v47, %v8738_v47 }
 0xe19   :  { %v9116_v41 = vmax.bf16 %v9084_v8, %v9052_v0  ;;  %v9115_v62 = vmax.bf16 %v9083_v43, %v9051_v48  ;;  %v9086_v24 = vmul.bf16 1045249613, %v9054_v54  ;;  %v9085_v16 = vmul.bf16 1045249613, %v9053_v9 }
 0xe1a   :  { %v9088_v5 = vmul.bf16 1045249613, %v9056_v56  ;;  %v9058_v29 = vadd.bf16 %v8882_v23, %v16657_v51  ;;  %v8688_v19 = vpack.i.b16 %v8672_v15, %v8672_v15  ;;  %v9087_v14 = vmul.bf16 1045249613, %v9055_v32 }
 0xe1b   :  { %9307 = vmatprep.mubr.bf16.mxu0 %v9116_v41  ;;  %v9118_v10 = vmax.bf16 %v9086_v24, %v9054_v54  ;;  %v9117_v63 = vmax.bf16 %v9085_v16, %v9053_v9  ;;  %v8875_v60 = vrot.slane %v8870_v50, %v17607_v42  ;;  %v8734_v37 = vrot.slane %v11072_v36, %v17607_v42 }
 0xe1c   :  { %9308 = vmatmul.mubr.bf16.vlgmr.msra.gmra.mxu0 %v9115_v62  ;;  %v9120_v2 = vmax.bf16 %v9088_v5, %v9056_v56  ;;  %v8665_v57 = vcombine.high %v16635_v27, %v16635_v27  ;;  %v9090_v18 = vmul.bf16 1045249613, %v9058_v29  ;;  %v8896_v53 = vrot.slane %v8891_v31, %v17607_v42 }
 0xe1d   :  { %9315 = vmatprep.mubr.bf16.mxu0 %v9118_v10  ;;  %v8746_v55 = vrot.slane %v8688_v19, %v17608_v30  ;;  %v8609_v52 = vadd.f32 %v8608_v38, %v16626_v1  ;;  %v9119_v28 = vmax.bf16 %v9087_v14, %v9055_v32  ;;  %v9057_v0 = vadd.bf16 %v8875_v60, %v16653_v49 }
 0xe1e   :  { %v8884_v48 = vpack.i.b16 %v8734_v37, %v8734_v37  ;;  %v9122_v35 = vmax.bf16 %v9090_v18, %v9058_v29  ;;  %v9060_v6 = vadd.bf16 %v8896_v53, %v16657_v51  ;;  %v11073_v12 = vpack.i.b16 %v8665_v57, %v8665_v57 }
 0xe1f   :  { %v8905_v11 = vpack.i.b16 %v8746_v55, %v8746_v55  ;;  %v8607_v58 = vadd.f32 %v8606_v61, %v16623_v13  ;;  %v9089_v20 = vmul.bf16 1045249613, %v9057_v0  ;;  %v8742_v43 = vrot.slane %v8688_v19, %v17607_v42 }
 0xe20   :  { %v8889_v8 = vrot.slane %v8884_v48, %v17607_v42  ;;  %v9092_v1 = vmul.bf16 1045249613, %v9060_v6  ;;  %v8754_v59 = vrot.slane %v11073_v12, %v17608_v30  ;;  %v8674_v44 = vunpack.i.h.s16 %v8665_v57 }
 0xe21   :  { %v11069_v27 = vpack.c.bf16 %v8609_v52, %v8607_v58  ;;  %v8910_v54 = vrot.slane %v8905_v11, %v17607_v42  ;;  %v9121_v62 = vmax.bf16 %v9089_v20, %v9057_v0  ;;  %v8898_v13 = vpack.i.b16 %v8742_v43, %v8742_v43 }
 0xe22   :  { %v9059_v24 = vadd.bf16 %v8889_v8, %v16653_v49  ;;  %v9124_v9 = vmax.bf16 %v9092_v1, %v9060_v6  ;;  %v8919_v10 = vpack.i.b16 %v8754_v59, %v8754_v59  ;;  %v8690_v56 = vpack.i.b16 %v8674_v44, %v8674_v44 }
 0xe23   :  { %v8632_v41 = vrot.slane %v11069_v27, %v17606_v39  ;;  %v9062_v45 = vadd.bf16 %v8910_v54, %v16657_v51  ;;  %v8903_v36 = vrot.slane %v8898_v13, %v17607_v42  ;;  %v8750_v16 = vrot.slane %v11073_v12, %v17607_v42 }
 0xe24   :  { %9316 = vmatmul.mubr.bf16.gmra.mxu0 %v9117_v63  ;;  %v9091_v25 = vmul.bf16 1045249613, %v9059_v24  ;;  %v8924_v5 = vrot.slane %v8919_v10, %v17607_v42  ;;  %v8762_v23 = vrot.slane %v8690_v56, %v17608_v30  ;;  %v8758_v19 = vrot.slane %v8690_v56, %v17607_v42 }
 0xe25   :  { %9323 = vmatprep.mubr.bf16.mxu0 %v9120_v2  ;;  %v16699_v7 = vrot.slane %v8632_v41, %v17606_v39  ;;  %v9094_v33 = vmul.bf16 1045249613, %v9062_v45  ;;  %v9061_v15 = vadd.bf16 %v8903_v36, %v16653_v49  ;;  %v8912_v63 = vpack.i.b16 %v8750_v16, %v8750_v16 }
 0xe26   :  { %v9123_v47 = vmax.bf16 %v9091_v25, %v9059_v24  ;;  %v9064_v61 = vadd.bf16 %v8924_v5, %v16657_v51  ;;  %v8933_v2 = vpack.i.b16 %v8762_v23, %v8762_v23  ;;  %v8634_v38 = vcombine.high %v8632_v41, %v8632_v41 }
 0xe27   :  { %v11074_v32 = vpack.i.b16 %v16699_v7, %v16699_v7  ;;  %v9126_v50 = vmax.bf16 %v9094_v33, %v9062_v45  ;;  %v9093_v29 = vmul.bf16 1045249613, %v9061_v15  ;;  %v8917_v31 = vrot.slane %v8912_v63, %v17607_v42 }
 0xe28   :  { %v8676_v14 = vunpack.i.h.s16 %v16699_v7  ;;  %v9096_v60 = vmul.bf16 1045249613, %v9064_v61  ;;  %v8938_v37 = vrot.slane %v8933_v2, %v17607_v42  ;;  %v8926_v55 = vpack.i.b16 %v8758_v19, %v8758_v19 }
 0xe29   :  { %v8770_v57 = vrot.slane %v11074_v32, %v17608_v30  ;;  %v9125_v18 = vmax.bf16 %v9093_v29, %v9061_v15  ;;  %v9063_v53 = vadd.bf16 %v8917_v31, %v16653_v49  ;;  %v16717_v12 = vrot.slane %v8634_v38, %v17606_v39 }
 0xe2a   :  { %v8692_v52 = vpack.i.b16 %v8676_v14, %v8676_v14  ;;  %v9066_v0 = vadd.bf16 %v8938_v37, %v16657_v51  ;;  %v8931_v11 = vrot.slane %v8926_v55, %v17607_v42 }
 0xe2b   :  { %v8947_v48 = vpack.i.b16 %v8770_v57, %v8770_v57  ;;  %v9095_v6 = vmul.bf16 1045249613, %v9063_v53  ;;  %v11075_v41 = vpack.i.b16 %v16717_v12, %v16717_v12  ;;  %v8678_v10 = vunpack.i.h.s16 %v16717_v12 }
 0xe2c   :  { %9324 = vmatmul.mubr.bf16.gmra.mxu0 %v9119_v28  ;;  %v9128_v28 = vmax.bf16 %v9096_v60, %v9064_v61  ;;  %v9098_v58 = vmul.bf16 1045249613, %v9066_v0  ;;  %v8778_v20 = vrot.slane %v8692_v52, %v17608_v30  ;;  %v9065_v43 = vadd.bf16 %v8931_v11, %v16653_v49 }
 0xe2d   :  { %9331 = vmatprep.mubr.bf16.mxu0 %v9122_v35  ;;  %v8766_v35 = vrot.slane %v11074_v32, %v17607_v42  ;;  %v8952_v27 = vrot.slane %v8947_v48, %v17607_v42  ;;  %v9127_v8 = vmax.bf16 %v9095_v6, %v9063_v53  ;;  %v8774_v39 = vrot.slane %v8692_v52, %v17607_v42 }
 0xe2e   :  { %v9130_v54 = vmax.bf16 %v9098_v58, %v9066_v0  ;;  %v8961_v44 = vpack.i.b16 %v8778_v20, %v8778_v20  ;;  %v8786_v45 = vrot.slane %v11075_v41, %v17608_v30  ;;  %v8694_v23 = vpack.i.b16 %v8678_v10, %v8678_v10 }
 0xe2f   :  { %v8940_v1 = vpack.i.b16 %v8766_v35, %v8766_v35  ;;  %v9068_v59 = vadd.bf16 %v8952_v27, %v16657_v51  ;;  %v8954_v36 = vpack.i.b16 %v8774_v39, %v8774_v39  ;;  %v8782_v63 = vrot.slane %v11075_v41, %v17607_v42 }
 0xe30   :  { %v8975_v5 = vpack.i.b16 %v8786_v45, %v8786_v45  ;;  %v8664_v32 = vcombine.high %v16699_v7, %v16699_v7  ;;  %v8794_v2 = vrot.slane %v8694_v23, %v17608_v30  ;;  %v8790_v7 = vrot.slane %v8694_v23, %v17607_v42 }
 0xe31   :  { %v8945_v24 = vrot.slane %v8940_v1, %v17607_v42  ;;  %v9100_v13 = vmul.bf16 1045249613, %v9068_v59  ;;  %v8959_v15 = vrot.slane %v8954_v36, %v17607_v42  ;;  %v8968_v19 = vpack.i.b16 %v8782_v63, %v8782_v63 }
 0xe32   :  { %v8980_v61 = vrot.slane %v8975_v5, %v17607_v42  ;;  %v8989_v37 = vpack.i.b16 %v8794_v2, %v8794_v2  ;;  %v11076_v57 = vpack.i.b16 %v8664_v32, %v8664_v32  ;;  %v8982_v35 = vpack.i.b16 %v8790_v7, %v8790_v7 }
 0xe33   :  { %v9067_v25 = vadd.bf16 %v8945_v24, %v16653_v49  ;;  %v9132_v16 = vmax.bf16 %v9100_v13, %v9068_v59  ;;  %v9069_v31 = vadd.bf16 %v8959_v15, %v16653_v49  ;;  %v8666_v1 = vcombine.high %v16717_v12, %v16717_v12 }
 0xe34   :  { %9332 = vmatmul.mubr.bf16.gmra.mxu0 %v9121_v62  ;;  %v9097_v62 = vmul.bf16 1045249613, %v9065_v43  ;;  %v9072_v60 = vadd.bf16 %v8980_v61, %v16657_v51  ;;  %v8994_v55 = vrot.slane %v8989_v37, %v17607_v42  ;;  %v8802_v52 = vrot.slane %v11076_v57, %v17608_v30 }
 0xe35   :  { %9339 = vmatprep.mubr.bf16.mxu0 %v9124_v9  ;;  %v8966_v9 = vrot.slane %v8961_v44, %v17607_v42  ;;  %v9101_v38 = vmul.bf16 1045249613, %v9069_v31  ;;  %v11077_v45 = vpack.i.b16 %v8666_v1, %v8666_v1 }
 0xe36   :  { %v9129_v56 = vmax.bf16 %v9097_v62, %v9065_v43  ;;  %v9104_v53 = vmul.bf16 1045249613, %v9072_v60  ;;  %v9074_v11 = vadd.bf16 %v8994_v55, %v16657_v51  ;;  %v9003_v58 = vpack.i.b16 %v8802_v52, %v8802_v52 }
 0xe37   :  { %v9070_v33 = vadd.bf16 %v8966_v9, %v16657_v51  ;;  %v9133_v0 = vmax.bf16 %v9101_v38, %v9069_v31  ;;  %v8798_v43 = vrot.slane %v11076_v57, %v17607_v42 }
 0xe38   :  { %v9136_v6 = vmax.bf16 %v9104_v53, %v9072_v60  ;;  %v9008_v59 = vrot.slane %v9003_v58, %v17607_v42 }
 0xe39   :  { %v8996_v62 = vpack.i.b16 %v8798_v43, %v8798_v43 }
 0xe3a   :  { %v9076_v13 = vadd.bf16 %v9008_v59, %v16657_v51 }
 0xe3c   :  { %9340 = vmatmul.mubr.bf16.gmra.mxu0 %v9123_v47  ;;  %v9099_v47 = vmul.bf16 1045249613, %v9067_v25 }
 0xe3d   :  { %9347 = vmatprep.mubr.bf16.mxu0 %v9126_v50  ;;  %v9102_v50 = vmul.bf16 1045249613, %v9070_v33 }
 0xe3e   :  { %v9131_v29 = vmax.bf16 %v9099_v47, %v9067_v25  ;;  %v9108_v25 = vmul.bf16 1045249613, %v9076_v13 }
 0xe3f   :  { %v9134_v14 = vmax.bf16 %v9102_v50, %v9070_v33  ;;  %v8682_v33 = vunpack.i.h.s16 %v8666_v1 }
 0xe40   :  { %v9140_v15 = vmax.bf16 %v9108_v25, %v9076_v13 }
 0xe41   :  { %v8698_v50 = vpack.i.b16 %v8682_v33, %v8682_v33 }
 0xe43   :  { %v8822_v52 = vrot.slane %v8698_v50, %v17607_v42 }
 0xe44   :  { %9348 = vmatmul.mubr.bf16.gmra.mxu0 %v9125_v18  ;;  %v8973_v18 = vrot.slane %v8968_v19, %v17607_v42 }
 0xe45   :  { %9355 = vmatprep.mubr.bf16.mxu0 %v9128_v28  ;;  %v8680_v28 = vunpack.i.h.s16 %v8664_v32 }
 0xe46   :  { %v9071_v48 = vadd.bf16 %v8973_v18, %v16653_v49 }
 0xe47   :  { %v8696_v27 = vpack.i.b16 %v8680_v28, %v8680_v28 }
 0xe48   :  { %v9103_v20 = vmul.bf16 1045249613, %v9071_v48 }
 0xe49   :  { %v8810_v44 = vrot.slane %v8696_v27, %v17608_v30  ;;  %v8806_v12 = vrot.slane %v8696_v27, %v17607_v42 }
 0xe4a   :  { %v9135_v41 = vmax.bf16 %v9103_v20, %v9071_v48 }
 0xe4b   :  { %v9017_v9 = vpack.i.b16 %v8810_v44, %v8810_v44  ;;  %v9010_v47 = vpack.i.b16 %v8806_v12, %v8806_v12  ;;  %v232_v44 = vld [vmem:[%s17521_s18 + $0x8] sm:$0xff] }
 0xe4c   :  { %9356 = vmatmul.mubr.bf16.gmra.mxu0 %v9127_v8  ;;  %v8987_v8 = vrot.slane %v8982_v35, %v17607_v42  ;;  %v9038_v35 = vpack.i.b16 %v8822_v52, %v8822_v52  ;;  %9995 = vmatprep.subr.mxu1 %v232_v44  ;;  %v132_v52 = vld [vmem:[%s17609_s2 + $0x28] sm:$0xff] }
 0xe4d   :  { %9363 = vmatprep.mubr.bf16.mxu0 %v9130_v54  ;;  %v9106_v54 = vmul.bf16 1045249613, %v9074_v11  ;;  %v9022_v36 = vrot.slane %v9017_v9, %v17607_v42  ;;  %v9015_v2 = vrot.slane %v9010_v47, %v17607_v42 }
 0xe4e   :  { %v9073_v39 = vadd.bf16 %v8987_v8, %v16653_v49  ;;  %v9043_v27 = vrot.slane %v9038_v35, %v17607_v42 }
 0xe4f   :  { %v9138_v24 = vmax.bf16 %v9106_v54, %v9074_v11  ;;  %v9078_v63 = vadd.bf16 %v9022_v36, %v16657_v51  ;;  %v9077_v37 = vadd.bf16 %v9015_v2, %v16653_v49 }
 0xe50   :  { %v9105_v10 = vmul.bf16 1045249613, %v9073_v39  ;;  %v9081_v43 = vadd.bf16 %v9043_v27, %v16653_v49 }
 0xe51   :  { %v9110_v31 = vmul.bf16 1045249613, %v9078_v63  ;;  %v9109_v53 = vmul.bf16 1045249613, %v9077_v37 }
 0xe52   :  { %v9137_v5 = vmax.bf16 %v9105_v10, %v9073_v39  ;;  %v9113_v54 = vmul.bf16 1045249613, %v9081_v43 }
 0xe53   :  { %v9142_v38 = vmax.bf16 %v9110_v31, %v9078_v63  ;;  %v9141_v48 = vmax.bf16 %v9109_v53, %v9077_v37 }
 0xe54   :  { %9364 = vmatmul.mubr.bf16.gmra.mxu0 %v9129_v56  ;;  %v9001_v56 = vrot.slane %v8996_v62, %v17607_v42  ;;  %v9145_v59 = vmax.bf16 %v9113_v54, %v9081_v43 }
 0xe55   :  { %9371 = vmatprep.mubr.bf16.mxu0 %v9132_v16  ;;  %v8818_v16 = vrot.slane %v11077_v45, %v17608_v30 }
 0xe56   :  { %v9075_v23 = vadd.bf16 %v9001_v56, %v16653_v49 }
 0xe57   :  { %v9031_v32 = vpack.i.b16 %v8818_v16, %v8818_v16 }
 0xe58   :  { %v9107_v61 = vmul.bf16 1045249613, %v9075_v23 }
 0xe59   :  { %v9036_v19 = vrot.slane %v9031_v32, %v17607_v42 }
 0xe5a   :  { %v9139_v60 = vmax.bf16 %v9107_v61, %v9075_v23 }
 0xe5b   :  { %v9080_v18 = vadd.bf16 %v9036_v19, %v16657_v51 }
 0xe5c   :  { %9372 = vmatmul.mubr.bf16.gmra.mxu0 %v9131_v29  ;;  %v8814_v29 = vrot.slane %v11077_v45, %v17607_v42 }
 0xe5d   :  { %9379 = vmatprep.mubr.bf16.mxu0 %v9134_v14  ;;  %v8826_v14 = vrot.slane %v8698_v50, %v17608_v30  ;;  %v9112_v28 = vmul.bf16 1045249613, %v9080_v18 }
 0xe5e   :  { %v9024_v57 = vpack.i.b16 %v8814_v29, %v8814_v29 }
 0xe5f   :  { %v9045_v7 = vpack.i.b16 %v8826_v14, %v8826_v14 }
 0xe60   :  { %v9029_v55 = vrot.slane %v9024_v57, %v17607_v42 }
 0xe62   :  { %v9079_v30 = vadd.bf16 %v9029_v55, %v16653_v49  ;;  %v127_v49 = vld [vmem:[%s17609_s2] sm:$0xff] }
 0xe64   :  { %9380 = vmatmul.mubr.bf16.gmra.mxu0 %v9133_v0  ;;  %v9050_v0 = vrot.slane %v9045_v7, %v17607_v42  ;;  %v9111_v58 = vmul.bf16 1045249613, %v9079_v30 }
 0xe65   :  { %9387 = vmatprep.mubr.bf16.mxu0 %v9136_v6  ;;  %v9144_v6 = vmax.bf16 %v9112_v28, %v9080_v18  ;;  %v131_v18 = vld [vmem:[%s17609_s2 + $0x20] sm:$0xff] }
 0xe66   :  { %v9082_v11 = vadd.bf16 %v9050_v0, %v16657_v51  ;;  %v9143_v8 = vmax.bf16 %v9111_v58, %v9079_v30  ;;  %v231_v51 = vld [vmem:[%s17521_s18] sm:$0xff] }
 0xe67   :  { %9996 = vmatpush1.msra.mxu1 %v231_v51 }
 0xe68   :  { %v9114_v20 = vmul.bf16 1045249613, %v9082_v11 }
 0xe6a   :  { %v9146_v1 = vmax.bf16 %v9114_v20, %v9082_v11 }
 0xe6c   :  { %9388 = vmatmul.mubr.bf16.gmra.mxu0 %v9135_v41 }
 0xe6d   :  { %9395 = vmatprep.mubr.bf16.mxu0 %v9138_v24  ;;  %v128_v24 = vld [vmem:[%s17609_s2 + $0x8] sm:$0xff] }
 0xe74   :  { %9396 = vmatmul.mubr.bf16.gmra.mxu0 %v9137_v5  ;;  %v129_v5 = vld [vmem:[%s17609_s2 + $0x10] sm:$0xff] }
 0xe75   :  { %9403 = vmatprep.mubr.bf16.mxu0 %v9140_v15  ;;  %v130_v15 = vld [vmem:[%s17609_s2 + $0x18] sm:$0xff] }
 0xe7c   :  { %9404 = vmatmul.mubr.bf16.gmra.mxu0 %v9139_v60 }
 0xe7d   :  { %9411 = vmatprep.mubr.bf16.mxu0 %v9142_v38 }
 0xe84   :  { %9412 = vmatmul.mubr.bf16.gmra.mxu0 %v9141_v48 }
 0xe85   :  { %9419 = vmatprep.mubr.bf16.mxu0 %v9144_v6 }
 0xe8c   :  { %9420 = vmatmul.mubr.bf16.gmra.mxu0 %v9143_v8 }
 0xe8d   :  { %9427 = vmatprep.mubr.bf16.mxu0 %v9146_v1 }
 0xe94   :  { %9428 = vmatmul.mubr.bf16.gmra.mxu0 %v9145_v59 }
 0xedc   :  { %v11767_v42 = vpop.f32.mrf.mxu0 }
 0xede   :  { %v11768_v41 = vpop.f32.mrf.mxu0 }
 0xedf   :  { %v11769_v39 = vadd.f32 %v11768_v41, %v11767_v42  ;;  %v133_v41 = vld [vmem:[%s17609_s2 + $0x30] sm:$0xff] }
 0xee0   :  { %v11770_v62 = vpop.f32.mrf.mxu0 }
 0xee1   :  { %v9310_v9 = vadd.f32 %v11769_v39, %v127_v49 }
 0xee2   :  { %v11771_v13 = vpop.f32.mrf.mxu0 }
 0xee3   :  { %v11772_v45 = vadd.f32 %v11771_v13, %v11770_v62  ;;  %v9437_v25 = vsel %vm9436_vm12, %v9310_v9, -inf }
 0xee4   :  { %v11773_v10 = vpop.f32.mrf.mxu0 }
 0xee5   :  { %v9313_v56 = vadd.f32 %v11772_v45, %v128_v24  ;;  %v134_v24 = vld [vmem:[%s17609_s2 + $0x38] sm:$0xff] }
 0xee6   :  { %v11774_v12 = vpop.f32.mrf.mxu0 }
 0xee7   :  { %v9438_v36 = vsel %vm9436_vm12, %v9313_v56, -inf  ;;  %v11775_v16 = vadd.f32 %v11774_v12, %v11773_v10 }
 0xee8   :  { %v9439_v33 = vmax.f32 %v9437_v25, %v9438_v36  ;;  %v11776_v23 = vpop.f32.mrf.mxu0 }
 0xee9   :  { %v9318_v32 = vadd.f32 %v11775_v16, %v129_v5 }
 0xeea   :  { %v9440_v47 = vrot.slane %v9439_v33, 4  ;;  %v11777_v63 = vpop.f32.mrf.mxu0 }
 0xeeb   :  { %v11778_v50 = vadd.f32 %v11777_v63, %v11776_v23  ;;  %v9446_v14 = vsel %vm9436_vm12, %v9318_v32, -inf }
 0xeec   :  { %v9441_v61 = vmax.f32 %v9439_v33, %v9440_v47  ;;  %v11779_v2 = vpop.f32.mrf.mxu0 }
 0xeed   :  { %v9321_v29 = vadd.f32 %v11778_v50, %v130_v15 }
 0xeee   :  { %v9442_v31 = vrot.slane %v9441_v61, 2  ;;  %v11780_v19 = vpop.f32.mrf.mxu0 }
 0xeef   :  { %v9447_v60 = vsel %vm9436_vm12, %v9321_v29, -inf  ;;  %v11781_v37 = vadd.f32 %v11780_v19, %v11779_v2 }
 0xef0   :  { %v9443_v57 = vmax.f32 %v9441_v61, %v9442_v31  ;;  %v9448_v38 = vmax.f32 %v9446_v14, %v9447_v60  ;;  %v11782_v7 = vpop.f32.mrf.mxu0  ;;  %v135_v31 = vld [vmem:[%s17609_s2 + $0x40] sm:$0xff]  ;;  %v136_v14 = vld [vmem:[%s17609_s2 + $0x48] sm:$0xff] }
 0xef1   :  { %v16801_v0 = vadd.f32 %v11781_v37, %v131_v18 }
 0xef2   :  { %v9444_v53 = vrot.slane %v9443_v57, 1  ;;  %v9449_v55 = vrot.slane %v9448_v38, 4  ;;  %v11783_v28 = vpop.f32.mrf.mxu0 }
 0xef3   :  { %v11784_v48 = vadd.f32 %v11783_v28, %v11782_v7  ;;  %v9455_v43 = vsel %vm9436_vm12, %v16801_v0, -inf }
 0xef4   :  { %v9445_v30 = vmax.f32 %v9443_v57, %v9444_v53  ;;  %v9450_v35 = vmax.f32 %v9448_v38, %v9449_v55  ;;  %v11785_v6 = vpop.f32.mrf.mxu0 }
 0xef5   :  { %v9329_v11 = vadd.f32 %v11784_v48, %v132_v52 }
 0xef6   :  { %v9581_v58 = vsub.f32 %v9310_v9, %v9445_v30  ;;  %v9582_v27 = vsub.f32 %v9313_v56, %v9445_v30  ;;  %v9451_v20 = vrot.slane %v9450_v35, 2  ;;  %v11786_v8 = vpop.f32.mrf.mxu0 }
 0xef7   :  { %v9456_v1 = vsel %vm9436_vm12, %v9329_v11, -inf  ;;  %v11787_v54 = vadd.f32 %v11786_v8, %v11785_v6 }
 0xef8   :  { %v9613_v59 = vmul.f32 1.442695, %v9581_v58  ;;  %v9615_v44 = vmul.f32 1.442695, %v9582_v27  ;;  %v9452_v51 = vmax.f32 %v9450_v35, %v9451_v20  ;;  %v9457_v42 = vmax.f32 %v9455_v43, %v9456_v1  ;;  %v11788_v39 = vpop.f32.mrf.mxu0 }
 0xef9   :  { %v16812_v9 = vadd.f32 %v11787_v54, %v133_v41 }
 0xefa   :  { %12266 = vpow2.f32 %v9613_v59  ;;  %v9453_v49 = vrot.slane %v9452_v51, 1  ;;  %v9458_v62 = vrot.slane %v9457_v42, 4  ;;  %v11789_v13 = vpop.f32.mrf.mxu0 }
 0xefb   :  { %12268 = vpow2.f32 %v9615_v44  ;;  %v11790_v45 = vadd.f32 %v11789_v13, %v11788_v39  ;;  %v9464_v23 = vsel %vm9436_vm12, %v16812_v9, -inf }
 0xefc   :  { %v9454_v10 = vmax.f32 %v9452_v51, %v9453_v49  ;;  %v9459_v56 = vmax.f32 %v9457_v42, %v9458_v62  ;;  %v11791_v12 = vpop.f32.mrf.mxu0  ;;  %v138_v42 = vld [vmem:[%s17609_s2 + $0x58] sm:$0xff] }
 0xefd   :  { %v16814_v25 = vadd.f32 %v11790_v45, %v134_v24 }
 0xefe   :  { %v9583_v36 = vsub.f32 %v9318_v32, %v9454_v10  ;;  %v9584_v16 = vsub.f32 %v9321_v29, %v9454_v10  ;;  %v9460_v33 = vrot.slane %v9459_v56, 2  ;;  %v11792_v5 = vpop.f32.mrf.mxu0 }
 0xeff   :  { %v9465_v47 = vsel %vm9436_vm12, %v16814_v25, -inf  ;;  %v11793_v15 = vadd.f32 %v11792_v5, %v11791_v12 }
 0xf00   :  { %v9617_v63 = vmul.f32 1.442695, %v9583_v36  ;;  %v9619_v50 = vmul.f32 1.442695, %v9584_v16  ;;  %v9461_v61 = vmax.f32 %v9459_v56, %v9460_v33  ;;  %v9466_v2 = vmax.f32 %v9464_v23, %v9465_v47  ;;  %v11794_v19 = vpop.f32.mrf.mxu0 }
 0xf01   :  { %v16826_v37 = vadd.f32 %v11793_v15, %v135_v31 }
 0xf02   :  { %12270 = vpow2.f32 %v9617_v63  ;;  %v9462_v32 = vrot.slane %v9461_v61, 1  ;;  %v9467_v29 = vrot.slane %v9466_v2, 4  ;;  %v11795_v60 = vpop.f32.mrf.mxu0  ;;  %v139_v63 = vld [vmem:[%s17609_s2 + $0x60] sm:$0xff] }
 0xf03   :  { %12272 = vpow2.f32 %v9619_v50  ;;  %v11796_v57 = vadd.f32 %v11795_v60, %v11794_v19  ;;  %v9473_v35 = vsel %vm9436_vm12, %v16826_v37, -inf }
 0xf04   :  { %v9463_v38 = vmax.f32 %v9461_v61, %v9462_v32  ;;  %v9468_v18 = vmax.f32 %v9466_v2, %v9467_v29  ;;  %v11797_v7 = vpop.f32.mrf.mxu0 }
 0xf05   :  { %v16828_v53 = vadd.f32 %v11796_v57, %v136_v14 }
 0xf06   :  { %v9585_v55 = vsub.f32 %v16801_v0, %v9463_v38  ;;  %v9586_v52 = vsub.f32 %v9329_v11, %v9463_v38  ;;  %v9469_v28 = vrot.slane %v9468_v18, 2  ;;  %v11798_v48 = vpop.f32.mrf.mxu0  ;;  %v137_v11 = vld [vmem:[%s17609_s2 + $0x50] sm:$0xff] }
 0xf07   :  { %v16831_v30 = vpop.eup %12266  ;;  %v9474_v6 = vsel %vm9436_vm12, %v16828_v53, -inf  ;;  %v11799_v58 = vadd.f32 %v11798_v48, %v11797_v7 }
 0xf08   :  { %v16837_v27 = vpop.eup %12268  ;;  %v9677_v20 = vsel %vm9436_vm12, %v16831_v30, 0.0  ;;  %v9621_v8 = vmul.f32 1.442695, %v9585_v55  ;;  %v9623_v43 = vmul.f32 1.442695, %v9586_v52  ;;  %v9470_v0 = vmax.f32 %v9468_v18, %v9469_v28  ;;  %v11800_v1 = vpop.f32.mrf.mxu0  ;;  %v140_v52 = vld [vmem:[%s17609_s2 + $0x68] sm:$0xff] }
 0xf09   :  { %v9678_v54 = vsel %vm9436_vm12, %v16837_v27, 0.0  ;;  %v9475_v59 = vmax.f32 %v9473_v35, %v9474_v6  ;;  %v16849_v49 = vadd.f32 %v11799_v58, %v137_v11 }
 0xf0a   :  { %v9679_v44 = vadd.f32 %v9678_v54, %v9677_v20  ;;  %12274 = vpow2.f32 %v9621_v8  ;;  %v9471_v51 = vrot.slane %v9470_v0, 1  ;;  %v11801_v41 = vpop.f32.mrf.mxu0 }
 0xf0b   :  { %12276 = vpow2.f32 %v9623_v43  ;;  %v9476_v39 = vrot.slane %v9475_v59, 4  ;;  %v11802_v62 = vadd.f32 %v11801_v41, %v11800_v1  ;;  %v9482_v47 = vsel %vm9436_vm12, %v16849_v49, -inf }
 0xf0c   :  { %v9680_v24 = vrot.slane %v9679_v44, 4  ;;  %v9472_v13 = vmax.f32 %v9470_v0, %v9471_v51  ;;  %v11803_v45 = vpop.f32.mrf.mxu0 }
 0xf0d   :  { %v9477_v10 = vmax.f32 %v9475_v59, %v9476_v39  ;;  %v16851_v56 = vadd.f32 %v11802_v62, %v138_v42  ;;  %v141_v42 = vld [vmem:[%s17609_s2 + $0x70] sm:$0xff] }
 0xf0e   :  { %v9681_v12 = vadd.f32 %v9680_v24, %v9679_v44  ;;  %v9587_v36 = vsub.f32 %v16812_v9, %v9472_v13  ;;  %v9588_v16 = vsub.f32 %v16814_v25, %v9472_v13  ;;  %v11804_v33 = vpop.f32.mrf.mxu0 }
 0xf0f   :  { %v16855_v5 = vpop.eup %12270  ;;  %v9478_v23 = vrot.slane %v9477_v10, 2  ;;  %v9483_v15 = vsel %vm9436_vm12, %v16851_v56, -inf  ;;  %v11805_v50 = vadd.f32 %v11804_v33, %v11803_v45 }
 0xf10   :  { %v16864_v61 = vpop.eup %12272  ;;  %v9682_v9 = vrot.slane %v9681_v12, 2  ;;  %v9686_v25 = vsel %vm9436_vm12, %v16855_v5, 0.0  ;;  %v9625_v2 = vmul.f32 1.442695, %v9587_v36  ;;  %v9627_v31 = vmul.f32 1.442695, %v9588_v16  ;;  %v11806_v19 = vpop.f32.mrf.mxu0 }
 0xf11   :  { %v9687_v32 = vsel %vm9436_vm12, %v16864_v61, 0.0  ;;  %v9479_v29 = vmax.f32 %v9477_v10, %v9478_v23  ;;  %v9484_v14 = vmax.f32 %v9482_v47, %v9483_v15  ;;  %v16870_v38 = vadd.f32 %v11805_v50, %v139_v63  ;;  %v142_v47 = vld [vmem:[%s17609_s2 + $0x78] sm:$0xff] }
 0xf12   :  { %v9683_v60 = vadd.f32 %v9682_v9, %v9681_v12  ;;  %v9688_v57 = vadd.f32 %v9687_v32, %v9686_v25  ;;  %12278 = vpow2.f32 %v9625_v2  ;;  %v11807_v18 = vpop.f32.mrf.mxu0 }
 0xf13   :  { %12280 = vpow2.f32 %v9627_v31  ;;  %v9480_v7 = vrot.slane %v9479_v29, 1  ;;  %v9485_v55 = vrot.slane %v9484_v14, 4  ;;  %v11808_v35 = vadd.f32 %v11807_v18, %v11806_v19 }
 0xf14   :  { %v9684_v28 = vrot.slane %v9683_v60, 1  ;;  %v9689_v48 = vrot.slane %v9688_v57, 4  ;;  %v11809_v6 = vpop.f32.mrf.mxu0  ;;  %v9491_v0 = vsel %vm9436_vm12, %v16870_v38, -inf }
 0xf15   :  { %v9481_v58 = vmax.f32 %v9479_v29, %v9480_v7  ;;  %v9486_v20 = vmax.f32 %v9484_v14, %v9485_v55  ;;  %v16877_v11 = vadd.f32 %v11808_v35, %v140_v52 }
 0xf16   :  { %v9685_v8 = vadd.f32 %v9684_v28, %v9683_v60  ;;  %v9690_v43 = vadd.f32 %v9689_v48, %v9688_v57  ;;  %v11810_v1 = vpop.f32.mrf.mxu0  ;;  %v143_v57 = vld [vmem:[%s17609_s2 + $0x80] sm:$0xff] }
 0xf17   :  { %v16879_v54 = vpop.eup %12274  ;;  %v9589_v59 = vsub.f32 %v16826_v37, %v9481_v58  ;;  %v9590_v44 = vsub.f32 %v16828_v53, %v9481_v58  ;;  %v9487_v51 = vrot.slane %v9486_v20, 2  ;;  %v11811_v41 = vadd.f32 %v11810_v1, %v11809_v6 }
 0xf18   :  { %v16886_v39 = vpop.eup %12276  ;;  %12282 = vrcp.f32 %v9685_v8  ;;  %v9691_v62 = vrot.slane %v9690_v43, 2  ;;  %v9695_v24 = vsel %vm9436_vm12, %v16879_v54, 0.0  ;;  %v9492_v13 = vsel %vm9436_vm12, %v16877_v11, -inf  ;;  %v11812_v45 = vpop.f32.mrf.mxu0 }
 0xf19   :  { %v9696_v37 = vsel %vm9436_vm12, %v16886_v39, 0.0  ;;  %v9629_v53 = vmul.f32 1.442695, %v9589_v59  ;;  %v9631_v10 = vmul.f32 1.442695, %v9590_v44  ;;  %v9488_v12 = vmax.f32 %v9486_v20, %v9487_v51 }
 0xf1a   :  { %v9692_v36 = vadd.f32 %v9691_v62, %v9690_v43  ;;  %v9697_v16 = vadd.f32 %v9696_v37, %v9695_v24  ;;  %v9493_v33 = vmax.f32 %v9491_v0, %v9492_v13  ;;  %v16894_v23 = vadd.f32 %v11811_v41, %v141_v42  ;;  %v11813_v15 = vpop.f32.mrf.mxu0  ;;  %v144_v62 = vld [vmem:[%s17609_s2 + $0x88] sm:$0xff] }
 0xf1b   :  { %12284 = vpow2.f32 %v9629_v53  ;;  %v9489_v63 = vrot.slane %v9488_v12, 1  ;;  %v11814_v50 = vadd.f32 %v11813_v15, %v11812_v45 }
 0xf1c   :  { %v9693_v9 = vrot.slane %v9692_v36, 1  ;;  %v9698_v25 = vrot.slane %v9697_v16, 4  ;;  %12286 = vpow2.f32 %v9631_v10  ;;  %v9494_v2 = vrot.slane %v9493_v33, 4  ;;  %v11815_v31 = vpop.f32.mrf.mxu0 }
 0xf1d   :  { %v9490_v19 = vmax.f32 %v9488_v12, %v9489_v63  ;;  %v16899_v32 = vadd.f32 %v11814_v50, %v142_v47  ;;  %v9500_v60 = vsel %vm9436_vm12, %v16894_v23, -inf }
 0xf1e   :  { %v9699_v29 = vadd.f32 %v9698_v25, %v9697_v16  ;;  %v9495_v14 = vmax.f32 %v9493_v33, %v9494_v2  ;;  %v11816_v18 = vpop.f32.mrf.mxu0  ;;  %v9694_v7 = vadd.f32 %v9693_v9, %v9692_v36 }
 0xf1f   :  { %v16906_v55 = vpop.eup %12278  ;;  %v9591_v52 = vsub.f32 %v16849_v49, %v9490_v19  ;;  %v9592_v28 = vsub.f32 %v16851_v56, %v9490_v19  ;;  %v9501_v48 = vsel %vm9436_vm12, %v16899_v32, -inf  ;;  %v11817_v35 = vadd.f32 %v11816_v18, %v11815_v31 }
 0xf20   :  { %v16912_v6 = vpop.eup %12280  ;;  %v9700_v58 = vrot.slane %v9699_v29, 2  ;;  %v9704_v20 = vsel %vm9436_vm12, %v16906_v55, 0.0  ;;  %v9496_v8 = vrot.slane %v9495_v14, 2  ;;  %v9502_v43 = vmax.f32 %v9500_v60, %v9501_v48  ;;  %v11818_v0 = vpop.f32.mrf.mxu0 }
 0xf21   :  { %v9705_v1 = vsel %vm9436_vm12, %v16912_v6, 0.0  ;;  %v9633_v59 = vmul.f32 1.442695, %v9591_v52  ;;  %v9635_v49 = vmul.f32 1.442695, %v9592_v28  ;;  %v16918_v44 = vadd.f32 %v11817_v35, %v143_v57  ;;  %v145_v28 = vld [vmem:[%s17609_s2 + $0x90] sm:$0xff] }
 0xf22   :  { %v9701_v56 = vadd.f32 %v9700_v58, %v9699_v29  ;;  %v9706_v51 = vadd.f32 %v9705_v1, %v9704_v20  ;;  %v9497_v42 = vmax.f32 %v9495_v14, %v9496_v8  ;;  %v9503_v41 = vrot.slane %v9502_v43, 4  ;;  %v11819_v24 = vpop.f32.mrf.mxu0  ;;  %v146_v1 = vld [vmem:[%s17609_s2 + $0x98] sm:$0xff] }
 0xf23   :  { %12288 = vpow2.f32 %v9633_v59  ;;  %v11820_v13 = vadd.f32 %v11819_v24, %v11818_v0  ;;  %v9509_v63 = vsel %vm9436_vm12, %v16918_v44, -inf }
 0xf24   :  { %v9702_v45 = vrot.slane %v9701_v56, 1  ;;  %v9707_v37 = vrot.slane %v9706_v51, 4  ;;  %12290 = vpow2.f32 %v9635_v49  ;;  %v9498_v53 = vrot.slane %v9497_v42, 1  ;;  %v11821_v10 = vpop.f32.mrf.mxu0 }
 0xf25   :  { %v12283_v12 = vpop.eup %12282  ;;  %v9504_v36 = vmax.f32 %v9502_v43, %v9503_v41  ;;  %v16923_v16 = vadd.f32 %v11820_v13, %v144_v62  ;;  %12292 = vrcp.f32 %v9694_v7 }
 0xf26   :  { %v9822_v33 = vmul.f32 %v12283_v12, %v16831_v30  ;;  %v9708_v47 = vadd.f32 %v9707_v37, %v9706_v51  ;;  %v9499_v15 = vmax.f32 %v9497_v42, %v9498_v53  ;;  %v11822_v50 = vpop.f32.mrf.mxu0  ;;  %v9703_v31 = vadd.f32 %v9702_v45, %v9701_v56 }
 0xf27   :  { %v9505_v9 = vrot.slane %v9504_v36, 2  ;;  %v9510_v25 = vsel %vm9436_vm12, %v16923_v16, -inf  ;;  %v11823_v2 = vadd.f32 %v11822_v50, %v11821_v10 }
 0xf28   :  { %v16930_v19 = vpop.eup %12284  ;;  %v9709_v29 = vrot.slane %v9708_v47, 2  ;;  %v9593_v14 = vsub.f32 %v16870_v38, %v9499_v15  ;;  %v9594_v60 = vsub.f32 %v16877_v11, %v9499_v15  ;;  %v9511_v30 = vmax.f32 %v9509_v63, %v9510_v25  ;;  %11094 = vmatmul.mubr.msk.f32.vlgmr.msra.gmra.mxu1 %vm9436_vm12, %v9822_v33  ;;  %v11824_v57 = vpop.f32.mrf.mxu0 }
 0xf29   :  { %v16935_v18 = vpop.eup %12286  ;;  %v9713_v7 = vsel %vm9436_vm12, %v16930_v19, 0.0  ;;  %v9506_v52 = vmax.f32 %v9504_v36, %v9505_v9  ;;  %10035 = vmatprep.mubr.f32.mxu1 %v17578_v26  ;;  %v9823_v38 = vmul.f32 %v12283_v12, %v16837_v27  ;;  %12294 = vrcp.f32 %v9703_v31 }
 0xf2a   :  { %v9710_v11 = vadd.f32 %v9709_v29, %v9708_v47  ;;  %v9714_v48 = vsel %vm9436_vm12, %v16935_v18, 0.0  ;;  %v9637_v35 = vmul.f32 1.442695, %v9593_v14  ;;  %v9639_v58 = vmul.f32 1.442695, %v9594_v60  ;;  %v11825_v20 = vpop.f32.mrf.mxu0  ;;  %v147_v47 = vld [vmem:[%s17609_s2 + $0xa0] sm:$0xff] }
 0xf2b   :  { %v9715_v8 = vadd.f32 %v9714_v48, %v9713_v7  ;;  %v9507_v43 = vrot.slane %v9506_v52, 1  ;;  %v9512_v0 = vrot.slane %v9511_v30, 4  ;;  %v16949_v49 = vadd.f32 %v11823_v2, %v145_v28 }
 0xf2c   :  { %v9711_v59 = vrot.slane %v9710_v11, 1  ;;  %12296 = vpow2.f32 %v9637_v35  ;;  %v11826_v27 = vadd.f32 %v11825_v20, %v11824_v57  ;;  %11095 = vmatmul.mubr.msk.f32.gmra.mxu1 %vm9436_vm12, %v9823_v38  ;;  %v11827_v56 = vpop.f32.mrf.mxu0 }
 0xf2d   :  { %v9716_v51 = vrot.slane %v9715_v8, 4  ;;  %12298 = vpow2.f32 %v9639_v58  ;;  %v9508_v42 = vmax.f32 %v9506_v52, %v9507_v43  ;;  %v9513_v41 = vmax.f32 %v9511_v30, %v9512_v0  ;;  %10041 = vmatprep.mubr.f32.mxu1 %v17578_v26 }
 0xf2e   :  { %v16953_v62 = vadd.f32 %v11826_v27, %v146_v1  ;;  %v11828_v24 = vpop.f32.mrf.mxu0  ;;  %v9712_v13 = vadd.f32 %v9711_v59, %v9710_v11  ;;  %v9518_v36 = vsel %vm9436_vm12, %v16949_v49, -inf  ;;  %v148_v11 = vld [vmem:[%s17609_s2 + $0xa8] sm:$0xff] }
 0xf2f   :  { %v9717_v45 = vadd.f32 %v9716_v51, %v9715_v8  ;;  %v9595_v37 = vsub.f32 %v16894_v23, %v9508_v42  ;;  %v9596_v53 = vsub.f32 %v16899_v32, %v9508_v42  ;;  %v9514_v10 = vrot.slane %v9513_v41, 2 }
 0xf30   :  { %v16957_v12 = vpop.eup %12288  ;;  %v9519_v33 = vsel %vm9436_vm12, %v16953_v62, -inf  ;;  %v11829_v15 = vadd.f32 %v11828_v24, %v11827_v56  ;;  %v11830_v63 = vpop.f32.mrf.mxu0  ;;  %12300 = vrcp.f32 %v9712_v13 }
 0xf31   :  { %v16966_v50 = vpop.eup %12290  ;;  %v9718_v23 = vrot.slane %v9717_v45, 2  ;;  %v9722_v32 = vsel %vm9436_vm12, %v16957_v12, 0.0  ;;  %v9641_v9 = vmul.f32 1.442695, %v9595_v37  ;;  %v9643_v25 = vmul.f32 1.442695, %v9596_v53 }
 0xf32   :  { %v12293_v2 = vpop.eup %12292  ;;  %v9723_v31 = vsel %vm9436_vm12, %v16966_v50, 0.0  ;;  %v9515_v29 = vmax.f32 %v9513_v41, %v9514_v10  ;;  %v9520_v14 = vmax.f32 %v9518_v36, %v9519_v33  ;;  %v11831_v60 = vpop.f32.mrf.mxu0  ;;  %v16973_v38 = vadd.f32 %v11829_v15, %v147_v47 }
 0xf33   :  { %v9719_v30 = vadd.f32 %v9718_v23, %v9717_v45  ;;  %v9724_v57 = vadd.f32 %v9723_v31, %v9722_v32  ;;  %12302 = vpow2.f32 %v9641_v9  ;;  %v9825_v7 = vmul.f32 %v12293_v2, %v16855_v5  ;;  %v149_v5 = vld [vmem:[%s17609_s2 + $0xb0] sm:$0xff] }
 0xf34   :  { %12304 = vpow2.f32 %v9643_v25  ;;  %v9516_v52 = vrot.slane %v9515_v29, 1  ;;  %v9521_v28 = vrot.slane %v9520_v14, 4  ;;  %v11833_v48 = vpop.f32.mrf.mxu0  ;;  %v11832_v58 = vadd.f32 %v11831_v60, %v11830_v63 }
 0xf35   :  { %v9725_v35 = vrot.slane %v9724_v57, 4  ;;  %11096 = vmatmul.mubr.msk.f32.gmra.mxu1 %vm9436_vm12, %v9825_v7  ;;  %v9720_v8 = vrot.slane %v9719_v30, 1  ;;  %v9826_v56 = vmul.f32 %v12293_v2, %v16864_v61  ;;  %v9527_v13 = vsel %vm9436_vm12, %v16973_v38, -inf }
 0xf36   :  { %v12295_v20 = vpop.eup %12294  ;;  %v9517_v43 = vmax.f32 %v9515_v29, %v9516_v52  ;;  %v9522_v0 = vmax.f32 %v9520_v14, %v9521_v28  ;;  %10047 = vmatprep.mubr.f32.mxu1 %v17578_v26  ;;  %v11834_v1 = vpop.f32.mrf.mxu0  ;;  %v16983_v27 = vadd.f32 %v11832_v58, %v148_v11 }
 0xf37   :  { %v9726_v59 = vadd.f32 %v9725_v35, %v9724_v57  ;;  %v11835_v51 = vadd.f32 %v11834_v1, %v11833_v48  ;;  %v9828_v61 = vmul.f32 %v12295_v20, %v16879_v54  ;;  %v150_v54 = vld [vmem:[%s17609_s2 + $0xb8] sm:$0xff]  ;;  %v9721_v25 = vadd.f32 %v9720_v8, %v9719_v30  ;;  %v151_v1 = vld [vmem:[%s17609_s2 + $0xc0] sm:$0xff] }
 0xf38   :  { %v9597_v42 = vsub.f32 %v16918_v44, %v9517_v43  ;;  %v9598_v41 = vsub.f32 %v16923_v16, %v9517_v43  ;;  %v9523_v24 = vrot.slane %v9522_v0, 2  ;;  %v11836_v45 = vpop.f32.mrf.mxu0  ;;  %v9528_v10 = vsel %vm9436_vm12, %v16983_v27, -inf }
 0xf39   :  { %v16990_v37 = vpop.eup %12296  ;;  %v9727_v53 = vrot.slane %v9726_v59, 2  ;;  %11097 = vmatmul.mubr.msk.f32.gmra.mxu1 %vm9436_vm12, %v9826_v56  ;;  %v16995_v36 = vadd.f32 %v11835_v51, %v149_v5  ;;  %v9529_v9 = vmax.f32 %v9527_v13, %v9528_v10  ;;  %v9829_v7 = vmul.f32 %v12295_v20, %v16886_v39 }
 0xf3a   :  { %v16998_v44 = vpop.eup %12298  ;;  %v9731_v16 = vsel %vm9436_vm12, %v16990_v37, 0.0  ;;  %v9645_v33 = vmul.f32 1.442695, %v9597_v42  ;;  %v9647_v47 = vmul.f32 1.442695, %v9598_v41  ;;  %v9524_v15 = vmax.f32 %v9522_v0, %v9523_v24  ;;  %10053 = vmatprep.mubr.f32.mxu1 %v17578_v26  ;;  %v11837_v63 = vpop.f32.mrf.mxu0 }
 0xf3b   :  { %v9728_v23 = vadd.f32 %v9727_v53, %v9726_v59  ;;  %v9732_v32 = vsel %vm9436_vm12, %v16998_v44, 0.0  ;;  %v11838_v29 = vadd.f32 %v11837_v63, %v11836_v45  ;;  %v9530_v57 = vrot.slane %v9529_v9, 4 }
 0xf3c   :  { %v9733_v2 = vadd.f32 %v9732_v32, %v9731_v16  ;;  %12306 = vpow2.f32 %v9645_v33  ;;  %v9525_v31 = vrot.slane %v9524_v15, 1  ;;  %v11839_v14 = vpop.f32.mrf.mxu0  ;;  %v9536_v11 = vsel %vm9436_vm12, %v16995_v36, -inf }
 0xf3d   :  { %v12301_v60 = vpop.eup %12300  ;;  %12308 = vpow2.f32 %v9647_v47  ;;  %11098 = vmatmul.mubr.msk.f32.gmra.mxu1 %vm9436_vm12, %v9828_v61  ;;  %v17012_v48 = vadd.f32 %v11838_v29, %v150_v54  ;;  %v9729_v35 = vrot.slane %v9728_v23, 1  ;;  %v9531_v58 = vmax.f32 %v9529_v9, %v9530_v57  ;;  %v152_v47 = vld [vmem:[%s17609_s2 + $0xc8] sm:$0xff] }
 0xf3e   :  { %v9734_v52 = vrot.slane %v9733_v2, 4  ;;  %v9526_v28 = vmax.f32 %v9524_v15, %v9525_v31  ;;  %10059 = vmatprep.mubr.f32.mxu1 %v17578_v26  ;;  %v11840_v30 = vpop.f32.mrf.mxu0  ;;  %12310 = vrcp.f32 %v9721_v25 }
 0xf3f   :  { %v11841_v8 = vadd.f32 %v11840_v30, %v11839_v14  ;;  %v9537_v20 = vsel %vm9436_vm12, %v17012_v48, -inf  ;;  %v9532_v42 = vrot.slane %v9531_v58, 2  ;;  %v9730_v32 = vadd.f32 %v9729_v35, %v9728_v23 }
 0xf40   :  { %v17015_v43 = vpop.eup %12302  ;;  %v9735_v0 = vadd.f32 %v9734_v52, %v9733_v2  ;;  %v9599_v5 = vsub.f32 %v16949_v49, %v9526_v28  ;;  %v9600_v39 = vsub.f32 %v16953_v62, %v9526_v28  ;;  %v11842_v59 = vpop.f32.mrf.mxu0  ;;  %v9538_v41 = vmax.f32 %v9536_v11, %v9537_v20 }
 0xf41   :  { %v17024_v56 = vpop.eup %12304  ;;  %v9740_v51 = vsel %vm9436_vm12, %v17015_v43, 0.0  ;;  %11099 = vmatmul.mubr.msk.f32.gmra.mxu1 %vm9436_vm12, %v9829_v7  ;;  %v9831_v49 = vmul.f32 %v12301_v60, %v16906_v55  ;;  %v9533_v61 = vmax.f32 %v9531_v58, %v9532_v42  ;;  %v17033_v33 = vadd.f32 %v11841_v8, %v151_v1 }
 0xf42   :  { %v9736_v62 = vrot.slane %v9735_v0, 2  ;;  %v9741_v24 = vsel %vm9436_vm12, %v17024_v56, 0.0  ;;  %v9649_v13 = vmul.f32 1.442695, %v9599_v5  ;;  %v9651_v45 = vmul.f32 1.442695, %v9600_v39  ;;  %10065 = vmatprep.mubr.f32.mxu1 %v17578_v26  ;;  %v11843_v53 = vpop.f32.mrf.mxu0 }
 0xf43   :  { %v9742_v10 = vadd.f32 %v9741_v24, %v9740_v51  ;;  %v9539_v16 = vrot.slane %v9538_v41, 4  ;;  %v11844_v55 = vadd.f32 %v11843_v53, %v11842_v59  ;;  %v9534_v54 = vrot.slane %v9533_v61, 1 }
 0xf44   :  { %v9737_v15 = vadd.f32 %v9736_v62, %v9735_v0  ;;  %12312 = vpow2.f32 %v9649_v13  ;;  %v11845_v63 = vpop.f32.mrf.mxu0  ;;  %v9832_v52 = vmul.f32 %v12301_v60, %v16912_v6  ;;  %v9545_v23 = vsel %vm9436_vm12, %v17033_v33, -inf  ;;  %v153_v6 = vld [vmem:[%s17609_s2 + $0xd0] sm:$0xff] }
 0xf45   :  { %v9743_v9 = vrot.slane %v9742_v10, 4  ;;  %12314 = vpow2.f32 %v9651_v45  ;;  %v9540_v25 = vmax.f32 %v9538_v41, %v9539_v16  ;;  %11100 = vmatmul.mubr.msk.f32.gmra.mxu1 %vm9436_vm12, %v9831_v49  ;;  %v17039_v31 = vadd.f32 %v11844_v55, %v152_v47  ;;  %v154_v45 = vld [vmem:[%s17609_s2 + $0xd8] sm:$0xff] }
 0xf46   :  { %v9738_v2 = vrot.slane %v9737_v15, 1  ;;  %10071 = vmatprep.mubr.f32.mxu1 %v17578_v26  ;;  %v11846_v29 = vpop.f32.mrf.mxu0  ;;  %12316 = vrcp.f32 %v9730_v32  ;;  %v9535_v57 = vmax.f32 %v9533_v61, %v9534_v54 }
 0xf47   :  { %v9744_v14 = vadd.f32 %v9743_v9, %v9742_v10  ;;  %v9541_v7 = vrot.slane %v9540_v25, 2  ;;  %v9546_v28 = vsel %vm9436_vm12, %v17039_v31, -inf  ;;  %v11847_v11 = vadd.f32 %v11846_v29, %v11845_v63 }
 0xf48   :  { %v11848_v30 = vpop.f32.mrf.mxu0  ;;  %v9739_v35 = vadd.f32 %v9738_v2, %v9737_v15  ;;  %v9601_v0 = vsub.f32 %v16973_v38, %v9535_v57  ;;  %v9602_v5 = vsub.f32 %v16983_v27, %v9535_v57  ;;  %v9547_v1 = vmax.f32 %v9545_v23, %v9546_v28 }
 0xf49   :  { %v17047_v58 = vpop.eup %12306  ;;  %v9745_v8 = vrot.slane %v9744_v14, 2  ;;  %v9542_v39 = vmax.f32 %v9540_v25, %v9541_v7  ;;  %11101 = vmatmul.mubr.msk.f32.gmra.mxu1 %vm9436_vm12, %v9832_v52  ;;  %v17062_v13 = vadd.f32 %v11847_v11, %v153_v6 }
 0xf4a   :  { %v17055_v60 = vpop.eup %12308  ;;  %v9749_v20 = vsel %vm9436_vm12, %v17047_v58, 0.0  ;;  %10077 = vmatprep.mubr.f32.mxu1 %v17578_v26  ;;  %v11849_v59 = vpop.f32.mrf.mxu0  ;;  %12318 = vrcp.f32 %v9739_v35  ;;  %v9653_v51 = vmul.f32 1.442695, %v9601_v0  ;;  %v9655_v42 = vmul.f32 1.442695, %v9602_v5 }
 0xf4b   :  { %v9746_v38 = vadd.f32 %v9745_v8, %v9744_v14  ;;  %v9750_v27 = vsel %vm9436_vm12, %v17055_v60, 0.0  ;;  %v12311_v41 = vpop.eup %12310  ;;  %v9543_v62 = vrot.slane %v9542_v39, 1  ;;  %v9548_v24 = vrot.slane %v9547_v1, 4 }
 0xf4c   :  { %v9751_v49 = vadd.f32 %v9750_v27, %v9749_v20  ;;  %v11851_v53 = vpop.f32.mrf.mxu0  ;;  %12320 = vpow2.f32 %v9653_v51  ;;  %v9834_v61 = vmul.f32 %v12311_v41, %v16930_v19  ;;  %v11850_v16 = vadd.f32 %v11849_v59, %v11848_v30  ;;  %v155_v19 = vld [vmem:[%s17609_s2 + $0xe0] sm:$0xff] }
 0xf4d   :  { %v9747_v10 = vrot.slane %v9746_v38, 1  ;;  %12322 = vpow2.f32 %v9655_v42  ;;  %v9544_v15 = vmax.f32 %v9542_v39, %v9543_v62  ;;  %v9549_v55 = vmax.f32 %v9547_v1, %v9548_v24 }
 0xf4e   :  { %v9752_v47 = vrot.slane %v9751_v49, 4  ;;  %v11852_v63 = vpop.f32.mrf.mxu0  ;;  %11102 = vmatmul.mubr.msk.f32.gmra.mxu1 %vm9436_vm12, %v9834_v61  ;;  %v17069_v32 = vadd.f32 %v11850_v16, %v154_v45  ;;  %v9554_v52 = vsel %vm9436_vm12, %v17062_v13, -inf }
 0xf4f   :  { %v11853_v9 = vadd.f32 %v11852_v63, %v11851_v53  ;;  %v9748_v54 = vadd.f32 %v9747_v10, %v9746_v38  ;;  %v9603_v2 = vsub.f32 %v16995_v36, %v9544_v15  ;;  %v9604_v29 = vsub.f32 %v17012_v48, %v9544_v15  ;;  %10083 = vmatprep.mubr.f32.mxu1 %v17578_v26  ;;  %v156_v38 = vld [vmem:[%s17609_s2 + $0xe8] sm:$0xff] }
 0xf50   :  { %v9753_v25 = vadd.f32 %v9752_v47, %v9751_v49  ;;  %v9550_v14 = vrot.slane %v9549_v55, 2  ;;  %v11854_v57 = vpop.f32.mrf.mxu0  ;;  %v9555_v23 = vsel %vm9436_vm12, %v17069_v32, -inf  ;;  %v9835_v36 = vmul.f32 %v12311_v41, %v16935_v18 }
 0xf51   :  { %v17077_v7 = vpop.eup %12312  ;;  %12324 = vrcp.f32 %v9748_v54  ;;  %v9657_v30 = vmul.f32 1.442695, %v9603_v2  ;;  %v9659_v35 = vmul.f32 1.442695, %v9604_v29  ;;  %v9556_v6 = vmax.f32 %v9554_v52, %v9555_v23  ;;  %v157_v29 = vld [vmem:[%s17609_s2 + $0xf0] sm:$0xff] }
 0xf52   :  { %v17084_v48 = vpop.eup %12314  ;;  %v9754_v28 = vrot.slane %v9753_v25, 2  ;;  %v9758_v11 = vsel %vm9436_vm12, %v17077_v7, 0.0  ;;  %v11855_v8 = vpop.f32.mrf.mxu0  ;;  %v9551_v39 = vmax.f32 %v9549_v55, %v9550_v14  ;;  %11103 = vmatmul.mubr.msk.f32.gmra.mxu1 %vm9436_vm12, %v9835_v36  ;;  %v17091_v20 = vadd.f32 %v11853_v9, %v155_v19 }
 0xf53   :  { %v12317_v0 = vpop.eup %12316  ;;  %v9759_v5 = vsel %vm9436_vm12, %v17084_v48, 0.0  ;;  %12326 = vpow2.f32 %v9657_v30  ;;  %10089 = vmatprep.mubr.f32.mxu1 %v17578_v26  ;;  %v9557_v42 = vrot.slane %v9556_v6, 4  ;;  %v11856_v41 = vadd.f32 %v11855_v8, %v11854_v57 }
 0xf54   :  { %v9755_v18 = vadd.f32 %v9754_v28, %v9753_v25  ;;  %v9760_v1 = vadd.f32 %v9759_v5, %v9758_v11  ;;  %v9837_v59 = vmul.f32 %v12317_v0, %v16957_v12  ;;  %v11857_v27 = vpop.f32.mrf.mxu0  ;;  %12328 = vpow2.f32 %v9659_v35 }
 0xf55   :  { %v9552_v51 = vrot.slane %v9551_v39, 1  ;;  %v9558_v10 = vmax.f32 %v9556_v6, %v9557_v42  ;;  %v9563_v61 = vsel %vm9436_vm12, %v17091_v20, -inf  ;;  %v17101_v12 = vadd.f32 %v11856_v41, %v156_v38 }
 0xf56   :  { %v9756_v49 = vrot.slane %v9755_v18, 1  ;;  %v9761_v62 = vrot.slane %v9760_v1, 4  ;;  %v11858_v24 = vpop.f32.mrf.mxu0  ;;  %11104 = vmatmul.mubr.msk.f32.gmra.mxu1 %vm9436_vm12, %v9837_v59  ;;  %v9838_v47 = vmul.f32 %v12317_v0, %v16966_v50 }
 0xf57   :  { %v12319_v45 = vpop.eup %12318  ;;  %v9553_v53 = vmax.f32 %v9551_v39, %v9552_v51  ;;  %10095 = vmatprep.mubr.f32.mxu1 %v17578_v26  ;;  %v11859_v15 = vadd.f32 %v11858_v24, %v11857_v27  ;;  %v9559_v25 = vrot.slane %v9558_v10, 2  ;;  %v9564_v2 = vsel %vm9436_vm12, %v17101_v12, -inf }
 0xf58   :  { %v9762_v16 = vadd.f32 %v9761_v62, %v9760_v1  ;;  %v11860_v55 = vpop.f32.mrf.mxu0  ;;  %v9757_v63 = vadd.f32 %v9756_v49, %v9755_v18  ;;  %v9565_v57 = vmax.f32 %v9563_v61, %v9564_v2  ;;  %v9840_v50 = vmul.f32 %v12319_v45, %v16990_v37  ;;  %v158_v37 = vld [vmem:[%s17609_s2 + $0xf8] sm:$0xff] }
 0xf59   :  { %v9605_v9 = vsub.f32 %v17033_v33, %v9553_v53  ;;  %v9606_v54 = vsub.f32 %v17039_v31, %v9553_v53  ;;  %v17112_v14 = vpop.eup %12320  ;;  %v9560_v28 = vmax.f32 %v9558_v10, %v9559_v25  ;;  %v17122_v8 = vadd.f32 %v11859_v15, %v157_v29 }
 0xf5a   :  { %v9763_v19 = vrot.slane %v9762_v16, 2  ;;  %v11861_v52 = vpop.f32.mrf.mxu0  ;;  %12330 = vrcp.f32 %v9757_v63  ;;  %v17115_v23 = vpop.eup %12322  ;;  %v9767_v33 = vsel %vm9436_vm12, %v17112_v14, 0.0  ;;  %11105 = vmatmul.mubr.msk.f32.gmra.mxu1 %vm9436_vm12, %v9838_v47  ;;  %v9566_v35 = vrot.slane %v9565_v57, 4 }
 0xf5b   :  { %v9661_v31 = vmul.f32 1.442695, %v9605_v9  ;;  %v9663_v36 = vmul.f32 1.442695, %v9606_v54  ;;  %v9768_v30 = vsel %vm9436_vm12, %v17115_v23, 0.0  ;;  %10101 = vmatprep.mubr.f32.mxu1 %v17578_v26  ;;  %v9561_v5 = vrot.slane %v9560_v28, 1 }
 0xf5c   :  { %v9764_v11 = vadd.f32 %v9763_v19, %v9762_v16  ;;  %v9769_v0 = vadd.f32 %v9768_v30, %v9767_v33  ;;  %v11862_v39 = vadd.f32 %v11861_v52, %v11860_v55  ;;  %v9567_v1 = vmax.f32 %v9565_v57, %v9566_v35 }
 0xf5d   :  { %12332 = vpow2.f32 %v9661_v31  ;;  %v9562_v38 = vmax.f32 %v9560_v28, %v9561_v5  ;;  %v9841_v51 = vmul.f32 %v12319_v45, %v16998_v44  ;;  %v9572_v41 = vsel %vm9436_vm12, %v17122_v8, -inf }
 0xf5e   :  { %v12325_v6 = vpop.eup %12324  ;;  %v9765_v18 = vrot.slane %v9764_v11, 1  ;;  %12334 = vpow2.f32 %v9663_v36  ;;  %v9770_v59 = vrot.slane %v9769_v0, 4  ;;  %11106 = vmatmul.mubr.msk.f32.gmra.mxu1 %vm9436_vm12, %v9840_v50  ;;  %v17129_v27 = vadd.f32 %v11862_v39, %v158_v37 }
 0xf5f   :  { %v9568_v42 = vrot.slane %v9567_v1, 2  ;;  %10107 = vmatprep.mubr.f32.mxu1 %v17578_v26  ;;  %v9843_v49 = vmul.f32 %v12325_v6, %v17015_v43  ;;  %v9607_v10 = vsub.f32 %v17062_v13, %v9562_v38  ;;  %v9608_v61 = vsub.f32 %v17069_v32, %v9562_v38 }
 0xf60   :  { %v9766_v62 = vadd.f32 %v9765_v18, %v9764_v11  ;;  %v17136_v24 = vpop.eup %12326  ;;  %v9771_v53 = vadd.f32 %v9770_v59, %v9769_v0  ;;  %v9573_v16 = vsel %vm9436_vm12, %v17129_v27, -inf  ;;  %v9844_v28 = vmul.f32 %v12325_v6, %v17024_v56 }
 0xf61   :  { %v17142_v44 = vpop.eup %12328  ;;  %v9776_v45 = vsel %vm9436_vm12, %v17136_v24, 0.0  ;;  %v9569_v47 = vmax.f32 %v9567_v1, %v9568_v42  ;;  %v9574_v15 = vmax.f32 %v9572_v41, %v9573_v16  ;;  %v9665_v63 = vmul.f32 1.442695, %v9607_v10 }
 0xf62   :  { %12336 = vrcp.f32 %v9766_v62  ;;  %v9772_v43 = vrot.slane %v9771_v53, 2  ;;  %v9777_v55 = vsel %vm9436_vm12, %v17142_v44, 0.0  ;;  %v9667_v9 = vmul.f32 1.442695, %v9608_v61  ;;  %11107 = vmatmul.mubr.msk.f32.gmra.mxu1 %vm9436_vm12, %v9841_v51 }
 0xf63   :  { %v9778_v13 = vadd.f32 %v9777_v55, %v9776_v45  ;;  %v9570_v32 = vrot.slane %v9569_v47, 1  ;;  %v9575_v54 = vrot.slane %v9574_v15, 4  ;;  %10113 = vmatprep.mubr.f32.mxu1 %v17578_v26  ;;  %12338 = vpow2.f32 %v9665_v63 }
 0xf64   :  { %v9773_v25 = vadd.f32 %v9772_v43, %v9771_v53  ;;  %12340 = vpow2.f32 %v9667_v9 }
 0xf65   :  { %v9779_v2 = vrot.slane %v9778_v13, 4  ;;  %v9571_v29 = vmax.f32 %v9569_v47, %v9570_v32  ;;  %v9576_v19 = vmax.f32 %v9574_v15, %v9575_v54 }
 0xf66   :  { %v9774_v50 = vrot.slane %v9773_v25, 1  ;;  %11108 = vmatmul.mubr.msk.f32.gmra.mxu1 %vm9436_vm12, %v9843_v49 }
 0xf67   :  { %v12331_v57 = vpop.eup %12330  ;;  %v9780_v52 = vadd.f32 %v9779_v2, %v9778_v13  ;;  %v9609_v33 = vsub.f32 %v17091_v20, %v9571_v29  ;;  %v9610_v31 = vsub.f32 %v17101_v12, %v9571_v29  ;;  %v9577_v36 = vrot.slane %v9576_v19, 2  ;;  %10119 = vmatprep.mubr.f32.mxu1 %v17578_v26 }
 0xf68   :  { %v9775_v11 = vadd.f32 %v9774_v50, %v9773_v25  ;;  %v9846_v20 = vmul.f32 %v12331_v57, %v17047_v58  ;;  %v9847_v62 = vmul.f32 %v12331_v57, %v17055_v60 }
 0xf69   :  { %v9781_v35 = vrot.slane %v9780_v52, 2  ;;  %v9669_v37 = vmul.f32 1.442695, %v9609_v33  ;;  %v9671_v0 = vmul.f32 1.442695, %v9610_v31  ;;  %v9578_v5 = vmax.f32 %v9576_v19, %v9577_v36 }
 0xf6a   :  { %v17155_v30 = vpop.eup %12332  ;;  %11109 = vmatmul.mubr.msk.f32.gmra.mxu1 %vm9436_vm12, %v9844_v28  ;;  %12342 = vrcp.f32 %v9775_v11 }
 0xf6b   :  { %v17157_v39 = vpop.eup %12334  ;;  %v9785_v18 = vsel %vm9436_vm12, %v17155_v30, 0.0  ;;  %v9782_v12 = vadd.f32 %v9781_v35, %v9780_v52  ;;  %12344 = vpow2.f32 %v9669_v37  ;;  %v9579_v6 = vrot.slane %v9578_v5, 1  ;;  %10125 = vmatprep.mubr.f32.mxu1 %v17578_v26 }
 0xf6c   :  { %v9786_v56 = vsel %vm9436_vm12, %v17157_v39, 0.0  ;;  %12346 = vpow2.f32 %v9671_v0 }
 0xf6d   :  { %v9787_v1 = vadd.f32 %v9786_v56, %v9785_v18  ;;  %v9783_v59 = vrot.slane %v9782_v12, 1  ;;  %v9580_v38 = vmax.f32 %v9578_v5, %v9579_v6 }
 0xf6e   :  { %11110 = vmatmul.mubr.msk.f32.gmra.mxu1 %vm9436_vm12, %v9846_v20 }
 0xf6f   :  { %v12337_v51 = vpop.eup %12336  ;;  %v9788_v42 = vrot.slane %v9787_v1, 4  ;;  %v9611_v41 = vsub.f32 %v17122_v8, %v9580_v38  ;;  %v9612_v58 = vsub.f32 %v17129_v27, %v9580_v38  ;;  %10131 = vmatprep.mubr.f32.mxu1 %v17578_v26  ;;  %v9784_v53 = vadd.f32 %v9783_v59, %v9782_v12 }
 0xf70   :  { %v17171_v10 = vpop.eup %12338  ;;  %v9849_v8 = vmul.f32 %v12337_v51, %v17077_v7  ;;  %v9850_v32 = vmul.f32 %v12337_v51, %v17084_v48 }
 0xf71   :  { %v9789_v49 = vadd.f32 %v9788_v42, %v9787_v1  ;;  %v9673_v61 = vmul.f32 1.442695, %v9611_v41  ;;  %v9675_v16 = vmul.f32 1.442695, %v9612_v58  ;;  %v17173_v45 = vpop.eup %12340  ;;  %v9794_v15 = vsel %vm9436_vm12, %v17171_v10, 0.0  ;;  %v248_v42 = vld [vmem:[%s17522_s19 + $0x78] sm:$0xff] }
 0xf72   :  { %11111 = vmatmul.mubr.msk.f32.gmra.mxu1 %vm9436_vm12, %v9847_v62  ;;  %12348 = vrcp.f32 %v9784_v53  ;;  %v9795_v27 = vsel %vm9436_vm12, %v17173_v45, 0.0 }
 0xf73   :  { %v9790_v47 = vrot.slane %v9789_v49, 2  ;;  %12350 = vpow2.f32 %v9673_v61  ;;  %10137 = vmatprep.mubr.f32.mxu1 %v17578_v26  ;;  %v9796_v43 = vadd.f32 %v9795_v27, %v9794_v15  ;;  %v263_v61 = vld [vmem:[%s17522_s19 + $0xf0] sm:$0xff] }
 0xf74   :  { %12352 = vpow2.f32 %v9675_v16 }
 0xf75   :  { %v9791_v60 = vadd.f32 %v9790_v47, %v9789_v49  ;;  %v9797_v63 = vrot.slane %v9796_v43, 4 }
 0xf76   :  { %11112 = vmatmul.mubr.msk.f32.gmra.mxu1 %vm9436_vm12, %v9849_v8  ;;  %v246_v8 = vld [vmem:[%s17522_s19 + $0x68] sm:$0xff] }
 0xf77   :  { %v9792_v55 = vrot.slane %v9791_v60, 1  ;;  %v12343_v9 = vpop.eup %12342  ;;  %10143 = vmatprep.mubr.f32.mxu1 %v17578_v26  ;;  %v9798_v7 = vadd.f32 %v9797_v63, %v9796_v43  ;;  %v261_v43 = vld [vmem:[%s17522_s19 + $0xe0] sm:$0xff] }
 0xf78   :  { %v17184_v13 = vpop.eup %12344  ;;  %v9852_v57 = vmul.f32 %v12343_v9, %v17112_v14  ;;  %v9853_v11 = vmul.f32 %v12343_v9, %v17115_v23  ;;  %v260_v9 = vld [vmem:[%s17522_s19 + $0xd8] sm:$0xff] }
 0xf79   :  { %v9793_v54 = vadd.f32 %v9792_v55, %v9791_v60  ;;  %v17187_v25 = vpop.eup %12346  ;;  %v9803_v2 = vsel %vm9436_vm12, %v17184_v13, 0.0  ;;  %v9799_v29 = vrot.slane %v9798_v7, 2  ;;  %v245_v55 = vld [vmem:[%s17522_s19 + $0x60] sm:$0xff] }
 0xf7a   :  { %v9804_v19 = vsel %vm9436_vm12, %v17187_v25, 0.0  ;;  %11113 = vmatmul.mubr.msk.f32.gmra.mxu1 %vm9436_vm12, %v9850_v32  ;;  %v258_v32 = vld [vmem:[%s17522_s19 + $0xc8] sm:$0xff] }
 0xf7b   :  { %12354 = vrcp.f32 %v9793_v54  ;;  %v9805_v50 = vadd.f32 %v9804_v19, %v9803_v2  ;;  %10149 = vmatprep.mubr.f32.mxu1 %v17578_v26  ;;  %v9800_v52 = vadd.f32 %v9799_v29, %v9798_v7  ;;  %v259_v7 = vld [vmem:[%s17522_s19 + $0xd0] sm:$0xff]  ;;  %v242_v54 = vld [vmem:[%s17522_s19 + $0x48] sm:$0xff]  ;;  %v241_v2 = vld [vmem:[%s17522_s19 + $0x40] sm:$0xff] }
 0xf7c   :  { %v256_v29 = vld [vmem:[%s17522_s19 + $0xb8] sm:$0xff] }
 0xf7d   :  { %v9806_v48 = vrot.slane %v9805_v50, 4  ;;  %v9801_v33 = vrot.slane %v9800_v52, 1  ;;  %v240_v19 = vld [vmem:[%s17522_s19 + $0x38] sm:$0xff] }
 0xf7e   :  { %11114 = vmatmul.mubr.msk.f32.gmra.mxu1 %vm9436_vm12, %v9852_v57  ;;  %v255_v57 = vld [vmem:[%s17522_s19 + $0xb0] sm:$0xff] }
 0xf7f   :  { %v12349_v31 = vpop.eup %12348  ;;  %v9807_v36 = vadd.f32 %v9806_v48, %v9805_v50  ;;  %10155 = vmatprep.mubr.f32.mxu1 %v17578_v26  ;;  %v9802_v35 = vadd.f32 %v9801_v33, %v9800_v52  ;;  %v239_v50 = vld [vmem:[%s17522_s19 + $0x30] sm:$0xff]  ;;  %v254_v52 = vld [vmem:[%s17522_s19 + $0xa8] sm:$0xff]  ;;  %v253_v33 = vld [vmem:[%s17522_s19 + $0xa0] sm:$0xff] }
 0xf80   :  { %v12351_v28 = vpop.eup %12350  ;;  %v9855_v18 = vmul.f32 %v12349_v31, %v17136_v24  ;;  %v9856_v38 = vmul.f32 %v12349_v31, %v17142_v44  ;;  %v264_v24 = vld [vmem:[%s17522_s19 + $0xf8] sm:$0xff]  ;;  %v238_v48 = vld [vmem:[%s17522_s19 + $0x28] sm:$0xff]  ;;  %v237_v31 = vld [vmem:[%s17522_s19 + $0x20] sm:$0xff] }
 0xf81   :  { %v17199_v37 = vpop.eup %12352  ;;  %v9808_v14 = vrot.slane %v9807_v36, 2  ;;  %v9812_v0 = vsel %vm9436_vm12, %v12351_v28, 0.0  ;;  %12356 = vrcp.f32 %v9802_v35  ;;  %11863 = vmatprep.subr.mxu1 %v264_v24  ;;  %v235_v35 = vld [vmem:[%s17522_s19 + $0x10] sm:$0xff] }
 0xf82   :  { %v9813_v5 = vsel %vm9436_vm12, %v17199_v37, 0.0  ;;  %11115 = vmatmul.mubr.msk.f32.gmra.mxu1 %vm9436_vm12, %v9853_v11  ;;  %v251_v11 = vld [vmem:[%s17522_s19 + $0x90] sm:$0xff] }
 0xf83   :  { %v9809_v20 = vadd.f32 %v9808_v14, %v9807_v36  ;;  %v9814_v12 = vadd.f32 %v9813_v5, %v9812_v0  ;;  %10161 = vmatprep.mubr.f32.mxu1 %v17578_v26  ;;  %11864 = vmatpush3.msra.mxu1 %v248_v42  ;;  %v252_v36 = vld [vmem:[%s17522_s19 + $0x98] sm:$0xff]  ;;  %v234_v14 = vld [vmem:[%s17522_s19 + $0x8] sm:$0xff]  ;;  %v249_v0 = vld [vmem:[%s17522_s19 + $0x80] sm:$0xff] }
 0xf84   :  { %11865 = vmatprep.subr.mxu1 %v263_v61  ;;  %v233_v5 = vld [vmem:[%s17522_s19] sm:$0xff] }
 0xf85   :  { %v9810_v56 = vrot.slane %v9809_v20, 1  ;;  %v9815_v23 = vrot.slane %v9814_v12, 4 }
 0xf86   :  { %11116 = vmatmul.mubr.msk.f32.gmra.mxu1 %vm9436_vm12, %v9855_v18  ;;  %v17333_v18 = vld [vmem:[%s17523_s20 + $0x38] sm:$0xff] }
 0xf87   :  { %v9816_v1 = vadd.f32 %v9815_v23, %v9814_v12  ;;  %10167 = vmatprep.mubr.f32.mxu1 %v17578_v26  ;;  %v9811_v59 = vadd.f32 %v9810_v56, %v9809_v20 }
 0xf88   :  { %v12355_v6 = vpop.eup %12354 }
 0xf89   :  { %v9817_v51 = vrot.slane %v9816_v1, 2  ;;  %v9858_v41 = vmul.f32 %v12355_v6, %v17155_v30  ;;  %12358 = vrcp.f32 %v9811_v59  ;;  %v9859_v53 = vmul.f32 %v12355_v6, %v17157_v39  ;;  %v247_v30 = vld [vmem:[%s17522_s19 + $0x70] sm:$0xff] }
 0xf8a   :  { %11117 = vmatmul.mubr.msk.f32.gmra.mxu1 %vm9436_vm12, %v9856_v38 }
 0xf8b   :  { %v9818_v58 = vadd.f32 %v9817_v51, %v9816_v1  ;;  %10173 = vmatprep.mubr.f32.mxu1 %v17578_v26  ;;  %11866 = vmatpush3.msra.mxu1 %v247_v30 }
 0xf8d   :  { %v9819_v44 = vrot.slane %v9818_v58, 1 }
 0xf8e   :  { %11118 = vmatmul.mubr.msk.f32.gmra.mxu1 %vm9436_vm12, %v9858_v41  ;;  %v12357_v49 = vpop.eup %12356 }
 0xf8f   :  { %10179 = vmatprep.mubr.f32.mxu1 %v17578_v26  ;;  %v9820_v62 = vadd.f32 %v9819_v44, %v9818_v58  ;;  %v9861_v16 = vmul.f32 %v12357_v49, %v17171_v10  ;;  %v9862_v47 = vmul.f32 %v12357_v49, %v17173_v45  ;;  %v262_v10 = vld [vmem:[%s17522_s19 + $0xe8] sm:$0xff] }
 0xf90   :  { %11867 = vmatprep.subr.mxu1 %v262_v10 }
 0xf91   :  { %12360 = vrcp.f32 %v9820_v62  ;;  %11868 = vmatpush3.msra.mxu1 %v246_v8 }
 0xf92   :  { %11119 = vmatmul.mubr.msk.f32.gmra.mxu1 %vm9436_vm12, %v9859_v53  ;;  %11869 = vmatprep.subr.mxu1 %v261_v43 }
 0xf93   :  { %10185 = vmatprep.mubr.f32.mxu1 %v17578_v26  ;;  %11870 = vmatpush3.msra.mxu1 %v245_v55 }
 0xf94   :  { %11871 = vmatprep.subr.mxu1 %v260_v9 }
 0xf96   :  { %11120 = vmatmul.mubr.msk.f32.gmra.mxu1 %vm9436_vm12, %v9861_v16  ;;  %v12359_v39 = vpop.eup %12358 }
 0xf97   :  { %10191 = vmatprep.mubr.f32.mxu1 %v17578_v26  ;;  %v9864_v15 = vmul.f32 %v12359_v39, %v17184_v13  ;;  %v9865_v45 = vmul.f32 %v12359_v39, %v17187_v25  ;;  %v244_v13 = vld [vmem:[%s17522_s19 + $0x58] sm:$0xff]  ;;  %v257_v25 = vld [vmem:[%s17522_s19 + $0xc0] sm:$0xff] }
 0xf98   :  { %11872 = vmatpush3.msra.mxu1 %v244_v13 }
 0xf99   :  { %11873 = vmatprep.subr.mxu1 %v259_v7 }
 0xf9a   :  { %11121 = vmatmul.mubr.msk.f32.gmra.mxu1 %vm9436_vm12, %v9862_v47 }
 0xf9b   :  { %10197 = vmatprep.mubr.f32.mxu1 %v17578_v26 }
 0xf9e   :  { %11122 = vmatmul.mubr.msk.f32.gmra.mxu1 %vm9436_vm12, %v9864_v15  ;;  %v12361_v27 = vpop.eup %12360 }
 0xf9f   :  { %10203 = vmatprep.mubr.f32.mxu1 %v17578_v26  ;;  %v9867_v60 = vmul.f32 %v12361_v27, %v12351_v28  ;;  %v9868_v63 = vmul.f32 %v12361_v27, %v17199_v37  ;;  %v236_v28 = vld [vmem:[%s17522_s19 + $0x18] sm:$0xff]  ;;  %v250_v37 = vld [vmem:[%s17522_s19 + $0x88] sm:$0xff] }
 0xfa2   :  { %11123 = vmatmul.mubr.msk.f32.gmra.mxu1 %vm9436_vm12, %v9865_v45 }
 0xfa3   :  { %10209 = vmatprep.mubr.f32.mxu1 %v17578_v26 }
 0xfa6   :  { %11124 = vmatmul.mubr.msk.f32.gmra.mxu1 %vm9436_vm12, %v9867_v60 }
 0xfa7   :  { %10215 = vmatprep.mubr.f32.mxu1 %v17578_v26  ;;  %v243_v26 = vld [vmem:[%s17522_s19 + $0x50] sm:$0xff] }
 0xfa8   :  { %11874 = vmatpush3.msra.mxu1 %v243_v26 }
 0xfa9   :  { %11875 = vmatprep.subr.mxu1 %v258_v32 }
 0xfaa   :  { %11125 = vmatmul.mubr.msk.f32.gmra.mxu1 %vm9436_vm12, %v9868_v63 }
 0xfab   :  { %11876 = vmatpush3.msra.mxu1 %v242_v54 }
 0xfac   :  { %11877 = vmatprep.subr.mxu1 %v257_v25 }
 0xfad   :  { %11878 = vmatpush3.msra.mxu1 %v241_v2 }
 0xfae   :  { %11879 = vmatprep.subr.mxu1 %v256_v29 }
 0xfaf   :  { %11880 = vmatpush3.msra.mxu1 %v240_v19 }
 0xfb0   :  { %11881 = vmatprep.subr.mxu1 %v255_v57 }
 0xfb1   :  { %11882 = vmatpush3.msra.mxu1 %v239_v50 }
 0xfb2   :  { %11883 = vmatprep.subr.mxu1 %v254_v52 }
 0xfb3   :  { %11884 = vmatpush3.msra.mxu1 %v238_v48 }
 0xfb4   :  { %11885 = vmatprep.subr.mxu1 %v253_v33 }
 0xfb5   :  { %11886 = vmatpush3.msra.mxu1 %v237_v31 }
 0xfb6   :  { %11887 = vmatprep.subr.mxu1 %v252_v36 }
 0xfb7   :  { %11888 = vmatpush3.msra.mxu1 %v236_v28 }
 0xfb8   :  { %11889 = vmatprep.subr.mxu1 %v251_v11 }
 0xfb9   :  { %11890 = vmatpush3.msra.mxu1 %v235_v35 }
 0xfba   :  { %11891 = vmatprep.subr.mxu1 %v250_v37 }
 0xfbb   :  { %11892 = vmatpush3.msra.mxu1 %v234_v14 }
 0xfbc   :  { %11893 = vmatprep.subr.mxu1 %v249_v0 }
 0xfbd   :  { %11894 = vmatpush3.msra.mxu1 %v233_v5 }
 0xfbe   :  { %11949 = vmatprep.subr.mxu1 %v17333_v18 }
 0xfe8   :  { %v10031_v20 = vpop.f32.mrf.mxu1 }
 0xfe9   :  { %v10222_v62 = vmul.f32 %v10031_v20, %v16643_v40 }
 0xfea   :  { %v10033_v12 = vpop.f32.mrf.mxu1 }
 0xfeb   :  { %v10223_v15 = vmul.f32 %v10033_v12, %v16645_v21 }
 0xfec   :  { %v10037_v56 = vpop.f32.mrf.mxu1 }
 0xfed   :  { %v10224_v44 = vmul.f32 %v10037_v56, %v16637_v4 }
 0xfee   :  { %v10039_v23 = vpop.f32.mrf.mxu1 }
 0xfef   :  { %v10286_v61 = vadd.f32 %v10224_v44, %v10222_v62  ;;  %v10225_v16 = vmul.f32 %v10039_v23, %v16639_v34 }
 0xff1   :  { %v10287_v39 = vrot.slane %v10286_v61, 4  ;;  %v10293_v8 = vadd.f32 %v10225_v16, %v10223_v15 }
 0xff3   :  { %v10288_v27 = vadd.f32 %v10287_v39, %v10286_v61  ;;  %v10294_v9 = vrot.slane %v10293_v8, 4 }
 0xff5   :  { %v10043_v6 = vpop.f32.mrf.mxu1  ;;  %v10289_v13 = vrot.slane %v10288_v27, 2  ;;  %v10295_v29 = vadd.f32 %v10294_v9, %v10293_v8 }
 0xff6   :  { %v10226_v43 = vmul.f32 %v10043_v6, %v16643_v40 }
 0xff7   :  { %v10045_v1 = vpop.f32.mrf.mxu1  ;;  %v10290_v50 = vadd.f32 %v10289_v13, %v10288_v27 }
 0xff8   :  { %v10227_v7 = vmul.f32 %v10045_v1, %v16645_v21 }
 0xff9   :  { %v10049_v59 = vpop.f32.mrf.mxu1  ;;  %v10291_v16 = vrot.slane %v10290_v50, 1 }
 0xffa   :  { %v10228_v45 = vmul.f32 %v10049_v59, %v16637_v4 }
 0xffb   :  { %v10051_v38 = vpop.f32.mrf.mxu1 }
 0xffc   :  { %v10229_v55 = vmul.f32 %v10051_v38, %v16639_v34  ;;  %v10300_v26 = vadd.f32 %v10228_v45, %v10226_v43 }
 0xffd   :  { %v10055_v51 = vpop.f32.mrf.mxu1 }
 0xffe   :  { %v10307_v25 = vadd.f32 %v10229_v55, %v10227_v7  ;;  %v10301_v52 = vrot.slane %v10300_v26, 4  ;;  %v10230_v36 = vmul.f32 %v10055_v51, %v16643_v40 }
 0xfff   :  { %v10057_v24 = vpop.f32.mrf.mxu1 }
0x1000   :  { %v10231_v19 = vmul.f32 %v10057_v24, %v16645_v21  ;;  %v10308_v37 = vrot.slane %v10307_v25, 4  ;;  %v10302_v61 = vadd.f32 %v10301_v52, %v10300_v26  ;;  %v17366_v52 = vadd.f32 %v10291_v16, %v10290_v50 }
0x1001   :  { %v10061_v42 = vpop.f32.mrf.mxu1 }
0x1002   :  { %v10232_v57 = vmul.f32 %v10061_v42, %v16637_v4  ;;  %v10296_v42 = vrot.slane %v10295_v29, 2  ;;  %v10303_v7 = vrot.slane %v10302_v61, 2 }
0x1003   :  { %v10063_v41 = vpop.f32.mrf.mxu1 }
0x1004   :  { %v10233_v54 = vmul.f32 %v10063_v41, %v16639_v34  ;;  %v10314_v12 = vadd.f32 %v10232_v57, %v10230_v36  ;;  %v17360_v8 = vadd.f32 %v10296_v42, %v10295_v29 }
0x1005   :  { %v10067_v58 = vpop.f32.mrf.mxu1 }
0x1006   :  { %v10321_v28 = vadd.f32 %v10233_v54, %v10231_v19  ;;  %v10234_v14 = vmul.f32 %v10067_v58, %v16643_v40  ;;  %v10315_v39 = vrot.slane %v10314_v12, 4 }
0x1007   :  { %v10069_v49 = vpop.f32.mrf.mxu1 }
0x1008   :  { %v10235_v0 = vmul.f32 %v10069_v49, %v16645_v21  ;;  %v10322_v41 = vrot.slane %v10321_v28, 4 }
0x1009   :  { %v10073_v53 = vpop.f32.mrf.mxu1 }
0x100a   :  { %v10236_v48 = vmul.f32 %v10073_v53, %v16637_v4  ;;  %v10323_v27 = vadd.f32 %v10322_v41, %v10321_v28 }
0x100b   :  { %v10075_v30 = vpop.f32.mrf.mxu1 }
0x100c   :  { %v10237_v33 = vmul.f32 %v10075_v30, %v16639_v34  ;;  %v10328_v1 = vadd.f32 %v10236_v48, %v10234_v14  ;;  %v10309_v30 = vadd.f32 %v10308_v37, %v10307_v25  ;;  %v10316_v25 = vadd.f32 %v10315_v39, %v10314_v12 }
0x100d   :  { %v10324_v48 = vrot.slane %v10323_v27, 2  ;;  %v10298_v14 = vrot.slane %v17360_v8, 1 }
0x100e   :  { %v10079_v47 = vpop.f32.mrf.mxu1  ;;  %v10335_v59 = vadd.f32 %v10237_v33, %v10235_v0  ;;  %v10310_v26 = vrot.slane %v10309_v30, 2  ;;  %v10304_v0 = vadd.f32 %v10303_v7, %v10302_v61  ;;  %v10317_v12 = vrot.slane %v10316_v25, 2 }
0x100f   :  { %v10238_v56 = vmul.f32 %v10079_v47, %v16643_v40  ;;  %v10329_v47 = vrot.slane %v10328_v1, 4 }
0x1010   :  { %v10081_v10 = vpop.f32.mrf.mxu1  ;;  %v10336_v15 = vrot.slane %v10335_v59, 4  ;;  %v10318_v16 = vadd.f32 %v10317_v12, %v10316_v25 }
0x1011   :  { %v10239_v23 = vmul.f32 %v10081_v10, %v16645_v21 }
0x1012   :  { %v10085_v60 = vpop.f32.mrf.mxu1  ;;  %v10337_v29 = vadd.f32 %v10336_v15, %v10335_v59  ;;  %v10319_v25 = vrot.slane %v10318_v16, 1 }
0x1013   :  { %v10240_v11 = vmul.f32 %v10085_v60, %v16637_v4 }
0x1014   :  { %v10087_v63 = vpop.f32.mrf.mxu1 }
0x1015   :  { %v10241_v35 = vmul.f32 %v10087_v63, %v16639_v34  ;;  %v10342_v58 = vadd.f32 %v10240_v11, %v10238_v56 }
0x1016   :  { %v10091_v32 = vpop.f32.mrf.mxu1 }
0x1017   :  { %v10242_v38 = vmul.f32 %v10091_v32, %v16643_v40  ;;  %v10349_v44 = vadd.f32 %v10241_v35, %v10239_v23  ;;  %v10343_v45 = vrot.slane %v10342_v58, 4  ;;  %v10338_v23 = vrot.slane %v10337_v29, 2 }
0x1018   :  { %v10093_v2 = vpop.f32.mrf.mxu1 }
0x1019   :  { %v10243_v51 = vmul.f32 %v10093_v2, %v16645_v21  ;;  %v10350_v60 = vrot.slane %v10349_v44, 4  ;;  %v10330_v2 = vadd.f32 %v10329_v47, %v10328_v1  ;;  %v10344_v36 = vadd.f32 %v10343_v45, %v10342_v58 }
0x101a   :  { %v10097_v31 = vpop.f32.mrf.mxu1  ;;  %v10339_v39 = vadd.f32 %v10338_v23, %v10337_v29 }
0x101b   :  { %v10244_v5 = vmul.f32 %v10097_v31, %v16637_v4  ;;  %v10351_v33 = vadd.f32 %v10350_v60, %v10349_v44  ;;  %v10331_v56 = vrot.slane %v10330_v2, 2  ;;  %v10345_v42 = vrot.slane %v10344_v36, 2 }
0x101c   :  { %v10099_v20 = vpop.f32.mrf.mxu1  ;;  %v10340_v29 = vrot.slane %v10339_v39, 1 }
0x101d   :  { %v10245_v6 = vmul.f32 %v10099_v20, %v16639_v34  ;;  %v10356_v49 = vadd.f32 %v10244_v5, %v10242_v38  ;;  %v10311_v5 = vadd.f32 %v10310_v26, %v10309_v30  ;;  %v10352_v50 = vrot.slane %v10351_v33, 2 }
0x101e   :  { %v10103_v24 = vpop.f32.mrf.mxu1  ;;  %v10305_v30 = vrot.slane %v10304_v0, 1 }
0x101f   :  { %v10363_v62 = vadd.f32 %v10245_v6, %v10243_v51  ;;  %v10357_v43 = vrot.slane %v10356_v49, 4  ;;  %v10246_v63 = vmul.f32 %v10103_v24, %v16643_v40  ;;  %v10325_v24 = vadd.f32 %v10324_v48, %v10323_v27 }
0x1020   :  { %v10105_v53 = vpop.f32.mrf.mxu1  ;;  %v10353_v45 = vadd.f32 %v10352_v50, %v10351_v33  ;;  %v10320_v50 = vadd.f32 %v10319_v25, %v10318_v16 }
0x1021   :  { %v10364_v55 = vrot.slane %v10363_v62, 4  ;;  %v10247_v32 = vmul.f32 %v10105_v53, %v16645_v21  ;;  %v10358_v28 = vadd.f32 %v10357_v43, %v10356_v49  ;;  %v10312_v43 = vrot.slane %v10311_v5, 1 }
0x1022   :  { %v10109_v10 = vpop.f32.mrf.mxu1  ;;  %v10354_v33 = vrot.slane %v10353_v45, 1 }
0x1023   :  { %v10248_v9 = vmul.f32 %v10109_v10, %v16637_v4  ;;  %v10365_v11 = vadd.f32 %v10364_v55, %v10363_v62  ;;  %v10359_v41 = vrot.slane %v10358_v28, 2  ;;  %v10332_v10 = vadd.f32 %v10331_v56, %v10330_v2 }
0x1024   :  { %v10111_v13 = vpop.f32.mrf.mxu1  ;;  %v10326_v55 = vrot.slane %v10325_v24, 1 }
0x1025   :  { %v10249_v54 = vmul.f32 %v10111_v13, %v16639_v34  ;;  %v10370_v19 = vadd.f32 %v10248_v9, %v10246_v63  ;;  %v10366_v58 = vrot.slane %v10365_v11, 2  ;;  %v10346_v63 = vadd.f32 %v10345_v42, %v10344_v36 }
0x1026   :  { %v10115_v57 = vpop.f32.mrf.mxu1  ;;  %v10360_v7 = vadd.f32 %v10359_v41, %v10358_v28  ;;  %v10333_v2 = vrot.slane %v10332_v10, 1  ;;  %v10355_v42 = vadd.f32 %v10354_v33, %v10353_v45 }
0x1027   :  { %v10377_v31 = vadd.f32 %v10249_v54, %v10247_v32  ;;  %v10371_v35 = vrot.slane %v10370_v19, 4  ;;  %v10250_v38 = vmul.f32 %v10115_v57, %v16643_v40  ;;  %v10367_v9 = vadd.f32 %v10366_v58, %v10365_v11 }
0x1028   :  { %v10117_v37 = vpop.f32.mrf.mxu1  ;;  %v10347_v36 = vrot.slane %v10346_v63, 1  ;;  %v10361_v28 = vrot.slane %v10360_v7, 1 }
0x1029   :  { %v10378_v20 = vrot.slane %v10377_v31, 4  ;;  %v10372_v6 = vadd.f32 %v10371_v35, %v10370_v19  ;;  %v10251_v62 = vmul.f32 %v10117_v37, %v16645_v21  ;;  %v10306_v19 = vadd.f32 %v10305_v30, %v10304_v0 }
0x102a   :  { %v10121_v1 = vpop.f32.mrf.mxu1  ;;  %v10313_v37 = vadd.f32 %v10312_v43, %v10311_v5  ;;  %v10368_v11 = vrot.slane %v10367_v9, 1  ;;  %v10299_v0 = vadd.f32 %v10298_v14, %v17360_v8  ;;  %v10348_v58 = vadd.f32 %v10347_v36, %v10346_v63  ;;  %v12491_v36 = vld [vmem:[%s17523_s20 + $0x10] sm:$0xff] }
0x102b   :  { %v10379_v59 = vadd.f32 %v10378_v20, %v10377_v31  ;;  %v10252_v51 = vmul.f32 %v10121_v1, %v16637_v4  ;;  %v10373_v47 = vrot.slane %v10372_v6, 2  ;;  %v10327_v20 = vadd.f32 %v10326_v55, %v10325_v24 }
0x102c   :  { %v10123_v44 = vpop.f32.mrf.mxu1  ;;  %v10556_v24 = vsel %vm3962_vm2, %v10313_v37, %v10299_v0 }
0x102d   :  { %v10380_v49 = vrot.slane %v10379_v59, 2  ;;  %v10384_v53 = vadd.f32 %v10252_v51, %v10250_v38  ;;  %v10253_v61 = vmul.f32 %v10123_v44, %v16639_v34  ;;  %v10374_v57 = vadd.f32 %v10373_v47, %v10372_v6 }
0x102e   :  { %v17373_v15 = vpop.f32.mrf.mxu1  ;;  %v10341_v6 = vadd.f32 %v10340_v29, %v10339_v39  ;;  %v10334_v51 = vadd.f32 %v10333_v2, %v10332_v10  ;;  %v10369_v44 = vadd.f32 %v10368_v11, %v10367_v9  ;;  %v10557_v14 = vsel %vm3964_vm3, %v10327_v20, %v10556_v24  ;;  %v12487_v29 = vld [vmem:[%s17523_s20 + $0x30] sm:$0xff]  ;;  %v12488_v2 = vld [vmem:[%s17523_s20 + $0x28] sm:$0xff] }
0x102f   :  { %v10385_v60 = vrot.slane %v10384_v53, 4  ;;  %v10391_v27 = vadd.f32 %v10253_v61, %v10251_v62  ;;  %v10381_v26 = vadd.f32 %v10380_v49, %v10379_v59  ;;  %v10375_v59 = vrot.slane %v10374_v57, 1 }
0x1030   :  { %v17375_v13 = vpop.f32.mrf.mxu1  ;;  %v10549_v62 = vsel %vm3962_vm2, %v10306_v19, %v17366_v52  ;;  %v10558_v47 = vsel %vm3966_vm4, %v10341_v6, %v10557_v14  ;;  %v10254_v11 = vmul.f32 %v17373_v15, %v16643_v40  ;;  %v12493_v15 = vld [vmem:[%s17523_s20] sm:$0xff] }
0x1031   :  { %v10386_v32 = vadd.f32 %v10385_v60, %v10384_v53  ;;  %v10392_v54 = vrot.slane %v10391_v27, 4  ;;  %v10382_v56 = vrot.slane %v10381_v26, 1  ;;  %v10362_v53 = vadd.f32 %v10361_v28, %v10360_v7 }
0x1032   :  { %v17377_v48 = vpop.f32.mrf.mxu1  ;;  %v10550_v61 = vsel %vm3964_vm3, %v10320_v50, %v10549_v62  ;;  %v10376_v30 = vadd.f32 %v10375_v59, %v10374_v57  ;;  %v10559_v60 = vsel %vm3968_vm5, %v10355_v42, %v10558_v47 }
0x1033   :  { %v10387_v31 = vrot.slane %v10386_v32, 2  ;;  %v10393_v35 = vadd.f32 %v10392_v54, %v10391_v27  ;;  %v10383_v8 = vadd.f32 %v10382_v56, %v10381_v26  ;;  %v10551_v10 = vsel %vm3966_vm4, %v10334_v51, %v10550_v61 }
0x1034   :  { %v17379_v12 = vpop.f32.mrf.mxu1  ;;  %v10552_v27 = vsel %vm3968_vm5, %v10348_v58, %v10551_v10  ;;  %v10560_v55 = vsel %vm3970_vm6, %v10369_v44, %v10559_v60  ;;  %v10256_v37 = vmul.f32 %v17377_v48, %v16637_v4  ;;  %v10255_v48 = vmul.f32 %v17375_v13, %v16645_v21 }
0x1035   :  { %v10388_v23 = vadd.f32 %v10387_v31, %v10386_v32  ;;  %v10394_v1 = vrot.slane %v10393_v35, 2  ;;  %v10561_v63 = vsel %vm3972_vm7, %v10383_v8, %v10560_v55  ;;  %v10553_v9 = vsel %vm3970_vm6, %v10362_v53, %v10552_v27  ;;  %v12489_v31 = vld [vmem:[%s17523_s20 + $0x20] sm:$0xff] }
0x1036   :  { %v17382_v38 = vpop.f32.mrf.mxu1  ;;  %v10554_v32 = vsel %vm3972_vm7, %v10376_v30, %v10553_v9  ;;  %v10257_v28 = vmul.f32 %v17379_v12, %v16639_v34 }
0x1037   :  { %v10389_v41 = vrot.slane %v10388_v23, 1  ;;  %v10395_v5 = vadd.f32 %v10394_v1, %v10393_v35  ;;  %v12490_v35 = vld [vmem:[%s17523_s20 + $0x18] sm:$0xff]  ;;  %v10398_v1 = vadd.f32 %v10256_v37, %v10254_v11  ;;  %v10258_v13 = vmul.f32 %v17382_v38, %v16643_v40 }
0x1038   :  { %v17385_v49 = vpop.f32.mrf.mxu1  ;;  %v10405_v50 = vadd.f32 %v10257_v28, %v10255_v48 }
0x1039   :  { %v10396_v39 = vrot.slane %v10395_v5, 1  ;;  %v10390_v45 = vadd.f32 %v10389_v41, %v10388_v23  ;;  %v12492_v23 = vld [vmem:[%s17523_s20 + $0x8] sm:$0xff]  ;;  %v10399_v6 = vrot.slane %v10398_v1, 4  ;;  %v10259_v44 = vmul.f32 %v17385_v49, %v16645_v21 }
0x103a   :  { %v10145_v16 = vpop.f32.mrf.mxu1  ;;  %v10406_v51 = vrot.slane %v10405_v50, 4 }
0x103b   :  { %v10397_v52 = vadd.f32 %v10396_v39, %v10395_v5  ;;  %v10555_v54 = vsel %vm3974_vm8, %v10390_v45, %v10554_v32  ;;  %v10260_v42 = vmul.f32 %v10145_v16, %v16637_v4  ;;  %v10400_v5 = vadd.f32 %v10399_v6, %v10398_v1 }
0x103c   :  { %v10147_v43 = vpop.f32.mrf.mxu1  ;;  %v10407_v53 = vadd.f32 %v10406_v51, %v10405_v50 }
0x103d   :  { %v10562_v26 = vsel %vm3974_vm8, %v10397_v52, %v10561_v63  ;;  %v10261_v24 = vmul.f32 %v10147_v43, %v16639_v34  ;;  %v10412_v8 = vadd.f32 %v10260_v42, %v10258_v13  ;;  %v10401_v39 = vrot.slane %v10400_v5, 2 }
0x103e   :  { %v10151_v7 = vpop.f32.mrf.mxu1  ;;  %10645 = vmatprep.mubr.f32.mxu1 %v10562_v26  ;;  %v10408_v52 = vrot.slane %v10407_v53, 2 }
0x103f   :  { %10646 = vmatmul.mubr.f32.vlgmr.msra.gmra.mxu1 %v10555_v54  ;;  %v10262_v14 = vmul.f32 %v10151_v7, %v16643_v40  ;;  %v10419_v47 = vadd.f32 %v10261_v24, %v10259_v44  ;;  %v10413_v55 = vrot.slane %v10412_v8, 4  ;;  %v17453_v1 = vadd.f32 %v10401_v39, %v10400_v5 }
0x1040   :  { %v10153_v19 = vpop.f32.mrf.mxu1  ;;  %11950 = vmatpush3.msra.mxu1 %v17333_v18 }
0x1041   :  { %11951 = vmatprep.subr.mxu1 %v12487_v29  ;;  %v10263_v38 = vmul.f32 %v10153_v19, %v16645_v21  ;;  %v10414_v11 = vadd.f32 %v10413_v55, %v10412_v8 }
0x1042   :  { %v10157_v25 = vpop.f32.mrf.mxu1  ;;  %11952 = vmatpush3.msra.mxu1 %v12487_v29 }
0x1043   :  { %11953 = vmatprep.subr.mxu1 %v12488_v2  ;;  %v10264_v58 = vmul.f32 %v10157_v25, %v16637_v4  ;;  %v10420_v25 = vrot.slane %v10419_v47, 4  ;;  %v10415_v24 = vrot.slane %v10414_v11, 2 }
0x1044   :  { %v10159_v57 = vpop.f32.mrf.mxu1  ;;  %11954 = vmatpush3.msra.mxu1 %v12488_v2 }
0x1045   :  { %11955 = vmatprep.subr.mxu1 %v12489_v31  ;;  %v10265_v61 = vmul.f32 %v10159_v57, %v16639_v34  ;;  %v10426_v10 = vadd.f32 %v10264_v58, %v10262_v14 }
0x1046   :  { %v10163_v33 = vpop.f32.mrf.mxu1  ;;  %11956 = vmatpush3.msra.mxu1 %v12489_v31 }
0x1047   :  { %11957 = vmatprep.subr.mxu1 %v12490_v35  ;;  %v10433_v63 = vadd.f32 %v10265_v61, %v10263_v38  ;;  %v10266_v9 = vmul.f32 %v10163_v33, %v16643_v40  ;;  %v10427_v29 = vrot.slane %v10426_v10, 4 }
0x1048   :  { %v10165_v18 = vpop.f32.mrf.mxu1  ;;  %11958 = vmatpush3.msra.mxu1 %v12490_v35 }
0x1049   :  { %11959 = vmatprep.subr.mxu1 %v12491_v36  ;;  %v10267_v45 = vmul.f32 %v10165_v18, %v16645_v21  ;;  %v10434_v28 = vrot.slane %v10433_v63, 4 }
0x104a   :  { %v10169_v20 = vpop.f32.mrf.mxu1  ;;  %11960 = vmatpush3.msra.mxu1 %v12491_v36 }
0x104b   :  { %11961 = vmatprep.subr.mxu1 %v12492_v23  ;;  %v10268_v60 = vmul.f32 %v10169_v20, %v16637_v4  ;;  %v10409_v20 = vadd.f32 %v10408_v52, %v10407_v53  ;;  %v10435_v58 = vadd.f32 %v10434_v28, %v10433_v63 }
0x104c   :  { %v10171_v56 = vpop.f32.mrf.mxu1  ;;  %11962 = vmatpush3.msra.mxu1 %v12492_v23 }
0x104d   :  { %11963 = vmatprep.subr.mxu1 %v12493_v15  ;;  %v10269_v30 = vmul.f32 %v10171_v56, %v16639_v34  ;;  %v10440_v31 = vadd.f32 %v10268_v60, %v10266_v9  ;;  %v10410_v51 = vrot.slane %v10409_v20, 1  ;;  %v10416_v9 = vadd.f32 %v10415_v24, %v10414_v11 }
0x104e   :  { %v10175_v0 = vpop.f32.mrf.mxu1  ;;  %11964 = vmatpush3.msra.mxu1 %v12493_v15  ;;  %v10428_v15 = vadd.f32 %v10427_v29, %v10426_v10  ;;  %v10403_v10 = vrot.slane %v17453_v1, 1 }
0x104f   :  { %v10447_v7 = vadd.f32 %v10269_v30, %v10267_v45  ;;  %v10270_v26 = vmul.f32 %v10175_v0, %v16643_v40  ;;  %v10421_v0 = vadd.f32 %v10420_v25, %v10419_v47  ;;  %v10441_v50 = vrot.slane %v10440_v31, 4 }
0x1050   :  { %v10177_v12 = vpop.f32.mrf.mxu1  ;;  %v10429_v30 = vrot.slane %v10428_v15, 2 }
0x1051   :  { %v10271_v32 = vmul.f32 %v10177_v12, %v16645_v21  ;;  %v10448_v56 = vrot.slane %v10447_v7, 4  ;;  %v10422_v8 = vrot.slane %v10421_v0, 2 }
0x1052   :  { %v10181_v59 = vpop.f32.mrf.mxu1 }
0x1053   :  { %v10272_v49 = vmul.f32 %v10181_v59, %v16637_v4  ;;  %v10449_v44 = vadd.f32 %v10448_v56, %v10447_v7  ;;  %v10423_v7 = vadd.f32 %v10422_v8, %v10421_v0  ;;  %v10417_v0 = vrot.slane %v10416_v9, 1 }
0x1054   :  { %v10183_v41 = vpop.f32.mrf.mxu1 }
0x1055   :  { %v10273_v27 = vmul.f32 %v10183_v41, %v16639_v34  ;;  %v10454_v18 = vadd.f32 %v10272_v49, %v10270_v26  ;;  %v10450_v52 = vrot.slane %v10449_v44, 2 }
0x1056   :  { %v10187_v62 = vpop.f32.mrf.mxu1 }
0x1057   :  { %v10461_v35 = vadd.f32 %v10273_v27, %v10271_v32  ;;  %v10274_v37 = vmul.f32 %v10187_v62, %v16643_v40  ;;  %v10455_v12 = vrot.slane %v10454_v18, 4  ;;  %v10411_v27 = vadd.f32 %v10410_v51, %v10409_v20 }
0x1058   :  { %v10189_v16 = vpop.f32.mrf.mxu1 }
0x1059   :  { %v10275_v57 = vmul.f32 %v10189_v16, %v16645_v21  ;;  %v10462_v6 = vrot.slane %v10461_v35, 4  ;;  %v10442_v16 = vadd.f32 %v10441_v50, %v10440_v31  ;;  %v10456_v39 = vadd.f32 %v10455_v12, %v10454_v18 }
0x105a   :  { %v10193_v43 = vpop.f32.mrf.mxu1 }
0x105b   :  { %v10276_v54 = vmul.f32 %v10193_v43, %v16637_v4  ;;  %v10463_v47 = vadd.f32 %v10462_v6, %v10461_v35  ;;  %v10436_v43 = vrot.slane %v10435_v58, 2  ;;  %v10457_v25 = vrot.slane %v10456_v39, 2 }
0x105c   :  { %v10195_v19 = vpop.f32.mrf.mxu1 }
0x105d   :  { %v10277_v2 = vmul.f32 %v10195_v19, %v16639_v34  ;;  %v10468_v23 = vadd.f32 %v10276_v54, %v10274_v37  ;;  %v10430_v54 = vadd.f32 %v10429_v30, %v10428_v15  ;;  %v10443_v19 = vrot.slane %v10442_v16, 2 }
0x105e   :  { %v10199_v33 = vpop.f32.mrf.mxu1  ;;  %v10464_v29 = vrot.slane %v10463_v47, 2  ;;  %v10437_v37 = vadd.f32 %v10436_v43, %v10435_v58  ;;  %v10424_v15 = vrot.slane %v10423_v7, 1  ;;  %v10458_v6 = vadd.f32 %v10457_v25, %v10456_v39 }
0x105f   :  { %v10475_v36 = vadd.f32 %v10277_v2, %v10275_v57  ;;  %v10278_v41 = vmul.f32 %v10199_v33, %v16643_v40  ;;  %v10469_v62 = vrot.slane %v10468_v23, 4  ;;  %v10451_v33 = vadd.f32 %v10450_v52, %v10449_v44 }
0x1060   :  { %v10201_v48 = vpop.f32.mrf.mxu1  ;;  %v10444_v50 = vadd.f32 %v10443_v19, %v10442_v16  ;;  %v10465_v12 = vadd.f32 %v10464_v29, %v10463_v47  ;;  %v10404_v52 = vadd.f32 %v10403_v10, %v17453_v1 }
0x1061   :  { %v10476_v42 = vrot.slane %v10475_v36, 4  ;;  %v10279_v5 = vmul.f32 %v10201_v48, %v16645_v21  ;;  %v10470_v55 = vadd.f32 %v10469_v62, %v10468_v23  ;;  %v10452_v24 = vrot.slane %v10451_v33, 1 }
0x1062   :  { %v10205_v59 = vpop.f32.mrf.mxu1  ;;  %v10418_v62 = vadd.f32 %v10417_v0, %v10416_v9  ;;  %v10445_v8 = vrot.slane %v10444_v50, 1  ;;  %v11126_v0 = vld [vmem:[%s17518_s15] ss:$0 sm:$0xff]  ;;  %s12522_s15 = smov [#allocation4]  }
0x1063   :  { %v10280_v13 = vmul.f32 %v10205_v59, %v16637_v4  ;;  %v10477_v45 = vadd.f32 %v10476_v42, %v10475_v36  ;;  %v10471_v20 = vrot.slane %v10470_v55, 2  ;;  %v10438_v42 = vrot.slane %v10437_v37, 1  ;;  %s10810_s13 = sshll.u32 %s12522_s15, 4  ;;  %s10811_s13 = int_to_ptr.vmem [resolvable:$true] %s10810_s13 }
0x1064   :  { %v10207_v53 = vpop.f32.mrf.mxu1  ;;  %p12500_p1 = scmp.lt.s32.totalorder %s10811_s13, %s10811_s13 }
0x1065   :  { %v10482_v14 = vadd.f32 %v10280_v13, %v10278_v41  ;;  %v10281_v61 = vmul.f32 %v10207_v53, %v16639_v34  ;;  %v10478_v2 = vrot.slane %v10477_v45, 2  ;;  %v10472_v41 = vadd.f32 %v10471_v20, %v10470_v55 }
0x1066   :  { %v10211_v38 = vpop.f32.mrf.mxu1  ;;  %v10425_v53 = vadd.f32 %v10424_v15, %v10423_v7  ;;  %v10439_v39 = vadd.f32 %v10438_v42, %v10437_v37 }
0x1067   :  { %v10483_v60 = vrot.slane %v10482_v14, 4  ;;  %v10489_v49 = vadd.f32 %v10281_v61, %v10279_v5  ;;  %v10282_v18 = vmul.f32 %v10211_v38, %v16643_v40  ;;  %v10479_v59 = vadd.f32 %v10478_v2, %v10477_v45 }
0x1068   :  { %v10213_v63 = vpop.f32.mrf.mxu1  ;;  %v10459_v5 = vrot.slane %v10458_v6, 1  ;;  %v10473_v47 = vrot.slane %v10472_v41, 1  ;;  %v10453_v45 = vadd.f32 %v10452_v24, %v10451_v33  ;;  %v10570_v55 = vsel %vm3962_vm2, %v10425_v53, %v10411_v27 }
0x1069   :  { %v10484_v26 = vadd.f32 %v10483_v60, %v10482_v14  ;;  %v10490_v32 = vrot.slane %v10489_v49, 4  ;;  %v10283_v36 = vmul.f32 %v10213_v63, %v16645_v21  ;;  %v10480_v14 = vrot.slane %v10479_v59, 1 }
0x106a   :  { %v10217_v57 = vpop.f32.mrf.mxu1  ;;  %v10446_v63 = vadd.f32 %v10445_v8, %v10444_v50  ;;  %v10460_v7 = vadd.f32 %v10459_v5, %v10458_v6  ;;  %v10474_v25 = vadd.f32 %v10473_v47, %v10472_v41 }
0x106b   :  { %v10491_v31 = vadd.f32 %v10490_v32, %v10489_v49  ;;  %v10284_v35 = vmul.f32 %v10217_v57, %v16637_v4  ;;  %v10485_v28 = vrot.slane %v10484_v26, 2  ;;  %v10431_v4 = vrot.slane %v10430_v54, 1 }
0x106c   :  { %v10219_v11 = vpop.f32.mrf.mxu1  ;;  %v10571_v57 = vsel %vm3964_vm3, %v10439_v39, %v10570_v55 }
0x106d   :  { %v10492_v56 = vrot.slane %v10491_v31, 2  ;;  %v10496_v23 = vadd.f32 %v10284_v35, %v10282_v18  ;;  %v10285_v48 = vmul.f32 %v10219_v11, %v16639_v34  ;;  %v10486_v21 = vadd.f32 %v10485_v28, %v10484_v26 }
0x106e   :  { %v10466_v34 = vrot.slane %v10465_v12, 1  ;;  %v10432_v16 = vadd.f32 %v10431_v4, %v10430_v54  ;;  %v10481_v26 = vadd.f32 %v10480_v14, %v10479_v59  ;;  %v10563_v54 = vsel %vm3962_vm2, %v10418_v62, %v10404_v52 }
0x106f   :  { %v10497_v40 = vrot.slane %v10496_v23, 4  ;;  %v10503_v51 = vadd.f32 %v10285_v48, %v10283_v36  ;;  %v10493_v13 = vadd.f32 %v10492_v56, %v10491_v31  ;;  %v10487_v60 = vrot.slane %v10486_v21, 1 }
0x1070   :  { %v10467_v9 = vadd.f32 %v10466_v34, %v10465_v12  ;;  %v10564_v2 = vsel %vm3964_vm3, %v10432_v16, %v10563_v54  ;;  %v10572_v1 = vsel %vm3966_vm4, %v10453_v45, %v10571_v57 }
0x1071   :  { %v10498_v58 = vadd.f32 %v10497_v40, %v10496_v23  ;;  %v10504_v44 = vrot.slane %v10503_v51, 4  ;;  %v10494_v38 = vrot.slane %v10493_v13, 1  ;;  %v10488_v31 = vadd.f32 %v10487_v60, %v10486_v21  ;;  %v12494_v21 = vld [vmem:[#allocation3] ss:$0 sm:$0xff] }
0x1072   :  { %v10573_v10 = vsel %vm3968_vm5, %v10467_v9, %v10572_v1  ;;  %v10565_v35 = vsel %vm3966_vm4, %v10446_v63, %v10564_v2 }
0x1073   :  { %v10499_v61 = vrot.slane %v10498_v58, 2  ;;  %v10505_v30 = vadd.f32 %v10504_v44, %v10503_v51  ;;  %v10495_v29 = vadd.f32 %v10494_v38, %v10493_v13  ;;  %v10574_v33 = vsel %vm3970_vm6, %v10481_v26, %v10573_v10 }
0x1074   :  { %v10566_v20 = vsel %vm3968_vm5, %v10460_v7, %v10565_v35 }
0x1075   :  { %v10500_v49 = vadd.f32 %v10499_v61, %v10498_v58  ;;  %v10506_v43 = vrot.slane %v10505_v30, 2  ;;  %v10575_v36 = vsel %vm3972_vm7, %v10495_v29, %v10574_v33  ;;  %v10567_v11 = vsel %vm3970_vm6, %v10474_v25, %v10566_v20 }
0x1076   :  { %v10568_v56 = vsel %vm3972_vm7, %v10488_v31, %v10567_v11 }
0x1077   :  { %v10501_v32 = vrot.slane %v10500_v49, 1  ;;  %v10507_v19 = vadd.f32 %v10506_v43, %v10505_v30 }
0x1079   :  { %v10508_v18 = vrot.slane %v10507_v19, 1  ;;  %v10502_v27 = vadd.f32 %v10501_v32, %v10500_v49 }
0x107b   :  { %v10509_v37 = vadd.f32 %v10508_v18, %v10507_v19  ;;  %v10569_v23 = vsel %vm3974_vm8, %v10502_v27, %v10568_v56 }
0x107d   :  { %v10576_v28 = vsel %vm3974_vm8, %v10509_v37, %v10575_v36 }
0x107e   :  { %10650 = vmatprep.mubr.f32.mxu1 %v10576_v28 }
0x107f   :  { %10651 = vmatmul.mubr.f32.gmra.mxu1 %v10569_v23 }
0x10ff   :  { %v11895_v48 = vpop.f32.mrf.mxu1 }
0x1101   :  { %v11896_v15 = vpop.f32.mrf.mxu1 }
0x1102   :  { %v11897_v50 = vadd.f32 %v11896_v15, %v11895_v48 }
0x1104   :  { %v10648_v12 = vadd.f32 %v11897_v50, %v11126_v0 }
0x1106   :  { %v10656_v6 = vmax.f32 %v10648_v12, 0.0 }
0x1108   :  { %v10658_v59 = vadd.f32 %v10656_v6, %v16558_v17 }
0x110a   :  { %11965 = vmatprep.mubr.msk.f32.mxu1 %vm371_vm0, %v10658_v59 }
0x113f   :  { %v11898_v40 = vpop.f32.mrf.mxu1 }
0x1141   :  { %v11899_v51 = vpop.f32.mrf.mxu1 }
0x1142   :  { %v11900_v4 = vadd.f32 %v11899_v51, %v11898_v40 }
0x1144   :  { %v10653_v42 = vadd.f32 %v11900_v4, %v11126_v0 }
0x1146   :  { %v10657_v41 = vmax.f32 %v10653_v42, 0.0 }
0x1148   :  { %v10659_v13 = vadd.f32 %v10657_v41, %v16576_v3 }
0x114a   :  { %11966 = vmatmul.mubr.msk.f32.vlgmr.msra.gmra.mxu1 %vm371_vm0, %v10659_v13 }
0x120a   :  { %v11967_v24 = vpop.f32.mrf.mxu1 }
0x120b   :  { %v10738_v58 = vadd.f32 %v12494_v21, %v11967_v24 }
0x120c   :  { %v10732_v44 = vpop.f32.mrf.mxu1 }
0x120d   :  { %v11130_v62 = vmul.f32 -1.442695, %v10738_v58  ;;  %v10733_v53 = vadd.f32 %v12494_v21, %v10732_v44 }
0x120f   :  { %12362 = vpow2.f32 %v11130_v62  ;;  %v11129_v8 = vmul.f32 -1.442695, %v10733_v53 }
0x1211   :  { %12364 = vpow2.f32 %v11129_v8 }
0x121c   :  { %v12363_v17 = vpop.eup %12362 }
0x121d   :  { %v10748_v34 = vadd.f32 1.0, %v12363_v17 }
0x121e   :  { %v12365_v5 = vpop.eup %12364 }
0x121f   :  { %12366 = vrcp.f32 %v10748_v34  ;;  %v10747_v14 = vadd.f32 1.0, %v12365_v5 }
0x1221   :  { %12368 = vrcp.f32 %v10747_v14 }
0x122c   :  { %v12367_v61 = vpop.eup %12366 }
0x122d   :  { %v10766_v30 = vsub.f32 1.0, %v12367_v61 }
0x122e   :  { %v12369_v3 = vpop.eup %12368 }
0x122f   :  { %10774 = vperm.xlu1 %11977, %v10766_v30   ;;  %v10765_v16 = vsub.f32 1.0, %v12369_v3 }
0x1231   :  { %10769 = vperm.xlu0 %11976, %v10765_v16  }
0x1233   :  { %10760 = vperm.xlu1 %11977, %v12367_v61  }
0x1235   :  { %10755 = vperm.xlu0 %11976, %v12369_v3  }
0x12aa   :  { %v10775_v39 = vpop.permute.xlu1 %10774 }
0x12ab   :  { %v10778_v47 = vmul.f32 %v10775_v39, %v10659_v13 }
0x12ac   :  { %v10770_v38 = vpop.permute.xlu0 %10769 }
0x12ad   :  { %v10777_v45 = vmul.f32 %v10770_v38, %v10658_v59  ;;  %10783 = vrot.lane.b32.xlu1 %v10778_v47, %s12520_s27 }
0x12ae   :  { %v10761_v60 = vpop.permute.xlu1 %10760 }
0x12af   :  { %10781 = vrot.lane.b32.xlu0 %v10777_v45, %s12520_s27  ;;  %v10764_v43 = vmul.f32 %v10761_v60, %v10659_v13  ;;  %s12495_s27 = scalar_lea.vmem %s10811_s13, 256 }
0x12b0   :  { %v10756_v49 = vpop.permute.xlu0 %10755  ;;  %p12496_p0 = scmp.ne.s32.totalorder %s10811_s13, %s12495_s27  ;;  %p12501_p2 = scmp.lt.s32.totalorder %s12495_s27, %s12495_s27 }
0x12b1   :  { %v10763_v55 = vmul.f32 %v10756_v49, %v10658_v59 }
0x12b2   :  { %p12502_p3 = por %p12501_p2, %p12500_p1 }
0x12b4   :  { %p12503_p4 = pnand %p12502_p3, %p12496_p0 }
0x131f   :  { %v10784_v52 = vpop.permute.xlu1 %10783 }
0x1320   :  { %v10788_v63 = vadd.f32 %v10784_v52, %v10764_v43 }
0x1321   :  { %v10782_v9 = vpop.permute.xlu0 %10781 }
0x1322   :  { %v10790_v7 = vmax.f32 %v10788_v63, 0.0  ;;  %v10787_v26 = vadd.f32 %v10782_v9, %v10763_v55 }
0x1324   :  { %v10789_v32 = vmax.f32 %v10787_v26, 0.0  ;;  %10795 = vrot.lane.b32.xlu1 %v10790_v7, %s12521_s26 }
0x1326   :  { %10793 = vrot.lane.b32.xlu0 %v10789_v32, %s12521_s26 }
0x1396   :  { %v10796_v19 = vpop.permute.xlu1 %10795 }
0x1397   :  { %v10800_v54 = vsel %vm4332_vm9, %v10790_v7, %v10796_v19 }
0x1398   :  { %v10802_v25 = vsel %vm14672_vm11, %v10800_v54, %v10659_v13  ;;  %v10794_v29 = vpop.permute.xlu0 %10793 }
0x1399   :  { %10804 = vst.msk [vmem:[#allocation4 + $0x8] sm:$0xff] %vm4332_vm9, %v10802_v25  ;;  %v10799_v57 = vsel %vm4332_vm9, %v10789_v32, %v10794_v29 }
0x139a   :  { %v10801_v2 = vsel %vm14645_vm10, %v10799_v57, %v10658_v59 }
0x139b   :  { %10803 = vst.msk [vmem:[#allocation4] sm:$0xff] %vm4332_vm9, %v10801_v2 }
0x139c   :  { %12506 = shalt.err (!%p12503_p4)
}
0x139d   :  { %s12523_s26 = smov 128   ;;  %s12524_s14 = smov 8  }
0x139e   :  { %10816 = dma.vmem_to_hbm [thread:$0]  %s10811_s13, 256, %s17525_s22, [#allocation5], %s12523_s26, %s12523_s26, %s12524_s14  }
0x139f   :  { %12515 = dma.done.wait [#allocation5], 256  }
0x13a0   :  { %12516 = vsyncadd [#allocation5], 4294967040 }
0x13a1   :  { %10820 = vsyncpa [#allocation5], 1 }

</bundles_post_ra>
